<compile_context>
chip_gen: v7x
topology: tpu7x:2x2x1
jax: 0.10.0
libtpu: 0.0.40
codegen_flags: <defaults>
</compile_context>

<pallas_src>
import functools

import jax
import jax.numpy as jnp
from jax.experimental import pallas as pl
from jax.experimental.pallas import tpu as pltpu

F32 = jnp.float32
BF16 = jnp.bfloat16

_WEIGHT_NAMES = ["w_entry", "b_entry", "w2bd", "b2c", "w5a", "w5b", "b5",
                 "w6", "b6", "w1h", "b1h", "w2h", "b2h",
                 "w3r", "b3r", "w3t", "b3t"]


def _round_up(a, m):
    return ((a + m - 1) // m) * m


# ----------------------------------------------------------------------------
# Fused kernel: feature extractor (per point tile) + running-sum AvgPool
#               + r/t MLP heads + per-object select (finalize step)
# ----------------------------------------------------------------------------
def _pose_refine_kernel(
    obj_ref, xe_ref,
    we_ref, be_ref, w2_ref, b2_ref, w5a_ref, w5b_ref, b5_ref,
    w6_ref, b6_ref, w1h_ref, b1h_ref, w2h_ref, b2h_ref,
    w3r_ref, b3r_ref, w3t_ref, b3t_ref,
    rx_ref, tx_ref,
    acc_ref,
    *, n_pts, tile_m, needs_mask):

    i = pl.program_id(0)

    @pl.when(i == 0)
    def _init():
        acc_ref[...] = jnp.zeros_like(acc_ref)

    def mm(a, w_ref):
        return jnp.dot(a, w_ref[...], preferred_element_type=F32)

    def relu_bf16(v):
        return jnp.maximum(v, 0.0).astype(BF16)

    # ---- feature extractor on this point tile (bf16 activations, f32 accumulate)
    xe = xe_ref[...].astype(BF16)                                       # (tile_m, 35)
    pf1 = relu_bf16(mm(xe, we_ref) + be_ref[...])                       # (tile_m, 128)
    pf2 = relu_bf16(mm(pf1, w2_ref) + b2_ref[...])                      # (tile_m, 256)
    h5 = relu_bf16(mm(pf1, w5a_ref) + mm(pf2, w5b_ref) + b5_ref[...])   # (tile_m, 512)
    h6 = jnp.maximum(mm(h5, w6_ref) + b6_ref[...], 0.0)                 # (tile_m, 1024) f32

    if needs_mask:  # static: only when n_pts was padded up to a tile multiple
        row = i * tile_m + jax.lax.broadcasted_iota(jnp.int32, (tile_m, 1), 0)
        h6 = jnp.where(row < n_pts, h6, 0.0)

    # running AvgPool sum (scale applied once in finalize)
    acc_ref[...] += jnp.sum(h6, axis=0, keepdims=True)                  # (1, 1024) f32

    @pl.when(i == pl.num_programs(0) - 1)
    def _finalize():
        ap = (acc_ref[...] * (1.0 / n_pts)).astype(BF16)                # (1, 1024)
        h1 = relu_bf16(jnp.dot(ap, w1h_ref[...],
                               preferred_element_type=F32) + b1h_ref[...])   # [r | t]
        h2 = jnp.maximum(jnp.dot(h1, w2h_ref[...],
                                 preferred_element_type=F32) + b2h_ref[...], 0.0)
        r2 = h2[:, 0:128].astype(BF16)
        t2 = h2[:, 128:256].astype(BF16)
        o = obj_ref[0]                                                  # scalar (SMEM)
        w3r = w3r_ref[o]                                                # (4, 128) bf16
        w3t = w3t_ref[o]                                                # (3, 128) bf16
        rx_ref[...] = jax.lax.dot_general(
            r2, w3r, (((1,), (1,)), ((), ())),
            preferred_element_type=F32) + b3r_ref[o]                    # (1, 4)
        tx_ref[...] = jax.lax.dot_general(
            t2, w3t, (((1,), (1,)), ((), ())),
            preferred_element_type=F32) + b3t_ref[o]                    # (1, 3)


def pose_refine_forward(x, emb, obj, fp):
    """x: (bs, N, 3) f32, emb: (bs, 32, N) f32, obj: (bs, 1) int -> ((1,4), (1,3))."""
    _, n_pts, _ = x.shape

    # The module hardcodes b = 0 (and obj[0]); only batch 0 enters the kernel.
    x0 = x[0]                                   # (N, 3)
    e0 = jnp.transpose(emb[0], (1, 0))          # (N, 32): NCW->NWC done once by XLA
    xe = jnp.concatenate([x0, e0], axis=1)      # (N, 35): single K=35 entry operand

    tile_m = min(512, _round_up(n_pts, 8))
    n_pad = _round_up(n_pts, tile_m)
    if n_pad != n_pts:
        xe = jnp.pad(xe, ((0, n_pad - n_pts), (0, 0)))
    num_tiles = n_pad // tile_m

    obj1d = jnp.reshape(obj, (-1,)).astype(jnp.int32)   # 1-D SMEM (no 2-D padding)

    weights = [fp[n] for n in _WEIGHT_NAMES]

    def const_spec(a):
        nd = a.ndim
        return pl.BlockSpec(a.shape, lambda i, _nd=nd: (0,) * _nd)  # VMEM-resident

    kernel = functools.partial(_pose_refine_kernel, n_pts=n_pts, tile_m=tile_m,
                               needs_mask=(n_pad != n_pts))

    rx, tx = pl.pallas_call(
        kernel,
        grid=(num_tiles,),
        out_shape=(jax.ShapeDtypeStruct((1, 4), F32),
                   jax.ShapeDtypeStruct((1, 3), F32)),
        in_specs=[pl.BlockSpec(memory_space=pltpu.MemorySpace.SMEM),        # obj
                  pl.BlockSpec((tile_m, 35), lambda i: (i, 0))]             # point tile
                 + [const_spec(w) for w in weights],
        out_specs=(pl.BlockSpec((1, 4), lambda i: (0, 0)),
                   pl.BlockSpec((1, 3), lambda i: (0, 0))),
        scratch_shapes=[pltpu.VMEM((1, 1024), F32)],                         # AvgPool sum
        compiler_params=pltpu.CompilerParams(
            dimension_semantics=("arbitrary",),          # reduction over point tiles
            vmem_limit_bytes=48 * 1024 * 1024),
    )(obj1d, xe, *weights)
    return rx, tx


# ----------------------------------------------------------------------------
# Parameters: per-layer init (PyTorch-equivalent, (in, out) layout) + one-time
# packing into the fused / block-diagonal / bf16 forms used by the kernel.
# ----------------------------------------------------------------------------
def init_params(key, num_obj):
    # NOTE: PyTorch Conv1d weights are (out, in, 1) and Linear weights (out, in);
    # transpose a real checkpoint to this (in, out) layout before fuse_params.
    def lin_init(key, fan_in, fan_out):
        kw, kb = jax.random.split(key)
        scale = 1.0 / jnp.sqrt(fan_in)
        w = jax.random.uniform(kw, (fan_in, fan_out), F32, -scale, scale)
        b = jax.random.uniform(kb, (1, fan_out), F32, -scale, scale)
        return w, b

    names_shapes = [
        ("w1", "b1", 3, 64),        # conv1
        ("ew1", "eb1", 32, 64),     # e_conv1
        ("w2", "b2", 64, 128),      # conv2
        ("ew2", "eb2", 64, 128),    # e_conv2
        ("w5", "b5", 384, 512),     # conv5
        ("w6", "b6", 512, 1024),    # conv6
        ("w1r", "b1r", 1024, 512),
        ("w1t", "b1t", 1024, 512),
        ("w2r", "b2r", 512, 128),
        ("w2t", "b2t", 512, 128),
        ("w3r", "b3r", 128, num_obj * 4),
        ("w3t", "b3t", 128, num_obj * 3),
    ]
    params = {}
    keys = jax.random.split(key, len(names_shapes))
    for k, (wn, bn, fi, fo) in zip(keys, names_shapes):
        w, b = lin_init(k, fi, fo)
        params[wn], params[bn] = w, b
    return params


def fuse_params(p, num_obj):
    """One-time packing: branch merges, block diagonals, bf16 matmul weights.

    NOTE: bf16 storage quantizes the checkpoint; validate end-to-end pose error
    against the original f32 weights, not only the in-script self-test.
    """
    def bf(a):
        return a.astype(BF16)

    def z(r, c):
        return jnp.zeros((r, c), F32)

    fp = {}
    # conv1 / e_conv1 -> one (35, 128) entry weight: input rows 0:3 = xyz,
    # rows 3:35 = emb channels; output lanes 0:64 = conv1 branch, 64:128 = e_conv1
    # branch (the pointfeat_1 channel concat becomes a lane split).
    we = jnp.zeros((35, 128), F32)
    we = we.at[0:3, 0:64].set(p["w1"])
    we = we.at[3:35, 64:128].set(p["ew1"])
    fp["w_entry"] = bf(we)
    fp["b_entry"] = jnp.concatenate([p["b1"], p["eb1"]], axis=1)            # (1, 128)
    # conv2 / e_conv2 -> block-diagonal (128, 256)
    fp["w2bd"] = bf(jnp.concatenate([
        jnp.concatenate([p["w2"], z(64, 128)], axis=1),
        jnp.concatenate([z(64, 128), p["ew2"]], axis=1)], axis=0))
    fp["b2c"] = jnp.concatenate([p["b2"], p["eb2"]], axis=1)                # (1, 256)
    # conv5 split into its two K-tiles (pointfeat_1 rows, pointfeat_2 rows)
    fp["w5a"] = bf(p["w5"][:128])                                           # (128, 512)
    fp["w5b"] = bf(p["w5"][128:])                                           # (256, 512)
    fp["b5"] = p["b5"]
    fp["w6"] = bf(p["w6"])                                                  # (512, 1024)
    fp["b6"] = p["b6"]
    # head conv1_r | conv1_t merged along the output axis
    fp["w1h"] = bf(jnp.concatenate([p["w1r"], p["w1t"]], axis=1))           # (1024, 1024)
    fp["b1h"] = jnp.concatenate([p["b1r"], p["b1t"]], axis=1)
    # head conv2_r / conv2_t block-diagonal (1024, 256)
    fp["w2h"] = bf(jnp.concatenate([
        jnp.concatenate([p["w2r"], z(512, 128)], axis=1),
        jnp.concatenate([z(512, 128), p["w2t"]], axis=1)], axis=0))
    fp["b2h"] = jnp.concatenate([p["b2r"], p["b2t"]], axis=1)
    # head conv3_r / conv3_t: object index on the leading (untiled) axis so the
    # kernel selects the (4,128)/(3,128) weight block dynamically.
    fp["w3r"] = bf(p["w3r"].T.reshape(num_obj, 4, 128))
    fp["b3r"] = p["b3r"].reshape(num_obj, 1, 4)
    fp["w3t"] = bf(p["w3t"].T.reshape(num_obj, 3, 128))
    fp["b3t"] = p["b3t"].reshape(num_obj, 1, 3)
    return fp


# ----------------------------------------------------------------------------
# Pure-JAX reference mirroring the kernel's precision policy (bf16 matmuls,
# f32 accumulation) for a sanity check.
# ----------------------------------------------------------------------------
def reference_forward(x, emb, obj, fp):
    n = x.shape[1]

    def mm(a, w):
        return jnp.dot(a, w, preferred_element_type=F32)

    def relu_bf(v):
        return jnp.maximum(v, 0.0).astype(BF16)

    xe = jnp.concatenate([x[0], emb[0].T], axis=1).astype(BF16)             # (n, 35)
    pf1 = relu_bf(mm(xe, fp["w_entry"]) + fp["b_entry"])
    pf2 = relu_bf(mm(pf1, fp["w2bd"]) + fp["b2c"])
    h5 = relu_bf(mm(pf1, fp["w5a"]) + mm(pf2, fp["w5b"]) + fp["b5"])
    h6 = jnp.maximum(mm(h5, fp["w6"]) + fp["b6"], 0.0)
    ap = (jnp.sum(h6, axis=0, keepdims=True) * (1.0 / n)).astype(BF16)
    h1 = relu_bf(mm(ap, fp["w1h"]) + fp["b1h"])
    h2 = jnp.maximum(mm(h1, fp["w2h"]) + fp["b2h"], 0.0)
    o = int(jnp.reshape(obj, (-1,))[0])
    r2 = h2[:, :128].astype(BF16)
    t2 = h2[:, 128:].astype(BF16)
    rx = mm(r2, jnp.transpose(fp["w3r"][o])) + fp["b3r"][o]
    tx = mm(t2, jnp.transpose(fp["w3t"][o])) + fp["b3t"][o]
    return rx, tx


if __name__ == "__main__":
    bs, num_points, num_obj = 2, 64, 5

    key = jax.random.PRNGKey(0)
    kp, kx, ke, ko = jax.random.split(key, 4)

    raw_params = init_params(kp, num_obj)
    params = fuse_params(raw_params, num_obj)   # one-time packing (bf16 etc.)

    x = jax.random.normal(kx, (bs, num_points, 3), F32)       # point cloud (bs, N, 3)
    emb = jax.random.normal(ke, (bs, 32, num_points), F32)    # PyTorch NCW embedding
    obj = jax.random.randint(ko, (bs, 1), 0, num_obj, jnp.int32)

    fwd = jax.jit(pose_refine_forward)
    out_rx, out_tx = fwd(x, emb, obj, params)
    jax.block_until_ready((out_rx, out_tx))

    assert out_rx.shape == (1, 4) and out_tx.shape == (1, 3)
    assert bool(jnp.all(jnp.isfinite(out_rx))) and bool(jnp.all(jnp.isfinite(out_tx)))

    ref_rx, ref_tx = reference_forward(x, emb, obj, params)
    tol = 3e-2
    assert float(jnp.max(jnp.abs(out_rx - ref_rx))) <= tol * (1.0 + float(jnp.max(jnp.abs(ref_rx))))
    assert float(jnp.max(jnp.abs(out_tx - ref_tx))) <= tol * (1.0 + float(jnp.max(jnp.abs(ref_tx))))

    print("KERNEL_OK")
</pallas_src>

<mosaic_0001>
module attributes {stable_mosaic.version = 11 : i64} {
  func.func @_pose_refine_kernel(%arg0: i32, %arg1: memref<2xi32, #tpu.memory_space<smem>>, %arg2: memref<64x35xf32, #tpu.memory_space<vmem>>, %arg3: memref<35x128xbf16, #tpu.memory_space<vmem>>, %arg4: memref<1x128xf32, #tpu.memory_space<vmem>>, %arg5: memref<128x256xbf16, #tpu.memory_space<vmem>>, %arg6: memref<1x256xf32, #tpu.memory_space<vmem>>, %arg7: memref<128x512xbf16, #tpu.memory_space<vmem>>, %arg8: memref<256x512xbf16, #tpu.memory_space<vmem>>, %arg9: memref<1x512xf32, #tpu.memory_space<vmem>>, %arg10: memref<512x1024xbf16, #tpu.memory_space<vmem>>, %arg11: memref<1x1024xf32, #tpu.memory_space<vmem>>, %arg12: memref<1024x1024xbf16, #tpu.memory_space<vmem>>, %arg13: memref<1x1024xf32, #tpu.memory_space<vmem>>, %arg14: memref<1024x256xbf16, #tpu.memory_space<vmem>>, %arg15: memref<1x256xf32, #tpu.memory_space<vmem>>, %arg16: memref<5x4x128xbf16, #tpu.memory_space<vmem>>, %arg17: memref<5x1x4xf32, #tpu.memory_space<vmem>>, %arg18: memref<5x3x128xbf16, #tpu.memory_space<vmem>>, %arg19: memref<5x1x3xf32, #tpu.memory_space<vmem>>, %arg20: memref<1x4xf32, #tpu.memory_space<vmem>>, %arg21: memref<1x3xf32, #tpu.memory_space<vmem>>, %arg22: memref<1x1024xf32, #tpu.memory_space<vmem>>) attributes {dimension_semantics = [#tpu.dimension_semantics<arbitrary>], iteration_bounds = array<i64: 1>, scalar_prefetch = 0 : i64, scratch_operands = 1 : i64, tpu.core_type = #tpu.core_type<tc>, window_params = [{transform_indices = @transform_0, window_bounds = array<i64: 2>}, {transform_indices = @transform_1, window_bounds = array<i64: 64, 35>}, {pipeline_mode = #tpu.pipeline_mode<synchronous>, transform_indices = @transform_2, window_bounds = array<i64: 35, 128>}, {pipeline_mode = #tpu.pipeline_mode<synchronous>, transform_indices = @transform_3, window_bounds = array<i64: 1, 128>}, {pipeline_mode = #tpu.pipeline_mode<synchronous>, transform_indices = @transform_4, window_bounds = array<i64: 128, 256>}, {pipeline_mode = #tpu.pipeline_mode<synchronous>, transform_indices = @transform_5, window_bounds = array<i64: 1, 256>}, {pipeline_mode = #tpu.pipeline_mode<synchronous>, transform_indices = @transform_6, window_bounds = array<i64: 128, 512>}, {pipeline_mode = #tpu.pipeline_mode<synchronous>, transform_indices = @transform_7, window_bounds = array<i64: 256, 512>}, {pipeline_mode = #tpu.pipeline_mode<synchronous>, transform_indices = @transform_8, window_bounds = array<i64: 1, 512>}, {pipeline_mode = #tpu.pipeline_mode<synchronous>, transform_indices = @transform_9, window_bounds = array<i64: 512, 1024>}, {pipeline_mode = #tpu.pipeline_mode<synchronous>, transform_indices = @transform_10, window_bounds = array<i64: 1, 1024>}, {pipeline_mode = #tpu.pipeline_mode<synchronous>, transform_indices = @transform_11, window_bounds = array<i64: 1024, 1024>}, {pipeline_mode = #tpu.pipeline_mode<synchronous>, transform_indices = @transform_12, window_bounds = array<i64: 1, 1024>}, {pipeline_mode = #tpu.pipeline_mode<synchronous>, transform_indices = @transform_13, window_bounds = array<i64: 1024, 256>}, {pipeline_mode = #tpu.pipeline_mode<synchronous>, transform_indices = @transform_14, window_bounds = array<i64: 1, 256>}, {pipeline_mode = #tpu.pipeline_mode<synchronous>, transform_indices = @transform_15, window_bounds = array<i64: 5, 4, 128>}, {pipeline_mode = #tpu.pipeline_mode<synchronous>, transform_indices = @transform_16, window_bounds = array<i64: 5, 1, 4>}, {pipeline_mode = #tpu.pipeline_mode<synchronous>, transform_indices = @transform_17, window_bounds = array<i64: 5, 3, 128>}, {pipeline_mode = #tpu.pipeline_mode<synchronous>, transform_indices = @transform_18, window_bounds = array<i64: 5, 1, 3>}, {pipeline_mode = #tpu.pipeline_mode<synchronous>, transform_indices = @transform_19, window_bounds = array<i64: 1, 4>}, {pipeline_mode = #tpu.pipeline_mode<synchronous>, transform_indices = @transform_20, window_bounds = array<i64: 1, 3>}]} {
    %c0_i32 = arith.constant 0 : i32
    %0 = arith.cmpi eq, %arg0, %c0_i32 : i32
    %1 = arith.extui %0 : i1 to i32
    %c0_i32_0 = arith.constant 0 : i32
    %2 = arith.cmpi ne, %1, %c0_i32_0 : i32
    scf.if %2 {
      %cst_35 = arith.constant 0.000000e+00 : f32
      %47 = vector.broadcast %cst_35 : f32 to vector<1x1024xf32>
      %c0_36 = arith.constant 0 : index
      %c0_37 = arith.constant 0 : index
      %48 = vector.load %arg22[%c0_36, %c0_37] : memref<1x1024xf32, #tpu.memory_space<vmem>>, vector<1x1024xf32>
      tpu.vector_store %arg22[%c0_36, %c0_37], %47 {strides = array<i32>} : memref<1x1024xf32, #tpu.memory_space<vmem>>, vector<1x1024xf32>,
    } else {
    }
    %c0 = arith.constant 0 : index
    %c0_1 = arith.constant 0 : index
    %3 = vector.load %arg2[%c0, %c0_1] : memref<64x35xf32, #tpu.memory_space<vmem>>, vector<64x35xf32>
    %4 = arith.truncf %3 : vector<64x35xf32> to vector<64x35xbf16>
    %c0_2 = arith.constant 0 : index
    %c0_3 = arith.constant 0 : index
    %5 = vector.load %arg3[%c0_2, %c0_3] : memref<35x128xbf16, #tpu.memory_space<vmem>>, vector<35x128xbf16>
    %cst = arith.constant dense<0.000000e+00> : vector<64x128xf32>
    %6 = tpu.matmul %4, %5, %cst {dimension_numbers = #tpu.dot_dimension_numbers<[1], [0], [0], [1], [0, 0, 1, 1], [], []>} : vector<64x35xbf16>, vector<35x128xbf16>, vector<64x128xf32> -> vector<64x128xf32>
    %c0_4 = arith.constant 0 : index
    %c0_5 = arith.constant 0 : index
    %7 = vector.load %arg4[%c0_4, %c0_5] : memref<1x128xf32, #tpu.memory_space<vmem>>, vector<1x128xf32>
    %8 = vector.broadcast %7 : vector<1x128xf32> to vector<64x128xf32>
    %9 = arith.addf %6, %8 : vector<64x128xf32>
    %cst_6 = arith.constant 0.000000e+00 : f32
    %10 = vector.broadcast %cst_6 : f32 to vector<64x128xf32>
    %11 = arith.maximumf %9, %10 : vector<64x128xf32>
    %12 = arith.truncf %11 : vector<64x128xf32> to vector<64x128xbf16>
    %c0_7 = arith.constant 0 : index
    %c0_8 = arith.constant 0 : index
    %13 = vector.load %arg5[%c0_7, %c0_8] : memref<128x256xbf16, #tpu.memory_space<vmem>>, vector<128x256xbf16>
    %cst_9 = arith.constant dense<0.000000e+00> : vector<64x256xf32>
    %14 = tpu.matmul %12, %13, %cst_9 {dimension_numbers = #tpu.dot_dimension_numbers<[1], [0], [0], [1], [0, 0, 1, 1], [], []>} : vector<64x128xbf16>, vector<128x256xbf16>, vector<64x256xf32> -> vector<64x256xf32>
    %c0_10 = arith.constant 0 : index
    %c0_11 = arith.constant 0 : index
    %15 = vector.load %arg6[%c0_10, %c0_11] : memref<1x256xf32, #tpu.memory_space<vmem>>, vector<1x256xf32>
    %16 = vector.broadcast %15 : vector<1x256xf32> to vector<64x256xf32>
    %17 = arith.addf %14, %16 : vector<64x256xf32>
    %cst_12 = arith.constant 0.000000e+00 : f32
    %18 = vector.broadcast %cst_12 : f32 to vector<64x256xf32>
    %19 = arith.maximumf %17, %18 : vector<64x256xf32>
    %20 = arith.truncf %19 : vector<64x256xf32> to vector<64x256xbf16>
    %c0_13 = arith.constant 0 : index
    %c0_14 = arith.constant 0 : index
    %21 = vector.load %arg7[%c0_13, %c0_14] : memref<128x512xbf16, #tpu.memory_space<vmem>>, vector<128x512xbf16>
    %cst_15 = arith.constant dense<0.000000e+00> : vector<64x512xf32>
    %22 = tpu.matmul %12, %21, %cst_15 {dimension_numbers = #tpu.dot_dimension_numbers<[1], [0], [0], [1], [0, 0, 1, 1], [], []>} : vector<64x128xbf16>, vector<128x512xbf16>, vector<64x512xf32> -> vector<64x512xf32>
    %c0_16 = arith.constant 0 : index
    %c0_17 = arith.constant 0 : index
    %23 = vector.load %arg8[%c0_16, %c0_17] : memref<256x512xbf16, #tpu.memory_space<vmem>>, vector<256x512xbf16>
    %cst_18 = arith.constant dense<0.000000e+00> : vector<64x512xf32>
    %24 = tpu.matmul %20, %23, %cst_18 {dimension_numbers = #tpu.dot_dimension_numbers<[1], [0], [0], [1], [0, 0, 1, 1], [], []>} : vector<64x256xbf16>, vector<256x512xbf16>, vector<64x512xf32> -> vector<64x512xf32>
    %25 = arith.addf %22, %24 : vector<64x512xf32>
    %c0_19 = arith.constant 0 : index
    %c0_20 = arith.constant 0 : index
    %26 = vector.load %arg9[%c0_19, %c0_20] : memref<1x512xf32, #tpu.memory_space<vmem>>, vector<1x512xf32>
    %27 = vector.broadcast %26 : vector<1x512xf32> to vector<64x512xf32>
    %28 = arith.addf %25, %27 : vector<64x512xf32>
    %cst_21 = arith.constant 0.000000e+00 : f32
    %29 = vector.broadcast %cst_21 : f32 to vector<64x512xf32>
    %30 = arith.maximumf %28, %29 : vector<64x512xf32>
    %31 = arith.truncf %30 : vector<64x512xf32> to vector<64x512xbf16>
    %c0_22 = arith.constant 0 : index
    %c0_23 = arith.constant 0 : index
    %32 = vector.load %arg10[%c0_22, %c0_23] : memref<512x1024xbf16, #tpu.memory_space<vmem>>, vector<512x1024xbf16>
    %cst_24 = arith.constant dense<0.000000e+00> : vector<64x1024xf32>
    %33 = tpu.matmul %31, %32, %cst_24 {dimension_numbers = #tpu.dot_dimension_numbers<[1], [0], [0], [1], [0, 0, 1, 1], [], []>} : vector<64x512xbf16>, vector<512x1024xbf16>, vector<64x1024xf32> -> vector<64x1024xf32>
    %c0_25 = arith.constant 0 : index
    %c0_26 = arith.constant 0 : index
    %34 = vector.load %arg11[%c0_25, %c0_26] : memref<1x1024xf32, #tpu.memory_space<vmem>>, vector<1x1024xf32>
    %35 = vector.broadcast %34 : vector<1x1024xf32> to vector<64x1024xf32>
    %36 = arith.addf %33, %35 : vector<64x1024xf32>
    %cst_27 = arith.constant 0.000000e+00 : f32
    %37 = vector.broadcast %cst_27 : f32 to vector<64x1024xf32>
    %38 = arith.maximumf %36, %37 : vector<64x1024xf32>
    %c0_28 = arith.constant 0 : index
    %c0_29 = arith.constant 0 : index
    %39 = vector.load %arg22[%c0_28, %c0_29] : memref<1x1024xf32, #tpu.memory_space<vmem>>, vector<1x1024xf32>
    %cst_30 = arith.constant dense<0.000000e+00> : vector<1024xf32>
    %40 = vector.multi_reduction <add>, %38, %cst_30 [0] : vector<64x1024xf32> to vector<1024xf32>
    %41 = vector.shape_cast %40 : vector<1024xf32> to vector<1x1024xf32>
    %42 = arith.addf %39, %41 : vector<1x1024xf32>
    %c0_31 = arith.constant 0 : index
    %c0_32 = arith.constant 0 : index
    %43 = vector.load %arg22[%c0_31, %c0_32] : memref<1x1024xf32, #tpu.memory_space<vmem>>, vector<1x1024xf32>
    tpu.vector_store %arg22[%c0_31, %c0_32], %42 {strides = array<i32>} : memref<1x1024xf32, #tpu.memory_space<vmem>>, vector<1x1024xf32>,
    %c0_i32_33 = arith.constant 0 : i32
    %44 = arith.cmpi eq, %arg0, %c0_i32_33 : i32
    %45 = arith.extui %44 : i1 to i32
    %c0_i32_34 = arith.constant 0 : i32
    %46 = arith.cmpi ne, %45, %c0_i32_34 : i32
    scf.if %46 {
      %c0_35 = arith.constant 0 : index
      %c0_36 = arith.constant 0 : index
      %47 = vector.load %arg22[%c0_35, %c0_36] : memref<1x1024xf32, #tpu.memory_space<vmem>>, vector<1x1024xf32>
      %cst_37 = arith.constant 1.562500e-02 : f32
      %48 = vector.broadcast %cst_37 : f32 to vector<1x1024xf32>
      %49 = arith.mulf %47, %48 : vector<1x1024xf32>
      %50 = arith.truncf %49 : vector<1x1024xf32> to vector<1x1024xbf16>
      %c0_38 = arith.constant 0 : index
      %c0_39 = arith.constant 0 : index
      %51 = vector.load %arg12[%c0_38, %c0_39] : memref<1024x1024xbf16, #tpu.memory_space<vmem>>, vector<1024x1024xbf16>
      %cst_40 = arith.constant dense<0.000000e+00> : vector<1x1024xf32>
      %52 = tpu.matmul %50, %51, %cst_40 {dimension_numbers = #tpu.dot_dimension_numbers<[1], [0], [0], [1], [0, 0, 1, 1], [], []>} : vector<1x1024xbf16>, vector<1024x1024xbf16>, vector<1x1024xf32> -> vector<1x1024xf32>
      %c0_41 = arith.constant 0 : index
      %c0_42 = arith.constant 0 : index
      %53 = vector.load %arg13[%c0_41, %c0_42] : memref<1x1024xf32, #tpu.memory_space<vmem>>, vector<1x1024xf32>
      %54 = arith.addf %52, %53 : vector<1x1024xf32>
      %cst_43 = arith.constant 0.000000e+00 : f32
      %55 = vector.broadcast %cst_43 : f32 to vector<1x1024xf32>
      %56 = arith.maximumf %54, %55 : vector<1x1024xf32>
      %57 = arith.truncf %56 : vector<1x1024xf32> to vector<1x1024xbf16>
      %c0_44 = arith.constant 0 : index
      %c0_45 = arith.constant 0 : index
      %58 = vector.load %arg14[%c0_44, %c0_45] : memref<1024x256xbf16, #tpu.memory_space<vmem>>, vector<1024x256xbf16>
      %cst_46 = arith.constant dense<0.000000e+00> : vector<1x256xf32>
      %59 = tpu.matmul %57, %58, %cst_46 {dimension_numbers = #tpu.dot_dimension_numbers<[1], [0], [0], [1], [0, 0, 1, 1], [], []>} : vector<1x1024xbf16>, vector<1024x256xbf16>, vector<1x256xf32> -> vector<1x256xf32>
      %c0_47 = arith.constant 0 : index
      %c0_48 = arith.constant 0 : index
      %60 = vector.load %arg15[%c0_47, %c0_48] : memref<1x256xf32, #tpu.memory_space<vmem>>, vector<1x256xf32>
      %61 = arith.addf %59, %60 : vector<1x256xf32>
      %cst_49 = arith.constant 0.000000e+00 : f32
      %62 = vector.broadcast %cst_49 : f32 to vector<1x256xf32>
      %63 = arith.maximumf %61, %62 : vector<1x256xf32>
      %64 = vector.extract_strided_slice %63 {offsets = [0, 0], sizes = [1, 128], strides = [1, 1]} : vector<1x256xf32> to vector<1x128xf32>
      %65 = arith.truncf %64 : vector<1x128xf32> to vector<1x128xbf16>
      %66 = vector.extract_strided_slice %63 {offsets = [0, 128], sizes = [1, 128], strides = [1, 1]} : vector<1x256xf32> to vector<1x128xf32>
      %67 = arith.truncf %66 : vector<1x128xf32> to vector<1x128xbf16>
      %c0_50 = arith.constant 0 : index
      %68 = memref.load %arg1[%c0_50] : memref<2xi32, #tpu.memory_space<smem>>
      %69 = arith.index_cast %68 : i32 to index
      %c0_51 = arith.constant 0 : index
      %c0_52 = arith.constant 0 : index
      %70 = vector.load %arg16[%69, %c0_51, %c0_52] : memref<5x4x128xbf16, #tpu.memory_space<vmem>>, vector<1x4x128xbf16>
      %71 = vector.shape_cast %70 : vector<1x4x128xbf16> to vector<4x128xbf16>
      %72 = arith.index_cast %68 : i32 to index
      %c0_53 = arith.constant 0 : index
      %c0_54 = arith.constant 0 : index
      %73 = vector.load %arg18[%72, %c0_53, %c0_54] : memref<5x3x128xbf16, #tpu.memory_space<vmem>>, vector<1x3x128xbf16>
      %74 = vector.shape_cast %73 : vector<1x3x128xbf16> to vector<3x128xbf16>
      %cst_55 = arith.constant dense<0.000000e+00> : vector<1x4xf32>
      %75 = tpu.matmul %65, %71, %cst_55 {dimension_numbers = #tpu.dot_dimension_numbers<[1], [1], [0], [0], [0, 0, 1, 0], [], []>} : vector<1x128xbf16>, vector<4x128xbf16>, vector<1x4xf32> -> vector<1x4xf32>
      %76 = arith.index_cast %68 : i32 to index
      %c0_56 = arith.constant 0 : index
      %c0_57 = arith.constant 0 : index
      %77 = vector.load %arg17[%76, %c0_56, %c0_57] : memref<5x1x4xf32, #tpu.memory_space<vmem>>, vector<1x1x4xf32>
      %78 = vector.shape_cast %77 : vector<1x1x4xf32> to vector<1x4xf32>
      %79 = arith.addf %75, %78 : vector<1x4xf32>
      %c0_58 = arith.constant 0 : index
      %c0_59 = arith.constant 0 : index
      %80 = vector.load %arg20[%c0_58, %c0_59] : memref<1x4xf32, #tpu.memory_space<vmem>>, vector<1x4xf32>
      tpu.vector_store %arg20[%c0_58, %c0_59], %79 {strides = array<i32>} : memref<1x4xf32, #tpu.memory_space<vmem>>, vector<1x4xf32>,
      %cst_60 = arith.constant dense<0.000000e+00> : vector<1x3xf32>
      %81 = tpu.matmul %67, %74, %cst_60 {dimension_numbers = #tpu.dot_dimension_numbers<[1], [1], [0], [0], [0, 0, 1, 0], [], []>} : vector<1x128xbf16>, vector<3x128xbf16>, vector<1x3xf32> -> vector<1x3xf32>
      %82 = arith.index_cast %68 : i32 to index
      %c0_61 = arith.constant 0 : index
      %c0_62 = arith.constant 0 : index
      %83 = vector.load %arg19[%82, %c0_61, %c0_62] : memref<5x1x3xf32, #tpu.memory_space<vmem>>, vector<1x1x3xf32>
      %84 = vector.shape_cast %83 : vector<1x1x3xf32> to vector<1x3xf32>
      %85 = arith.addf %81, %84 : vector<1x3xf32>
      %c0_63 = arith.constant 0 : index
      %c0_64 = arith.constant 0 : index
      %86 = vector.load %arg21[%c0_63, %c0_64] : memref<1x3xf32, #tpu.memory_space<vmem>>, vector<1x3xf32>
      tpu.vector_store %arg21[%c0_63, %c0_64], %85 {strides = array<i32>} : memref<1x3xf32, #tpu.memory_space<vmem>>, vector<1x3xf32>,
    } else {
    }
    return
  }
  func.func @transform_0(%arg0: i32) -> i32 {
    %c0_i32 = arith.constant 0 : i32
    %c0_i32_0 = arith.constant 0 : i32
    return %c0_i32 : i32
  }
  func.func @transform_1(%arg0: i32) -> (i32, i32) {
    %c0_i32 = arith.constant 0 : i32
    %c0_i32_0 = arith.constant 0 : i32
    return %arg0, %c0_i32 : i32, i32
  }
  func.func @transform_2(%arg0: i32) -> (i32, i32) {
    %c0_i32 = arith.constant 0 : i32
    %c0_i32_0 = arith.constant 0 : i32
    %c0_i32_1 = arith.constant 0 : i32
    return %c0_i32, %c0_i32_0 : i32, i32
  }
  func.func @transform_3(%arg0: i32) -> (i32, i32) {
    %c0_i32 = arith.constant 0 : i32
    %c0_i32_0 = arith.constant 0 : i32
    %c0_i32_1 = arith.constant 0 : i32
    return %c0_i32, %c0_i32_0 : i32, i32
  }
  func.func @transform_4(%arg0: i32) -> (i32, i32) {
    %c0_i32 = arith.constant 0 : i32
    %c0_i32_0 = arith.constant 0 : i32
    %c0_i32_1 = arith.constant 0 : i32
    return %c0_i32, %c0_i32_0 : i32, i32
  }
  func.func @transform_5(%arg0: i32) -> (i32, i32) {
    %c0_i32 = arith.constant 0 : i32
    %c0_i32_0 = arith.constant 0 : i32
    %c0_i32_1 = arith.constant 0 : i32
    return %c0_i32, %c0_i32_0 : i32, i32
  }
  func.func @transform_6(%arg0: i32) -> (i32, i32) {
    %c0_i32 = arith.constant 0 : i32
    %c0_i32_0 = arith.constant 0 : i32
    %c0_i32_1 = arith.constant 0 : i32
    return %c0_i32, %c0_i32_0 : i32, i32
  }
  func.func @transform_7(%arg0: i32) -> (i32, i32) {
    %c0_i32 = arith.constant 0 : i32
    %c0_i32_0 = arith.constant 0 : i32
    %c0_i32_1 = arith.constant 0 : i32
    return %c0_i32, %c0_i32_0 : i32, i32
  }
  func.func @transform_8(%arg0: i32) -> (i32, i32) {
    %c0_i32 = arith.constant 0 : i32
    %c0_i32_0 = arith.constant 0 : i32
    %c0_i32_1 = arith.constant 0 : i32
    return %c0_i32, %c0_i32_0 : i32, i32
  }
  func.func @transform_9(%arg0: i32) -> (i32, i32) {
    %c0_i32 = arith.constant 0 : i32
    %c0_i32_0 = arith.constant 0 : i32
    %c0_i32_1 = arith.constant 0 : i32
    return %c0_i32, %c0_i32_0 : i32, i32
  }
  func.func @transform_10(%arg0: i32) -> (i32, i32) {
    %c0_i32 = arith.constant 0 : i32
    %c0_i32_0 = arith.constant 0 : i32
    %c0_i32_1 = arith.constant 0 : i32
    return %c0_i32, %c0_i32_0 : i32, i32
  }
  func.func @transform_11(%arg0: i32) -> (i32, i32) {
    %c0_i32 = arith.constant 0 : i32
    %c0_i32_0 = arith.constant 0 : i32
    %c0_i32_1 = arith.constant 0 : i32
    return %c0_i32, %c0_i32_0 : i32, i32
  }
  func.func @transform_12(%arg0: i32) -> (i32, i32) {
    %c0_i32 = arith.constant 0 : i32
    %c0_i32_0 = arith.constant 0 : i32
    %c0_i32_1 = arith.constant 0 : i32
    return %c0_i32, %c0_i32_0 : i32, i32
  }
  func.func @transform_13(%arg0: i32) -> (i32, i32) {
    %c0_i32 = arith.constant 0 : i32
    %c0_i32_0 = arith.constant 0 : i32
    %c0_i32_1 = arith.constant 0 : i32
    return %c0_i32, %c0_i32_0 : i32, i32
  }
  func.func @transform_14(%arg0: i32) -> (i32, i32) {
    %c0_i32 = arith.constant 0 : i32
    %c0_i32_0 = arith.constant 0 : i32
    %c0_i32_1 = arith.constant 0 : i32
    return %c0_i32, %c0_i32_0 : i32, i32
  }
  func.func @transform_15(%arg0: i32) -> (i32, i32, i32) {
    %c0_i32 = arith.constant 0 : i32
    %c0_i32_0 = arith.constant 0 : i32
    %c0_i32_1 = arith.constant 0 : i32
    %c0_i32_2 = arith.constant 0 : i32
    return %c0_i32, %c0_i32_0, %c0_i32_1 : i32, i32, i32
  }
  func.func @transform_16(%arg0: i32) -> (i32, i32, i32) {
    %c0_i32 = arith.constant 0 : i32
    %c0_i32_0 = arith.constant 0 : i32
    %c0_i32_1 = arith.constant 0 : i32
    %c0_i32_2 = arith.constant 0 : i32
    return %c0_i32, %c0_i32_0, %c0_i32_1 : i32, i32, i32
  }
  func.func @transform_17(%arg0: i32) -> (i32, i32, i32) {
    %c0_i32 = arith.constant 0 : i32
    %c0_i32_0 = arith.constant 0 : i32
    %c0_i32_1 = arith.constant 0 : i32
    %c0_i32_2 = arith.constant 0 : i32
    return %c0_i32, %c0_i32_0, %c0_i32_1 : i32, i32, i32
  }
  func.func @transform_18(%arg0: i32) -> (i32, i32, i32) {
    %c0_i32 = arith.constant 0 : i32
    %c0_i32_0 = arith.constant 0 : i32
    %c0_i32_1 = arith.constant 0 : i32
    %c0_i32_2 = arith.constant 0 : i32
    return %c0_i32, %c0_i32_0, %c0_i32_1 : i32, i32, i32
  }
  func.func @transform_19(%arg0: i32) -> (i32, i32) {
    %c0_i32 = arith.constant 0 : i32
    %c0_i32_0 = arith.constant 0 : i32
    %c0_i32_1 = arith.constant 0 : i32
    return %c0_i32, %c0_i32_0 : i32, i32
  }
  func.func @transform_20(%arg0: i32) -> (i32, i32) {
    %c0_i32 = arith.constant 0 : i32
    %c0_i32_0 = arith.constant 0 : i32
    %c0_i32_1 = arith.constant 0 : i32
    return %c0_i32, %c0_i32_0 : i32, i32
  }
}

</mosaic_0001>

<bundles_post_ra>
// kernel: pose_refine_forward.1
= control target key start
LH: loop header
LB: loop body
LE: loop exit
PB: predicated region body
PF: predicated region fallthrough
CT: control target
= control target key end

     0   :  { %s11917_s0 = inlined_call_operand.hbm [shape: s32[2], index: 0, kind: input, shape index: {}]   ;;  %s11918_s1 = inlined_call_operand.vmem [shape: f32[64,35], index: 1, kind: input, shape index: {}]   ;;  %s11919_s2 = inlined_call_operand.hbm [shape: bf16[35,128], index: 2, kind: input, shape index: {}]   ;;  %s11920_s3 = inlined_call_operand.hbm [shape: f32[1,128], index: 3, kind: input, shape index: {}]   ;;  %s11921_s4 = inlined_call_operand.hbm [shape: bf16[128,256], index: 4, kind: input, shape index: {}]   ;;  %s11922_s5 = inlined_call_operand.hbm [shape: f32[1,256], index: 5, kind: input, shape index: {}]   ;;  %s11923_s6 = inlined_call_operand.hbm [shape: bf16[128,512], index: 6, kind: input, shape index: {}]   ;;  %s11924_s7 = inlined_call_operand.hbm [shape: bf16[256,512], index: 7, kind: input, shape index: {}]   ;;  %s11925_s8 = inlined_call_operand.hbm [shape: f32[1,512], index: 8, kind: input, shape index: {}]   ;;  %s11926_s9 = inlined_call_operand.hbm [shape: bf16[512,1024], index: 9, kind: input, shape index: {}]   ;;  %s11927_s10 = inlined_call_operand.hbm [shape: f32[1,1024], index: 10, kind: input, shape index: {}]   ;;  %s11928_s11 = inlined_call_operand.hbm [shape: bf16[1024,1024], index: 11, kind: input, shape index: {}]   ;;  %s11929_s12 = inlined_call_operand.hbm [shape: f32[1,1024], index: 12, kind: input, shape index: {}]   ;;  %s11930_s13 = inlined_call_operand.hbm [shape: bf16[1024,256], index: 13, kind: input, shape index: {}]   ;;  %s11931_s14 = inlined_call_operand.hbm [shape: f32[1,256], index: 14, kind: input, shape index: {}]   ;;  %s11932_s15 = inlined_call_operand.hbm [shape: bf16[5,4,128], index: 15, kind: input, shape index: {}]   ;;  %s11933_s16 = inlined_call_operand.vmem [shape: f32[5,1,4], index: 16, kind: input, shape index: {}]   ;;  %s11934_s17 = inlined_call_operand.hbm [shape: bf16[5,3,128], index: 17, kind: input, shape index: {}]   ;;  %s11935_s18 = inlined_call_operand.vmem [shape: f32[5,1,3], index: 18, kind: input, shape index: {}]   ;;  %s11936_s19 = inlined_call_operand.hbm [shape: f32[1,4], index: 19, kind: output, shape index: {0}]   ;;  %s11937_s20 = inlined_call_operand.hbm [shape: f32[1,3], index: 20, kind: output, shape index: {1}]  }
   0x1   :  { %11946 = sst [smem:[#allocation43_spill]] %s11917_s0 }
   0x2   :  { %11947 = sst [smem:[#allocation44_spill]] %s11918_s1 }
   0x3   :  { %11948 = sst [smem:[#allocation45_spill]] %s11919_s2 }
   0x4   :  { %11949 = sst [smem:[#allocation46_spill]] %s11920_s3 }
   0x5   :  { %11950 = sst [smem:[#allocation47_spill]] %s11921_s4 }
   0x6   :  { %26 = vsyncpa [#allocation6], 0 }
   0x7   :  { %27 = vsyncpa [#allocation4], 0 }
   0x8   :  { %28 = vsyncpa [#allocation9], 0 }
   0x9   :  { %29 = vsyncpa [#allocation12], 0 }
   0xa   :  { %30 = vsyncpa [#allocation15], 0 }
   0xb   :  { %31 = vsyncpa [#allocation18], 0 }
   0xc   :  { %32 = vsyncpa [#allocation21], 0 }
   0xd   :  { %33 = vsyncpa [#allocation24], 0 }
   0xe   :  { %34 = vsyncpa [#allocation27], 0 }
   0xf   :  { %35 = vsyncpa [#allocation5], 0 }
  0x10   :  { %36 = vsyncpa [#allocation31], 0  ;;  %s10988_s1 = smov [#allocation8]   ;;  %s10989_s23 = smov [#allocation11]  }
  0x11   :  { %s65_s22 = sshll.u32 %s10988_s1, 4  ;;  %s87_s24 = sshll.u32 %s10989_s23, 4  ;;  %s66_s22 = int_to_ptr.vmem [resolvable:$true] %s65_s22  ;;  %s88_s24 = int_to_ptr.vmem [resolvable:$true] %s87_s24 }
  0x12   :  { %s11951_s3 = sld [smem:[#allocation46_spill]] }
  0x18   :  { %s10582_s26 = scalar_lea.hbm %s11951_s3, 16 }
  0x19   :  { %p10583_p0 = scmp.ne.s32.totalorder %s11951_s3, %s10582_s26  ;;  %p10586_p1 = scmp.lt.u32.totalorder %s10582_s26, %s11951_s3 }
  0x1b   :  { %p10588_p2 = pnand %p10586_p1, %p10583_p0 }
  0x1d   :  { %10591 = shalt.err (!%p10588_p2)
}
  0x1e   :  { %s10592_s30 = scalar_lea.vmem %s66_s22, 16  ;;  %s10596_s0 = scalar_lea.vmem %s66_s22, 32 }
  0x1f   :  { %p10593_p3 = scmp.ne.s32.totalorder %s66_s22, %s10592_s30  ;;  %p10597_p4 = scmp.lt.s32.totalorder %s66_s22, %s66_s22 }
  0x20   :  { %p10598_p5 = scmp.lt.s32.totalorder %s10596_s0, %s10592_s30 }
  0x22   :  { %p10599_p6 = por %p10598_p5, %p10597_p4 }
  0x24   :  { %p10600_p7 = pnand %p10599_p6, %p10593_p3 }
  0x26   :  { %10603 = shalt.err (!%p10600_p7)
}
  0x27   :  { %68 = dma.hbm_to_vmem [thread:$0]  %s11951_s3, 16, %s66_s22, [#allocation9]  }
  0x28   :  { %s10604_s25 = scalar_lea.hbm %s11922_s5, 32 }
  0x29   :  { %p10605_p8 = scmp.ne.s32.totalorder %s11922_s5, %s10604_s25  ;;  %p10608_p9 = scmp.lt.u32.totalorder %s10604_s25, %s11922_s5 }
  0x2b   :  { %p10610_p10 = pnand %p10608_p9, %p10605_p8 }
  0x2d   :  { %10613 = shalt.err (!%p10610_p10)
}
  0x2e   :  { %s10614_s29 = scalar_lea.vmem %s88_s24, 32  ;;  %p10619_p12 = scmp.lt.s32.totalorder %s88_s24, %s88_s24 }
  0x2f   :  { %p10615_p11 = scmp.ne.s32.totalorder %s88_s24, %s10614_s29  ;;  %p10620_p13 = scmp.lt.s32.totalorder %s10614_s29, %s10614_s29 }
  0x31   :  { %p10621_p0 = por %p10620_p13, %p10619_p12 }
  0x33   :  { %p10622_p1 = pnand %p10621_p0, %p10615_p11 }
  0x35   :  { %10625 = shalt.err (!%p10622_p1)
}
  0x36   :  { %90 = dma.hbm_to_vmem [thread:$0]  %s11922_s5, 32, %s88_s24, [#allocation12]  }
  0x37   :  { %s10990_s30 = smov [#allocation14]   ;;  %s10991_s21 = smov [#allocation17]  }
  0x38   :  { %s108_s0 = sshll.u32 %s10990_s30, 4  ;;  %s130_s1 = sshll.u32 %s10991_s21, 4  ;;  %s109_s0 = int_to_ptr.vmem [resolvable:$true] %s108_s0  ;;  %s11149_s1 = int_to_ptr.vmem [resolvable:$true] %s130_s1 }
  0x39   :  { %s10626_s25 = scalar_lea.hbm %s11924_s7, 8192 }
  0x3a   :  { %p10627_p2 = scmp.ne.s32.totalorder %s11924_s7, %s10626_s25  ;;  %p10630_p3 = scmp.lt.u32.totalorder %s10626_s25, %s11924_s7 }
  0x3c   :  { %p10632_p4 = pnand %p10630_p3, %p10627_p2 }
  0x3e   :  { %10635 = shalt.err (!%p10632_p4)
}
  0x3f   :  { %s10636_s5 = scalar_lea.vmem %s109_s0, 8192  ;;  %p10641_p6 = scmp.lt.s32.totalorder %s109_s0, %s109_s0 }
  0x40   :  { %p10637_p5 = scmp.ne.s32.totalorder %s109_s0, %s10636_s5  ;;  %p10642_p7 = scmp.lt.s32.totalorder %s10636_s5, %s10636_s5 }
  0x42   :  { %p10643_p8 = por %p10642_p7, %p10641_p6 }
  0x44   :  { %p10644_p9 = pnand %p10643_p8, %p10637_p5 }
  0x46   :  { %10647 = shalt.err (!%p10644_p9)
}
  0x47   :  { %s11945_s24 = smov 256   ;;  %s10993_s29 = smov 16  }
  0x48   :  { %114 = dma.hbm_to_vmem [thread:$0]  %s11924_s7, 8192, %s109_s0, [#allocation15], %s11945_s24, %s11945_s24, %s10993_s29  }
  0x49   :  { %s10648_s23 = scalar_lea.hbm %s11926_s9, 32768 }
  0x4a   :  { %p10649_p10 = scmp.ne.s32.totalorder %s11926_s9, %s10648_s23  ;;  %p10652_p11 = scmp.lt.u32.totalorder %s10648_s23, %s11926_s9 }
  0x4c   :  { %p10654_p12 = pnand %p10652_p11, %p10649_p10 }
  0x4e   :  { %10657 = shalt.err (!%p10654_p12)
}
  0x4f   :  { %s10658_s28 = scalar_lea.vmem %s11149_s1, 32768  ;;  %p10663_p0 = scmp.lt.s32.totalorder %s11149_s1, %s11149_s1 }
  0x50   :  { %p10659_p13 = scmp.ne.s32.totalorder %s11149_s1, %s10658_s28  ;;  %p10664_p1 = scmp.lt.s32.totalorder %s10658_s28, %s10658_s28 }
  0x52   :  { %p10665_p2 = por %p10664_p1, %p10663_p0 }
  0x54   :  { %p10666_p3 = pnand %p10665_p2, %p10659_p13 }
  0x56   :  { %10669 = shalt.err (!%p10666_p3)
}
  0x57   :  { %s10994_s7 = smov 512   ;;  %s11943_s0 = smov 32  }
  0x58   :  { %136 = dma.hbm_to_vmem [thread:$0]  %s11926_s9, 32768, %s11149_s1, [#allocation18], %s10994_s7, %s10994_s7, %s11943_s0  }
  0x59   :  { %s10996_s22 = smov [#allocation20]   ;;  %s10670_s23 = scalar_lea.hbm %s11928_s11, 65536 }
  0x5a   :  { %s152_s3 = sshll.u32 %s10996_s22, 4  ;;  %p10671_p4 = scmp.ne.s32.totalorder %s11928_s11, %s10670_s23  ;;  %s153_s3 = int_to_ptr.vmem [resolvable:$true] %s152_s3 }
  0x5b   :  { %p10674_p5 = scmp.lt.u32.totalorder %s10670_s23, %s11928_s11 }
  0x5d   :  { %p10676_p6 = pnand %p10674_p5, %p10671_p4 }
  0x5f   :  { %10679 = shalt.err (!%p10676_p6)
}
  0x60   :  { %s10680_s28 = scalar_lea.vmem %s153_s3, 65536  ;;  %p10685_p8 = scmp.lt.s32.totalorder %s153_s3, %s153_s3 }
  0x61   :  { %p10681_p7 = scmp.ne.s32.totalorder %s153_s3, %s10680_s28  ;;  %p10686_p9 = scmp.lt.s32.totalorder %s10680_s28, %s10680_s28 }
  0x63   :  { %p10687_p10 = por %p10686_p9, %p10685_p8 }
  0x65   :  { %p10688_p11 = pnand %p10687_p10, %p10681_p7 }
  0x67   :  { %10691 = shalt.err (!%p10688_p11)
}
  0x68   :  { %158 = dma.hbm_to_vmem [thread:$0]  %s11928_s11, 65536, %s153_s3, [#allocation21], %s10994_s7, %s10994_s7, %s11943_s0  }
  0x69   :  { %s10997_s4 = smov [#allocation23]   ;;  %s10998_s22 = smov [#allocation26]  }
  0x6a   :  { %s174_s5 = sshll.u32 %s10997_s4, 4  ;;  %s196_s30 = sshll.u32 %s10998_s22, 4  ;;  %s175_s5 = int_to_ptr.vmem [resolvable:$true] %s174_s5  ;;  %s197_s30 = int_to_ptr.vmem [resolvable:$true] %s196_s30 }
  0x6b   :  { %s10692_s2 = scalar_lea.hbm %s11930_s13, 16384 }
  0x6c   :  { %p10693_p12 = scmp.ne.s32.totalorder %s11930_s13, %s10692_s2  ;;  %p10696_p13 = scmp.lt.u32.totalorder %s10692_s2, %s11930_s13 }
  0x6e   :  { %p10698_p0 = pnand %p10696_p13, %p10693_p12 }
  0x70   :  { %10701 = shalt.err (!%p10698_p0)
}
  0x71   :  { %s10702_s11 = scalar_lea.vmem %s175_s5, 16384  ;;  %p10707_p2 = scmp.lt.s32.totalorder %s175_s5, %s175_s5 }
  0x72   :  { %p10703_p1 = scmp.ne.s32.totalorder %s175_s5, %s10702_s11  ;;  %p10708_p3 = scmp.lt.s32.totalorder %s10702_s11, %s10702_s11 }
  0x74   :  { %p10709_p4 = por %p10708_p3, %p10707_p2 }
  0x76   :  { %p10710_p5 = pnand %p10709_p4, %p10703_p1 }
  0x78   :  { %10713 = shalt.err (!%p10710_p5)
}
  0x79   :  { %s10999_s7 = smov 128   ;;  %s11000_s3 = smov 8  }
  0x7a   :  { %180 = dma.hbm_to_vmem [thread:$0]  %s11930_s13, 16384, %s175_s5, [#allocation24], %s10999_s7, %s10999_s7, %s11000_s3  }
  0x7b   :  { %s10714_s21 = scalar_lea.hbm %s11932_s15, 160 }
  0x7c   :  { %p10715_p6 = scmp.ne.s32.totalorder %s11932_s15, %s10714_s21  ;;  %p10718_p7 = scmp.lt.u32.totalorder %s10714_s21, %s11932_s15 }
  0x7e   :  { %p10720_p8 = pnand %p10718_p7, %p10715_p6 }
  0x80   :  { %10723 = shalt.err (!%p10720_p8)
}
  0x81   :  { %s10724_s26 = scalar_lea.vmem %s197_s30, 160  ;;  %p10729_p10 = scmp.lt.s32.totalorder %s197_s30, %s197_s30 }
  0x82   :  { %p10725_p9 = scmp.ne.s32.totalorder %s197_s30, %s10724_s26  ;;  %p10730_p11 = scmp.lt.s32.totalorder %s10724_s26, %s10724_s26 }
  0x84   :  { %p10731_p12 = por %p10730_p11, %p10729_p10 }
  0x86   :  { %p10732_p13 = pnand %p10731_p12, %p10725_p9 }
  0x88   :  { %10735 = shalt.err (!%p10732_p13)
}
  0x89   :  { %s11944_s13 = smov 2   ;;  %s11952_s1 = sld [smem:[#allocation43_spill]] }
  0x8a   :  { %202 = dma.hbm_to_vmem [thread:$0]  %s11932_s15, 160, %s197_s30, [#allocation27], %s11943_s0, %s11943_s0, %s11944_s13  }
  0x8f   :  { %s10736_s4 = scalar_lea.hbm %s11952_s1, 16 }
  0x90   :  { %p10737_p0 = scmp.ne.s32.totalorder %s11952_s1, %s10736_s4  ;;  %p10740_p1 = scmp.lt.u32.totalorder %s10736_s4, %s11952_s1 }
  0x92   :  { %p10742_p2 = pnand %p10740_p1, %p10737_p0 }
  0x94   :  { %10745 = shalt.err (!%p10742_p2)
}
  0x95   :  { %s11002_s25 = smov [#allocation3]   ;;  %s11003_s15 = smov [#allocation7]  }
  0x96   :  { %44 = dma.hbm_to_smem %s11952_s1, 16, %s11002_s25, [#allocation6]  }
  0x97   :  { %s52_s30 = sshll.u32 %s11003_s15, 4  ;;  %s11953_s11 = sld [smem:[#allocation45_spill]]  ;;  %s53_s30 = int_to_ptr.vmem [resolvable:$true] %s52_s30 }
  0x9d   :  { %s10746_s9 = scalar_lea.hbm %s11953_s11, 320 }
  0x9e   :  { %p10747_p3 = scmp.ne.s32.totalorder %s11953_s11, %s10746_s9  ;;  %p10750_p4 = scmp.lt.u32.totalorder %s10746_s9, %s11953_s11 }
  0xa0   :  { %p10752_p5 = pnand %p10750_p4, %p10747_p3 }
  0xa2   :  { %10755 = shalt.err (!%p10752_p5)
}
  0xa3   :  { %s10756_s2 = scalar_lea.vmem %s53_s30, 320  ;;  %p10761_p7 = scmp.lt.s32.totalorder %s53_s30, %s53_s30 }
  0xa4   :  { %p10757_p6 = scmp.ne.s32.totalorder %s53_s30, %s10756_s2  ;;  %p10762_p8 = scmp.lt.s32.totalorder %s10756_s2, %s10756_s2 }
  0xa6   :  { %p10763_p9 = por %p10762_p8, %p10761_p7 }
  0xa8   :  { %p10764_p10 = pnand %p10763_p9, %p10757_p6 }
  0xaa   :  { %10767 = shalt.err (!%p10764_p10)
}
  0xab   :  { %s11004_s1 = smov 64   ;;  %s11005_s25 = smov 4  }
  0xac   :  { %58 = dma.hbm_to_vmem [thread:$0]  %s11953_s11, 320, %s53_s30, [#allocation4], %s11004_s1, %s11004_s1, %s11005_s25  }
  0xad   :  { %s11006_s15 = smov [#allocation10]   ;;  %s11007_s28 = smov [#allocation13]  }
  0xae   :  { %s74_s5 = sshll.u32 %s11006_s15, 4  ;;  %s96_s22 = sshll.u32 %s11007_s28, 4  ;;  %s75_s5 = int_to_ptr.vmem [resolvable:$true] %s74_s5  ;;  %s11251_s22 = int_to_ptr.vmem [resolvable:$true] %s96_s22 }
  0xaf   :  { %s11954_s23 = sld [smem:[#allocation47_spill]] }
  0xb5   :  { %s10768_s4 = scalar_lea.hbm %s11954_s23, 2048 }
  0xb6   :  { %p10769_p11 = scmp.ne.s32.totalorder %s11954_s23, %s10768_s4  ;;  %p10772_p12 = scmp.lt.u32.totalorder %s10768_s4, %s11954_s23 }
  0xb8   :  { %p10774_p13 = pnand %p10772_p12, %p10769_p11 }
  0xba   :  { %10777 = shalt.err (!%p10774_p13)
}
  0xbb   :  { %s10778_s30 = scalar_lea.vmem %s75_s5, 2048  ;;  %p10783_p1 = scmp.lt.s32.totalorder %s75_s5, %s75_s5 }
  0xbc   :  { %p10779_p0 = scmp.ne.s32.totalorder %s75_s5, %s10778_s30  ;;  %p10784_p2 = scmp.lt.s32.totalorder %s10778_s30, %s10778_s30 }
  0xbe   :  { %p10785_p3 = por %p10784_p2, %p10783_p1 }
  0xc0   :  { %p10786_p4 = pnand %p10785_p3, %p10779_p0 }
  0xc2   :  { %10789 = shalt.err (!%p10786_p4)
}
  0xc3   :  { %80 = dma.hbm_to_vmem [thread:$0]  %s11954_s23, 2048, %s75_s5, [#allocation9], %s10999_s7, %s10999_s7, %s11000_s3  }
  0xc4   :  { %s10790_s24 = scalar_lea.hbm %s11923_s6, 4096 }
  0xc5   :  { %p10791_p5 = scmp.ne.s32.totalorder %s11923_s6, %s10790_s24  ;;  %p10794_p6 = scmp.lt.u32.totalorder %s10790_s24, %s11923_s6 }
  0xc7   :  { %p10796_p7 = pnand %p10794_p6, %p10791_p5 }
  0xc9   :  { %10799 = shalt.err (!%p10796_p7)
}
  0xca   :  { %s10800_s28 = scalar_lea.vmem %s11251_s22, 4096  ;;  %p10805_p9 = scmp.lt.s32.totalorder %s11251_s22, %s11251_s22 }
  0xcb   :  { %p10801_p8 = scmp.ne.s32.totalorder %s11251_s22, %s10800_s28  ;;  %p10806_p10 = scmp.lt.s32.totalorder %s10800_s28, %s10800_s28 }
  0xcd   :  { %p10807_p11 = por %p10806_p10, %p10805_p9 }
  0xcf   :  { %p10808_p12 = pnand %p10807_p11, %p10801_p8 }
  0xd1   :  { %10811 = shalt.err (!%p10808_p12)
}
  0xd2   :  { %s11955_s7 = smov 256   ;;  %s11008_s9 = smov [#allocation16]  }
  0xd3   :  { %102 = dma.hbm_to_vmem [thread:$0]  %s11923_s6, 4096, %s11251_s22, [#allocation12], %s11955_s7, %s11955_s7, %s10993_s29  }
  0xd4   :  { %s121_s21 = sshll.u32 %s11008_s9, 4  ;;  %s11009_s23 = smov [#allocation19]   ;;  %s122_s21 = int_to_ptr.vmem [resolvable:$true] %s121_s21 }
  0xd5   :  { %s143_s4 = sshll.u32 %s11009_s23, 4  ;;  %s10812_s11 = scalar_lea.hbm %s11925_s8, 64  ;;  %s144_s4 = int_to_ptr.vmem [resolvable:$true] %s143_s4 }
  0xd6   :  { %p10813_p13 = scmp.ne.s32.totalorder %s11925_s8, %s10812_s11  ;;  %p10816_p0 = scmp.lt.u32.totalorder %s10812_s11, %s11925_s8 }
  0xd8   :  { %p10818_p1 = pnand %p10816_p0, %p10813_p13 }
  0xda   :  { %10821 = shalt.err (!%p10818_p1)
}
  0xdb   :  { %s10822_s6 = scalar_lea.vmem %s122_s21, 64  ;;  %p10827_p3 = scmp.lt.s32.totalorder %s122_s21, %s122_s21 }
  0xdc   :  { %p10823_p2 = scmp.ne.s32.totalorder %s122_s21, %s10822_s6  ;;  %p10828_p4 = scmp.lt.s32.totalorder %s10822_s6, %s10822_s6 }
  0xde   :  { %p10829_p5 = por %p10828_p4, %p10827_p3 }
  0xe0   :  { %p10830_p6 = pnand %p10829_p5, %p10823_p2 }
  0xe2   :  { %10833 = shalt.err (!%p10830_p6)
}
  0xe3   :  { %124 = dma.hbm_to_vmem [thread:$0]  %s11925_s8, 64, %s122_s21, [#allocation15]  }
  0xe4   :  { %s10834_s26 = scalar_lea.hbm %s11927_s10, 128 }
  0xe5   :  { %p10835_p7 = scmp.ne.s32.totalorder %s11927_s10, %s10834_s26  ;;  %p10838_p8 = scmp.lt.u32.totalorder %s10834_s26, %s11927_s10 }
  0xe7   :  { %p10840_p9 = pnand %p10838_p8, %p10835_p7 }
  0xe9   :  { %10843 = shalt.err (!%p10840_p9)
}
  0xea   :  { %s10844_s5 = scalar_lea.vmem %s144_s4, 128  ;;  %p10849_p11 = scmp.lt.s32.totalorder %s144_s4, %s144_s4 }
  0xeb   :  { %p10845_p10 = scmp.ne.s32.totalorder %s144_s4, %s10844_s5  ;;  %p10850_p12 = scmp.lt.s32.totalorder %s10844_s5, %s10844_s5 }
  0xed   :  { %p10851_p13 = por %p10850_p12, %p10849_p11 }
  0xef   :  { %p10852_p0 = pnand %p10851_p13, %p10845_p10 }
  0xf1   :  { %10855 = shalt.err (!%p10852_p0)
}
  0xf2   :  { %146 = dma.hbm_to_vmem [thread:$0]  %s11927_s10, 128, %s144_s4, [#allocation18]  }
  0xf3   :  { %s11010_s21 = smov [#allocation22]   ;;  %s11011_s2 = smov [#allocation25]  }
  0xf4   :  { %s165_s23 = sshll.u32 %s11010_s21, 4  ;;  %s187_s30 = sshll.u32 %s11011_s2, 4  ;;  %s166_s23 = int_to_ptr.vmem [resolvable:$true] %s165_s23  ;;  %s188_s30 = int_to_ptr.vmem [resolvable:$true] %s187_s30 }
  0xf5   :  { %s10856_s0 = scalar_lea.hbm %s11929_s12, 128 }
  0xf6   :  { %p10857_p1 = scmp.ne.s32.totalorder %s11929_s12, %s10856_s0  ;;  %p10860_p2 = scmp.lt.u32.totalorder %s10856_s0, %s11929_s12 }
  0xf8   :  { %p10862_p3 = pnand %p10860_p2, %p10857_p1 }
  0xfa   :  { %10865 = shalt.err (!%p10862_p3)
}
  0xfb   :  { %s10866_s10 = scalar_lea.vmem %s166_s23, 128  ;;  %p10871_p5 = scmp.lt.s32.totalorder %s166_s23, %s166_s23 }
  0xfc   :  { %p10867_p4 = scmp.ne.s32.totalorder %s166_s23, %s10866_s10  ;;  %p10872_p6 = scmp.lt.s32.totalorder %s10866_s10, %s10866_s10 }
  0xfe   :  { %p10873_p7 = por %p10872_p6, %p10871_p5 }
 0x100   :  { %p10874_p8 = pnand %p10873_p7, %p10867_p4 }
 0x102   :  { %10877 = shalt.err (!%p10874_p8)
}
 0x103   :  { %168 = dma.hbm_to_vmem [thread:$0]  %s11929_s12, 128, %s166_s23, [#allocation21]  }
 0x104   :  { %s10878_s26 = scalar_lea.hbm %s11931_s14, 32 }
 0x105   :  { %p10879_p9 = scmp.ne.s32.totalorder %s11931_s14, %s10878_s26  ;;  %p10882_p10 = scmp.lt.u32.totalorder %s10878_s26, %s11931_s14 }
 0x107   :  { %p10884_p11 = pnand %p10882_p10, %p10879_p9 }
 0x109   :  { %10887 = shalt.err (!%p10884_p11)
}
 0x10a   :  { %s10888_s5 = scalar_lea.vmem %s188_s30, 32  ;;  %p10893_p13 = scmp.lt.s32.totalorder %s188_s30, %s188_s30 }
 0x10b   :  { %p10889_p12 = scmp.ne.s32.totalorder %s188_s30, %s10888_s5  ;;  %p10894_p0 = scmp.lt.s32.totalorder %s10888_s5, %s10888_s5 }
 0x10d   :  { %p10895_p1 = por %p10894_p0, %p10893_p13 }
 0x10f   :  { %p10896_p2 = pnand %p10895_p1, %p10889_p12 }
 0x111   :  { %10899 = shalt.err (!%p10896_p2)
}
 0x112   :  { %190 = dma.hbm_to_vmem [thread:$0]  %s11931_s14, 32, %s188_s30, [#allocation24]  }
 0x113   :  { %s11012_s9 = smov [#allocation28]   ;;  %s10900_s11 = scalar_lea.hbm %s11934_s17, 160 }
 0x114   :  { %s210_s21 = sshll.u32 %s11012_s9, 4  ;;  %p10901_p3 = scmp.ne.s32.totalorder %s11934_s17, %s10900_s11  ;;  %s211_s21 = int_to_ptr.vmem [resolvable:$true] %s210_s21 }
 0x115   :  { %p10904_p4 = scmp.lt.u32.totalorder %s10900_s11, %s11934_s17 }
 0x117   :  { %p10906_p5 = pnand %p10904_p4, %p10901_p3 }
 0x119   :  { %10909 = shalt.err (!%p10906_p5)
}
 0x11a   :  { %s10910_s6 = scalar_lea.vmem %s211_s21, 160  ;;  %p10915_p7 = scmp.lt.s32.totalorder %s211_s21, %s211_s21 }
 0x11b   :  { %p10911_p6 = scmp.ne.s32.totalorder %s211_s21, %s10910_s6  ;;  %p10916_p8 = scmp.lt.s32.totalorder %s10910_s6, %s10910_s6 }
 0x11d   :  { %p10917_p9 = por %p10916_p8, %p10915_p7 }
 0x11f   :  { %p10918_p10 = pnand %p10917_p9, %p10911_p6 }
 0x121   :  { %10921 = shalt.err (!%p10918_p10)
}
 0x122   :  { %s11956_s14 = smov 2   ;;  %s11957_s30 = smov 32  }
 0x123   :  { %216 = dma.hbm_to_vmem [thread:$0]  %s11934_s17, 160, %s211_s21, [#allocation27], %s11957_s30, %s11957_s30, %s11956_s14  }
 0x124   :  { %10966 = dma.done.wait [#allocation6], 16  }
 0x125   :  { %10967 = vsyncadd [#allocation6], 4294967280 }
 0x126   :  { %10968 = dma.done.wait [#allocation4], 320  }
 0x127   :  { %10969 = vsyncadd [#allocation4], 4294966976 }
 0x128   :  { %10970 = dma.done.wait [#allocation9], 2064  }
 0x129   :  { %10971 = vsyncadd [#allocation9], 4294965232 }
 0x12a   :  { %10972 = dma.done.wait [#allocation12], 4128  }
 0x12b   :  { %10973 = vsyncadd [#allocation12], 4294963168 }
 0x12c   :  { %10974 = dma.done.wait [#allocation15], 8256  }
 0x12d   :  { %10975 = vsyncadd [#allocation15], 4294959040 }
 0x12e   :  { %10976 = dma.done.wait [#allocation18], 32896  }
 0x12f   :  { %10977 = vsyncadd [#allocation18], 4294934400 }
 0x130   :  { %10978 = dma.done.wait [#allocation21], 65664  }
 0x131   :  { %10979 = vsyncadd [#allocation21], 4294901632 }
 0x132   :  { %10980 = dma.done.wait [#allocation24], 16416  }
 0x133   :  { %10981 = vsyncadd [#allocation24], 4294950880 }
 0x134   :  { %10982 = dma.done.wait [#allocation27], 320  }
 0x135   :  { %10983 = vsyncadd [#allocation27], 4294966976 }
 0x136   :  { %267 = sfence }
 0x137   :  { %v10219_v0 = vld [vmem:[#allocation7] sm:$0xff]   ;;  %vm326_vm0 = vcmask 1040384   ;;  %v10220_v1 = vld [vmem:[#allocation7 + $0x8] sm:$0xff]   ;;  %vm327_vm1 = vcmask 1041408   ;;  %v11013_v3 = vmov 65535   ;;  %s11958_s22 = sld [smem:[#allocation44_spill]] }
 0x138   :  { %9931 = vmatprep.subr.bf16.mxu1 %v10219_v0  ;;  %v10221_v2 = vld [vmem:[#allocation7 + $0x10] ss:$0 sps:$4 sm:$0x33]   ;;  %v328_v4 = vsel %vm326_vm0, 4294967295, %v11013_v3  ;;  %vm313_vm2 = vcmask 285696   ;;  %v11014_v35 = vmov 0  }
 0x139   :  { %9932 = vmatpush3.bf16.msra.mxu1 %v10219_v0  ;;  %v329_v7 = vsel %vm327_vm1, %v328_v4, 0  ;;  %v10224_v14 = vld [vmem:[#allocation10 + $0x4] ss:$8 sps:$4 sm:$0xff]   ;;  %v10222_v17 = vld [vmem:[#allocation10] ss:$8 sps:$4 sm:$0xff]   ;;  %s11875_s11 = sld [smem:[#allocation3]] }
 0x13a   :  { %9933 = vmatprep.subr.bf16.mxu1 %v10220_v1  ;;  %v331_v9 = vand.u32 %v10221_v2, %v329_v7  ;;  %v10227_v18 = vld [vmem:[#allocation10 + $0x14] ss:$8 sps:$4 sm:$0xff]   ;;  %v10225_v21 = vld [vmem:[#allocation10 + $0x10] ss:$8 sps:$4 sm:$0xff]   ;;  %v10230_v22 = vld [vmem:[#allocation10 + $0x24] ss:$8 sps:$4 sm:$0xff]  }
 0x13b   :  { %v10228_v23 = vld [vmem:[#allocation10 + $0x20] ss:$8 sps:$4 sm:$0xff]   ;;  %v10233_v25 = vld [vmem:[#allocation10 + $0x34] ss:$8 sps:$4 sm:$0xff]   ;;  %v10231_v26 = vld [vmem:[#allocation10 + $0x30] ss:$8 sps:$4 sm:$0xff]  }
 0x13c   :  { %v10236_v27 = vld [vmem:[#allocation10 + $0x44] ss:$8 sps:$4 sm:$0xff]   ;;  %v10234_v28 = vld [vmem:[#allocation10 + $0x40] ss:$8 sps:$4 sm:$0xff]   ;;  %v10239_v29 = vld [vmem:[#allocation10 + $0x54] ss:$8 sps:$4 sm:$0xff]  }
 0x13d   :  { %v274_v5 = vld [vmem:[%s11958_s22] sm:$0xff]  ;;  %v275_v6 = vld [vmem:[%s11958_s22 + $0x8] sm:$0xff]  ;;  %v276_v10 = vld [vmem:[%s11958_s22 + $0x10] sm:$0xff]  ;;  %9934 = vmatpush3.bf16.msra.mxu1 %v10220_v1  ;;  %vm11017_vm3 = vmmov 0   ;;  %s11018_s30 = smov [#allocation29]   ;;  %vm8813_vm4 = vcmask 24576  }
 0x13e   :  { %v282_v8 = vpack.c.bf16 %v275_v6, %v274_v5  ;;  %v277_v11 = vld [vmem:[%s11958_s22 + $0x18] sm:$0xff]  ;;  %v278_v12 = vld [vmem:[%s11958_s22 + $0x20] sm:$0xff]  ;;  %v279_v13 = vld [vmem:[%s11958_s22 + $0x28] sm:$0xff]  ;;  %9935 = vmatprep.subr.bf16.mxu1 %v331_v9  ;;  %s8865_s29 = sshll.u32 %s11018_s30, 4  ;;  %s8866_s29 = int_to_ptr.vmem [resolvable:$true] %s8865_s29 }
 0x13f   :  { %v283_v15 = vpack.c.bf16 %v277_v11, %v276_v10  ;;  %v284_v16 = vpack.c.bf16 %v279_v13, %v278_v12  ;;  %v280_v19 = vld [vmem:[%s11958_s22 + $0x30] sm:$0xff]  ;;  %v281_v20 = vld [vmem:[%s11958_s22 + $0x38] sm:$0xff]  ;;  %s9918_s1 = sshll.u32 %s11875_s11, 1  ;;  %s8771_s14 = scalar_lea.vmem %s11933_s16, %s11875_s11 }
 0x140   :  { %9937 = vmatprep.mubr.msk.bf16.mxu1 %vm313_vm2, %v282_v8  ;;  %v285_v24 = vpack.c.bf16 %v281_v20, %v280_v19  ;;  %v10237_v30 = vld [vmem:[#allocation10 + $0x50] ss:$8 sps:$4 sm:$0xff]   ;;  %v10242_v31 = vld [vmem:[#allocation10 + $0x64] ss:$8 sps:$4 sm:$0xff]   ;;  %v10240_v32 = vld [vmem:[#allocation10 + $0x60] ss:$8 sps:$4 sm:$0xff]   ;;  %s8815_s4 = scalar_lea.vmem %s11935_s18, %s11875_s11  ;;  %p10927_p12 = scmp.lt.s32.totalorder %s8866_s29, %s8866_s29 }
 0x141   :  { %9936 = vmatpush3.bf16.msra.mxu1 %v331_v9  ;;  %v10245_v33 = vld [vmem:[#allocation10 + $0x74] ss:$8 sps:$4 sm:$0xff]   ;;  %v10243_v34 = vld [vmem:[#allocation10 + $0x70] ss:$8 sps:$4 sm:$0xff]   ;;  %s8766_s0 = scalar_lea.vmem [#allocation26], %s9918_s1  ;;  %s8769_s25 = scalar_lea.vmem [#allocation28], %s9918_s1 }
 0x142   :  { %518 = vmatprep.subr.bf16.mxu1 %v10224_v14  ;;  %v10248_v36 = vld [vmem:[#allocation14 + $0x4] ss:$16 sps:$4 sm:$0xff]   ;;  %v8902_v37 = vld [vmem:[#allocation8] ss:$0 sm:$0xff]  ;;  %v10246_v51 = vld [vmem:[#allocation14] ss:$16 sps:$4 sm:$0xff]  }
 0x143   :  { %v10251_v54 = vld [vmem:[#allocation14 + $0x24] ss:$16 sps:$4 sm:$0xff]   ;;  %v10249_v62 = vld [vmem:[#allocation14 + $0x20] ss:$16 sps:$4 sm:$0xff]   ;;  %s10922_s22 = scalar_lea.vmem %s8866_s29, 16  ;;  %s10926_s13 = scalar_lea.vmem %s8866_s29, 32 }
 0x144   :  { %9938 = vmatmul.mubr.msk.bf16.vlgmr.msra.gmra.mrb[0].mxu1 %vm313_vm2, %v283_v15  ;;  %v10254_v1 = vld [vmem:[#allocation14 + $0x44] ss:$16 sps:$4 sm:$0xff]   ;;  %v10252_v5 = vld [vmem:[#allocation14 + $0x40] ss:$16 sps:$4 sm:$0xff]   ;;  %p10923_p11 = scmp.ne.s32.totalorder %s8866_s29, %s10922_s22  ;;  %p10928_p13 = scmp.lt.s32.totalorder %s10926_s13, %s10922_s22 }
 0x145   :  { %9941 = vmatprep.mubr.msk.bf16.mxu1 %vm313_vm2, %v284_v16  ;;  %519 = vmatpush1.bf16.msra.mxu1 %v10222_v17  ;;  %v10257_v7 = vld [vmem:[#allocation14 + $0x64] ss:$16 sps:$4 sm:$0xff]   ;;  %v10255_v8 = vld [vmem:[#allocation14 + $0x60] ss:$16 sps:$4 sm:$0xff]  }
 0x146   :  { %520 = vmatprep.subr.bf16.mxu1 %v10227_v18  ;;  %v10260_v9 = vld [vmem:[#allocation14 + $0x84] ss:$16 sps:$4 sm:$0xff]   ;;  %v10258_v10 = vld [vmem:[#allocation14 + $0x80] ss:$16 sps:$4 sm:$0xff]   ;;  %p10929_p0 = por %p10928_p13, %p10927_p12 }
 0x147   :  { %v10263_v11 = vld [vmem:[#allocation14 + $0xa4] ss:$16 sps:$4 sm:$0xff]   ;;  %v10261_v12 = vld [vmem:[#allocation14 + $0xa0] ss:$16 sps:$4 sm:$0xff]  }
 0x148   :  { %v10266_v13 = vld [vmem:[#allocation14 + $0xc4] ss:$16 sps:$4 sm:$0xff]   ;;  %v10264_v14 = vld [vmem:[#allocation14 + $0xc0] ss:$16 sps:$4 sm:$0xff]   ;;  %p10930_p1 = pnand %p10929_p0, %p10923_p11 }
 0x149   :  { %521 = vmatpush1.bf16.msra.mxu1 %v10225_v21  ;;  %v10269_v15 = vld [vmem:[#allocation14 + $0xe4] ss:$16 sps:$4 sm:$0xff]   ;;  %v10267_v16 = vld [vmem:[#allocation14 + $0xe0] ss:$16 sps:$4 sm:$0xff]  }
 0x14a   :  { %522 = vmatprep.subr.bf16.mxu1 %v10230_v22  ;;  %v10272_v17 = vld [vmem:[#allocation14 + $0x104] ss:$16 sps:$4 sm:$0xff]   ;;  %v10270_v18 = vld [vmem:[#allocation14 + $0x100] ss:$16 sps:$4 sm:$0xff]  }
 0x14b   :  { %v10275_v19 = vld [vmem:[#allocation14 + $0x124] ss:$16 sps:$4 sm:$0xff]   ;;  %v10273_v20 = vld [vmem:[#allocation14 + $0x120] ss:$16 sps:$4 sm:$0xff]  }
 0x14c   :  { %9942 = vmatmul.mubr.msk.bf16.gmra.mrb[4].mxu1 %vm313_vm2, %v285_v24  ;;  %v10278_v21 = vld [vmem:[#allocation14 + $0x144] ss:$16 sps:$4 sm:$0xff]   ;;  %v10276_v22 = vld [vmem:[#allocation14 + $0x140] ss:$16 sps:$4 sm:$0xff]  }
 0x14d   :  { %523 = vmatpush1.bf16.msra.mxu1 %v10228_v23  ;;  %550 = vmatprep.mubr.bf16.mxu1 %v11014_v35  ;;  %v10281_v23 = vld [vmem:[#allocation14 + $0x164] ss:$16 sps:$4 sm:$0xff]   ;;  %v10279_v24 = vld [vmem:[#allocation14 + $0x160] ss:$16 sps:$4 sm:$0xff]  }
 0x14e   :  { %524 = vmatprep.subr.bf16.mxu1 %v10233_v25  ;;  %v10284_v25 = vld [vmem:[#allocation14 + $0x184] ss:$16 sps:$4 sm:$0xff]  }
 0x151   :  { %525 = vmatpush1.bf16.msra.mxu1 %v10231_v26  ;;  %v10282_v26 = vld [vmem:[#allocation14 + $0x180] ss:$16 sps:$4 sm:$0xff]  }
 0x152   :  { %526 = vmatprep.subr.bf16.mxu1 %v10236_v27  ;;  %v10287_v27 = vld [vmem:[#allocation14 + $0x1a4] ss:$16 sps:$4 sm:$0xff]  }
 0x155   :  { %527 = vmatpush1.bf16.msra.mxu1 %v10234_v28  ;;  %v10285_v28 = vld [vmem:[#allocation14 + $0x1a0] ss:$16 sps:$4 sm:$0xff]  }
 0x156   :  { %528 = vmatprep.subr.bf16.mxu1 %v10239_v29  ;;  %v10290_v29 = vld [vmem:[#allocation14 + $0x1c4] ss:$16 sps:$4 sm:$0xff]  }
 0x159   :  { %529 = vmatpush1.bf16.msra.mxu1 %v10237_v30  ;;  %v10288_v30 = vld [vmem:[#allocation14 + $0x1c0] ss:$16 sps:$4 sm:$0xff]  }
 0x15a   :  { %530 = vmatprep.subr.bf16.mxu1 %v10242_v31  ;;  %v10293_v31 = vld [vmem:[#allocation14 + $0x1e4] ss:$16 sps:$4 sm:$0xff]  }
 0x15d   :  { %531 = vmatpush1.bf16.msra.mxu1 %v10240_v32  ;;  %v10291_v32 = vld [vmem:[#allocation14 + $0x1e0] ss:$16 sps:$4 sm:$0xff]  }
 0x15e   :  { %532 = vmatprep.subr.bf16.mxu1 %v10245_v33  ;;  %v10296_v33 = vld [vmem:[#allocation14 + $0xc] ss:$16 sps:$4 sm:$0xff]  }
 0x161   :  { %533 = vmatpush1.bf16.msra.mxu1 %v10243_v34  ;;  %v428_v34 = vlaneseq }
 0x162   :  { %1031 = vmatprep.subr.bf16.mxu1 %v10248_v36 }
 0x163   :  { %v11395_v36 = vshrl.u32 %v428_v34, 7 }
 0x217   :  { %v9939_v38 = vpop.f32.mrb[0].mxu1 }
 0x218   :  { %v376_v39 = vadd.f32 %v9939_v38, %v8902_v37  ;;  %v367_v40 = vpop.f32.mrb[1].mxu1  ;;  %v426_v38 = vld [vmem:[#allocation11] sm:$0x3] }
 0x219   :  { %v368_v41 = vadd.f32 %v8902_v37, %v367_v40  ;;  %v9940_v42 = vpop.f32.mrb[2].mxu1 }
 0x21a   :  { %v379_v43 = vadd.f32 %v9940_v42, %v8902_v37  ;;  %v370_v44 = vpop.f32.mrb[3].mxu1  ;;  %v400_v46 = vmax.f32 %v376_v39, 0.0  ;;  %v11401_v39 = vsub.s32 1, %v11395_v36 }
 0x21b   :  { %v371_v45 = vadd.f32 %v8902_v37, %v370_v44  ;;  %v398_v48 = vmax.f32 %v368_v41, 0.0 }
 0x21c   :  { %v401_v47 = vmax.f32 %v379_v43, 0.0  ;;  %v11407_v41 = vrot.slane %v426_v38, %v11401_v39 }
 0x21d   :  { %v399_v49 = vmax.f32 %v371_v45, 0.0 }
 0x21e   :  { %v11380_v50 = vpack.c.bf16 %v401_v47, %v400_v46 }
 0x21f   :  { %v11382_v52 = vpack.c.bf16 %v399_v49, %v398_v48  ;;  %v9943_v53 = vpop.f32.mrb[4].mxu1 }
 0x220   :  { %v392_v55 = vadd.f32 %v9943_v53, %v8902_v37  ;;  %v383_v56 = vpop.f32.mrb[5].mxu1 }
 0x221   :  { %551 = vmatmul.mubr.bf16.vlgmr.msra.gmra.mrb[8].mxu1 %v11382_v52  ;;  %v384_v57 = vadd.f32 %v8902_v37, %v383_v56  ;;  %v9944_v58 = vpop.f32.mrb[6].mxu1 }
 0x222   :  { %v404_v59 = vmax.f32 %v392_v55, 0.0  ;;  %560 = vmatprep.mubr.bf16.mxu1 %v11014_v35  ;;  %v395_v60 = vadd.f32 %v9944_v58, %v8902_v37  ;;  %v386_v61 = vpop.f32.mrb[7].mxu1  ;;  %1032 = vmatpush1.bf16.msra.mxu1 %v10246_v51 }
 0x223   :  { %v402_v63 = vmax.f32 %v384_v57, 0.0  ;;  %v387_v0 = vadd.f32 %v8902_v37, %v386_v61  ;;  %1033 = vmatprep.subr.bf16.mxu1 %v10251_v54  ;;  %v11398_v37 = vsub.s32 0, %v11395_v36 }
 0x224   :  { %v405_v2 = vmax.f32 %v395_v60, 0.0 }
 0x225   :  { %v403_v3 = vmax.f32 %v387_v0, 0.0  ;;  %v11404_v40 = vrot.slane %v426_v38, %v11398_v37 }
 0x226   :  { %v11386_v4 = vpack.c.bf16 %v405_v2, %v404_v59  ;;  %1034 = vmatpush1.bf16.msra.mxu1 %v10249_v62  ;;  %v10294_v59 = vld [vmem:[#allocation14 + $0x8] ss:$16 sps:$4 sm:$0xff]   ;;  %v10299_v62 = vld [vmem:[#allocation14 + $0x2c] ss:$16 sps:$4 sm:$0xff]  }
 0x227   :  { %v11388_v6 = vpack.c.bf16 %v403_v3, %v402_v63  ;;  %1035 = vmatprep.subr.bf16.mxu1 %v10254_v1 }
 0x229   :  { %561 = vmatmul.mubr.bf16.gmra.mrb[12].mxu1 %v11380_v50 }
 0x22a   :  { %570 = vmatprep.mubr.bf16.mxu1 %v11014_v35  ;;  %1036 = vmatpush1.bf16.msra.mxu1 %v10252_v5  ;;  %v10297_v5 = vld [vmem:[#allocation14 + $0x28] ss:$16 sps:$4 sm:$0xff]  }
 0x22b   :  { %1037 = vmatprep.subr.bf16.mxu1 %v10257_v7 }
 0x22e   :  { %1038 = vmatpush1.bf16.msra.mxu1 %v10255_v8 }
 0x22f   :  { %1039 = vmatprep.subr.bf16.mxu1 %v10260_v9  ;;  %v10302_v9 = vld [vmem:[#allocation14 + $0x4c] ss:$16 sps:$4 sm:$0xff]  }
 0x231   :  { %571 = vmatmul.mubr.bf16.gmra.mrb[16].mxu1 %v11388_v6 }
 0x232   :  { %580 = vmatprep.mubr.bf16.mxu1 %v11014_v35  ;;  %1040 = vmatpush1.bf16.msra.mxu1 %v10258_v10 }
 0x233   :  { %1041 = vmatprep.subr.bf16.mxu1 %v10263_v11 }
 0x236   :  { %1042 = vmatpush1.bf16.msra.mxu1 %v10261_v12 }
 0x237   :  { %1043 = vmatprep.subr.bf16.mxu1 %v10266_v13 }
 0x239   :  { %581 = vmatmul.mubr.bf16.gmra.mrb[20].mxu1 %v11386_v4 }
 0x23a   :  { %1044 = vmatpush1.bf16.msra.mxu1 %v10264_v14 }
 0x23b   :  { %1045 = vmatprep.subr.bf16.mxu1 %v10269_v15  ;;  %v10300_v15 = vld [vmem:[#allocation14 + $0x48] ss:$16 sps:$4 sm:$0xff]  }
 0x23e   :  { %1046 = vmatpush1.bf16.msra.mxu1 %v10267_v16 }
 0x23f   :  { %1047 = vmatprep.subr.bf16.mxu1 %v10272_v17 }
 0x242   :  { %1048 = vmatpush1.bf16.msra.mxu1 %v10270_v18  ;;  %v10305_v18 = vld [vmem:[#allocation14 + $0x6c] ss:$16 sps:$4 sm:$0xff]  }
 0x243   :  { %1049 = vmatprep.subr.bf16.mxu1 %v10275_v19 }
 0x246   :  { %1050 = vmatpush1.bf16.msra.mxu1 %v10273_v20 }
 0x247   :  { %1051 = vmatprep.subr.bf16.mxu1 %v10278_v21 }
 0x24a   :  { %1052 = vmatpush1.bf16.msra.mxu1 %v10276_v22 }
 0x24b   :  { %1053 = vmatprep.subr.bf16.mxu1 %v10281_v23 }
 0x24e   :  { %1054 = vmatpush1.bf16.msra.mxu1 %v10279_v24 }
 0x24f   :  { %1055 = vmatprep.subr.bf16.mxu1 %v10284_v25 }
 0x252   :  { %1056 = vmatpush1.bf16.msra.mxu1 %v10282_v26  ;;  %v10303_v26 = vld [vmem:[#allocation14 + $0x68] ss:$16 sps:$4 sm:$0xff]  }
 0x253   :  { %1057 = vmatprep.subr.bf16.mxu1 %v10287_v27 }
 0x256   :  { %1058 = vmatpush1.bf16.msra.mxu1 %v10285_v28  ;;  %v10308_v28 = vld [vmem:[#allocation14 + $0x8c] ss:$16 sps:$4 sm:$0xff]  }
 0x257   :  { %1059 = vmatprep.subr.bf16.mxu1 %v10290_v29 }
 0x25a   :  { %1060 = vmatpush1.bf16.msra.mxu1 %v10288_v30 }
 0x25b   :  { %1061 = vmatprep.subr.bf16.mxu1 %v10293_v31 }
 0x25e   :  { %1062 = vmatpush1.bf16.msra.mxu1 %v10291_v32 }
 0x25f   :  { %1104 = vmatprep.subr.bf16.mxu1 %v10296_v33  ;;  %v10306_v33 = vld [vmem:[#allocation14 + $0x88] ss:$16 sps:$4 sm:$0xff]  }
 0x2f4   :  { %v552_v42 = vpop.f32.mrb[8].mxu1 }
 0x2f5   :  { %v553_v43 = vadd.f32 %v552_v42, %v11404_v40  ;;  %v554_v44 = vpop.f32.mrb[9].mxu1  ;;  %v10311_v42 = vld [vmem:[#allocation14 + $0xac] ss:$16 sps:$4 sm:$0xff]  }
 0x2f6   :  { %v555_v45 = vadd.f32 %v554_v44, %v11407_v41  ;;  %v556_v46 = vpop.f32.mrb[10].mxu1 }
 0x2f7   :  { %v557_v47 = vadd.f32 %v556_v46, %v11404_v40  ;;  %v558_v48 = vpop.f32.mrb[11].mxu1  ;;  %v591_v51 = vmax.f32 %v553_v43, 0.0 }
 0x2f8   :  { %v559_v49 = vadd.f32 %v558_v48, %v11407_v41  ;;  %v592_v54 = vmax.f32 %v555_v45, 0.0 }
 0x2f9   :  { %v593_v53 = vmax.f32 %v557_v47, 0.0 }
 0x2fa   :  { %v594_v55 = vmax.f32 %v559_v49, 0.0 }
 0x2fb   :  { %v11413_v56 = vpack.c.bf16 %v593_v53, %v591_v51  ;;  %v10309_v51 = vld [vmem:[#allocation14 + $0xa8] ss:$16 sps:$4 sm:$0xff]  }
 0x2fc   :  { %v11415_v57 = vpack.c.bf16 %v594_v55, %v592_v54  ;;  %v562_v58 = vpop.f32.mrb[12].mxu1  ;;  %v10314_v54 = vld [vmem:[#allocation14 + $0xcc] ss:$16 sps:$4 sm:$0xff]  }
 0x2fd   :  { %v563_v60 = vadd.f32 %v562_v58, %v11404_v40  ;;  %v564_v61 = vpop.f32.mrb[13].mxu1 }
 0x2fe   :  { %v565_v63 = vadd.f32 %v564_v61, %v11407_v41  ;;  %v566_v0 = vpop.f32.mrb[14].mxu1  ;;  %1063 = vmatprep.mubr.bf16.mxu1 %v11415_v57  ;;  %v1585_v61 = vld [vmem:[#allocation17] sm:$0xff] }
 0x2ff   :  { %v567_v1 = vadd.f32 %v566_v0, %v11404_v40  ;;  %v568_v2 = vpop.f32.mrb[15].mxu1  ;;  %1064 = vmatmul.mubr.bf16.vlgmr.msra.gmra.mrb[24].mxu1 %v11413_v56  ;;  %v595_v7 = vmax.f32 %v563_v60, 0.0  ;;  %v10312_v60 = vld [vmem:[#allocation14 + $0xc8] ss:$16 sps:$4 sm:$0xff]  }
 0x300   :  { %v569_v3 = vadd.f32 %v568_v2, %v11407_v41  ;;  %1105 = vmatpush1.bf16.msra.mxu1 %v10294_v59  ;;  %v596_v10 = vmax.f32 %v565_v63, 0.0  ;;  %v1597_v2 = vld [vmem:[#allocation17 + $0x60] sm:$0xff] }
 0x301   :  { %v597_v8 = vmax.f32 %v567_v1, 0.0  ;;  %1106 = vmatprep.subr.bf16.mxu1 %v10299_v62  ;;  %v10315_v62 = vld [vmem:[#allocation14 + $0xe8] ss:$16 sps:$4 sm:$0xff]  }
 0x302   :  { %v598_v11 = vmax.f32 %v569_v3, 0.0  ;;  %v1593_v1 = vld [vmem:[#allocation17 + $0x40] sm:$0xff]  ;;  %v10320_v3 = vld [vmem:[#allocation14 + $0x10c] ss:$16 sps:$4 sm:$0xff]  }
 0x303   :  { %v11423_v12 = vpack.c.bf16 %v597_v8, %v595_v7  ;;  %v1601_v7 = vld [vmem:[#allocation17 + $0x80] sm:$0xff] }
 0x304   :  { %v11425_v13 = vpack.c.bf16 %v598_v11, %v596_v10  ;;  %1107 = vmatpush1.bf16.msra.mxu1 %v10297_v5  ;;  %v572_v14 = vpop.f32.mrb[16].mxu1  ;;  %v9031_v5 = vcombine.high %v1593_v1, %v1597_v2  ;;  %v1605_v8 = vld [vmem:[#allocation17 + $0xa0] sm:$0xff] }
 0x305   :  { %v573_v16 = vadd.f32 %v572_v14, %v11404_v40  ;;  %v574_v17 = vpop.f32.mrb[17].mxu1  ;;  %1108 = vmatprep.subr.bf16.mxu1 %v10302_v9  ;;  %v9030_v9 = vcombine.low %v1593_v1, %v1597_v2  ;;  %v10318_v10 = vld [vmem:[#allocation14 + $0x108] ss:$16 sps:$4 sm:$0xff]   ;;  %v9039_v11 = vcombine.high %v1601_v7, %v1605_v8  ;;  %v10323_v14 = vld [vmem:[#allocation14 + $0x12c] ss:$16 sps:$4 sm:$0xff]  }
 0x306   :  { %v575_v19 = vadd.f32 %v574_v17, %v11407_v41  ;;  %v576_v20 = vpop.f32.mrb[18].mxu1  ;;  %1073 = vmatprep.mubr.bf16.mxu1 %v11425_v13  ;;  %v10321_v17 = vld [vmem:[#allocation14 + $0x128] ss:$16 sps:$4 sm:$0xff]  }
 0x307   :  { %v599_v21 = vmax.f32 %v573_v16, 0.0  ;;  %v577_v22 = vadd.f32 %v576_v20, %v11404_v40  ;;  %v578_v23 = vpop.f32.mrb[19].mxu1  ;;  %1074 = vmatmul.mubr.bf16.gmra.mrb[28].mxu1 %v11423_v12  ;;  %v9038_v16 = vcombine.low %v1601_v7, %v1605_v8  ;;  %v1617_v20 = vld [vmem:[#allocation17 + $0x100] sm:$0xff] }
 0x308   :  { %v600_v24 = vmax.f32 %v575_v19, 0.0  ;;  %v579_v25 = vadd.f32 %v578_v23, %v11407_v41  ;;  %1109 = vmatpush1.bf16.msra.mxu1 %v10300_v15  ;;  %v1613_v15 = vld [vmem:[#allocation17 + $0xe0] sm:$0xff]  ;;  %v10326_v19 = vld [vmem:[#allocation14 + $0x14c] ss:$16 sps:$4 sm:$0xff]  }
 0x309   :  { %v601_v27 = vmax.f32 %v577_v22, 0.0  ;;  %1110 = vmatprep.subr.bf16.mxu1 %v10305_v18  ;;  %v10324_v23 = vld [vmem:[#allocation14 + $0x148] ss:$16 sps:$4 sm:$0xff]  }
 0x30a   :  { %v602_v29 = vmax.f32 %v579_v25, 0.0  ;;  %v10329_v25 = vld [vmem:[#allocation14 + $0x16c] ss:$16 sps:$4 sm:$0xff]   ;;  %v10339_v1 = vld [vmem:[#allocation14 + $0x1e8] ss:$16 sps:$4 sm:$0xff]  }
 0x30b   :  { %v11433_v30 = vpack.c.bf16 %v601_v27, %v599_v21  ;;  %v1621_v21 = vld [vmem:[#allocation17 + $0x120] sm:$0xff] }
 0x30c   :  { %v11435_v31 = vpack.c.bf16 %v602_v29, %v600_v24  ;;  %1111 = vmatpush1.bf16.msra.mxu1 %v10303_v26  ;;  %v582_v32 = vpop.f32.mrb[20].mxu1  ;;  %v9055_v24 = vcombine.high %v1617_v20, %v1621_v21  ;;  %v1625_v26 = vld [vmem:[#allocation17 + $0x140] sm:$0xff] }
 0x30d   :  { %v583_v34 = vadd.f32 %v582_v32, %v11404_v40  ;;  %v584_v38 = vpop.f32.mrb[21].mxu1  ;;  %1112 = vmatprep.subr.bf16.mxu1 %v10308_v28  ;;  %v1629_v27 = vld [vmem:[#allocation17 + $0x160] sm:$0xff]  ;;  %v9054_v28 = vcombine.low %v1617_v20, %v1621_v21 }
 0x30e   :  { %v585_v43 = vadd.f32 %v584_v38, %v11407_v41  ;;  %v586_v44 = vpop.f32.mrb[22].mxu1  ;;  %1083 = vmatprep.mubr.bf16.mxu1 %v11435_v31  ;;  %v10327_v29 = vld [vmem:[#allocation14 + $0x168] ss:$16 sps:$4 sm:$0xff]   ;;  %v9063_v32 = vcombine.high %v1625_v26, %v1629_v27 }
 0x30f   :  { %v603_v45 = vmax.f32 %v583_v34, 0.0  ;;  %v587_v46 = vadd.f32 %v586_v44, %v11404_v40  ;;  %v588_v47 = vpop.f32.mrb[23].mxu1  ;;  %1084 = vmatmul.mubr.bf16.gmra.mrb[32].mxu1 %v11433_v30  ;;  %v10317_v40 = vld [vmem:[#allocation14 + $0xec] ss:$16 sps:$4 sm:$0xff]   ;;  %v1633_v34 = vld [vmem:[#allocation17 + $0x180] sm:$0xff] }
 0x310   :  { %v604_v48 = vmax.f32 %v585_v43, 0.0  ;;  %v589_v49 = vadd.f32 %v588_v47, %v11407_v41  ;;  %1113 = vmatpush1.bf16.msra.mxu1 %v10306_v33  ;;  %v1589_v41 = vld [vmem:[#allocation17 + $0x20] sm:$0xff]  ;;  %v10332_v33 = vld [vmem:[#allocation14 + $0x18c] ss:$16 sps:$4 sm:$0xff]  }
 0x311   :  { %v605_v53 = vmax.f32 %v587_v46, 0.0  ;;  %1114 = vmatprep.subr.bf16.mxu1 %v10311_v42  ;;  %v9023_v63 = vcombine.high %v1585_v61, %v1589_v41  ;;  %v9022_v0 = vcombine.low %v1585_v61, %v1589_v41  ;;  %v1637_v38 = vld [vmem:[#allocation17 + $0x1a0] sm:$0xff]  ;;  %v9062_v42 = vcombine.low %v1625_v26, %v1629_v27  ;;  %v10341_v41 = vld [vmem:[#allocation14 + $0x1ec] ss:$16 sps:$4 sm:$0xff]   ;;  %v10351_v26 = vld [vmem:[#allocation13 + $0x60] ss:$16 sps:$4 sm:$0xff]  }
 0x312   :  { %v606_v55 = vmax.f32 %v589_v49, 0.0  ;;  %v10330_v43 = vld [vmem:[#allocation14 + $0x188] ss:$16 sps:$4 sm:$0xff]   ;;  %v9071_v44 = vcombine.high %v1633_v34, %v1637_v38 }
 0x313   :  { %v11443_v58 = vpack.c.bf16 %v605_v53, %v603_v45  ;;  %3163 = vmatprep.subr.bf16.mxu0 %v9023_v63  ;;  %v10335_v45 = vld [vmem:[#allocation14 + $0x1ac] ss:$16 sps:$4 sm:$0xff]   ;;  %v1641_v46 = vld [vmem:[#allocation17 + $0x1c0] sm:$0xff] }
 0x314   :  { %v11445_v59 = vpack.c.bf16 %v606_v55, %v604_v48  ;;  %1115 = vmatpush1.bf16.msra.mxu1 %v10309_v51  ;;  %3164 = vmatpush1.bf16.msra.mxu0 %v9022_v0  ;;  %v1645_v47 = vld [vmem:[#allocation17 + $0x1e0] sm:$0xff]  ;;  %v9070_v48 = vcombine.low %v1633_v34, %v1637_v38  ;;  %v10338_v53 = vld [vmem:[#allocation14 + $0x1cc] ss:$16 sps:$4 sm:$0xff]   ;;  %v10360_v34 = vld [vmem:[#allocation13 + $0xc0] ss:$16 sps:$4 sm:$0xff]  }
 0x315   :  { %1116 = vmatprep.subr.bf16.mxu1 %v10314_v54  ;;  %3165 = vmatprep.subr.bf16.mxu0 %v9031_v5  ;;  %v10333_v49 = vld [vmem:[#allocation14 + $0x1a8] ss:$16 sps:$4 sm:$0xff]   ;;  %v9079_v51 = vcombine.high %v1641_v46, %v1645_v47  ;;  %v10365_v38 = vld [vmem:[#allocation13 + $0xe4] ss:$16 sps:$4 sm:$0xff]  }
 0x316   :  { %1093 = vmatprep.mubr.bf16.mxu1 %v11445_v59  ;;  %v1649_v54 = vld [vmem:[#allocation17 + $0x200] sm:$0xff] }
 0x317   :  { %1094 = vmatmul.mubr.bf16.gmra.mrb[36].mxu1 %v11443_v58  ;;  %v1653_v55 = vld [vmem:[#allocation17 + $0x220] sm:$0xff] }
 0x318   :  { %1117 = vmatpush1.bf16.msra.mxu1 %v10312_v60  ;;  %1136 = vmatprep.mubr.bf16.mxu1 %v11415_v57  ;;  %v1609_v57 = vld [vmem:[#allocation17 + $0xc0] sm:$0xff]  ;;  %v9078_v60 = vcombine.low %v1641_v46, %v1645_v47  ;;  %v9087_v61 = vcombine.high %v1649_v54, %v1653_v55  ;;  %v9086_v0 = vcombine.low %v1649_v54, %v1653_v55  ;;  %v10377_v46 = vld [vmem:[#allocation13 + $0x6c] ss:$16 sps:$4 sm:$0xff]  }
 0x319   :  { %1118 = vmatprep.subr.bf16.mxu1 %v10317_v40  ;;  %3166 = vmatpush1.bf16.msra.mxu0 %v9030_v9  ;;  %v9047_v18 = vcombine.high %v1609_v57, %v1613_v15  ;;  %v9046_v22 = vcombine.low %v1609_v57, %v1613_v15  ;;  %v10336_v40 = vld [vmem:[#allocation14 + $0x1c8] ss:$16 sps:$4 sm:$0xff]   ;;  %v10342_v9 = vld [vmem:[#allocation13] ss:$16 sps:$4 sm:$0xff]   ;;  %v10386_v54 = vld [vmem:[#allocation13 + $0xcc] ss:$16 sps:$4 sm:$0xff]  }
 0x31a   :  { %3167 = vmatprep.subr.bf16.mxu0 %v9039_v11  ;;  %v1661_v63 = vld [vmem:[#allocation17 + $0x260] sm:$0xff] }
 0x31b   :  { %v1665_v5 = vld [vmem:[#allocation17 + $0x280] sm:$0xff] }
 0x31c   :  { %1119 = vmatpush1.bf16.msra.mxu1 %v10315_v62  ;;  %v1657_v62 = vld [vmem:[#allocation17 + $0x240] sm:$0xff] }
 0x31d   :  { %1120 = vmatprep.subr.bf16.mxu1 %v10320_v3  ;;  %3168 = vmatpush1.bf16.msra.mxu0 %v9038_v16  ;;  %v9095_v2 = vcombine.high %v1657_v62, %v1661_v63  ;;  %v10344_v3 = vld [vmem:[#allocation13 + $0x4] ss:$16 sps:$4 sm:$0xff]   ;;  %v9094_v8 = vcombine.low %v1657_v62, %v1661_v63  ;;  %v10345_v16 = vld [vmem:[#allocation13 + $0x20] ss:$16 sps:$4 sm:$0xff]   ;;  %v10375_v47 = vld [vmem:[#allocation13 + $0x68] ss:$16 sps:$4 sm:$0xff]  }
 0x31e   :  { %3169 = vmatprep.subr.bf16.mxu0 %v9047_v18  ;;  %v1669_v7 = vld [vmem:[#allocation17 + $0x2a0] sm:$0xff]  ;;  %v1594_v63 = vld [vmem:[#allocation17 + $0x48] sm:$0xff] }
 0x31f   :  { %v9103_v11 = vcombine.high %v1665_v5, %v1669_v7  ;;  %v1677_v57 = vld [vmem:[#allocation17 + $0x2e0] sm:$0xff]  ;;  %v9102_v15 = vcombine.low %v1665_v5, %v1669_v7  ;;  %v1606_v5 = vld [vmem:[#allocation17 + $0xa8] sm:$0xff] }
 0x320   :  { %1121 = vmatpush1.bf16.msra.mxu1 %v10318_v10  ;;  %v10347_v10 = vld [vmem:[#allocation13 + $0x24] ss:$16 sps:$4 sm:$0xff]   ;;  %v10384_v55 = vld [vmem:[#allocation13 + $0xc8] ss:$16 sps:$4 sm:$0xff]  }
 0x321   :  { %1122 = vmatprep.subr.bf16.mxu1 %v10323_v14  ;;  %3170 = vmatpush1.bf16.msra.mxu0 %v9046_v22  ;;  %v1673_v14 = vld [vmem:[#allocation17 + $0x2c0] sm:$0xff]  ;;  %v10348_v22 = vld [vmem:[#allocation13 + $0x40] ss:$16 sps:$4 sm:$0xff]  }
 0x322   :  { %3171 = vmatprep.subr.bf16.mxu0 %v9055_v24  ;;  %v10350_v18 = vld [vmem:[#allocation13 + $0x44] ss:$16 sps:$4 sm:$0xff]   ;;  %v9110_v21 = vcombine.low %v1673_v14, %v1677_v57 }
 0x323   :  { %v1685_v20 = vld [vmem:[#allocation17 + $0x320] sm:$0xff] }
 0x324   :  { %1123 = vmatpush1.bf16.msra.mxu1 %v10321_v17  ;;  %v9111_v17 = vcombine.high %v1673_v14, %v1677_v57  ;;  %v1689_v24 = vld [vmem:[#allocation17 + $0x340] sm:$0xff]  ;;  %v1618_v57 = vld [vmem:[#allocation17 + $0x108] sm:$0xff] }
 0x325   :  { %1124 = vmatprep.subr.bf16.mxu1 %v10326_v19  ;;  %3172 = vmatpush1.bf16.msra.mxu0 %v9054_v28  ;;  %v1681_v19 = vld [vmem:[#allocation17 + $0x300] sm:$0xff] }
 0x326   :  { %3173 = vmatprep.subr.bf16.mxu0 %v9063_v32  ;;  %v10356_v28 = vld [vmem:[#allocation13 + $0x84] ss:$16 sps:$4 sm:$0xff]   ;;  %v10354_v32 = vld [vmem:[#allocation13 + $0x80] ss:$16 sps:$4 sm:$0xff]  }
 0x328   :  { %1125 = vmatpush1.bf16.msra.mxu1 %v10324_v23  ;;  %v10353_v23 = vld [vmem:[#allocation13 + $0x64] ss:$16 sps:$4 sm:$0xff]  }
 0x329   :  { %1126 = vmatprep.subr.bf16.mxu1 %v10329_v25  ;;  %3174 = vmatpush1.bf16.msra.mxu0 %v9062_v42  ;;  %v1693_v25 = vld [vmem:[#allocation17 + $0x360] sm:$0xff]  ;;  %v10363_v42 = vld [vmem:[#allocation13 + $0xe0] ss:$16 sps:$4 sm:$0xff]  }
 0x32a   :  { %3175 = vmatprep.subr.bf16.mxu0 %v9071_v44  ;;  %v9127_v27 = vcombine.high %v1689_v24, %v1693_v25  ;;  %v10369_v44 = vld [vmem:[#allocation13 + $0x28] ss:$16 sps:$4 sm:$0xff]  }
 0x32c   :  { %1127 = vmatpush1.bf16.msra.mxu1 %v10327_v29  ;;  %v9126_v29 = vcombine.low %v1689_v24, %v1693_v25  ;;  %v1646_v24 = vld [vmem:[#allocation17 + $0x1e8] sm:$0xff] }
 0x32d   :  { %1128 = vmatprep.subr.bf16.mxu1 %v10332_v33  ;;  %3176 = vmatpush1.bf16.msra.mxu0 %v9070_v48  ;;  %v10359_v33 = vld [vmem:[#allocation13 + $0xa4] ss:$16 sps:$4 sm:$0xff]   ;;  %v10380_v48 = vld [vmem:[#allocation13 + $0x8c] ss:$16 sps:$4 sm:$0xff]  }
 0x32e   :  { %3177 = vmatprep.subr.bf16.mxu0 %v9079_v51  ;;  %v10383_v51 = vld [vmem:[#allocation13 + $0xac] ss:$16 sps:$4 sm:$0xff]  }
 0x330   :  { %1129 = vmatpush1.bf16.msra.mxu1 %v10330_v43  ;;  %v10368_v43 = vld [vmem:[#allocation13 + $0xc] ss:$16 sps:$4 sm:$0xff]  }
 0x331   :  { %1130 = vmatprep.subr.bf16.mxu1 %v10335_v45  ;;  %3178 = vmatpush1.bf16.msra.mxu0 %v9078_v60  ;;  %v10374_v45 = vld [vmem:[#allocation13 + $0x4c] ss:$16 sps:$4 sm:$0xff]  }
 0x332   :  { %3179 = vmatprep.subr.bf16.mxu0 %v9087_v61  ;;  %v10389_v60 = vld [vmem:[#allocation13 + $0xec] ss:$16 sps:$4 sm:$0xff]  }
 0x333   :  { %v1590_v61 = vld [vmem:[#allocation17 + $0x28] sm:$0xff] }
 0x334   :  { %1131 = vmatpush1.bf16.msra.mxu1 %v10333_v49  ;;  %v10378_v49 = vld [vmem:[#allocation13 + $0x88] ss:$16 sps:$4 sm:$0xff]  }
 0x335   :  { %1132 = vmatprep.subr.bf16.mxu1 %v10338_v53  ;;  %3180 = vmatpush1.bf16.msra.mxu0 %v9086_v0  ;;  %v10381_v53 = vld [vmem:[#allocation13 + $0xa8] ss:$16 sps:$4 sm:$0xff]   ;;  %v1598_v0 = vld [vmem:[#allocation17 + $0x68] sm:$0xff] }
 0x336   :  { %3181 = vmatprep.subr.bf16.mxu0 %v9095_v2  ;;  %v9033_v2 = vcombine.high %v1594_v63, %v1598_v0  ;;  %v9032_v7 = vcombine.low %v1594_v63, %v1598_v0  ;;  %v1705_v63 = vld [vmem:[#allocation17 + $0x3c0] sm:$0xff] }
 0x337   :  { %v1709_v0 = vld [vmem:[#allocation17 + $0x3e0] sm:$0xff] }
 0x338   :  { %1133 = vmatpush1.bf16.msra.mxu1 %v10336_v40  ;;  %v1586_v40 = vld [vmem:[#allocation17 + $0x8] sm:$0xff] }
 0x339   :  { %1134 = vmatprep.subr.bf16.mxu1 %v10341_v41  ;;  %3182 = vmatpush1.bf16.msra.mxu0 %v9094_v8  ;;  %v10387_v41 = vld [vmem:[#allocation13 + $0xe8] ss:$16 sps:$4 sm:$0xff]   ;;  %v9025_v62 = vcombine.high %v1586_v40, %v1590_v61 }
 0x33a   :  { %3183 = vmatprep.subr.bf16.mxu0 %v9103_v11 }
 0x33c   :  { %1135 = vmatpush1.bf16.msra.mxu1 %v10339_v1  ;;  %v9024_v1 = vcombine.low %v1586_v40, %v1590_v61  ;;  %v1702_v40 = vld [vmem:[#allocation17 + $0x3a8] sm:$0xff] }
 0x33d   :  { %1337 = vmatprep.subr.bf16.mxu1 %v10344_v3  ;;  %3184 = vmatpush1.bf16.msra.mxu0 %v9102_v15  ;;  %v1602_v3 = vld [vmem:[#allocation17 + $0x88] sm:$0xff] }
 0x33e   :  { %3185 = vmatprep.subr.bf16.mxu0 %v9111_v17  ;;  %v9041_v8 = vcombine.high %v1602_v3, %v1606_v5  ;;  %v9040_v11 = vcombine.low %v1602_v3, %v1606_v5  ;;  %v1622_v15 = vld [vmem:[#allocation17 + $0x128] sm:$0xff] }
 0x33f   :  { %1137 = vmatmul.mubr.bf16.vlgmr.msra.gmra.mrb[40].mxu1 %v11413_v56  ;;  %v9119_v56 = vcombine.high %v1681_v19, %v1685_v20  ;;  %v1626_v17 = vld [vmem:[#allocation17 + $0x148] sm:$0xff] }
 0x340   :  { %1146 = vmatprep.mubr.bf16.mxu1 %v11425_v13  ;;  %1338 = vmatpush1.bf16.msra.mxu1 %v10342_v9  ;;  %v9118_v13 = vcombine.low %v1681_v19, %v1685_v20  ;;  %v1610_v9 = vld [vmem:[#allocation17 + $0xc8] sm:$0xff]  ;;  %v9056_v19 = vcombine.low %v1618_v57, %v1622_v15 }
 0x341   :  { %1339 = vmatprep.subr.bf16.mxu1 %v10347_v10  ;;  %3186 = vmatpush1.bf16.msra.mxu0 %v9110_v21  ;;  %v1614_v10 = vld [vmem:[#allocation17 + $0xe8] sm:$0xff] }
 0x342   :  { %3187 = vmatprep.subr.bf16.mxu0 %v9119_v56  ;;  %v9049_v14 = vcombine.high %v1610_v9, %v1614_v10  ;;  %v1634_v21 = vld [vmem:[#allocation17 + $0x188] sm:$0xff] }
 0x343   :  { %v1642_v56 = vld [vmem:[#allocation17 + $0x1c8] sm:$0xff] }
 0x344   :  { %1340 = vmatpush1.bf16.msra.mxu1 %v10345_v16  ;;  %v9057_v16 = vcombine.high %v1618_v57, %v1622_v15  ;;  %v1710_v3 = vld [vmem:[#allocation17 + $0x3e8] sm:$0xff] }
 0x345   :  { %1341 = vmatprep.subr.bf16.mxu1 %v10350_v18  ;;  %3188 = vmatpush1.bf16.msra.mxu0 %v9118_v13  ;;  %v1630_v18 = vld [vmem:[#allocation17 + $0x168] sm:$0xff]  ;;  %v9081_v13 = vcombine.high %v1642_v56, %v1646_v24 }
 0x346   :  { %3189 = vmatprep.subr.bf16.mxu0 %v9127_v27  ;;  %v9065_v20 = vcombine.high %v1626_v17, %v1630_v18  ;;  %v1654_v27 = vld [vmem:[#allocation17 + $0x228] sm:$0xff] }
 0x347   :  { %1147 = vmatmul.mubr.bf16.gmra.mrb[44].mxu1 %v11423_v12  ;;  %v10357_v12 = vld [vmem:[#allocation13 + $0xa0] ss:$16 sps:$4 sm:$0xff]  }
 0x348   :  { %1156 = vmatprep.mubr.bf16.mxu1 %v11435_v31  ;;  %1342 = vmatpush1.bf16.msra.mxu1 %v10348_v22  ;;  %v10362_v31 = vld [vmem:[#allocation13 + $0xc4] ss:$16 sps:$4 sm:$0xff]   ;;  %v1638_v22 = vld [vmem:[#allocation17 + $0x1a8] sm:$0xff] }
 0x349   :  { %1343 = vmatprep.subr.bf16.mxu1 %v10353_v23  ;;  %3190 = vmatpush1.bf16.msra.mxu0 %v9126_v29  ;;  %v9073_v23 = vcombine.high %v1634_v21, %v1638_v22  ;;  %v9072_v25 = vcombine.low %v1634_v21, %v1638_v22  ;;  %v1658_v29 = vld [vmem:[#allocation17 + $0x248] sm:$0xff] }
 0x34a   :  { %v1718_v57 = vld [vmem:[#allocation17 + $0x428] sm:$0xff] }
 0x34c   :  { %1344 = vmatpush1.bf16.msra.mxu1 %v10351_v26  ;;  %v1650_v26 = vld [vmem:[#allocation17 + $0x208] sm:$0xff] }
 0x34d   :  { %1345 = vmatprep.subr.bf16.mxu1 %v10356_v28  ;;  %v9080_v28 = vcombine.low %v1642_v56, %v1646_v24 }
 0x34f   :  { %1157 = vmatmul.mubr.bf16.gmra.mrb[48].mxu1 %v11433_v30  ;;  %v10366_v30 = vld [vmem:[#allocation13 + $0x8] ss:$16 sps:$4 sm:$0xff]  }
 0x350   :  { %1166 = vmatprep.mubr.bf16.mxu1 %v11445_v59  ;;  %1346 = vmatpush1.bf16.msra.mxu1 %v10354_v32  ;;  %v10371_v59 = vld [vmem:[#allocation13 + $0x2c] ss:$16 sps:$4 sm:$0xff]   ;;  %v9088_v32 = vcombine.low %v1650_v26, %v1654_v27 }
 0x351   :  { %1347 = vmatprep.subr.bf16.mxu1 %v10359_v33 }
 0x354   :  { %1348 = vmatpush1.bf16.msra.mxu1 %v10357_v12  ;;  %v1666_v12 = vld [vmem:[#allocation17 + $0x288] sm:$0xff] }
 0x355   :  { %1349 = vmatprep.subr.bf16.mxu1 %v10362_v31  ;;  %v1670_v31 = vld [vmem:[#allocation17 + $0x2a8] sm:$0xff] }
 0x357   :  { %1167 = vmatmul.mubr.bf16.gmra.mrb[52].mxu1 %v11443_v58  ;;  %v10372_v58 = vld [vmem:[#allocation13 + $0x48] ss:$16 sps:$4 sm:$0xff]  }
 0x358   :  { %1350 = vmatpush1.bf16.msra.mxu1 %v10360_v34  ;;  %1369 = vmatprep.mubr.bf16.mxu1 %v11014_v35 }
 0x359   :  { %1351 = vmatprep.subr.bf16.mxu1 %v10365_v38  ;;  %v9105_v38 = vcombine.high %v1666_v12, %v1670_v31 }
 0x35c   :  { %1352 = vmatpush1.bf16.msra.mxu1 %v10363_v42  ;;  %v1674_v42 = vld [vmem:[#allocation17 + $0x2c8] sm:$0xff] }
 0x35d   :  { %1410 = vmatprep.subr.bf16.mxu1 %v10368_v43  ;;  %v1678_v43 = vld [vmem:[#allocation17 + $0x2e8] sm:$0xff] }
 0x35f   :  { %1370 = vmatmul.mubr.bf16.vlgmr.msra.gmra.mrb[24].mxu1 %v11382_v52 }
 0x360   :  { %1411 = vmatpush1.bf16.msra.mxu1 %v10366_v30  ;;  %1379 = vmatprep.mubr.bf16.mxu1 %v11014_v35  ;;  %v9113_v30 = vcombine.high %v1674_v42, %v1678_v43 }
 0x361   :  { %1412 = vmatprep.subr.bf16.mxu1 %v10371_v59  ;;  %v1682_v59 = vld [vmem:[#allocation17 + $0x308] sm:$0xff] }
 0x364   :  { %1413 = vmatpush1.bf16.msra.mxu1 %v10369_v44  ;;  %v1686_v44 = vld [vmem:[#allocation17 + $0x328] sm:$0xff] }
 0x365   :  { %1414 = vmatprep.subr.bf16.mxu1 %v10374_v45  ;;  %v9112_v45 = vcombine.low %v1674_v42, %v1678_v43 }
 0x367   :  { %1380 = vmatmul.mubr.bf16.gmra.mrb[28].mxu1 %v11380_v50 }
 0x368   :  { %1415 = vmatpush1.bf16.msra.mxu1 %v10372_v58  ;;  %1389 = vmatprep.mubr.bf16.mxu1 %v11014_v35  ;;  %v9121_v58 = vcombine.high %v1682_v59, %v1686_v44 }
 0x369   :  { %1416 = vmatprep.subr.bf16.mxu1 %v10377_v46  ;;  %v1690_v46 = vld [vmem:[#allocation17 + $0x348] sm:$0xff] }
 0x36c   :  { %1417 = vmatpush1.bf16.msra.mxu1 %v10375_v47  ;;  %v1694_v47 = vld [vmem:[#allocation17 + $0x368] sm:$0xff] }
 0x36d   :  { %1418 = vmatprep.subr.bf16.mxu1 %v10380_v48  ;;  %v9120_v48 = vcombine.low %v1682_v59, %v1686_v44  ;;  %v1733_v44 = vld [vmem:[#allocation17 + $0x4a0] sm:$0xff] }
 0x36f   :  { %1390 = vmatmul.mubr.bf16.gmra.mrb[32].mxu1 %v11388_v6 }
 0x370   :  { %1419 = vmatpush1.bf16.msra.mxu1 %v10378_v49  ;;  %1399 = vmatprep.mubr.bf16.mxu1 %v11014_v35  ;;  %v9129_v49 = vcombine.high %v1690_v46, %v1694_v47 }
 0x371   :  { %1420 = vmatprep.subr.bf16.mxu1 %v10383_v51  ;;  %v9128_v51 = vcombine.low %v1690_v46, %v1694_v47 }
 0x374   :  { %1421 = vmatpush1.bf16.msra.mxu1 %v10381_v53  ;;  %v1697_v53 = vld [vmem:[#allocation17 + $0x380] sm:$0xff] }
 0x375   :  { %1422 = vmatprep.subr.bf16.mxu1 %v10386_v54  ;;  %v1701_v54 = vld [vmem:[#allocation17 + $0x3a0] sm:$0xff] }
 0x377   :  { %1400 = vmatmul.mubr.bf16.gmra.mrb[36].mxu1 %v11386_v4 }
 0x378   :  { %1423 = vmatpush1.bf16.msra.mxu1 %v10384_v55  ;;  %1442 = vmatprep.mubr.bf16.mxu1 %v11014_v35  ;;  %v1698_v55 = vld [vmem:[#allocation17 + $0x388] sm:$0xff] }
 0x379   :  { %1424 = vmatprep.subr.bf16.mxu1 %v10389_v60  ;;  %v9135_v60 = vcombine.high %v1697_v53, %v1701_v54  ;;  %v9137_v61 = vcombine.high %v1698_v55, %v1702_v40 }
 0x37b   :  { %3191 = vmatprep.subr.bf16.mxu0 %v9135_v60 }
 0x37c   :  { %1425 = vmatpush1.bf16.msra.mxu1 %v10387_v41  ;;  %v9134_v41 = vcombine.low %v1697_v53, %v1701_v54 }
 0x37d   :  { %3309 = vmatprep.subr.bf16.mxu1 %v9025_v62  ;;  %v9136_v62 = vcombine.low %v1698_v55, %v1702_v40  ;;  %v1737_v40 = vld [vmem:[#allocation17 + $0x4c0] sm:$0xff] }
 0x37e   :  { %3192 = vmatpush1.bf16.msra.mxu0 %v9134_v41 }
 0x37f   :  { %1443 = vmatmul.mubr.bf16.vlgmr.msra.gmra.mrb[40].mxu1 %v11382_v52  ;;  %v9048_v52 = vcombine.low %v1610_v9, %v1614_v10  ;;  %v1713_v9 = vld [vmem:[#allocation17 + $0x400] sm:$0xff] }
 0x380   :  { %1452 = vmatprep.mubr.bf16.mxu1 %v11014_v35  ;;  %3310 = vmatpush1.bf16.msra.mxu1 %v9024_v1  ;;  %v1706_v1 = vld [vmem:[#allocation17 + $0x3c8] sm:$0xff]  ;;  %v1717_v10 = vld [vmem:[#allocation17 + $0x420] sm:$0xff] }
 0x381   :  { %3311 = vmatprep.subr.bf16.mxu1 %v9033_v2  ;;  %v9143_v2 = vcombine.high %v1705_v63, %v1709_v0  ;;  %v9145_v5 = vcombine.high %v1706_v1, %v1710_v3  ;;  %v9150_v15 = vcombine.low %v1713_v9, %v1717_v10 }
 0x383   :  { %3193 = vmatprep.subr.bf16.mxu0 %v9143_v2 }
 0x384   :  { %3312 = vmatpush1.bf16.msra.mxu1 %v9032_v7  ;;  %v9142_v7 = vcombine.low %v1705_v63, %v1709_v0  ;;  %v1738_v63 = vld [vmem:[#allocation17 + $0x4c8] sm:$0xff] }
 0x385   :  { %3313 = vmatprep.subr.bf16.mxu1 %v9041_v8  ;;  %v9144_v8 = vcombine.low %v1706_v1, %v1710_v3  ;;  %v1742_v0 = vld [vmem:[#allocation17 + $0x4e8] sm:$0xff] }
 0x386   :  { %3194 = vmatpush1.bf16.msra.mxu0 %v9142_v7 }
 0x387   :  { %1453 = vmatmul.mubr.bf16.gmra.mrb[44].mxu1 %v11380_v50  ;;  %v9064_v50 = vcombine.low %v1626_v17, %v1630_v18  ;;  %v11473_v17 = vld [vmem:[#allocation16] sm:$0xf] }
 0x388   :  { %1462 = vmatprep.mubr.bf16.mxu1 %v11014_v35  ;;  %3314 = vmatpush1.bf16.msra.mxu1 %v9040_v11  ;;  %v1714_v11 = vld [vmem:[#allocation17 + $0x408] sm:$0xff]  ;;  %v11477_v18 = vrot.slane %v11473_v17, %v11398_v37 }
 0x389   :  { %3315 = vmatprep.subr.bf16.mxu1 %v9049_v14  ;;  %v9151_v14 = vcombine.high %v1713_v9, %v1717_v10 }
 0x38b   :  { %3236 = vmatprep.subr.bf16.mxu0 %v9151_v14  ;;  %v1745_v14 = vld [vmem:[#allocation17 + $0x500] sm:$0xff] }
 0x38c   :  { %3316 = vmatpush1.bf16.msra.mxu1 %v9048_v52  ;;  %v9152_v52 = vcombine.low %v1714_v11, %v1718_v57 }
 0x38d   :  { %3317 = vmatprep.subr.bf16.mxu1 %v9057_v16  ;;  %v9153_v16 = vcombine.high %v1714_v11, %v1718_v57  ;;  %v9177_v11 = vcombine.high %v1738_v63, %v1742_v0 }
 0x38f   :  { %1463 = vmatmul.mubr.bf16.gmra.mrb[48].mxu1 %v11388_v6  ;;  %v9089_v6 = vcombine.high %v1650_v26, %v1654_v27  ;;  %v1721_v27 = vld [vmem:[#allocation17 + $0x440] sm:$0xff] }
 0x390   :  { %1472 = vmatprep.mubr.bf16.mxu1 %v11014_v35  ;;  %3318 = vmatpush1.bf16.msra.mxu1 %v9056_v19  ;;  %v1662_v35 = vld [vmem:[#allocation17 + $0x268] sm:$0xff]  ;;  %v11481_v19 = vrot.slane %v11473_v17, %v11401_v39 }
 0x391   :  { %3319 = vmatprep.subr.bf16.mxu1 %v9065_v20  ;;  %v9097_v33 = vcombine.high %v1658_v29, %v1662_v35  ;;  %v9096_v34 = vcombine.low %v1658_v29, %v1662_v35  ;;  %v1725_v29 = vld [vmem:[#allocation17 + $0x460] sm:$0xff]  ;;  %v1722_v35 = vld [vmem:[#allocation17 + $0x448] sm:$0xff] }
 0x392   :  { %v9159_v42 = vcombine.high %v1721_v27, %v1725_v29 }
 0x394   :  { %3320 = vmatpush1.bf16.msra.mxu1 %v9064_v50 }
 0x395   :  { %3321 = vmatprep.subr.bf16.mxu1 %v9073_v23 }
 0x397   :  { %1473 = vmatmul.mubr.bf16.gmra.mrb[52].mxu1 %v11386_v4  ;;  %v9104_v4 = vcombine.low %v1666_v12, %v1670_v31 }
 0x398   :  { %3322 = vmatpush1.bf16.msra.mxu1 %v9072_v25 }
 0x399   :  { %3323 = vmatprep.subr.bf16.mxu1 %v9081_v13 }
 0x39c   :  { %3324 = vmatpush1.bf16.msra.mxu1 %v9080_v28 }
 0x39d   :  { %3325 = vmatprep.subr.bf16.mxu1 %v9089_v6 }
 0x3a0   :  { %3326 = vmatpush1.bf16.msra.mxu1 %v9088_v32  ;;  %v1726_v32 = vld [vmem:[#allocation17 + $0x468] sm:$0xff] }
 0x3a1   :  { %3327 = vmatprep.subr.bf16.mxu1 %v9097_v33  ;;  %v9161_v43 = vcombine.high %v1722_v35, %v1726_v32 }
 0x3a4   :  { %3328 = vmatpush1.bf16.msra.mxu1 %v9096_v34 }
 0x3a5   :  { %3329 = vmatprep.subr.bf16.mxu1 %v9105_v38 }
 0x3a8   :  { %3330 = vmatpush1.bf16.msra.mxu1 %v9104_v4  ;;  %v1729_v4 = vld [vmem:[#allocation17 + $0x480] sm:$0xff] }
 0x3a9   :  { %3331 = vmatprep.subr.bf16.mxu1 %v9113_v30  ;;  %v9167_v55 = vcombine.high %v1729_v4, %v1733_v44 }
 0x3ac   :  { %3332 = vmatpush1.bf16.msra.mxu1 %v9112_v45  ;;  %v1730_v45 = vld [vmem:[#allocation17 + $0x488] sm:$0xff] }
 0x3ad   :  { %3333 = vmatprep.subr.bf16.mxu1 %v9121_v58  ;;  %v1734_v58 = vld [vmem:[#allocation17 + $0x4a8] sm:$0xff] }
 0x3ae   :  { %v9169_v60 = vcombine.high %v1730_v45, %v1734_v58  ;;  %v9168_v7 = vcombine.low %v1730_v45, %v1734_v58  ;;  %v1761_v58 = vld [vmem:[#allocation17 + $0x580] sm:$0xff] }
 0x3b0   :  { %3334 = vmatpush1.bf16.msra.mxu1 %v9120_v48 }
 0x3b1   :  { %3335 = vmatprep.subr.bf16.mxu1 %v9129_v49  ;;  %v9158_v49 = vcombine.low %v1721_v27, %v1725_v29  ;;  %v1753_v27 = vld [vmem:[#allocation17 + $0x540] sm:$0xff] }
 0x3b2   :  { %v1757_v29 = vld [vmem:[#allocation17 + $0x560] sm:$0xff] }
 0x3b4   :  { %3336 = vmatpush1.bf16.msra.mxu1 %v9128_v51  ;;  %v9160_v51 = vcombine.low %v1722_v35, %v1726_v32  ;;  %v1754_v35 = vld [vmem:[#allocation17 + $0x548] sm:$0xff] }
 0x3b5   :  { %3337 = vmatprep.subr.bf16.mxu1 %v9137_v61  ;;  %v1758_v32 = vld [vmem:[#allocation17 + $0x568] sm:$0xff] }
 0x3b6   :  { %v9193_v45 = vcombine.high %v1754_v35, %v1758_v32 }
 0x3b8   :  { %3338 = vmatpush1.bf16.msra.mxu1 %v9136_v62  ;;  %v1741_v62 = vld [vmem:[#allocation17 + $0x4e0] sm:$0xff] }
 0x3b9   :  { %3339 = vmatprep.subr.bf16.mxu1 %v9145_v5  ;;  %v9166_v5 = vcombine.low %v1729_v4, %v1733_v44  ;;  %v9175_v10 = vcombine.high %v1737_v40, %v1741_v62  ;;  %v11516_v4 = vsub.s32 2, %v11395_v36  ;;  %v9191_v44 = vcombine.high %v1753_v27, %v1757_v29 }
 0x3bc   :  { %3340 = vmatpush1.bf16.msra.mxu1 %v9144_v8 }
 0x3bd   :  { %3382 = vmatprep.subr.bf16.mxu1 %v9153_v16  ;;  %v1746_v16 = vld [vmem:[#allocation17 + $0x508] sm:$0xff] }
 0x432   :  { %v1371_v20 = vpop.f32.mrb[24].mxu1 }
 0x433   :  { %v1505_v21 = vadd.f32 %v11477_v18, %v1371_v20  ;;  %v1373_v22 = vpop.f32.mrb[25].mxu1  ;;  %v1750_v20 = vld [vmem:[#allocation17 + $0x528] sm:$0xff] }
 0x434   :  { %v1506_v50 = vadd.f32 %v11481_v19, %v1373_v22  ;;  %v1375_v23 = vpop.f32.mrb[26].mxu1 }
 0x435   :  { %v1509_v56 = vadd.f32 %v11477_v18, %v1375_v23  ;;  %v1377_v24 = vpop.f32.mrb[27].mxu1  ;;  %v1537_v13 = vmax.f32 %v1505_v21, 0.0  ;;  %v9174_v23 = vcombine.low %v1737_v40, %v1741_v62 }
 0x436   :  { %v1510_v25 = vadd.f32 %v11481_v19, %v1377_v24  ;;  %v1538_v28 = vmax.f32 %v1506_v50, 0.0 }
 0x437   :  { %v1541_v26 = vmax.f32 %v1509_v56, 0.0  ;;  %v9176_v56 = vcombine.low %v1738_v63, %v1742_v0 }
 0x438   :  { %v1542_v6 = vmax.f32 %v1510_v25, 0.0 }
 0x439   :  { %v11487_v33 = vpack.c.bf16 %v1541_v26, %v1537_v13  ;;  %v9185_v26 = vcombine.high %v1746_v16, %v1750_v20 }
 0x43a   :  { %v11489_v12 = vpack.c.bf16 %v1542_v6, %v1538_v28  ;;  %v1381_v31 = vpop.f32.mrb[28].mxu1 }
 0x43b   :  { %v1513_v34 = vadd.f32 %v11477_v18, %v1381_v31  ;;  %v1383_v38 = vpop.f32.mrb[29].mxu1 }
 0x43c   :  { %v1514_v30 = vadd.f32 %v11481_v19, %v1383_v38  ;;  %v1385_v59 = vpop.f32.mrb[30].mxu1  ;;  %3195 = vmatprep.mubr.bf16.mxu0 %v11489_v12  ;;  %3341 = vmatprep.mubr.bf16.mxu1 %v11489_v12 }
 0x43d   :  { %v1517_v46 = vadd.f32 %v11477_v18, %v1385_v59  ;;  %v1387_v47 = vpop.f32.mrb[31].mxu1  ;;  %3196 = vmatmul.mubr.bf16.vlgmr.msra.gmra.mrb[0].mxu0 %v11487_v33  ;;  %3342 = vmatmul.mubr.bf16.vlgmr.msra.gmra.mrb[56].mxu1 %v11487_v33  ;;  %v1545_v53 = vmax.f32 %v1513_v34, 0.0 }
 0x43e   :  { %v1518_v48 = vadd.f32 %v11481_v19, %v1387_v47  ;;  %3237 = vmatpush1.bf16.msra.mxu0 %v9150_v15  ;;  %3383 = vmatpush1.bf16.msra.mxu1 %v9152_v52  ;;  %v1546_v61 = vmax.f32 %v1514_v30, 0.0  ;;  %v1749_v52 = vld [vmem:[#allocation17 + $0x520] sm:$0xff] }
 0x43f   :  { %v1549_v54 = vmax.f32 %v1517_v46, 0.0  ;;  %3238 = vmatprep.subr.bf16.mxu0 %v9159_v42  ;;  %3384 = vmatprep.subr.bf16.mxu1 %v9161_v43  ;;  %v9183_v13 = vcombine.high %v1745_v14, %v1749_v52  ;;  %v9182_v42 = vcombine.low %v1745_v14, %v1749_v52  ;;  %v9184_v43 = vcombine.low %v1746_v16, %v1750_v20 }
 0x440   :  { %v1550_v41 = vmax.f32 %v1518_v48, 0.0  ;;  %v11523_v48 = vsub.s32 3, %v11395_v36 }
 0x441   :  { %v11499_v1 = vpack.c.bf16 %v1549_v54, %v1545_v53  ;;  %v1766_v53 = vld [vmem:[#allocation17 + $0x5a8] sm:$0xff] }
 0x442   :  { %v11501_v2 = vpack.c.bf16 %v1550_v41, %v1546_v61  ;;  %3239 = vmatpush1.bf16.msra.mxu0 %v9158_v49  ;;  %3385 = vmatpush1.bf16.msra.mxu1 %v9160_v51  ;;  %v1391_v3 = vpop.f32.mrb[32].mxu1  ;;  %v1765_v49 = vld [vmem:[#allocation17 + $0x5a0] sm:$0xff]  ;;  %v1762_v51 = vld [vmem:[#allocation17 + $0x588] sm:$0xff]  ;;  %v9192_v61 = vcombine.low %v1754_v35, %v1758_v32  ;;  %v11531_v41 = vrot.slane %v11473_v17, %v11516_v4 }
 0x443   :  { %v1521_v8 = vadd.f32 %v11477_v18, %v1391_v3  ;;  %v1393_v9 = vpop.f32.mrb[33].mxu1  ;;  %3240 = vmatprep.subr.bf16.mxu0 %v9167_v55  ;;  %3386 = vmatprep.subr.bf16.mxu1 %v9169_v60  ;;  %v9190_v60 = vcombine.low %v1753_v27, %v1757_v29  ;;  %v9201_v0 = vcombine.high %v1762_v51, %v1766_v53  ;;  %v1769_v3 = vld [vmem:[#allocation17 + $0x5c0] sm:$0xff] }
 0x444   :  { %v1522_v57 = vadd.f32 %v11481_v19, %v1393_v9  ;;  %v1395_v15 = vpop.f32.mrb[34].mxu1  ;;  %3205 = vmatprep.mubr.bf16.mxu0 %v11501_v2  ;;  %3351 = vmatprep.mubr.bf16.mxu1 %v11501_v2  ;;  %v1770_v9 = vld [vmem:[#allocation17 + $0x5c8] sm:$0xff]  ;;  %v9200_v52 = vcombine.low %v1762_v51, %v1766_v53 }
 0x445   :  { %v1525_v21 = vadd.f32 %v11477_v18, %v1395_v15  ;;  %v1397_v22 = vpop.f32.mrb[35].mxu1  ;;  %3206 = vmatmul.mubr.bf16.gmra.mrb[4].mxu0 %v11499_v1  ;;  %3352 = vmatmul.mubr.bf16.gmra.mrb[60].mxu1 %v11499_v1  ;;  %v1553_v24 = vmax.f32 %v1521_v8, 0.0  ;;  %v11535_v8 = vrot.slane %v11473_v17, %v11523_v48  ;;  %v9198_v15 = vcombine.low %v1761_v58, %v1765_v49 }
 0x446   :  { %v1526_v50 = vadd.f32 %v11481_v19, %v1397_v22  ;;  %3241 = vmatpush1.bf16.msra.mxu0 %v9166_v5  ;;  %3387 = vmatpush1.bf16.msra.mxu1 %v9168_v7  ;;  %v1554_v28 = vmax.f32 %v1522_v57, 0.0  ;;  %v1777_v22 = vld [vmem:[#allocation17 + $0x600] sm:$0xff] }
 0x447   :  { %v1557_v25 = vmax.f32 %v1525_v21, 0.0  ;;  %3242 = vmatprep.subr.bf16.mxu0 %v9175_v10  ;;  %3388 = vmatprep.subr.bf16.mxu1 %v9177_v11  ;;  %v1774_v10 = vld [vmem:[#allocation17 + $0x5e8] sm:$0xff] }
 0x448   :  { %v1558_v6 = vmax.f32 %v1526_v50, 0.0  ;;  %v9209_v17 = vcombine.high %v1770_v9, %v1774_v10 }
 0x449   :  { %v11511_v31 = vpack.c.bf16 %v1557_v25, %v1553_v24  ;;  %v1778_v24 = vld [vmem:[#allocation17 + $0x608] sm:$0xff] }
 0x44a   :  { %v11513_v34 = vpack.c.bf16 %v1558_v6, %v1554_v28  ;;  %3243 = vmatpush1.bf16.msra.mxu0 %v9174_v23  ;;  %3389 = vmatpush1.bf16.msra.mxu1 %v9176_v56  ;;  %v1401_v38 = vpop.f32.mrb[36].mxu1  ;;  %v1781_v56 = vld [vmem:[#allocation17 + $0x620] sm:$0xff]  ;;  %v1782_v25 = vld [vmem:[#allocation17 + $0x628] sm:$0xff]  ;;  %v9208_v6 = vcombine.low %v1770_v9, %v1774_v10 }
 0x44b   :  { %v1529_v30 = vadd.f32 %v11477_v18, %v1401_v38  ;;  %v1403_v59 = vpop.f32.mrb[37].mxu1  ;;  %3244 = vmatprep.subr.bf16.mxu0 %v9183_v13  ;;  %3390 = vmatprep.subr.bf16.mxu1 %v9185_v26  ;;  %v9215_v32 = vcombine.high %v1777_v22, %v1781_v56  ;;  %v9217_v38 = vcombine.high %v1778_v24, %v1782_v25 }
 0x44c   :  { %v1530_v46 = vadd.f32 %v11481_v19, %v1403_v59  ;;  %v1405_v47 = vpop.f32.mrb[38].mxu1  ;;  %3215 = vmatprep.mubr.bf16.mxu0 %v11513_v34  ;;  %3361 = vmatprep.mubr.bf16.mxu1 %v11513_v34  ;;  %v1789_v59 = vld [vmem:[#allocation17 + $0x660] sm:$0xff]  ;;  %v9216_v51 = vcombine.low %v1778_v24, %v1782_v25 }
 0x44d   :  { %v1533_v54 = vadd.f32 %v11477_v18, %v1405_v47  ;;  %v1407_v55 = vpop.f32.mrb[39].mxu1  ;;  %3216 = vmatmul.mubr.bf16.gmra.mrb[8].mxu0 %v11511_v31  ;;  %3362 = vmatmul.mubr.bf16.gmra.mrb[64].mxu1 %v11511_v31  ;;  %v1561_v62 = vmax.f32 %v1529_v30, 0.0  ;;  %v9199_v18 = vcombine.high %v1761_v58, %v1765_v49  ;;  %v9214_v49 = vcombine.low %v1777_v22, %v1781_v56  ;;  %v1802_v22 = vld [vmem:[#allocation17 + $0x6c8] sm:$0xff] }
 0x44e   :  { %v1534_v40 = vadd.f32 %v11481_v19, %v1407_v55  ;;  %3245 = vmatpush1.bf16.msra.mxu0 %v9182_v42  ;;  %3391 = vmatpush1.bf16.msra.mxu1 %v9184_v43  ;;  %v1562_v5 = vmax.f32 %v1530_v46, 0.0  ;;  %v1773_v19 = vld [vmem:[#allocation17 + $0x5e0] sm:$0xff] }
 0x44f   :  { %v1565_v63 = vmax.f32 %v1533_v54, 0.0  ;;  %3246 = vmatprep.subr.bf16.mxu0 %v9191_v44  ;;  %3392 = vmatprep.subr.bf16.mxu1 %v9193_v45  ;;  %v9207_v21 = vcombine.high %v1769_v3, %v1773_v19  ;;  %v9206_v28 = vcombine.low %v1769_v3, %v1773_v19  ;;  %v1785_v42 = vld [vmem:[#allocation17 + $0x640] sm:$0xff]  ;;  %v1786_v44 = vld [vmem:[#allocation17 + $0x648] sm:$0xff] }
 0x450   :  { %v1566_v7 = vmax.f32 %v1534_v40, 0.0  ;;  %v1790_v45 = vld [vmem:[#allocation17 + $0x668] sm:$0xff]  ;;  %v9223_v55 = vcombine.high %v1785_v42, %v1789_v59  ;;  %v1793_v40 = vld [vmem:[#allocation17 + $0x680] sm:$0xff]  ;;  %v9222_v19 = vcombine.low %v1785_v42, %v1789_v59 }
 0x451   :  { %v11537_v11 = vpack.c.bf16 %v1565_v63, %v1561_v62  ;;  %v1797_v63 = vld [vmem:[#allocation17 + $0x6a0] sm:$0xff]  ;;  %v9224_v9 = vcombine.low %v1786_v44, %v1790_v45  ;;  %v1810_v42 = vld [vmem:[#allocation17 + $0x708] sm:$0xff] }
 0x452   :  { %v11539_v14 = vpack.c.bf16 %v1566_v7, %v1562_v5  ;;  %3247 = vmatpush1.bf16.msra.mxu0 %v9190_v60  ;;  %3393 = vmatpush1.bf16.msra.mxu1 %v9192_v61  ;;  %v1444_v57 = vpop.f32.mrb[40].mxu1  ;;  %v9225_v60 = vcombine.high %v1786_v44, %v1790_v45  ;;  %v9230_v25 = vcombine.low %v1793_v40, %v1797_v63 }
 0x453   :  { %v1507_v16 = vadd.f32 %v11531_v41, %v1444_v57  ;;  %v1446_v20 = vpop.f32.mrb[41].mxu1  ;;  %3248 = vmatprep.subr.bf16.mxu0 %v9199_v18  ;;  %3394 = vmatprep.subr.bf16.mxu1 %v9201_v0  ;;  %v1794_v18 = vld [vmem:[#allocation17 + $0x688] sm:$0xff] }
 0x454   :  { %v1508_v50 = vadd.f32 %v11535_v8, %v1446_v20  ;;  %v1448_v23 = vpop.f32.mrb[42].mxu1  ;;  %3225 = vmatprep.mubr.bf16.mxu0 %v11539_v14  ;;  %3371 = vmatprep.mubr.bf16.mxu1 %v11539_v14  ;;  %v1798_v0 = vld [vmem:[#allocation17 + $0x6a8] sm:$0xff] }
 0x455   :  { %v1511_v13 = vadd.f32 %v11531_v41, %v1448_v23  ;;  %v1450_v26 = vpop.f32.mrb[43].mxu1  ;;  %3226 = vmatmul.mubr.bf16.gmra.mrb[12].mxu0 %v11537_v11  ;;  %3372 = vmatmul.mubr.bf16.gmra.mrb[68].mxu1 %v11537_v11  ;;  %v1539_v29 = vmax.f32 %v1507_v16, 0.0  ;;  %v1801_v16 = vld [vmem:[#allocation17 + $0x6c0] sm:$0xff] }
 0x456   :  { %v1512_v27 = vadd.f32 %v11535_v8, %v1450_v26  ;;  %3249 = vmatpush1.bf16.msra.mxu0 %v9198_v15  ;;  %3395 = vmatpush1.bf16.msra.mxu1 %v9200_v52  ;;  %v1540_v43 = vmax.f32 %v1508_v50, 0.0  ;;  %v9231_v15 = vcombine.high %v1793_v40, %v1797_v63  ;;  %v9233_v52 = vcombine.high %v1794_v18, %v1798_v0  ;;  %v1806_v50 = vld [vmem:[#allocation17 + $0x6e8] sm:$0xff] }
 0x457   :  { %v1543_v35 = vmax.f32 %v1511_v13, 0.0  ;;  %3250 = vmatprep.subr.bf16.mxu0 %v9207_v21  ;;  %3396 = vmatprep.subr.bf16.mxu1 %v9209_v17  ;;  %v1805_v17 = vld [vmem:[#allocation17 + $0x6e0] sm:$0xff]  ;;  %v9232_v13 = vcombine.low %v1794_v18, %v1798_v0  ;;  %v1822_v63 = vld [vmem:[#allocation17 + $0x768] sm:$0xff] }
 0x458   :  { %v1544_v30 = vmax.f32 %v1512_v27, 0.0  ;;  %v9238_v45 = vcombine.low %v1801_v16, %v1805_v17 }
 0x459   :  { %v11549_v58 = vpack.c.bf16 %v1543_v35, %v1539_v29  ;;  %v1809_v29 = vld [vmem:[#allocation17 + $0x700] sm:$0xff] }
 0x45a   :  { %v11551_v46 = vpack.c.bf16 %v1544_v30, %v1540_v43  ;;  %3251 = vmatpush1.bf16.msra.mxu0 %v9206_v28  ;;  %3397 = vmatpush1.bf16.msra.mxu1 %v9208_v6  ;;  %v1454_v47 = vpop.f32.mrb[44].mxu1  ;;  %v9239_v28 = vcombine.high %v1801_v16, %v1805_v17  ;;  %v9241_v6 = vcombine.high %v1802_v22, %v1806_v50  ;;  %v1814_v43 = vld [vmem:[#allocation17 + $0x728] sm:$0xff] }
 0x45b   :  { %v1515_v53 = vadd.f32 %v11531_v41, %v1454_v47  ;;  %v1456_v54 = vpop.f32.mrb[45].mxu1  ;;  %3252 = vmatprep.subr.bf16.mxu0 %v9215_v32  ;;  %3398 = vmatprep.subr.bf16.mxu1 %v9217_v38  ;;  %v1813_v38 = vld [vmem:[#allocation17 + $0x720] sm:$0xff]  ;;  %v9240_v47 = vcombine.low %v1802_v22, %v1806_v50  ;;  %v1830_v17 = vld [vmem:[#allocation17 + $0x7a8] sm:$0xff] }
 0x45c   :  { %v1516_v61 = vadd.f32 %v11535_v8, %v1456_v54  ;;  %v1458_v62 = vpop.f32.mrb[46].mxu1  ;;  %3268 = vmatprep.mubr.bf16.mxu0 %v11551_v46  ;;  %3414 = vmatprep.mubr.bf16.mxu1 %v11551_v46  ;;  %v9249_v54 = vcombine.high %v1810_v42, %v1814_v43 }
 0x45d   :  { %v1519_v3 = vadd.f32 %v11531_v41, %v1458_v62  ;;  %v1460_v5 = vpop.f32.mrb[47].mxu1  ;;  %v1547_v10 = vmax.f32 %v1515_v53, 0.0  ;;  %v9247_v53 = vcombine.high %v1809_v29, %v1813_v38  ;;  %v1818_v62 = vld [vmem:[#allocation17 + $0x748] sm:$0xff] }
 0x45e   :  { %v1520_v7 = vadd.f32 %v11535_v8, %v1460_v5  ;;  %3253 = vmatpush1.bf16.msra.mxu0 %v9214_v49  ;;  %3399 = vmatpush1.bf16.msra.mxu1 %v9216_v51  ;;  %v1548_v20 = vmax.f32 %v1516_v61, 0.0  ;;  %v1821_v61 = vld [vmem:[#allocation17 + $0x760] sm:$0xff]  ;;  %v9246_v5 = vcombine.low %v1809_v29, %v1813_v38 }
 0x45f   :  { %v1551_v57 = vmax.f32 %v1519_v3, 0.0  ;;  %3254 = vmatprep.subr.bf16.mxu0 %v9223_v55  ;;  %3400 = vmatprep.subr.bf16.mxu1 %v9225_v60  ;;  %v1817_v55 = vld [vmem:[#allocation17 + $0x740] sm:$0xff] }
 0x460   :  { %v1552_v21 = vmax.f32 %v1520_v7, 0.0  ;;  %v9248_v7 = vcombine.low %v1810_v42, %v1814_v43  ;;  %v1833_v29 = vld [vmem:[#allocation17 + $0x7c0] sm:$0xff]  ;;  %v1834_v42 = vld [vmem:[#allocation17 + $0x7c8] sm:$0xff] }
 0x461   :  { %v11559_v23 = vpack.c.bf16 %v1551_v57, %v1547_v10  ;;  %v9255_v10 = vcombine.high %v1817_v55, %v1821_v61  ;;  %v9257_v57 = vcombine.high %v1818_v62, %v1822_v63  ;;  %v1837_v38 = vld [vmem:[#allocation17 + $0x7e0] sm:$0xff]  ;;  %v1838_v43 = vld [vmem:[#allocation17 + $0x7e8] sm:$0xff] }
 0x462   :  { %v11561_v56 = vpack.c.bf16 %v1552_v21, %v1548_v20  ;;  %3255 = vmatpush1.bf16.msra.mxu0 %v9222_v19  ;;  %3401 = vmatpush1.bf16.msra.mxu1 %v9224_v9  ;;  %v1464_v24 = vpop.f32.mrb[48].mxu1  ;;  %v1829_v20 = vld [vmem:[#allocation17 + $0x7a0] sm:$0xff]  ;;  %v1826_v21 = vld [vmem:[#allocation17 + $0x788] sm:$0xff] }
 0x463   :  { %v1523_v26 = vadd.f32 %v11531_v41, %v1464_v24  ;;  %v1466_v27 = vpop.f32.mrb[49].mxu1  ;;  %3256 = vmatprep.subr.bf16.mxu0 %v9231_v15  ;;  %3402 = vmatprep.subr.bf16.mxu1 %v9233_v52  ;;  %v1825_v15 = vld [vmem:[#allocation17 + $0x780] sm:$0xff] }
 0x464   :  { %v1524_v35 = vadd.f32 %v11535_v8, %v1466_v27  ;;  %v1468_v32 = vpop.f32.mrb[50].mxu1 }
 0x465   :  { %v1527_v30 = vadd.f32 %v11531_v41, %v1468_v32  ;;  %v1470_v59 = vpop.f32.mrb[51].mxu1  ;;  %v1555_v49 = vmax.f32 %v1523_v26, 0.0 }
 0x466   :  { %v1528_v44 = vadd.f32 %v11535_v8, %v1470_v59  ;;  %3257 = vmatpush1.bf16.msra.mxu0 %v9230_v25  ;;  %3403 = vmatpush1.bf16.msra.mxu1 %v9232_v13  ;;  %v1556_v60 = vmax.f32 %v1524_v35, 0.0  ;;  %v9254_v25 = vcombine.low %v1817_v55, %v1821_v61  ;;  %v9256_v13 = vcombine.low %v1818_v62, %v1822_v63  ;;  %v1595_v61 = vld [vmem:[#allocation17 + $0x50] sm:$0xff]  ;;  %v1596_v63 = vld [vmem:[#allocation17 + $0x58] sm:$0xff] }
 0x467   :  { %v1559_v51 = vmax.f32 %v1527_v30, 0.0  ;;  %3258 = vmatprep.subr.bf16.mxu0 %v9239_v28  ;;  %3404 = vmatprep.subr.bf16.mxu1 %v9241_v6  ;;  %v9263_v28 = vcombine.high %v1825_v15, %v1829_v20  ;;  %v9265_v6 = vcombine.high %v1826_v21, %v1830_v17  ;;  %v9264_v59 = vcombine.low %v1826_v21, %v1830_v17  ;;  %v1599_v62 = vld [vmem:[#allocation17 + $0x70] sm:$0xff] }
 0x468   :  { %v1560_v40 = vmax.f32 %v1528_v44, 0.0  ;;  %v9271_v44 = vcombine.high %v1833_v29, %v1837_v38  ;;  %v9272_v55 = vcombine.low %v1834_v42, %v1838_v43 }
 0x469   :  { %v11567_v18 = vpack.c.bf16 %v1559_v51, %v1555_v49  ;;  %v1591_v49 = vld [vmem:[#allocation17 + $0x30] sm:$0xff]  ;;  %v1588_v51 = vld [vmem:[#allocation17 + $0x18] sm:$0xff] }
 0x46a   :  { %v11569_v0 = vpack.c.bf16 %v1560_v40, %v1556_v60  ;;  %3259 = vmatpush1.bf16.msra.mxu0 %v9238_v45  ;;  %3405 = vmatpush1.bf16.msra.mxu1 %v9240_v47  ;;  %v1474_v3 = vpop.f32.mrb[52].mxu1  ;;  %v9273_v45 = vcombine.high %v1834_v42, %v1838_v43  ;;  %v1587_v47 = vld [vmem:[#allocation17 + $0x10] sm:$0xff] }
 0x46b   :  { %v1531_v19 = vadd.f32 %v11531_v41, %v1474_v3  ;;  %v1476_v9 = vpop.f32.mrb[53].mxu1  ;;  %3260 = vmatprep.subr.bf16.mxu0 %v9247_v53  ;;  %3406 = vmatprep.subr.bf16.mxu1 %v9249_v54  ;;  %v1592_v53 = vld [vmem:[#allocation17 + $0x38] sm:$0xff]  ;;  %v9270_v54 = vcombine.low %v1833_v29, %v1837_v38  ;;  %v9027_v60 = vcombine.high %v1587_v47, %v1591_v49  ;;  %v1623_v29 = vld [vmem:[#allocation17 + $0x130] sm:$0xff] }
 0x46c   :  { %v1532_v52 = vadd.f32 %v11535_v8, %v1476_v9  ;;  %v1478_v16 = vpop.f32.mrb[54].mxu1  ;;  %v9029_v40 = vcombine.high %v1588_v51, %v1592_v53  ;;  %v1600_v3 = vld [vmem:[#allocation17 + $0x78] sm:$0xff] }
 0x46d   :  { %v1535_v22 = vadd.f32 %v11531_v41, %v1478_v16  ;;  %v1480_v50 = vpop.f32.mrb[55].mxu1  ;;  %v1563_v26 = vmax.f32 %v1531_v19, 0.0  ;;  %v9035_v19 = vcombine.high %v1595_v61, %v1599_v62  ;;  %v9037_v9 = vcombine.high %v1596_v63, %v1600_v3 }
 0x46e   :  { %v1536_v24 = vadd.f32 %v11535_v8, %v1480_v50  ;;  %3261 = vmatpush1.bf16.msra.mxu0 %v9246_v5  ;;  %3407 = vmatpush1.bf16.msra.mxu1 %v9248_v7  ;;  %v1564_v35 = vmax.f32 %v1532_v52, 0.0  ;;  %v9262_v8 = vcombine.low %v1825_v15, %v1829_v20  ;;  %v9026_v5 = vcombine.low %v1587_v47, %v1591_v49  ;;  %v1604_v15 = vld [vmem:[#allocation17 + $0x98] sm:$0xff]  ;;  %v1615_v50 = vld [vmem:[#allocation17 + $0xf0] sm:$0xff] }
 0x46f   :  { %v1567_v27 = vmax.f32 %v1535_v22, 0.0  ;;  %3262 = vmatprep.subr.bf16.mxu0 %v9255_v10  ;;  %3408 = vmatprep.subr.bf16.mxu1 %v9257_v57  ;;  %v9028_v7 = vcombine.low %v1588_v51, %v1592_v53  ;;  %v1603_v10 = vld [vmem:[#allocation17 + $0x90] sm:$0xff]  ;;  %v1608_v52 = vld [vmem:[#allocation17 + $0xb8] sm:$0xff]  ;;  %v9034_v16 = vcombine.low %v1595_v61, %v1599_v62  ;;  %v9036_v20 = vcombine.low %v1596_v63, %v1600_v3 }
 0x470   :  { %v1568_v32 = vmax.f32 %v1536_v24, 0.0  ;;  %v1607_v57 = vld [vmem:[#allocation17 + $0xb0] sm:$0xff]  ;;  %v9045_v17 = vcombine.high %v1604_v15, %v1608_v52  ;;  %v1612_v24 = vld [vmem:[#allocation17 + $0xd8] sm:$0xff] }
 0x471   :  { %v11575_v41 = vpack.c.bf16 %v1567_v27, %v1563_v26  ;;  %v9043_v21 = vcombine.high %v1603_v10, %v1607_v57  ;;  %v1611_v22 = vld [vmem:[#allocation17 + $0xd0] sm:$0xff]  ;;  %v9044_v26 = vcombine.low %v1604_v15, %v1608_v52  ;;  %v1632_v47 = vld [vmem:[#allocation17 + $0x178] sm:$0xff] }
 0x472   :  { %v11577_v30 = vpack.c.bf16 %v1568_v32, %v1564_v35  ;;  %3263 = vmatpush1.bf16.msra.mxu0 %v9254_v25  ;;  %3409 = vmatpush1.bf16.msra.mxu1 %v9256_v13  ;;  %v1616_v25 = vld [vmem:[#allocation17 + $0xf8] sm:$0xff]  ;;  %v9042_v13 = vcombine.low %v1603_v10, %v1607_v57  ;;  %v9051_v27 = vcombine.high %v1611_v22, %v1615_v50 }
 0x473   :  { %3264 = vmatprep.subr.bf16.mxu0 %v9263_v28  ;;  %3410 = vmatprep.subr.bf16.mxu1 %v9265_v6  ;;  %v9053_v28 = vcombine.high %v1612_v24, %v1616_v25  ;;  %v1619_v6 = vld [vmem:[#allocation17 + $0x110] sm:$0xff]  ;;  %v1620_v35 = vld [vmem:[#allocation17 + $0x118] sm:$0xff]  ;;  %v9050_v38 = vcombine.low %v1611_v22, %v1615_v50  ;;  %v9052_v42 = vcombine.low %v1612_v24, %v1616_v25 }
 0x474   :  { %v1624_v32 = vld [vmem:[#allocation17 + $0x138] sm:$0xff]  ;;  %v9059_v43 = vcombine.high %v1619_v6, %v1623_v29  ;;  %v9058_v49 = vcombine.low %v1619_v6, %v1623_v29 }
 0x475   :  { %v9060_v51 = vcombine.low %v1620_v35, %v1624_v32  ;;  %v1640_v61 = vld [vmem:[#allocation17 + $0x1b8] sm:$0xff] }
 0x476   :  { %3265 = vmatpush1.bf16.msra.mxu0 %v9262_v8  ;;  %3411 = vmatpush1.bf16.msra.mxu1 %v9264_v59  ;;  %v9061_v8 = vcombine.high %v1620_v35, %v1624_v32  ;;  %v1627_v59 = vld [vmem:[#allocation17 + $0x150] sm:$0xff]  ;;  %v1648_v10 = vld [vmem:[#allocation17 + $0x1f8] sm:$0xff] }
 0x477   :  { %3266 = vmatprep.subr.bf16.mxu0 %v9271_v44  ;;  %3412 = vmatprep.subr.bf16.mxu1 %v9273_v45  ;;  %v1631_v44 = vld [vmem:[#allocation17 + $0x170] sm:$0xff]  ;;  %v1628_v45 = vld [vmem:[#allocation17 + $0x158] sm:$0xff] }
 0x478   :  { %v9067_v53 = vcombine.high %v1627_v59, %v1631_v44  ;;  %v9066_v62 = vcombine.low %v1627_v59, %v1631_v44  ;;  %v9068_v63 = vcombine.low %v1628_v45, %v1632_v47  ;;  %v1656_v22 = vld [vmem:[#allocation17 + $0x238] sm:$0xff] }
 0x479   :  { %v1664_v6 = vld [vmem:[#allocation17 + $0x278] sm:$0xff] }
 0x47a   :  { %3267 = vmatpush1.bf16.msra.mxu0 %v9270_v54  ;;  %3413 = vmatpush1.bf16.msra.mxu1 %v9272_v55  ;;  %v9069_v54 = vcombine.high %v1628_v45, %v1632_v47  ;;  %v1635_v55 = vld [vmem:[#allocation17 + $0x190] sm:$0xff] }
 0x47b   :  { %3455 = vmatprep.subr.bf16.mxu0 %v9027_v60  ;;  %3601 = vmatprep.subr.bf16.mxu1 %v9029_v40  ;;  %v1639_v60 = vld [vmem:[#allocation17 + $0x1b0] sm:$0xff]  ;;  %v1636_v40 = vld [vmem:[#allocation17 + $0x198] sm:$0xff] }
 0x47c   :  { %v9075_v3 = vcombine.high %v1635_v55, %v1639_v60  ;;  %v9074_v57 = vcombine.low %v1635_v55, %v1639_v60  ;;  %v9076_v15 = vcombine.low %v1636_v40, %v1640_v61 }
 0x47d   :  { %3269 = vmatmul.mubr.bf16.vlgmr.msra.gmra.mrb[0].mxu0 %v11549_v58  ;;  %3415 = vmatmul.mubr.bf16.vlgmr.msra.gmra.mrb[56].mxu1 %v11549_v58 }
 0x47e   :  { %3278 = vmatprep.mubr.bf16.mxu0 %v11561_v56  ;;  %3424 = vmatprep.mubr.bf16.mxu1 %v11561_v56 }
 0x47f   :  { %3456 = vmatpush1.bf16.msra.mxu0 %v9026_v5  ;;  %3602 = vmatpush1.bf16.msra.mxu1 %v9028_v7  ;;  %v9077_v5 = vcombine.high %v1636_v40, %v1640_v61  ;;  %v1643_v7 = vld [vmem:[#allocation17 + $0x1d0] sm:$0xff] }
 0x480   :  { %3457 = vmatprep.subr.bf16.mxu0 %v9035_v19  ;;  %3603 = vmatprep.subr.bf16.mxu1 %v9037_v9  ;;  %v1647_v19 = vld [vmem:[#allocation17 + $0x1f0] sm:$0xff]  ;;  %v1644_v9 = vld [vmem:[#allocation17 + $0x1d8] sm:$0xff] }
 0x481   :  { %v9083_v52 = vcombine.high %v1643_v7, %v1647_v19  ;;  %v9082_v50 = vcombine.low %v1643_v7, %v1647_v19  ;;  %v9084_v24 = vcombine.low %v1644_v9, %v1648_v10 }
 0x483   :  { %3458 = vmatpush1.bf16.msra.mxu0 %v9034_v16  ;;  %3604 = vmatpush1.bf16.msra.mxu1 %v9036_v20  ;;  %v9085_v16 = vcombine.high %v1644_v9, %v1648_v10  ;;  %v1651_v20 = vld [vmem:[#allocation17 + $0x210] sm:$0xff] }
 0x484   :  { %3459 = vmatprep.subr.bf16.mxu0 %v9043_v21  ;;  %3605 = vmatprep.subr.bf16.mxu1 %v9045_v17  ;;  %v1655_v21 = vld [vmem:[#allocation17 + $0x230] sm:$0xff]  ;;  %v1652_v17 = vld [vmem:[#allocation17 + $0x218] sm:$0xff] }
 0x485   :  { %3279 = vmatmul.mubr.bf16.gmra.mrb[4].mxu0 %v11559_v23  ;;  %3425 = vmatmul.mubr.bf16.gmra.mrb[60].mxu1 %v11559_v23  ;;  %v9091_v25 = vcombine.high %v1651_v20, %v1655_v21  ;;  %v9090_v29 = vcombine.low %v1651_v20, %v1655_v21  ;;  %v9092_v35 = vcombine.low %v1652_v17, %v1656_v22 }
 0x486   :  { %3288 = vmatprep.mubr.bf16.mxu0 %v11569_v0  ;;  %3434 = vmatprep.mubr.bf16.mxu1 %v11569_v0 }
 0x487   :  { %3460 = vmatpush1.bf16.msra.mxu0 %v9042_v13  ;;  %3606 = vmatpush1.bf16.msra.mxu1 %v9044_v26  ;;  %v9093_v13 = vcombine.high %v1652_v17, %v1656_v22  ;;  %v1659_v26 = vld [vmem:[#allocation17 + $0x250] sm:$0xff] }
 0x488   :  { %3461 = vmatprep.subr.bf16.mxu0 %v9051_v27  ;;  %3607 = vmatprep.subr.bf16.mxu1 %v9053_v28  ;;  %v1663_v27 = vld [vmem:[#allocation17 + $0x270] sm:$0xff]  ;;  %v1660_v28 = vld [vmem:[#allocation17 + $0x258] sm:$0xff] }
 0x489   :  { %v9099_v32 = vcombine.high %v1659_v26, %v1663_v27  ;;  %v9098_v59 = vcombine.low %v1659_v26, %v1663_v27  ;;  %v9100_v44 = vcombine.low %v1660_v28, %v1664_v6 }
 0x48b   :  { %3462 = vmatpush1.bf16.msra.mxu0 %v9050_v38  ;;  %3608 = vmatpush1.bf16.msra.mxu1 %v9052_v42  ;;  %v1667_v38 = vld [vmem:[#allocation17 + $0x290] sm:$0xff] }
 0x48c   :  { %3463 = vmatprep.subr.bf16.mxu0 %v9059_v43  ;;  %3609 = vmatprep.subr.bf16.mxu1 %v9061_v8  ;;  %v1671_v42 = vld [vmem:[#allocation17 + $0x2b0] sm:$0xff]  ;;  %v1668_v43 = vld [vmem:[#allocation17 + $0x298] sm:$0xff] }
 0x48d   :  { %3289 = vmatmul.mubr.bf16.gmra.mrb[8].mxu0 %v11567_v18  ;;  %3435 = vmatmul.mubr.bf16.gmra.mrb[64].mxu1 %v11567_v18  ;;  %v1672_v8 = vld [vmem:[#allocation17 + $0x2b8] sm:$0xff]  ;;  %v9107_v45 = vcombine.high %v1667_v38, %v1671_v42  ;;  %v9106_v55 = vcombine.low %v1667_v38, %v1671_v42 }
 0x48e   :  { %3298 = vmatprep.mubr.bf16.mxu0 %v11577_v30  ;;  %3444 = vmatprep.mubr.bf16.mxu1 %v11577_v30  ;;  %v9109_v47 = vcombine.high %v1668_v43, %v1672_v8  ;;  %v9108_v60 = vcombine.low %v1668_v43, %v1672_v8 }
 0x48f   :  { %3464 = vmatpush1.bf16.msra.mxu0 %v9058_v49  ;;  %3610 = vmatpush1.bf16.msra.mxu1 %v9060_v51  ;;  %v1675_v49 = vld [vmem:[#allocation17 + $0x2d0] sm:$0xff] }
 0x490   :  { %3465 = vmatprep.subr.bf16.mxu0 %v9067_v53  ;;  %3611 = vmatprep.subr.bf16.mxu1 %v9069_v54  ;;  %v1679_v51 = vld [vmem:[#allocation17 + $0x2f0] sm:$0xff]  ;;  %v1676_v53 = vld [vmem:[#allocation17 + $0x2d8] sm:$0xff] }
 0x491   :  { %v1680_v54 = vld [vmem:[#allocation17 + $0x2f8] sm:$0xff]  ;;  %v9115_v40 = vcombine.high %v1675_v49, %v1679_v51  ;;  %v9114_v7 = vcombine.low %v1675_v49, %v1679_v51 }
 0x492   :  { %v9117_v61 = vcombine.high %v1676_v53, %v1680_v54  ;;  %v9116_v19 = vcombine.low %v1676_v53, %v1680_v54 }
 0x493   :  { %3466 = vmatpush1.bf16.msra.mxu0 %v9066_v62  ;;  %3612 = vmatpush1.bf16.msra.mxu1 %v9068_v63  ;;  %v1683_v62 = vld [vmem:[#allocation17 + $0x310] sm:$0xff] }
 0x494   :  { %3467 = vmatprep.subr.bf16.mxu0 %v9075_v3  ;;  %3613 = vmatprep.subr.bf16.mxu1 %v9077_v5  ;;  %v1687_v63 = vld [vmem:[#allocation17 + $0x330] sm:$0xff]  ;;  %v1684_v3 = vld [vmem:[#allocation17 + $0x318] sm:$0xff] }
 0x495   :  { %3299 = vmatmul.mubr.bf16.gmra.mrb[12].mxu0 %v11575_v41  ;;  %3445 = vmatmul.mubr.bf16.gmra.mrb[68].mxu1 %v11575_v41  ;;  %v1688_v5 = vld [vmem:[#allocation17 + $0x338] sm:$0xff]  ;;  %v9123_v9 = vcombine.high %v1683_v62, %v1687_v63  ;;  %v9122_v20 = vcombine.low %v1683_v62, %v1687_v63 }
 0x496   :  { %3487 = vmatprep.mubr.bf16.mxu0 %v11489_v12  ;;  %3633 = vmatprep.mubr.bf16.mxu1 %v11489_v12  ;;  %v9101_v12 = vcombine.high %v1660_v28, %v1664_v6  ;;  %v9125_v10 = vcombine.high %v1684_v3, %v1688_v5  ;;  %v9124_v21 = vcombine.low %v1684_v3, %v1688_v5 }
 0x497   :  { %3468 = vmatpush1.bf16.msra.mxu0 %v9074_v57  ;;  %3614 = vmatpush1.bf16.msra.mxu1 %v9076_v15  ;;  %v1691_v57 = vld [vmem:[#allocation17 + $0x350] sm:$0xff] }
 0x498   :  { %3469 = vmatprep.subr.bf16.mxu0 %v9083_v52  ;;  %3615 = vmatprep.subr.bf16.mxu1 %v9085_v16  ;;  %v1695_v15 = vld [vmem:[#allocation17 + $0x370] sm:$0xff]  ;;  %v1692_v52 = vld [vmem:[#allocation17 + $0x358] sm:$0xff] }
 0x499   :  { %v1696_v16 = vld [vmem:[#allocation17 + $0x378] sm:$0xff]  ;;  %v9131_v17 = vcombine.high %v1691_v57, %v1695_v15  ;;  %v9130_v26 = vcombine.low %v1691_v57, %v1695_v15 }
 0x49a   :  { %v9133_v22 = vcombine.high %v1692_v52, %v1696_v16  ;;  %v9132_v27 = vcombine.low %v1692_v52, %v1696_v16 }
 0x49b   :  { %3470 = vmatpush1.bf16.msra.mxu0 %v9082_v50  ;;  %3616 = vmatpush1.bf16.msra.mxu1 %v9084_v24  ;;  %v1699_v50 = vld [vmem:[#allocation17 + $0x390] sm:$0xff] }
 0x49c   :  { %3471 = vmatprep.subr.bf16.mxu0 %v9091_v25  ;;  %3617 = vmatprep.subr.bf16.mxu1 %v9093_v13  ;;  %v1703_v24 = vld [vmem:[#allocation17 + $0x3b0] sm:$0xff]  ;;  %v1700_v25 = vld [vmem:[#allocation17 + $0x398] sm:$0xff] }
 0x49d   :  { %v1704_v13 = vld [vmem:[#allocation17 + $0x3b8] sm:$0xff]  ;;  %v9139_v28 = vcombine.high %v1699_v50, %v1703_v24  ;;  %v9138_v38 = vcombine.low %v1699_v50, %v1703_v24 }
 0x49e   :  { %v9141_v6 = vcombine.high %v1700_v25, %v1704_v13  ;;  %v9140_v42 = vcombine.low %v1700_v25, %v1704_v13  ;;  %v1747_v13 = vld [vmem:[#allocation17 + $0x510] sm:$0xff] }
 0x49f   :  { %3472 = vmatpush1.bf16.msra.mxu0 %v9090_v29  ;;  %3618 = vmatpush1.bf16.msra.mxu1 %v9092_v35  ;;  %v1707_v29 = vld [vmem:[#allocation17 + $0x3d0] sm:$0xff] }
 0x4a0   :  { %3473 = vmatprep.subr.bf16.mxu0 %v9099_v32  ;;  %3619 = vmatprep.subr.bf16.mxu1 %v9101_v12  ;;  %v1711_v35 = vld [vmem:[#allocation17 + $0x3f0] sm:$0xff]  ;;  %v1708_v32 = vld [vmem:[#allocation17 + $0x3d8] sm:$0xff] }
 0x4a1   :  { %v1712_v12 = vld [vmem:[#allocation17 + $0x3f8] sm:$0xff]  ;;  %v9147_v43 = vcombine.high %v1707_v29, %v1711_v35  ;;  %v9146_v49 = vcombine.low %v1707_v29, %v1711_v35 }
 0x4a2   :  { %v9149_v8 = vcombine.high %v1708_v32, %v1712_v12  ;;  %v9148_v51 = vcombine.low %v1708_v32, %v1712_v12  ;;  %v1755_v32 = vld [vmem:[#allocation17 + $0x550] sm:$0xff] }
 0x4a3   :  { %3474 = vmatpush1.bf16.msra.mxu0 %v9098_v59  ;;  %3620 = vmatpush1.bf16.msra.mxu1 %v9100_v44  ;;  %v1715_v59 = vld [vmem:[#allocation17 + $0x410] sm:$0xff] }
 0x4a4   :  { %3475 = vmatprep.subr.bf16.mxu0 %v9107_v45  ;;  %3621 = vmatprep.subr.bf16.mxu1 %v9109_v47  ;;  %v1719_v44 = vld [vmem:[#allocation17 + $0x430] sm:$0xff]  ;;  %v1716_v45 = vld [vmem:[#allocation17 + $0x418] sm:$0xff] }
 0x4a5   :  { %v1720_v47 = vld [vmem:[#allocation17 + $0x438] sm:$0xff]  ;;  %v9155_v53 = vcombine.high %v1715_v59, %v1719_v44  ;;  %v9154_v62 = vcombine.low %v1715_v59, %v1719_v44  ;;  %v1759_v12 = vld [vmem:[#allocation17 + $0x570] sm:$0xff] }
 0x4a6   :  { %v9157_v54 = vcombine.high %v1716_v45, %v1720_v47  ;;  %v9156_v63 = vcombine.low %v1716_v45, %v1720_v47  ;;  %v1763_v44 = vld [vmem:[#allocation17 + $0x590] sm:$0xff]  ;;  %v1764_v45 = vld [vmem:[#allocation17 + $0x598] sm:$0xff] }
 0x4a7   :  { %3476 = vmatpush1.bf16.msra.mxu0 %v9106_v55  ;;  %3622 = vmatpush1.bf16.msra.mxu1 %v9108_v60  ;;  %v1723_v55 = vld [vmem:[#allocation17 + $0x450] sm:$0xff]  ;;  %v1768_v47 = vld [vmem:[#allocation17 + $0x5b8] sm:$0xff] }
 0x4a8   :  { %3477 = vmatprep.subr.bf16.mxu0 %v9115_v40  ;;  %3623 = vmatprep.subr.bf16.mxu1 %v9117_v61  ;;  %v1727_v60 = vld [vmem:[#allocation17 + $0x470] sm:$0xff]  ;;  %v1724_v40 = vld [vmem:[#allocation17 + $0x458] sm:$0xff] }
 0x4a9   :  { %v1728_v61 = vld [vmem:[#allocation17 + $0x478] sm:$0xff]  ;;  %v9163_v3 = vcombine.high %v1723_v55, %v1727_v60  ;;  %v9162_v57 = vcombine.low %v1723_v55, %v1727_v60  ;;  %v1771_v55 = vld [vmem:[#allocation17 + $0x5d0] sm:$0xff] }
 0x4aa   :  { %v9165_v5 = vcombine.high %v1724_v40, %v1728_v61  ;;  %v9164_v15 = vcombine.low %v1724_v40, %v1728_v61  ;;  %v1775_v60 = vld [vmem:[#allocation17 + $0x5f0] sm:$0xff]  ;;  %v1772_v40 = vld [vmem:[#allocation17 + $0x5d8] sm:$0xff] }
 0x4ab   :  { %3478 = vmatpush1.bf16.msra.mxu0 %v9114_v7  ;;  %3624 = vmatpush1.bf16.msra.mxu1 %v9116_v19  ;;  %v1731_v7 = vld [vmem:[#allocation17 + $0x490] sm:$0xff]  ;;  %v1776_v61 = vld [vmem:[#allocation17 + $0x5f8] sm:$0xff] }
 0x4ac   :  { %3479 = vmatprep.subr.bf16.mxu0 %v9123_v9  ;;  %3625 = vmatprep.subr.bf16.mxu1 %v9125_v10  ;;  %v1735_v19 = vld [vmem:[#allocation17 + $0x4b0] sm:$0xff]  ;;  %v1732_v9 = vld [vmem:[#allocation17 + $0x498] sm:$0xff] }
 0x4ad   :  { %v1736_v10 = vld [vmem:[#allocation17 + $0x4b8] sm:$0xff]  ;;  %v9171_v52 = vcombine.high %v1731_v7, %v1735_v19 }
 0x4ae   :  { %v9173_v16 = vcombine.high %v1732_v9, %v1736_v10  ;;  %v9172_v50 = vcombine.low %v1732_v9, %v1736_v10  ;;  %v9210_v9 = vcombine.low %v1771_v55, %v1775_v60  ;;  %v9212_v10 = vcombine.low %v1772_v40, %v1776_v61 }
 0x4af   :  { %3480 = vmatpush1.bf16.msra.mxu0 %v9122_v20  ;;  %3626 = vmatpush1.bf16.msra.mxu1 %v9124_v21  ;;  %v1739_v20 = vld [vmem:[#allocation17 + $0x4d0] sm:$0xff] }
 0x4b0   :  { %3481 = vmatprep.subr.bf16.mxu0 %v9131_v17  ;;  %3627 = vmatprep.subr.bf16.mxu1 %v9133_v22  ;;  %v1743_v21 = vld [vmem:[#allocation17 + $0x4f0] sm:$0xff]  ;;  %v1740_v17 = vld [vmem:[#allocation17 + $0x4d8] sm:$0xff] }
 0x4b1   :  { %v1744_v22 = vld [vmem:[#allocation17 + $0x4f8] sm:$0xff]  ;;  %v9179_v24 = vcombine.high %v1739_v20, %v1743_v21 }
 0x4b2   :  { %v9181_v25 = vcombine.high %v1740_v17, %v1744_v22 }
 0x4b3   :  { %3482 = vmatpush1.bf16.msra.mxu0 %v9130_v26  ;;  %3628 = vmatpush1.bf16.msra.mxu1 %v9132_v27  ;;  %v1748_v26 = vld [vmem:[#allocation17 + $0x518] sm:$0xff] }
 0x4b4   :  { %3483 = vmatprep.subr.bf16.mxu0 %v9139_v28  ;;  %3629 = vmatprep.subr.bf16.mxu1 %v9141_v6  ;;  %v1752_v27 = vld [vmem:[#allocation17 + $0x538] sm:$0xff]  ;;  %v9178_v28 = vcombine.low %v1739_v20, %v1743_v21  ;;  %v9180_v6 = vcombine.low %v1740_v17, %v1744_v22 }
 0x4b5   :  { %v9189_v35 = vcombine.high %v1748_v26, %v1752_v27  ;;  %v1788_v20 = vld [vmem:[#allocation17 + $0x658] sm:$0xff] }
 0x4b6   :  { %v1792_v21 = vld [vmem:[#allocation17 + $0x678] sm:$0xff] }
 0x4b7   :  { %3484 = vmatpush1.bf16.msra.mxu0 %v9138_v38  ;;  %3630 = vmatpush1.bf16.msra.mxu1 %v9140_v42  ;;  %v1756_v38 = vld [vmem:[#allocation17 + $0x558] sm:$0xff] }
 0x4b8   :  { %3485 = vmatprep.subr.bf16.mxu0 %v9147_v43  ;;  %3631 = vmatprep.subr.bf16.mxu1 %v9149_v8  ;;  %v1760_v42 = vld [vmem:[#allocation17 + $0x578] sm:$0xff]  ;;  %v9188_v43 = vcombine.low %v1748_v26, %v1752_v27  ;;  %v9195_v8 = vcombine.high %v1755_v32, %v1759_v12 }
 0x4b9   :  { %v9197_v59 = vcombine.high %v1756_v38, %v1760_v42 }
 0x4bb   :  { %3486 = vmatpush1.bf16.msra.mxu0 %v9146_v49  ;;  %3632 = vmatpush1.bf16.msra.mxu1 %v9148_v51  ;;  %v9194_v49 = vcombine.low %v1755_v32, %v1759_v12  ;;  %v9196_v51 = vcombine.low %v1756_v38, %v1760_v42 }
 0x4bc   :  { %3528 = vmatprep.subr.bf16.mxu0 %v9155_v53  ;;  %3674 = vmatprep.subr.bf16.mxu1 %v9157_v54  ;;  %v9205_v54 = vcombine.high %v1764_v45, %v1768_v47 }
 0x4be   :  { %3488 = vmatmul.mubr.bf16.vlgmr.msra.gmra.mrb[16].mxu0 %v11487_v33  ;;  %3634 = vmatmul.mubr.bf16.vlgmr.msra.gmra.mrb[72].mxu1 %v11487_v33  ;;  %v9170_v33 = vcombine.low %v1731_v7, %v1735_v19  ;;  %v1780_v7 = vld [vmem:[#allocation17 + $0x618] sm:$0xff] }
 0x4bf   :  { %3497 = vmatprep.mubr.bf16.mxu0 %v11501_v2  ;;  %3529 = vmatpush1.bf16.msra.mxu0 %v9154_v62  ;;  %v9204_v62 = vcombine.low %v1764_v45, %v1768_v47  ;;  %v1784_v19 = vld [vmem:[#allocation17 + $0x638] sm:$0xff] }
 0x4c0   :  { %3643 = vmatprep.mubr.bf16.mxu1 %v11501_v2  ;;  %3675 = vmatpush1.bf16.msra.mxu1 %v9156_v63  ;;  %v1751_v2 = vld [vmem:[#allocation17 + $0x530] sm:$0xff]  ;;  %v9211_v63 = vcombine.high %v1771_v55, %v1775_v60  ;;  %v9220_v17 = vcombine.low %v1780_v7, %v1784_v19 }
 0x4c1   :  { %3530 = vmatprep.subr.bf16.mxu0 %v9163_v3  ;;  %3676 = vmatprep.subr.bf16.mxu1 %v9165_v5  ;;  %v9187_v29 = vcombine.high %v1747_v13, %v1751_v2  ;;  %v9213_v3 = vcombine.high %v1772_v40, %v1776_v61  ;;  %v1779_v5 = vld [vmem:[#allocation17 + $0x610] sm:$0xff] }
 0x4c3   :  { %3531 = vmatpush1.bf16.msra.mxu0 %v9162_v57 }
 0x4c4   :  { %3677 = vmatpush1.bf16.msra.mxu1 %v9164_v15  ;;  %3532 = vmatprep.subr.bf16.mxu0 %v9171_v52  ;;  %v9221_v15 = vcombine.high %v1780_v7, %v1784_v19  ;;  %v1787_v52 = vld [vmem:[#allocation17 + $0x650] sm:$0xff] }
 0x4c5   :  { %3678 = vmatprep.subr.bf16.mxu1 %v9173_v16  ;;  %v1791_v16 = vld [vmem:[#allocation17 + $0x670] sm:$0xff] }
 0x4c6   :  { %3498 = vmatmul.mubr.bf16.gmra.mrb[20].mxu0 %v11499_v1  ;;  %3644 = vmatmul.mubr.bf16.gmra.mrb[76].mxu1 %v11499_v1  ;;  %v9186_v1 = vcombine.low %v1747_v13, %v1751_v2  ;;  %v9227_v22 = vcombine.high %v1787_v52, %v1791_v16  ;;  %v9226_v13 = vcombine.low %v1787_v52, %v1791_v16 }
 0x4c7   :  { %3507 = vmatprep.mubr.bf16.mxu0 %v11513_v34  ;;  %3533 = vmatpush1.bf16.msra.mxu0 %v9170_v33  ;;  %v9229_v33 = vcombine.high %v1788_v20, %v1792_v21  ;;  %v9228_v2 = vcombine.low %v1788_v20, %v1792_v21 }
 0x4c8   :  { %3653 = vmatprep.mubr.bf16.mxu1 %v11513_v34  ;;  %3679 = vmatpush1.bf16.msra.mxu1 %v9172_v50  ;;  %v1767_v34 = vld [vmem:[#allocation17 + $0x5b0] sm:$0xff] }
 0x4c9   :  { %3534 = vmatprep.subr.bf16.mxu0 %v9179_v24  ;;  %3680 = vmatprep.subr.bf16.mxu1 %v9181_v25  ;;  %v9203_v53 = vcombine.high %v1763_v44, %v1767_v34  ;;  %v1795_v50 = vld [vmem:[#allocation17 + $0x690] sm:$0xff]  ;;  %v1800_v25 = vld [vmem:[#allocation17 + $0x6b8] sm:$0xff] }
 0x4ca   :  { %v1799_v24 = vld [vmem:[#allocation17 + $0x6b0] sm:$0xff] }
 0x4cb   :  { %3535 = vmatpush1.bf16.msra.mxu0 %v9178_v28  ;;  %v9235_v26 = vcombine.high %v1795_v50, %v1799_v24  ;;  %v1803_v28 = vld [vmem:[#allocation17 + $0x6d0] sm:$0xff]  ;;  %v9234_v32 = vcombine.low %v1795_v50, %v1799_v24 }
 0x4cc   :  { %3681 = vmatpush1.bf16.msra.mxu1 %v9180_v6  ;;  %3536 = vmatprep.subr.bf16.mxu0 %v9187_v29  ;;  %v1807_v6 = vld [vmem:[#allocation17 + $0x6f0] sm:$0xff]  ;;  %v1804_v29 = vld [vmem:[#allocation17 + $0x6d8] sm:$0xff] }
 0x4cd   :  { %3682 = vmatprep.subr.bf16.mxu1 %v9189_v35  ;;  %v1808_v35 = vld [vmem:[#allocation17 + $0x6f8] sm:$0xff]  ;;  %v9243_v38 = vcombine.high %v1803_v28, %v1807_v6  ;;  %v4031_v50 = vld [vmem:[#allocation20 + $0x8] sm:$0xff] }
 0x4ce   :  { %3508 = vmatmul.mubr.bf16.gmra.mrb[24].mxu0 %v11511_v31  ;;  %3654 = vmatmul.mubr.bf16.gmra.mrb[80].mxu1 %v11511_v31  ;;  %v9202_v31 = vcombine.low %v1763_v44, %v1767_v34  ;;  %v9245_v42 = vcombine.high %v1804_v29, %v1808_v35  ;;  %v9242_v44 = vcombine.low %v1803_v28, %v1807_v6 }
 0x4cf   :  { %3517 = vmatprep.mubr.bf16.mxu0 %v11539_v14  ;;  %3537 = vmatpush1.bf16.msra.mxu0 %v9186_v1  ;;  %v1811_v1 = vld [vmem:[#allocation17 + $0x710] sm:$0xff]  ;;  %v9244_v34 = vcombine.low %v1804_v29, %v1808_v35 }
 0x4d0   :  { %3663 = vmatprep.mubr.bf16.mxu1 %v11539_v14  ;;  %3683 = vmatpush1.bf16.msra.mxu1 %v9188_v43  ;;  %v1783_v14 = vld [vmem:[#allocation17 + $0x630] sm:$0xff] }
 0x4d1   :  { %3538 = vmatprep.subr.bf16.mxu0 %v9195_v8  ;;  %3684 = vmatprep.subr.bf16.mxu1 %v9197_v59  ;;  %v9219_v57 = vcombine.high %v1779_v5, %v1783_v14  ;;  %v1815_v43 = vld [vmem:[#allocation17 + $0x730] sm:$0xff]  ;;  %v1812_v8 = vld [vmem:[#allocation17 + $0x718] sm:$0xff] }
 0x4d2   :  { %v1816_v59 = vld [vmem:[#allocation17 + $0x738] sm:$0xff]  ;;  %v9251_v45 = vcombine.high %v1811_v1, %v1815_v43  ;;  %v9250_v55 = vcombine.low %v1811_v1, %v1815_v43 }
 0x4d3   :  { %3539 = vmatpush1.bf16.msra.mxu0 %v9194_v49  ;;  %v9253_v47 = vcombine.high %v1812_v8, %v1816_v59  ;;  %v1819_v49 = vld [vmem:[#allocation17 + $0x750] sm:$0xff]  ;;  %v9252_v60 = vcombine.low %v1812_v8, %v1816_v59 }
 0x4d4   :  { %3685 = vmatpush1.bf16.msra.mxu1 %v9196_v51  ;;  %3540 = vmatprep.subr.bf16.mxu0 %v9203_v53  ;;  %v1823_v51 = vld [vmem:[#allocation17 + $0x770] sm:$0xff]  ;;  %v1820_v53 = vld [vmem:[#allocation17 + $0x758] sm:$0xff] }
 0x4d5   :  { %3686 = vmatprep.subr.bf16.mxu1 %v9205_v54  ;;  %v1824_v54 = vld [vmem:[#allocation17 + $0x778] sm:$0xff]  ;;  %v9259_v40 = vcombine.high %v1819_v49, %v1823_v51 }
 0x4d6   :  { %3518 = vmatmul.mubr.bf16.gmra.mrb[28].mxu0 %v11537_v11  ;;  %3664 = vmatmul.mubr.bf16.gmra.mrb[84].mxu1 %v11537_v11  ;;  %v9218_v11 = vcombine.low %v1779_v5, %v1783_v14  ;;  %v9261_v61 = vcombine.high %v1820_v53, %v1824_v54  ;;  %v9258_v5 = vcombine.low %v1819_v49, %v1823_v51 }
 0x4d7   :  { %3541 = vmatpush1.bf16.msra.mxu0 %v9202_v31  ;;  %3560 = vmatprep.mubr.bf16.mxu0 %v11551_v46  ;;  %v1827_v31 = vld [vmem:[#allocation17 + $0x790] sm:$0xff]  ;;  %v9260_v14 = vcombine.low %v1820_v53, %v1824_v54 }
 0x4d8   :  { %3687 = vmatpush1.bf16.msra.mxu1 %v9204_v62  ;;  %3706 = vmatprep.mubr.bf16.mxu1 %v11551_v46  ;;  %v1796_v46 = vld [vmem:[#allocation17 + $0x698] sm:$0xff]  ;;  %v1831_v62 = vld [vmem:[#allocation17 + $0x7b0] sm:$0xff] }
 0x4d9   :  { %3542 = vmatprep.subr.bf16.mxu0 %v9211_v63  ;;  %3688 = vmatprep.subr.bf16.mxu1 %v9213_v3  ;;  %v9237_v27 = vcombine.high %v1796_v46, %v1800_v25  ;;  %v9236_v12 = vcombine.low %v1796_v46, %v1800_v25  ;;  %v1828_v63 = vld [vmem:[#allocation17 + $0x798] sm:$0xff]  ;;  %v9267_v7 = vcombine.high %v1827_v31, %v1831_v62  ;;  %v4035_v25 = vld [vmem:[#allocation20 + $0x28] sm:$0xff] }
 0x4da   :  { %v1832_v3 = vld [vmem:[#allocation17 + $0x7b8] sm:$0xff]  ;;  %v9266_v52 = vcombine.low %v1827_v31, %v1831_v62  ;;  %v4046_v31 = vld [vmem:[#allocation20 + $0x80] sm:$0xff] }
 0x4db   :  { %3543 = vmatpush1.bf16.msra.mxu0 %v9210_v9  ;;  %v9269_v19 = vcombine.high %v1828_v63, %v1832_v3  ;;  %v1835_v9 = vld [vmem:[#allocation17 + $0x7d0] sm:$0xff]  ;;  %v9268_v16 = vcombine.low %v1828_v63, %v1832_v3  ;;  %v4050_v62 = vld [vmem:[#allocation20 + $0xa0] sm:$0xff] }
 0x4dc   :  { %3689 = vmatpush1.bf16.msra.mxu1 %v9212_v10  ;;  %3544 = vmatprep.subr.bf16.mxu0 %v9219_v57  ;;  %v1839_v10 = vld [vmem:[#allocation17 + $0x7f0] sm:$0xff]  ;;  %v1836_v57 = vld [vmem:[#allocation17 + $0x7d8] sm:$0xff] }
 0x4dd   :  { %3690 = vmatprep.subr.bf16.mxu1 %v9221_v15  ;;  %v1840_v15 = vld [vmem:[#allocation17 + $0x7f8] sm:$0xff]  ;;  %v9275_v20 = vcombine.high %v1835_v9, %v1839_v10  ;;  %v4047_v63 = vld [vmem:[#allocation20 + $0x88] sm:$0xff] }
 0x4de   :  { %v9277_v21 = vcombine.high %v1836_v57, %v1840_v15 }
 0x4df   :  { %3545 = vmatpush1.bf16.msra.mxu0 %v9218_v11  ;;  %v9274_v11 = vcombine.low %v1835_v9, %v1839_v10 }
 0x4e0   :  { %3691 = vmatpush1.bf16.msra.mxu1 %v9220_v17  ;;  %3546 = vmatprep.subr.bf16.mxu0 %v9227_v22  ;;  %v9276_v17 = vcombine.low %v1836_v57, %v1840_v15  ;;  %v4030_v22 = vld [vmem:[#allocation20] sm:$0xff]  ;;  %v9294_v57 = vcombine.low %v4046_v31, %v4050_v62  ;;  %v9295_v15 = vcombine.high %v4046_v31, %v4050_v62 }
 0x4e1   :  { %3692 = vmatprep.subr.bf16.mxu1 %v9229_v33  ;;  %v4034_v33 = vld [vmem:[#allocation20 + $0x20] sm:$0xff] }
 0x4e2   :  { %v9278_v24 = vcombine.low %v4030_v22, %v4034_v33  ;;  %v9279_v46 = vcombine.high %v4030_v22, %v4034_v33 }
 0x4e3   :  { %3547 = vmatpush1.bf16.msra.mxu0 %v9226_v13  ;;  %v9280_v13 = vcombine.low %v4031_v50, %v4035_v25 }
 0x4e4   :  { %3693 = vmatpush1.bf16.msra.mxu1 %v9228_v2  ;;  %3548 = vmatprep.subr.bf16.mxu0 %v9235_v26  ;;  %v9281_v2 = vcombine.high %v4031_v50, %v4035_v25  ;;  %v4058_v25 = vld [vmem:[#allocation20 + $0xe0] sm:$0xff] }
 0x4e5   :  { %3694 = vmatprep.subr.bf16.mxu1 %v9237_v27 }
 0x4e7   :  { %3549 = vmatpush1.bf16.msra.mxu0 %v9234_v32 }
 0x4e8   :  { %3695 = vmatpush1.bf16.msra.mxu1 %v9236_v12  ;;  %3550 = vmatprep.subr.bf16.mxu0 %v9243_v38  ;;  %v4038_v38 = vld [vmem:[#allocation20 + $0x40] sm:$0xff] }
 0x4e9   :  { %3696 = vmatprep.subr.bf16.mxu1 %v9245_v42  ;;  %v4042_v42 = vld [vmem:[#allocation20 + $0x60] sm:$0xff] }
 0x4eb   :  { %3551 = vmatpush1.bf16.msra.mxu0 %v9242_v44 }
 0x4ec   :  { %3697 = vmatpush1.bf16.msra.mxu1 %v9244_v34  ;;  %3552 = vmatprep.subr.bf16.mxu0 %v9251_v45  ;;  %v4039_v45 = vld [vmem:[#allocation20 + $0x48] sm:$0xff] }
 0x4ed   :  { %3698 = vmatprep.subr.bf16.mxu1 %v9253_v47  ;;  %v4043_v47 = vld [vmem:[#allocation20 + $0x68] sm:$0xff] }
 0x4ef   :  { %3553 = vmatpush1.bf16.msra.mxu0 %v9250_v55 }
 0x4f0   :  { %3699 = vmatpush1.bf16.msra.mxu1 %v9252_v60  ;;  %3554 = vmatprep.subr.bf16.mxu0 %v9259_v40  ;;  %v9286_v40 = vcombine.low %v4038_v38, %v4042_v42 }
 0x4f1   :  { %3700 = vmatprep.subr.bf16.mxu1 %v9261_v61  ;;  %v9287_v61 = vcombine.high %v4038_v38, %v4042_v42 }
 0x4f3   :  { %3555 = vmatpush1.bf16.msra.mxu0 %v9258_v5 }
 0x4f4   :  { %3701 = vmatpush1.bf16.msra.mxu1 %v9260_v14  ;;  %3556 = vmatprep.subr.bf16.mxu0 %v9267_v7  ;;  %v9288_v14 = vcombine.low %v4039_v45, %v4043_v47  ;;  %v9289_v7 = vcombine.high %v4039_v45, %v4043_v47  ;;  %v4062_v47 = vld [vmem:[#allocation20 + $0x100] sm:$0xff] }
 0x4f5   :  { %3702 = vmatprep.subr.bf16.mxu1 %v9269_v19  ;;  %v4051_v19 = vld [vmem:[#allocation20 + $0xa8] sm:$0xff] }
 0x4f7   :  { %3557 = vmatpush1.bf16.msra.mxu0 %v9266_v52 }
 0x4f8   :  { %3703 = vmatpush1.bf16.msra.mxu1 %v9268_v16  ;;  %3558 = vmatprep.subr.bf16.mxu0 %v9275_v20 }
 0x4f9   :  { %3704 = vmatprep.subr.bf16.mxu1 %v9277_v21 }
 0x4fb   :  { %3559 = vmatpush1.bf16.msra.mxu0 %v9274_v11  ;;  %v9296_v11 = vcombine.low %v4047_v63, %v4051_v19 }
 0x4fc   :  { %3705 = vmatpush1.bf16.msra.mxu1 %v9276_v17  ;;  %7144 = vmatprep.subr.bf16.mxu0 %v9279_v46  ;;  %v4054_v46 = vld [vmem:[#allocation20 + $0xc0] sm:$0xff] }
 0x4fd   :  { %7308 = vmatprep.subr.bf16.mxu1 %v9281_v2  ;;  %v9302_v62 = vcombine.low %v4054_v46, %v4058_v25 }
 0x4fe   :  { %3561 = vmatmul.mubr.bf16.vlgmr.msra.gmra.mrb[16].mxu0 %v11549_v58 }
 0x4ff   :  { %3707 = vmatmul.mubr.bf16.vlgmr.msra.gmra.mrb[72].mxu1 %v11549_v58  ;;  %3570 = vmatprep.mubr.bf16.mxu0 %v11561_v56  ;;  %v11625_v58 = vld [vmem:[#allocation19] sm:$0xff] }
 0x500   :  { %3716 = vmatprep.mubr.bf16.mxu1 %v11561_v56  ;;  %7145 = vmatpush1.bf16.msra.mxu0 %v9278_v24  ;;  %v11633_v56 = vrot.slane %v11625_v58, %v11516_v4  ;;  %v9297_v24 = vcombine.high %v4047_v63, %v4051_v19 }
 0x501   :  { %7309 = vmatpush1.bf16.msra.mxu1 %v9280_v13  ;;  %7146 = vmatprep.subr.bf16.mxu0 %v9287_v61 }
 0x502   :  { %7310 = vmatprep.subr.bf16.mxu1 %v9289_v7 }
 0x504   :  { %7147 = vmatpush1.bf16.msra.mxu0 %v9286_v40  ;;  %v4067_v40 = vld [vmem:[#allocation20 + $0x128] sm:$0xff] }
 0x505   :  { %7311 = vmatpush1.bf16.msra.mxu1 %v9288_v14  ;;  %7148 = vmatprep.subr.bf16.mxu0 %v9295_v15 }
 0x506   :  { %3571 = vmatmul.mubr.bf16.gmra.mrb[20].mxu0 %v11559_v23  ;;  %7312 = vmatprep.subr.bf16.mxu1 %v9297_v24 }
 0x507   :  { %3717 = vmatmul.mubr.bf16.gmra.mrb[76].mxu1 %v11559_v23  ;;  %3580 = vmatprep.mubr.bf16.mxu0 %v11569_v0  ;;  %v11629_v23 = vrot.slane %v11625_v58, %v11398_v37 }
 0x508   :  { %3726 = vmatprep.mubr.bf16.mxu1 %v11569_v0  ;;  %v11641_v0 = vrot.slane %v11625_v58, %v11523_v48  ;;  %7149 = vmatpush1.bf16.msra.mxu0 %v9294_v57 }
 0x509   :  { %7313 = vmatpush1.bf16.msra.mxu1 %v9296_v11  ;;  %v4074_v11 = vld [vmem:[#allocation20 + $0x160] sm:$0xff] }
 0x50e   :  { %3581 = vmatmul.mubr.bf16.gmra.mrb[24].mxu0 %v11567_v18 }
 0x50f   :  { %3727 = vmatmul.mubr.bf16.gmra.mrb[80].mxu1 %v11567_v18  ;;  %3590 = vmatprep.mubr.bf16.mxu0 %v11577_v30  ;;  %v11637_v18 = vrot.slane %v11625_v58, %v11401_v39 }
 0x510   :  { %3736 = vmatprep.mubr.bf16.mxu1 %v11577_v30 }
 0x516   :  { %3591 = vmatmul.mubr.bf16.gmra.mrb[28].mxu0 %v11575_v41 }
 0x517   :  { %3737 = vmatmul.mubr.bf16.gmra.mrb[84].mxu1 %v11575_v41 }
 0x550   :  { %v3270_v30 = vpop.f32.mrb[0].mxu0  ;;  %v3416_v41 = vpop.f32.mrb[56].mxu1 }
 0x551   :  { %v9957_v26 = vadd.f32 %v3270_v30, %v11629_v23  ;;  %v9973_v27 = vadd.f32 %v3416_v41, %v11633_v56  ;;  %v3272_v28 = vpop.f32.mrb[1].mxu0  ;;  %v3418_v6 = vpop.f32.mrb[57].mxu1 }
 0x552   :  { %v9958_v29 = vadd.f32 %v3272_v28, %v11637_v18  ;;  %v9974_v35 = vadd.f32 %v3418_v6, %v11641_v0  ;;  %v3274_v32 = vpop.f32.mrb[2].mxu0  ;;  %v3420_v12 = vpop.f32.mrb[58].mxu1 }
 0x553   :  { %v3747_v1 = vmax.f32 %v9957_v26, 0.0  ;;  %v3749_v43 = vmax.f32 %v9973_v27, 0.0  ;;  %v9959_v8 = vadd.f32 %v3274_v32, %v11629_v23  ;;  %v9975_v59 = vadd.f32 %v3420_v12, %v11633_v56  ;;  %v3276_v44 = vpop.f32.mrb[3].mxu0  ;;  %v3422_v34 = vpop.f32.mrb[59].mxu1 }
 0x554   :  { %v3748_v49 = vmax.f32 %v9958_v29, 0.0  ;;  %v3750_v51 = vmax.f32 %v9974_v35, 0.0  ;;  %v9960_v53 = vadd.f32 %v3276_v44, %v11637_v18  ;;  %v9976_v54 = vadd.f32 %v3422_v34, %v11641_v0 }
 0x555   :  { %v3755_v55 = vmax.f32 %v9959_v8, 0.0  ;;  %v3757_v60 = vmax.f32 %v9975_v59, 0.0  ;;  %v9303_v26 = vcombine.high %v4054_v46, %v4058_v25  ;;  %v4059_v8 = vld [vmem:[#allocation20 + $0xe8] sm:$0xff] }
 0x556   :  { %v3756_v3 = vmax.f32 %v9960_v53, 0.0  ;;  %v3758_v5 = vmax.f32 %v9976_v54, 0.0 }
 0x557   :  { %v3812_v9 = vadd.f32 %v3755_v55, %v3747_v1  ;;  %v3838_v10 = vadd.f32 %v3757_v60, %v3749_v43  ;;  %v4055_v43 = vld [vmem:[#allocation20 + $0xc8] sm:$0xff]  ;;  %7150 = vmatprep.subr.bf16.mxu0 %v9303_v26 }
 0x558   :  { %v3825_v52 = vadd.f32 %v3756_v3, %v3748_v49  ;;  %v3851_v16 = vadd.f32 %v3758_v5, %v3750_v51  ;;  %v3280_v20 = vpop.f32.mrb[4].mxu0  ;;  %v3426_v21 = vpop.f32.mrb[60].mxu1  ;;  %v4066_v49 = vld [vmem:[#allocation20 + $0x120] sm:$0xff]  ;;  %v4063_v60 = vld [vmem:[#allocation20 + $0x108] sm:$0xff]  ;;  %v9304_v63 = vcombine.low %v4055_v43, %v4059_v8  ;;  %v9305_v19 = vcombine.high %v4055_v43, %v4059_v8  ;;  %7151 = vmatpush1.bf16.msra.mxu0 %v9302_v62 }
 0x559   :  { %v9961_v17 = vadd.f32 %v3280_v20, %v11629_v23  ;;  %v9977_v22 = vadd.f32 %v3426_v21, %v11633_v56  ;;  %v3282_v33 = vpop.f32.mrb[5].mxu0  ;;  %v3428_v50 = vpop.f32.mrb[61].mxu1  ;;  %v9312_v20 = vcombine.low %v4063_v60, %v4067_v40  ;;  %v4070_v21 = vld [vmem:[#allocation20 + $0x140] sm:$0xff]  ;;  %v9313_v24 = vcombine.high %v4063_v60, %v4067_v40 }
 0x55a   :  { %v9962_v13 = vadd.f32 %v3282_v33, %v11637_v18  ;;  %v9978_v2 = vadd.f32 %v3428_v50, %v11641_v0  ;;  %v3284_v30 = vpop.f32.mrb[6].mxu0  ;;  %v3430_v41 = vpop.f32.mrb[62].mxu1  ;;  %7314 = vmatprep.subr.bf16.mxu1 %v9305_v19  ;;  %v9319_v46 = vcombine.high %v4070_v21, %v4074_v11  ;;  %v4078_v43 = vld [vmem:[#allocation20 + $0x180] sm:$0xff] }
 0x55b   :  { %v3763_v27 = vmax.f32 %v9961_v17, 0.0  ;;  %v3765_v28 = vmax.f32 %v9977_v22, 0.0  ;;  %v9963_v6 = vadd.f32 %v3284_v30, %v11629_v23  ;;  %v9979_v29 = vadd.f32 %v3430_v41, %v11633_v56  ;;  %v3286_v35 = vpop.f32.mrb[7].mxu0  ;;  %v3432_v32 = vpop.f32.mrb[63].mxu1  ;;  %7315 = vmatpush1.bf16.msra.mxu1 %v9304_v63  ;;  %v4082_v8 = vld [vmem:[#allocation20 + $0x1a0] sm:$0xff] }
 0x55c   :  { %v3764_v12 = vmax.f32 %v9962_v13, 0.0  ;;  %v3766_v38 = vmax.f32 %v9978_v2, 0.0  ;;  %v9964_v42 = vadd.f32 %v3286_v35, %v11637_v18  ;;  %v9980_v1 = vadd.f32 %v3432_v32, %v11641_v0  ;;  %7316 = vmatprep.subr.bf16.mxu1 %v9313_v24  ;;  %v4071_v35 = vld [vmem:[#allocation20 + $0x148] sm:$0xff] }
 0x55d   :  { %v3813_v59 = vadd.f32 %v3812_v9, %v3763_v27  ;;  %v3839_v44 = vadd.f32 %v3838_v10, %v3765_v28  ;;  %v3771_v34 = vmax.f32 %v9963_v6, 0.0  ;;  %v3773_v45 = vmax.f32 %v9979_v29, 0.0  ;;  %v4075_v32 = vld [vmem:[#allocation20 + $0x168] sm:$0xff] }
 0x55e   :  { %v3826_v51 = vadd.f32 %v3825_v52, %v3764_v12  ;;  %v3852_v53 = vadd.f32 %v3851_v16, %v3766_v38  ;;  %v3772_v54 = vmax.f32 %v9964_v42, 0.0  ;;  %v3774_v55 = vmax.f32 %v9980_v1, 0.0 }
 0x55f   :  { %v3814_v61 = vadd.f32 %v3813_v59, %v3771_v34  ;;  %v3840_v31 = vadd.f32 %v3839_v44, %v3773_v45  ;;  %v9310_v9 = vcombine.low %v4062_v47, %v4066_v49  ;;  %v9311_v16 = vcombine.high %v4062_v47, %v4066_v49  ;;  %v4079_v47 = vld [vmem:[#allocation20 + $0x188] sm:$0xff]  ;;  %7317 = vmatpush1.bf16.msra.mxu1 %v9312_v20 }
 0x560   :  { %v3827_v3 = vadd.f32 %v3826_v51, %v3772_v54  ;;  %v3853_v5 = vadd.f32 %v3852_v53, %v3774_v55  ;;  %v3290_v14 = vpop.f32.mrb[8].mxu0  ;;  %v3436_v7 = vpop.f32.mrb[64].mxu1  ;;  %v4083_v49 = vld [vmem:[#allocation20 + $0x1a8] sm:$0xff]  ;;  %v9318_v54 = vcombine.low %v4070_v21, %v4074_v11  ;;  %v9320_v55 = vcombine.low %v4071_v35, %v4075_v32 }
 0x561   :  { %v9965_v10 = vadd.f32 %v3290_v14, %v11629_v23  ;;  %v9981_v57 = vadd.f32 %v3436_v7, %v11633_v56  ;;  %v3292_v15 = vpop.f32.mrb[9].mxu0  ;;  %v3438_v52 = vpop.f32.mrb[65].mxu1  ;;  %7152 = vmatprep.subr.bf16.mxu0 %v9311_v16  ;;  %v9321_v62 = vcombine.high %v4071_v35, %v4075_v32  ;;  %v9326_v63 = vcombine.low %v4078_v43, %v4082_v8 }
 0x562   :  { %v9966_v17 = vadd.f32 %v3292_v15, %v11637_v18  ;;  %v9982_v22 = vadd.f32 %v3438_v52, %v11641_v0  ;;  %v3294_v33 = vpop.f32.mrb[10].mxu0  ;;  %v3440_v50 = vpop.f32.mrb[66].mxu1  ;;  %7153 = vmatpush1.bf16.msra.mxu0 %v9310_v9  ;;  %v9327_v19 = vcombine.high %v4078_v43, %v4082_v8  ;;  %v9328_v9 = vcombine.low %v4079_v47, %v4083_v49  ;;  %v4095_v43 = vld [vmem:[#allocation20 + $0x208] sm:$0xff] }
 0x563   :  { %v3779_v25 = vmax.f32 %v9965_v10, 0.0  ;;  %v3781_v13 = vmax.f32 %v9981_v57, 0.0  ;;  %v9967_v2 = vadd.f32 %v3294_v33, %v11629_v23  ;;  %v9983_v30 = vadd.f32 %v3440_v50, %v11633_v56  ;;  %v3296_v41 = vpop.f32.mrb[11].mxu0  ;;  %v3442_v26 = vpop.f32.mrb[67].mxu1  ;;  %7154 = vmatprep.subr.bf16.mxu0 %v9319_v46  ;;  %v4086_v10 = vld [vmem:[#allocation20 + $0x1c0] sm:$0xff]  ;;  %7318 = vmatprep.subr.bf16.mxu1 %v9321_v62  ;;  %v4099_v8 = vld [vmem:[#allocation20 + $0x228] sm:$0xff] }
 0x564   :  { %v3780_v27 = vmax.f32 %v9966_v17, 0.0  ;;  %v3782_v28 = vmax.f32 %v9982_v22, 0.0  ;;  %v9968_v6 = vadd.f32 %v3296_v41, %v11637_v18  ;;  %v9984_v29 = vadd.f32 %v3442_v26, %v11641_v0  ;;  %v4090_v57 = vld [vmem:[#allocation20 + $0x1e0] sm:$0xff]  ;;  %7319 = vmatpush1.bf16.msra.mxu1 %v9320_v55  ;;  %v4087_v41 = vld [vmem:[#allocation20 + $0x1c8] sm:$0xff] }
 0x565   :  { %v3815_v12 = vadd.f32 %v3814_v61, %v3779_v25  ;;  %v3841_v38 = vadd.f32 %v3840_v31, %v3781_v13  ;;  %v3787_v42 = vmax.f32 %v9967_v2, 0.0  ;;  %v3789_v1 = vmax.f32 %v9983_v30, 0.0  ;;  %v4091_v26 = vld [vmem:[#allocation20 + $0x1e8] sm:$0xff] }
 0x566   :  { %v3828_v59 = vadd.f32 %v3827_v3, %v3780_v27  ;;  %v3854_v44 = vadd.f32 %v3853_v5, %v3782_v28  ;;  %v3788_v34 = vmax.f32 %v9968_v6, 0.0  ;;  %v3790_v45 = vmax.f32 %v9984_v29, 0.0  ;;  %7155 = vmatpush1.bf16.msra.mxu0 %v9318_v54  ;;  %v4106_v54 = vld [vmem:[#allocation20 + $0x260] sm:$0xff]  ;;  %v4103_v55 = vld [vmem:[#allocation20 + $0x248] sm:$0xff] }
 0x567   :  { %v3816_v51 = vadd.f32 %v3815_v12, %v3787_v42  ;;  %v3842_v53 = vadd.f32 %v3841_v38, %v3789_v1  ;;  %v9329_v21 = vcombine.high %v4079_v47, %v4083_v49  ;;  %v9335_v11 = vcombine.high %v4086_v10, %v4090_v57  ;;  %7156 = vmatprep.subr.bf16.mxu0 %v9327_v19  ;;  %v4094_v12 = vld [vmem:[#allocation20 + $0x200] sm:$0xff]  ;;  %v4107_v62 = vld [vmem:[#allocation20 + $0x268] sm:$0xff] }
 0x568   :  { %v3829_v60 = vadd.f32 %v3828_v59, %v3788_v34  ;;  %v3855_v40 = vadd.f32 %v3854_v44, %v3790_v45  ;;  %v3300_v61 = vpop.f32.mrb[12].mxu0  ;;  %v3446_v31 = vpop.f32.mrb[68].mxu1  ;;  %v4098_v38 = vld [vmem:[#allocation20 + $0x220] sm:$0xff]  ;;  %v9337_v34 = vcombine.high %v4087_v41, %v4091_v26 }
 0x569   :  { %v9969_v14 = vadd.f32 %v3300_v61, %v11629_v23  ;;  %v9985_v3 = vadd.f32 %v3446_v31, %v11633_v56  ;;  %v3302_v5 = vpop.f32.mrb[13].mxu0  ;;  %v3448_v7 = vpop.f32.mrb[69].mxu1  ;;  %7320 = vmatprep.subr.bf16.mxu1 %v9329_v21  ;;  %v9342_v49 = vcombine.low %v4094_v12, %v4098_v38  ;;  %v9345_v61 = vcombine.high %v4095_v43, %v4099_v8  ;;  %v4111_v21 = vld [vmem:[#allocation20 + $0x288] sm:$0xff] }
 0x56a   :  { %v9970_v15 = vadd.f32 %v3302_v5, %v11637_v18  ;;  %v9986_v52 = vadd.f32 %v3448_v7, %v11641_v0  ;;  %v3304_v16 = vpop.f32.mrb[14].mxu0  ;;  %v3450_v20 = vpop.f32.mrb[70].mxu1  ;;  %7157 = vmatpush1.bf16.msra.mxu0 %v9326_v63  ;;  %7321 = vmatpush1.bf16.msra.mxu1 %v9328_v9  ;;  %v11015_v7 = vmov 1966171168  }
 0x56b   :  { %v3795_v17 = vmax.f32 %v9969_v14, 0.0  ;;  %v3797_v22 = vmax.f32 %v9985_v3, 0.0  ;;  %v9971_v33 = vadd.f32 %v3304_v16, %v11629_v23  ;;  %v9987_v50 = vadd.f32 %v3450_v20, %v11633_v56  ;;  %v3306_v24 = vpop.f32.mrb[15].mxu0  ;;  %v3452_v46 = vpop.f32.mrb[71].mxu1  ;;  %7158 = vmatprep.subr.bf16.mxu0 %v9335_v11  ;;  %7322 = vmatprep.subr.bf16.mxu1 %v9337_v34  ;;  %v4110_v16 = vld [vmem:[#allocation20 + $0x280] sm:$0xff]  ;;  %v4127_v34 = vld [vmem:[#allocation20 + $0x308] sm:$0xff] }
 0x56c   :  { %v3796_v25 = vmax.f32 %v9970_v15, 0.0  ;;  %v3798_v13 = vmax.f32 %v9986_v52, 0.0  ;;  %v9972_v2 = vadd.f32 %v3306_v24, %v11637_v18  ;;  %v9988_v30 = vadd.f32 %v3452_v46, %v11641_v0  ;;  %v4114_v20 = vld [vmem:[#allocation20 + $0x2a0] sm:$0xff] }
 0x56d   :  { %v3817_v27 = vadd.f32 %v3816_v51, %v3795_v17  ;;  %v3843_v28 = vadd.f32 %v3842_v53, %v3797_v22  ;;  %v3803_v6 = vmax.f32 %v9971_v33, 0.0  ;;  %v3805_v29 = vmax.f32 %v9987_v50, 0.0  ;;  %v4102_v53 = vld [vmem:[#allocation20 + $0x240] sm:$0xff]  ;;  %v4115_v33 = vld [vmem:[#allocation20 + $0x2a8] sm:$0xff] }
 0x56e   :  { %v3830_v23 = vadd.f32 %v3829_v60, %v3796_v25  ;;  %v3856_v56 = vadd.f32 %v3855_v40, %v3798_v13  ;;  %v3804_v35 = vmax.f32 %v9972_v2, 0.0  ;;  %v3806_v32 = vmax.f32 %v9988_v30, 0.0 }
 0x56f   :  { %v3818_v42 = vadd.f32 %v3817_v27, %v3803_v6  ;;  %v3844_v1 = vadd.f32 %v3843_v28, %v3805_v29  ;;  %v9334_v18 = vcombine.low %v4086_v10, %v4090_v57  ;;  %v9336_v0 = vcombine.low %v4087_v41, %v4091_v26  ;;  %v4118_v28 = vld [vmem:[#allocation20 + $0x2c0] sm:$0xff]  ;;  %v4119_v29 = vld [vmem:[#allocation20 + $0x2c8] sm:$0xff] }
 0x570   :  { %v3831_v59 = vadd.f32 %v3830_v23, %v3804_v35  ;;  %v3857_v44 = vadd.f32 %v3856_v56, %v3806_v32  ;;  %v9343_v51 = vcombine.high %v4094_v12, %v4098_v38  ;;  %v9351_v31 = vcombine.high %v4102_v53, %v4106_v54  ;;  %v4122_v6 = vld [vmem:[#allocation20 + $0x2e0] sm:$0xff]  ;;  %v4123_v32 = vld [vmem:[#allocation20 + $0x2e8] sm:$0xff] }
 0x571   :  { %v3819_v45 = vrot.slane %v3818_v42, 4  ;;  %v3845_v47 = vrot.slane %v3844_v1, 4  ;;  %7159 = vmatpush1.bf16.msra.mxu0 %v9334_v18  ;;  %7323 = vmatpush1.bf16.msra.mxu1 %v9336_v0  ;;  %v9344_v3 = vcombine.low %v4095_v43, %v4099_v8  ;;  %v3929_v19 = vunpack.c.l.s4 %v11015_v7 }
 0x572   :  { %v3832_v60 = vrot.slane %v3831_v59, 4  ;;  %v3858_v40 = vrot.slane %v3857_v44, 4  ;;  %7160 = vmatprep.subr.bf16.mxu0 %v9343_v51  ;;  %7324 = vmatprep.subr.bf16.mxu1 %v9345_v61  ;;  %v9353_v10 = vcombine.high %v4103_v55, %v4107_v62  ;;  %v9350_v52 = vcombine.low %v4102_v53, %v4106_v54  ;;  %v4131_v51 = vld [vmem:[#allocation20 + $0x328] sm:$0xff]  ;;  %v4134_v61 = vld [vmem:[#allocation20 + $0x340] sm:$0xff] }
 0x573   :  { %v3820_v63 = vadd.f32 %v3819_v45, %v3818_v42  ;;  %v3846_v14 = vadd.f32 %v3845_v47, %v3844_v1  ;;  %v9359_v22 = vcombine.high %v4110_v16, %v4114_v20  ;;  %v9352_v46 = vcombine.low %v4103_v55, %v4107_v62  ;;  %v4135_v62 = vld [vmem:[#allocation20 + $0x348] sm:$0xff] }
 0x574   :  { %v3833_v5 = vadd.f32 %v3832_v60, %v3831_v59  ;;  %v3859_v9 = vadd.f32 %v3858_v40, %v3857_v44  ;;  %v3930_v13 = vunpack.c.0.s8 %v3929_v19  ;;  %v9361_v30 = vcombine.high %v4111_v21, %v4115_v33  ;;  %v4126_v59 = vld [vmem:[#allocation20 + $0x300] sm:$0xff] }
 0x575   :  { %v3821_v57 = vrot.slane %v3820_v63, 2  ;;  %v3847_v15 = vrot.slane %v3846_v14, 2  ;;  %7161 = vmatpush1.bf16.msra.mxu0 %v9342_v49  ;;  %7325 = vmatpush1.bf16.msra.mxu1 %v9344_v3  ;;  %v9358_v27 = vcombine.low %v4110_v16, %v4114_v20  ;;  %v9367_v35 = vcombine.high %v4118_v28, %v4122_v6  ;;  %v4130_v44 = vld [vmem:[#allocation20 + $0x320] sm:$0xff]  ;;  %v4139_v3 = vld [vmem:[#allocation20 + $0x368] sm:$0xff] }
 0x576   :  { %v3834_v11 = vrot.slane %v3833_v5, 2  ;;  %v3860_v17 = vrot.slane %v3859_v9, 2  ;;  %7162 = vmatprep.subr.bf16.mxu0 %v9351_v31  ;;  %7326 = vmatprep.subr.bf16.mxu1 %v9353_v10  ;;  %v9360_v42 = vcombine.low %v4111_v21, %v4115_v33  ;;  %v11676_v18 = vsub.s32 %v3930_v13, %v11395_v36  ;;  %v4138_v31 = vld [vmem:[#allocation20 + $0x360] sm:$0xff] }
 0x577   :  { %v3822_v50 = vadd.f32 %v3821_v57, %v3820_v63  ;;  %v3848_v24 = vadd.f32 %v3847_v15, %v3846_v14  ;;  %v9369_v43 = vcombine.high %v4119_v29, %v4123_v32  ;;  %v9366_v8 = vcombine.low %v4118_v28, %v4122_v6  ;;  %v4146_v10 = vld [vmem:[#allocation20 + $0x3a0] sm:$0xff]  ;;  %v4143_v57 = vld [vmem:[#allocation20 + $0x388] sm:$0xff] }
 0x578   :  { %v3835_v25 = vadd.f32 %v3834_v11, %v3833_v5  ;;  %v3861_v2 = vadd.f32 %v3860_v17, %v3859_v9  ;;  %v9375_v49 = vcombine.high %v4126_v59, %v4130_v44  ;;  %v9368_v53 = vcombine.low %v4119_v29, %v4123_v32  ;;  %v4142_v9 = vld [vmem:[#allocation20 + $0x380] sm:$0xff] }
 0x579   :  { %v3823_v41 = vrot.slane %v3822_v50, 1  ;;  %v3849_v26 = vrot.slane %v3848_v24, 1  ;;  %7163 = vmatpush1.bf16.msra.mxu0 %v9350_v52  ;;  %7327 = vmatpush1.bf16.msra.mxu1 %v9352_v46  ;;  %v9377_v60 = vcombine.high %v4127_v34, %v4131_v51  ;;  %v9374_v40 = vcombine.low %v4126_v59, %v4130_v44  ;;  %v4147_v52 = vld [vmem:[#allocation20 + $0x3a8] sm:$0xff]  ;;  %v4150_v11 = vld [vmem:[#allocation20 + $0x3c0] sm:$0xff] }
 0x57a   :  { %v3836_v23 = vrot.slane %v3835_v25, 1  ;;  %v3862_v56 = vrot.slane %v3861_v2, 1  ;;  %7164 = vmatprep.subr.bf16.mxu0 %v9359_v22  ;;  %7328 = vmatprep.subr.bf16.mxu1 %v9361_v30  ;;  %v9383_v14 = vcombine.high %v4134_v61, %v4138_v31  ;;  %v9376_v5 = vcombine.low %v4127_v34, %v4131_v51  ;;  %v4154_v17 = vld [vmem:[#allocation20 + $0x3e0] sm:$0xff]  ;;  %v4151_v22 = vld [vmem:[#allocation20 + $0x3c8] sm:$0xff] }
 0x57b   :  { %v3824_v12 = vadd.f32 %v3823_v41, %v3822_v50  ;;  %v3850_v38 = vadd.f32 %v3849_v26, %v3848_v24  ;;  %v9385_v7 = vcombine.high %v4135_v62, %v4139_v3  ;;  %v9382_v19 = vcombine.low %v4134_v61, %v4138_v31  ;;  %v4155_v50 = vld [vmem:[#allocation20 + $0x3e8] sm:$0xff]  ;;  %v11686_v13 = vld [vmem:[#allocation20 + $0x400] sm:$0xff] }
 0x57c   :  { %v3837_v1 = vadd.f32 %v3836_v23, %v3835_v25  ;;  %v3863_v0 = vadd.f32 %v3862_v56, %v3861_v2  ;;  %v9391_v15 = vcombine.high %v4142_v9, %v4146_v10  ;;  %v9384_v16 = vcombine.low %v4135_v62, %v4139_v3  ;;  %v11688_v2 = vld [vmem:[#allocation20 + $0x420] sm:$0xff]  ;;  %v11690_v30 = vld [vmem:[#allocation20 + $0x408] sm:$0xff] }
 0x57d   :  { %7165 = vmatpush1.bf16.msra.mxu0 %v9358_v27  ;;  %7329 = vmatpush1.bf16.msra.mxu1 %v9360_v42  ;;  %v9393_v20 = vcombine.high %v4143_v57, %v4147_v52  ;;  %v9390_v21 = vcombine.low %v4142_v9, %v4146_v10  ;;  %v9399_v33 = vcombine.high %v4150_v11, %v4154_v17  ;;  %v11694_v26 = vld [vmem:[#allocation20 + $0x428] sm:$0xff]  ;;  %v11703_v23 = vsub.s32 4, %v11395_v36 }
 0x57e   :  { %v3924_v45 = vcombine.low %v3824_v12, %v3837_v1  ;;  %v3925_v47 = vcombine.low %v3850_v38, %v3863_v0  ;;  %7166 = vmatprep.subr.bf16.mxu0 %v9367_v35  ;;  %7330 = vmatprep.subr.bf16.mxu1 %v9369_v43  ;;  %v9392_v24 = vcombine.low %v4143_v57, %v4147_v52  ;;  %v11706_v56 = vsub.s32 6, %v11395_v36 }
 0x57f   :  { %v9401_v46 = vcombine.high %v4151_v22, %v4155_v50  ;;  %v9398_v25 = vcombine.low %v4150_v11, %v4154_v17  ;;  %v9407_v41 = vcombine.high %v11686_v13, %v11688_v2  ;;  %v9400_v27 = vcombine.low %v4151_v22, %v4155_v50 }
 0x580   :  { %v11679_v54 = vrot.slane %v3924_v45, %v11676_v18  ;;  %v11682_v55 = vrot.slane %v3925_v47, %v11676_v18  ;;  %v9406_v28 = vcombine.low %v11686_v13, %v11688_v2  ;;  %v9408_v6 = vcombine.low %v11690_v30, %v11694_v26 }
 0x581   :  { %7167 = vmatpush1.bf16.msra.mxu0 %v9366_v8  ;;  %7331 = vmatpush1.bf16.msra.mxu1 %v9368_v53  ;;  %v9409_v29 = vcombine.high %v11690_v30, %v11694_v26  ;;  %v11709_v35 = vsub.s32 5, %v11395_v36  ;;  %v11712_v32 = vsub.s32 7, %v11395_v36  ;;  %v11716_v12 = vrot.slane %v11625_v58, %v11703_v23 }
 0x582   :  { %v3956_v63 = vcombine.low %v11679_v54, %v11682_v55  ;;  %7168 = vmatprep.subr.bf16.mxu0 %v9375_v49  ;;  %7332 = vmatprep.subr.bf16.mxu1 %v9377_v60  ;;  %v11720_v38 = vrot.slane %v11625_v58, %v11706_v56 }
 0x583   :  { %v11724_v42 = vrot.slane %v11625_v58, %v11709_v35  ;;  %v11728_v1 = vrot.slane %v11625_v58, %v11712_v32 }
 0x585   :  { %7169 = vmatpush1.bf16.msra.mxu0 %v9374_v40  ;;  %7333 = vmatpush1.bf16.msra.mxu1 %v9376_v5 }
 0x586   :  { %7170 = vmatprep.subr.bf16.mxu0 %v9383_v14  ;;  %7334 = vmatprep.subr.bf16.mxu1 %v9385_v7 }
 0x589   :  { %7171 = vmatpush1.bf16.msra.mxu0 %v9382_v19  ;;  %7335 = vmatpush1.bf16.msra.mxu1 %v9384_v16 }
 0x58a   :  { %7172 = vmatprep.subr.bf16.mxu0 %v9391_v15  ;;  %7336 = vmatprep.subr.bf16.mxu1 %v9393_v20 }
 0x58d   :  { %7173 = vmatpush1.bf16.msra.mxu0 %v9390_v21  ;;  %7337 = vmatpush1.bf16.msra.mxu1 %v9392_v24 }
 0x58e   :  { %7174 = vmatprep.subr.bf16.mxu0 %v9399_v33  ;;  %7338 = vmatprep.subr.bf16.mxu1 %v9401_v46 }
 0x591   :  { %7175 = vmatpush1.bf16.msra.mxu0 %v9398_v25  ;;  %7339 = vmatpush1.bf16.msra.mxu1 %v9400_v27 }
 0x592   :  { %7185 = vmatprep.subr.bf16.mxu0 %v9407_v41  ;;  %7349 = vmatprep.subr.bf16.mxu1 %v9409_v29 }
 0x5d1   :  { %v3562_v0 = vpop.f32.mrb[16].mxu0 }
 0x5d2   :  { %v9989_v36 = vadd.f32 %v3562_v0, %v11716_v12  ;;  %v3708_v43 = vpop.f32.mrb[72].mxu1  ;;  %v3564_v8 = vpop.f32.mrb[17].mxu0 }
 0x5d3   :  { %v10005_v59 = vadd.f32 %v3708_v43, %v11720_v38  ;;  %v9990_v44 = vadd.f32 %v3564_v8, %v11724_v42  ;;  %v3710_v34 = vpop.f32.mrb[73].mxu1  ;;  %v3566_v45 = vpop.f32.mrb[18].mxu0 }
 0x5d4   :  { %v10006_v47 = vadd.f32 %v3710_v34, %v11728_v1  ;;  %v9991_v49 = vadd.f32 %v3566_v45, %v11716_v12  ;;  %v3712_v51 = vpop.f32.mrb[74].mxu1  ;;  %v3568_v53 = vpop.f32.mrb[19].mxu0  ;;  %v3751_v61 = vmax.f32 %v9989_v36, 0.0 }
 0x5d5   :  { %v10007_v58 = vadd.f32 %v3712_v51, %v11720_v38  ;;  %v9992_v60 = vadd.f32 %v3568_v53, %v11724_v42  ;;  %v3714_v40 = vpop.f32.mrb[75].mxu1  ;;  %v3753_v14 = vmax.f32 %v10005_v59, 0.0  ;;  %v3752_v3 = vmax.f32 %v9990_v44, 0.0 }
 0x5d6   :  { %v3759_v31 = vmax.f32 %v9991_v49, 0.0  ;;  %v10008_v62 = vadd.f32 %v3714_v40, %v11728_v1  ;;  %v3754_v19 = vmax.f32 %v10006_v47, 0.0 }
 0x5d7   :  { %v3761_v5 = vmax.f32 %v10007_v58, 0.0  ;;  %v3760_v7 = vmax.f32 %v9992_v60, 0.0 }
 0x5d8   :  { %v3864_v9 = vadd.f32 %v3759_v31, %v3751_v61  ;;  %v3762_v10 = vmax.f32 %v10008_v62, 0.0 }
 0x5d9   :  { %v3890_v57 = vadd.f32 %v3761_v5, %v3753_v14  ;;  %v3877_v15 = vadd.f32 %v3760_v7, %v3752_v3  ;;  %v3572_v52 = vpop.f32.mrb[20].mxu0 }
 0x5da   :  { %v3903_v16 = vadd.f32 %v3762_v10, %v3754_v19  ;;  %v9993_v20 = vadd.f32 %v3572_v52, %v11716_v12  ;;  %v3718_v21 = vpop.f32.mrb[76].mxu1  ;;  %v3574_v11 = vpop.f32.mrb[21].mxu0 }
 0x5db   :  { %v10009_v17 = vadd.f32 %v3718_v21, %v11720_v38  ;;  %v9994_v22 = vadd.f32 %v3574_v11, %v11724_v42  ;;  %v3720_v33 = vpop.f32.mrb[77].mxu1  ;;  %v3576_v50 = vpop.f32.mrb[22].mxu0 }
 0x5dc   :  { %v3767_v24 = vmax.f32 %v9993_v20, 0.0  ;;  %v10010_v46 = vadd.f32 %v3720_v33, %v11728_v1  ;;  %v9995_v25 = vadd.f32 %v3576_v50, %v11716_v12  ;;  %v3722_v41 = vpop.f32.mrb[78].mxu1  ;;  %v3578_v27 = vpop.f32.mrb[23].mxu0 }
 0x5dd   :  { %v3769_v29 = vmax.f32 %v10009_v17, 0.0  ;;  %v3768_v0 = vmax.f32 %v9994_v22, 0.0  ;;  %v10011_v36 = vadd.f32 %v3722_v41, %v11720_v38  ;;  %v9996_v43 = vadd.f32 %v3578_v27, %v11724_v42  ;;  %v3724_v8 = vpop.f32.mrb[79].mxu1 }
 0x5de   :  { %v3865_v59 = vadd.f32 %v3864_v9, %v3767_v24  ;;  %v3770_v44 = vmax.f32 %v10010_v46, 0.0  ;;  %v3775_v34 = vmax.f32 %v9995_v25, 0.0  ;;  %v10012_v45 = vadd.f32 %v3724_v8, %v11728_v1 }
 0x5df   :  { %v3891_v47 = vadd.f32 %v3890_v57, %v3769_v29  ;;  %v3878_v49 = vadd.f32 %v3877_v15, %v3768_v0  ;;  %v3777_v51 = vmax.f32 %v10011_v36, 0.0  ;;  %v3776_v53 = vmax.f32 %v9996_v43, 0.0 }
 0x5e0   :  { %v3904_v58 = vadd.f32 %v3903_v16, %v3770_v44  ;;  %v3866_v60 = vadd.f32 %v3865_v59, %v3775_v34  ;;  %v3778_v40 = vmax.f32 %v10012_v45, 0.0 }
 0x5e1   :  { %v3892_v61 = vadd.f32 %v3891_v47, %v3777_v51  ;;  %v3879_v31 = vadd.f32 %v3878_v49, %v3776_v53  ;;  %v3582_v62 = vpop.f32.mrb[24].mxu0 }
 0x5e2   :  { %v3905_v14 = vadd.f32 %v3904_v58, %v3778_v40  ;;  %v9997_v3 = vadd.f32 %v3582_v62, %v11716_v12  ;;  %v3728_v5 = vpop.f32.mrb[80].mxu1  ;;  %v3584_v7 = vpop.f32.mrb[25].mxu0 }
 0x5e3   :  { %v10013_v19 = vadd.f32 %v3728_v5, %v11720_v38  ;;  %v9998_v9 = vadd.f32 %v3584_v7, %v11724_v42  ;;  %v3730_v10 = vpop.f32.mrb[81].mxu1  ;;  %v3586_v57 = vpop.f32.mrb[26].mxu0 }
 0x5e4   :  { %v3783_v15 = vmax.f32 %v9997_v3, 0.0  ;;  %v10014_v52 = vadd.f32 %v3730_v10, %v11728_v1  ;;  %v9999_v16 = vadd.f32 %v3586_v57, %v11716_v12  ;;  %v3732_v20 = vpop.f32.mrb[82].mxu1  ;;  %v3588_v21 = vpop.f32.mrb[27].mxu0 }
 0x5e5   :  { %v3785_v11 = vmax.f32 %v10013_v19, 0.0  ;;  %v3784_v17 = vmax.f32 %v9998_v9, 0.0  ;;  %v10015_v22 = vadd.f32 %v3732_v20, %v11720_v38  ;;  %v10000_v33 = vadd.f32 %v3588_v21, %v11724_v42  ;;  %v3734_v50 = vpop.f32.mrb[83].mxu1 }
 0x5e6   :  { %v3867_v24 = vadd.f32 %v3866_v60, %v3783_v15  ;;  %v3786_v46 = vmax.f32 %v10014_v52, 0.0  ;;  %v3791_v25 = vmax.f32 %v9999_v16, 0.0  ;;  %v10016_v41 = vadd.f32 %v3734_v50, %v11728_v1 }
 0x5e7   :  { %v3893_v27 = vadd.f32 %v3892_v61, %v3785_v11  ;;  %v3880_v29 = vadd.f32 %v3879_v31, %v3784_v17  ;;  %v3793_v0 = vmax.f32 %v10015_v22, 0.0  ;;  %v3792_v36 = vmax.f32 %v10000_v33, 0.0 }
 0x5e8   :  { %v3906_v43 = vadd.f32 %v3905_v14, %v3786_v46  ;;  %v3868_v8 = vadd.f32 %v3867_v24, %v3791_v25  ;;  %v3794_v59 = vmax.f32 %v10016_v41, 0.0 }
 0x5e9   :  { %v3894_v44 = vadd.f32 %v3893_v27, %v3793_v0  ;;  %v3881_v34 = vadd.f32 %v3880_v29, %v3792_v36  ;;  %v3592_v45 = vpop.f32.mrb[28].mxu0 }
 0x5ea   :  { %v3907_v47 = vadd.f32 %v3906_v43, %v3794_v59  ;;  %v10001_v49 = vadd.f32 %v3592_v45, %v11716_v12  ;;  %v3738_v51 = vpop.f32.mrb[84].mxu1  ;;  %v3594_v53 = vpop.f32.mrb[29].mxu0 }
 0x5eb   :  { %v10017_v58 = vadd.f32 %v3738_v51, %v11720_v38  ;;  %v10002_v60 = vadd.f32 %v3594_v53, %v11724_v42  ;;  %v3740_v40 = vpop.f32.mrb[85].mxu1  ;;  %v3596_v61 = vpop.f32.mrb[30].mxu0 }
 0x5ec   :  { %v3799_v31 = vmax.f32 %v10001_v49, 0.0  ;;  %v10018_v62 = vadd.f32 %v3740_v40, %v11728_v1  ;;  %v10003_v14 = vadd.f32 %v3596_v61, %v11716_v12  ;;  %v3742_v3 = vpop.f32.mrb[86].mxu1  ;;  %v3598_v5 = vpop.f32.mrb[31].mxu0 }
 0x5ed   :  { %v3801_v7 = vmax.f32 %v10017_v58, 0.0  ;;  %v3800_v19 = vmax.f32 %v10002_v60, 0.0  ;;  %v10019_v9 = vadd.f32 %v3742_v3, %v11720_v38  ;;  %v10004_v10 = vadd.f32 %v3598_v5, %v11724_v42  ;;  %v3744_v57 = vpop.f32.mrb[87].mxu1 }
 0x5ee   :  { %v3869_v15 = vadd.f32 %v3868_v8, %v3799_v31  ;;  %v3802_v52 = vmax.f32 %v10018_v62, 0.0  ;;  %v3807_v16 = vmax.f32 %v10003_v14, 0.0  ;;  %v10020_v20 = vadd.f32 %v3744_v57, %v11728_v1 }
 0x5ef   :  { %v3895_v21 = vadd.f32 %v3894_v44, %v3801_v7  ;;  %v3882_v11 = vadd.f32 %v3881_v34, %v3800_v19  ;;  %v3809_v17 = vmax.f32 %v10019_v9, 0.0  ;;  %v3808_v22 = vmax.f32 %v10004_v10, 0.0 }
 0x5f0   :  { %v3908_v33 = vadd.f32 %v3907_v47, %v3802_v52  ;;  %v3870_v12 = vadd.f32 %v3869_v15, %v3807_v16  ;;  %v3810_v50 = vmax.f32 %v10020_v20, 0.0  ;;  %v3964_v9 = vrot.slane %v3956_v63, %v11676_v18  ;;  %v4166_v20 = vld [vmem:[#allocation20 + $0x440] sm:$0xff] }
 0x5f1   :  { %v3896_v24 = vadd.f32 %v3895_v21, %v3809_v17  ;;  %v3883_v46 = vadd.f32 %v3882_v11, %v3808_v22  ;;  %v4170_v11 = vld [vmem:[#allocation20 + $0x460] sm:$0xff]  ;;  %v4167_v17 = vld [vmem:[#allocation20 + $0x448] sm:$0xff] }
 0x5f2   :  { %v3871_v25 = vrot.slane %v3870_v12, 4  ;;  %v3909_v41 = vadd.f32 %v3908_v33, %v3810_v50  ;;  %v4171_v22 = vld [vmem:[#allocation20 + $0x468] sm:$0xff]  ;;  %v9415_v63 = vcombine.high %v4166_v20, %v4170_v11 }
 0x5f3   :  { %v3897_v38 = vrot.slane %v3896_v24, 4  ;;  %v3884_v27 = vrot.slane %v3883_v46, 4  ;;  %v9417_v33 = vcombine.high %v4167_v17, %v4171_v22  ;;  %v4175_v50 = vld [vmem:[#allocation20 + $0x488] sm:$0xff] }
 0x5f4   :  { %v3872_v42 = vadd.f32 %v3871_v25, %v3870_v12  ;;  %v3910_v29 = vrot.slane %v3909_v41, 4  ;;  %v4178_v12 = vld [vmem:[#allocation20 + $0x4a0] sm:$0xff]  ;;  %v9414_v25 = vcombine.low %v4166_v20, %v4170_v11 }
 0x5f5   :  { %v3898_v0 = vadd.f32 %v3897_v38, %v3896_v24  ;;  %v3885_v36 = vadd.f32 %v3884_v27, %v3883_v46  ;;  %v4179_v24 = vld [vmem:[#allocation20 + $0x4a8] sm:$0xff] }
 0x5f6   :  { %v3873_v43 = vrot.slane %v3872_v42, 2  ;;  %v3911_v8 = vadd.f32 %v3910_v29, %v3909_v41  ;;  %v9416_v41 = vcombine.low %v4167_v17, %v4171_v22  ;;  %v9425_v27 = vcombine.high %v4175_v50, %v4179_v24  ;;  %v4186_v29 = vld [vmem:[#allocation20 + $0x4e0] sm:$0xff] }
 0x5f7   :  { %v3899_v1 = vrot.slane %v3898_v0, 2  ;;  %v3886_v59 = vrot.slane %v3885_v36, 2  ;;  %v9424_v2 = vcombine.low %v4175_v50, %v4179_v24  ;;  %v4222_v17 = vld [vmem:[#allocation20 + $0x600] sm:$0xff] }
 0x5f8   :  { %v3874_v44 = vadd.f32 %v3873_v43, %v3872_v42  ;;  %v3912_v34 = vrot.slane %v3911_v8, 2  ;;  %v4182_v42 = vld [vmem:[#allocation20 + $0x4c0] sm:$0xff]  ;;  %v4191_v43 = vld [vmem:[#allocation20 + $0x508] sm:$0xff] }
 0x5f9   :  { %v3900_v45 = vadd.f32 %v3899_v1, %v3898_v0  ;;  %v3887_v47 = vadd.f32 %v3886_v59, %v3885_v36  ;;  %v4183_v0 = vld [vmem:[#allocation20 + $0x4c8] sm:$0xff]  ;;  %v9431_v30 = vcombine.high %v4182_v42, %v4186_v29  ;;  %v9430_v1 = vcombine.low %v4182_v42, %v4186_v29  ;;  %v4226_v22 = vld [vmem:[#allocation20 + $0x620] sm:$0xff] }
 0x5fa   :  { %v3875_v49 = vrot.slane %v3874_v44, 1  ;;  %v3913_v51 = vadd.f32 %v3912_v34, %v3911_v8  ;;  %v4187_v36 = vld [vmem:[#allocation20 + $0x4e8] sm:$0xff]  ;;  %v9471_v50 = vcombine.high %v4222_v17, %v4226_v22  ;;  %v9470_v42 = vcombine.low %v4222_v17, %v4226_v22 }
 0x5fb   :  { %v3901_v53 = vrot.slane %v3900_v45, 1  ;;  %v3888_v58 = vrot.slane %v3887_v47, 1  ;;  %v9433_v26 = vcombine.high %v4183_v0, %v4187_v36  ;;  %v4195_v8 = vld [vmem:[#allocation20 + $0x528] sm:$0xff]  ;;  %v9432_v59 = vcombine.low %v4183_v0, %v4187_v36 }
 0x5fc   :  { %v3876_v60 = vadd.f32 %v3875_v49, %v3874_v44  ;;  %v3914_v40 = vrot.slane %v3913_v51, 1  ;;  %v9441_v34 = vcombine.high %v4191_v43, %v4195_v8  ;;  %v4199_v49 = vld [vmem:[#allocation20 + $0x548] sm:$0xff] }
 0x5fd   :  { %v3902_v61 = vadd.f32 %v3901_v53, %v3900_v45  ;;  %v3889_v31 = vadd.f32 %v3888_v58, %v3887_v47  ;;  %v4198_v45 = vld [vmem:[#allocation20 + $0x540] sm:$0xff]  ;;  %v9440_v58 = vcombine.low %v4191_v43, %v4195_v8 }
 0x5fe   :  { %v3915_v62 = vadd.f32 %v3914_v40, %v3913_v51  ;;  %v4202_v47 = vld [vmem:[#allocation20 + $0x560] sm:$0xff]  ;;  %v4203_v51 = vld [vmem:[#allocation20 + $0x568] sm:$0xff] }
 0x5ff   :  { %v3926_v14 = vcombine.low %v3876_v60, %v3889_v31  ;;  %v9447_v60 = vcombine.high %v4198_v45, %v4202_v47  ;;  %v9449_v40 = vcombine.high %v4199_v49, %v4203_v51  ;;  %v4210_v31 = vld [vmem:[#allocation20 + $0x5a0] sm:$0xff] }
 0x600   :  { %v3927_v3 = vcombine.low %v3902_v61, %v3915_v62  ;;  %v4206_v61 = vld [vmem:[#allocation20 + $0x580] sm:$0xff]  ;;  %v4207_v62 = vld [vmem:[#allocation20 + $0x588] sm:$0xff] }
 0x601   :  { %v3948_v5 = vrot.slane %v3926_v14, %v11676_v18  ;;  %v4211_v14 = vld [vmem:[#allocation20 + $0x5a8] sm:$0xff] }
 0x602   :  { %v3955_v7 = vrot.slane %v3927_v3, %v11676_v18  ;;  %v9446_v3 = vcombine.low %v4198_v45, %v4202_v47  ;;  %v9456_v20 = vcombine.low %v4207_v62, %v4211_v14 }
 0x604   :  { %v3957_v19 = vcombine.low %v3948_v5, %v3955_v7  ;;  %v9448_v5 = vcombine.low %v4199_v49, %v4203_v51  ;;  %v9455_v7 = vcombine.high %v4206_v61, %v4210_v31 }
 0x606   :  { %v3971_v10 = vrot.slane %v3957_v19, %v11676_v18  ;;  %v4174_v18 = vld [vmem:[#allocation20 + $0x480] sm:$0xff]  ;;  %v9457_v19 = vcombine.high %v4207_v62, %v4211_v14 }
 0x607   :  { %v9423_v38 = vcombine.high %v4174_v18, %v4178_v12  ;;  %v9422_v13 = vcombine.low %v4174_v18, %v4178_v12  ;;  %v4223_v18 = vld [vmem:[#allocation20 + $0x608] sm:$0xff] }
 0x608   :  { %v3972_v57 = vcombine.low %v3964_v9, %v3971_v10  ;;  %v4214_v9 = vld [vmem:[#allocation20 + $0x5c0] sm:$0xff] }
 0x609   :  { %v4218_v10 = vld [vmem:[#allocation20 + $0x5e0] sm:$0xff] }
 0x60a   :  { %v11769_v15 = vmul.f32 0.015625, %v3972_v57  ;;  %v4215_v57 = vld [vmem:[#allocation20 + $0x5c8] sm:$0xff] }
 0x60c   :  { %v3989_v52 = vrot.slane %v11769_v15, %v11401_v39  ;;  %v3985_v16 = vrot.slane %v11769_v15, %v11398_v37  ;;  %v3997_v21 = vrot.slane %v11769_v15, %v11523_v48 }
 0x60e   :  { %v11777_v54 = vpack.c.bf16 %v3989_v52, %v3989_v52  ;;  %v11779_v55 = vpack.c.bf16 %v3985_v16, %v3985_v16  ;;  %v11785_v46 = vpack.c.bf16 %v3997_v21, %v3997_v21  ;;  %v4219_v52 = vld [vmem:[#allocation20 + $0x5e8] sm:$0xff]  ;;  %v9454_v16 = vcombine.low %v4206_v61, %v4210_v31 }
 0x60f   :  { %v9463_v21 = vcombine.high %v4214_v9, %v4218_v10  ;;  %v9465_v11 = vcombine.high %v4215_v57, %v4219_v52  ;;  %v9464_v12 = vcombine.low %v4215_v57, %v4219_v52 }
 0x610   :  { %7176 = vmatprep.mubr.bf16.mxu0 %v11777_v54  ;;  %7340 = vmatprep.mubr.bf16.mxu1 %v11777_v54 }
 0x611   :  { %7177 = vmatmul.mubr.bf16.vlgmr.msra.gmra.mrb[32].mxu0 %v11779_v55  ;;  %7341 = vmatmul.mubr.bf16.vlgmr.msra.gmra.mrb[88].mxu1 %v11779_v55 }
 0x612   :  { %7186 = vmatpush1.bf16.msra.mxu0 %v9406_v28  ;;  %7350 = vmatpush1.bf16.msra.mxu1 %v9408_v6  ;;  %v4190_v28 = vld [vmem:[#allocation20 + $0x500] sm:$0xff] }
 0x613   :  { %7217 = vmatprep.mubr.bf16.mxu0 %v11785_v46  ;;  %7381 = vmatprep.mubr.bf16.mxu1 %v11785_v46  ;;  %v4194_v6 = vld [vmem:[#allocation20 + $0x520] sm:$0xff] }
 0x614   :  { %7187 = vmatprep.subr.bf16.mxu0 %v9415_v63  ;;  %7351 = vmatprep.subr.bf16.mxu1 %v9417_v33  ;;  %v9439_v44 = vcombine.high %v4190_v28, %v4194_v6  ;;  %v9438_v53 = vcombine.low %v4190_v28, %v4194_v6  ;;  %v4227_v63 = vld [vmem:[#allocation20 + $0x628] sm:$0xff]  ;;  %v9462_v33 = vcombine.low %v4214_v9, %v4218_v10 }
 0x615   :  { %v9473_v24 = vcombine.high %v4223_v18, %v4227_v63  ;;  %v9472_v29 = vcombine.low %v4223_v18, %v4227_v63 }
 0x616   :  { %7188 = vmatpush1.bf16.msra.mxu0 %v9414_v25  ;;  %7352 = vmatpush1.bf16.msra.mxu1 %v9416_v41  ;;  %v4230_v25 = vld [vmem:[#allocation20 + $0x640] sm:$0xff] }
 0x617   :  { %7189 = vmatprep.subr.bf16.mxu0 %v9423_v38  ;;  %7353 = vmatprep.subr.bf16.mxu1 %v9425_v27  ;;  %v4234_v41 = vld [vmem:[#allocation20 + $0x660] sm:$0xff]  ;;  %v4231_v38 = vld [vmem:[#allocation20 + $0x648] sm:$0xff] }
 0x618   :  { %v4235_v27 = vld [vmem:[#allocation20 + $0x668] sm:$0xff]  ;;  %v9479_v0 = vcombine.high %v4230_v25, %v4234_v41  ;;  %v9478_v28 = vcombine.low %v4230_v25, %v4234_v41 }
 0x619   :  { %v9481_v36 = vcombine.high %v4231_v38, %v4235_v27  ;;  %v9480_v6 = vcombine.low %v4231_v38, %v4235_v27 }
 0x61a   :  { %7190 = vmatpush1.bf16.msra.mxu0 %v9422_v13  ;;  %7354 = vmatpush1.bf16.msra.mxu1 %v9424_v2  ;;  %v4238_v13 = vld [vmem:[#allocation20 + $0x680] sm:$0xff] }
 0x61b   :  { %7191 = vmatprep.subr.bf16.mxu0 %v9431_v30  ;;  %7355 = vmatprep.subr.bf16.mxu1 %v9433_v26  ;;  %v4242_v2 = vld [vmem:[#allocation20 + $0x6a0] sm:$0xff]  ;;  %v4239_v30 = vld [vmem:[#allocation20 + $0x688] sm:$0xff] }
 0x61c   :  { %v4243_v26 = vld [vmem:[#allocation20 + $0x6a8] sm:$0xff]  ;;  %v9487_v43 = vcombine.high %v4238_v13, %v4242_v2  ;;  %v9486_v45 = vcombine.low %v4238_v13, %v4242_v2 }
 0x61d   :  { %v9489_v8 = vcombine.high %v4239_v30, %v4243_v26  ;;  %v9488_v47 = vcombine.low %v4239_v30, %v4243_v26  ;;  %v3993_v30 = vrot.slane %v11769_v15, %v11516_v4 }
 0x61e   :  { %7192 = vmatpush1.bf16.msra.mxu0 %v9430_v1  ;;  %7356 = vmatpush1.bf16.msra.mxu1 %v9432_v59  ;;  %v4246_v1 = vld [vmem:[#allocation20 + $0x6c0] sm:$0xff] }
 0x61f   :  { %7193 = vmatprep.subr.bf16.mxu0 %v9439_v44  ;;  %7357 = vmatprep.subr.bf16.mxu1 %v9441_v34  ;;  %v4250_v59 = vld [vmem:[#allocation20 + $0x6e0] sm:$0xff]  ;;  %v4247_v44 = vld [vmem:[#allocation20 + $0x6c8] sm:$0xff] }
 0x620   :  { %v4251_v34 = vld [vmem:[#allocation20 + $0x6e8] sm:$0xff]  ;;  %v9495_v49 = vcombine.high %v4246_v1, %v4250_v59  ;;  %v9494_v61 = vcombine.low %v4246_v1, %v4250_v59 }
 0x621   :  { %v9497_v51 = vcombine.high %v4247_v44, %v4251_v34  ;;  %v9496_v31 = vcombine.low %v4247_v44, %v4251_v34  ;;  %v4295_v1 = vld [vmem:[#allocation20 + $0x848] sm:$0xff]  ;;  %v11799_v34 = vpack.c.bf16 %v3993_v30, %v3993_v30 }
 0x622   :  { %7194 = vmatpush1.bf16.msra.mxu0 %v9438_v53  ;;  %7358 = vmatpush1.bf16.msra.mxu1 %v9440_v58  ;;  %v4254_v53 = vld [vmem:[#allocation20 + $0x700] sm:$0xff]  ;;  %v4299_v59 = vld [vmem:[#allocation20 + $0x868] sm:$0xff] }
 0x623   :  { %7195 = vmatprep.subr.bf16.mxu0 %v9447_v60  ;;  %7359 = vmatprep.subr.bf16.mxu1 %v9449_v40  ;;  %v4258_v58 = vld [vmem:[#allocation20 + $0x720] sm:$0xff]  ;;  %v4255_v60 = vld [vmem:[#allocation20 + $0x708] sm:$0xff] }
 0x624   :  { %v4259_v40 = vld [vmem:[#allocation20 + $0x728] sm:$0xff]  ;;  %v9503_v62 = vcombine.high %v4254_v53, %v4258_v58  ;;  %v9502_v9 = vcombine.low %v4254_v53, %v4258_v58  ;;  %v4302_v53 = vld [vmem:[#allocation20 + $0x880] sm:$0xff] }
 0x625   :  { %v9505_v14 = vcombine.high %v4255_v60, %v4259_v40  ;;  %v9504_v10 = vcombine.low %v4255_v60, %v4259_v40  ;;  %v4306_v58 = vld [vmem:[#allocation20 + $0x8a0] sm:$0xff]  ;;  %v4303_v60 = vld [vmem:[#allocation20 + $0x888] sm:$0xff] }
 0x626   :  { %7196 = vmatpush1.bf16.msra.mxu0 %v9446_v3  ;;  %7360 = vmatpush1.bf16.msra.mxu1 %v9448_v5  ;;  %v4262_v3 = vld [vmem:[#allocation20 + $0x740] sm:$0xff]  ;;  %v4307_v40 = vld [vmem:[#allocation20 + $0x8a8] sm:$0xff] }
 0x627   :  { %7197 = vmatprep.subr.bf16.mxu0 %v9455_v7  ;;  %7361 = vmatprep.subr.bf16.mxu1 %v9457_v19  ;;  %v4266_v5 = vld [vmem:[#allocation20 + $0x760] sm:$0xff]  ;;  %v4263_v7 = vld [vmem:[#allocation20 + $0x748] sm:$0xff] }
 0x628   :  { %v4267_v19 = vld [vmem:[#allocation20 + $0x768] sm:$0xff]  ;;  %v9511_v57 = vcombine.high %v4262_v3, %v4266_v5  ;;  %v9510_v17 = vcombine.low %v4262_v3, %v4266_v5  ;;  %v4310_v3 = vld [vmem:[#allocation20 + $0x8c0] sm:$0xff] }
 0x629   :  { %v9513_v52 = vcombine.high %v4263_v7, %v4267_v19  ;;  %v9512_v22 = vcombine.low %v4263_v7, %v4267_v19  ;;  %v4314_v5 = vld [vmem:[#allocation20 + $0x8e0] sm:$0xff]  ;;  %v4311_v7 = vld [vmem:[#allocation20 + $0x8c8] sm:$0xff] }
 0x62a   :  { %7198 = vmatpush1.bf16.msra.mxu0 %v9454_v16  ;;  %7362 = vmatpush1.bf16.msra.mxu1 %v9456_v20  ;;  %v4270_v16 = vld [vmem:[#allocation20 + $0x780] sm:$0xff]  ;;  %v4315_v19 = vld [vmem:[#allocation20 + $0x8e8] sm:$0xff] }
 0x62b   :  { %7199 = vmatprep.subr.bf16.mxu0 %v9463_v21  ;;  %7363 = vmatprep.subr.bf16.mxu1 %v9465_v11  ;;  %v4274_v20 = vld [vmem:[#allocation20 + $0x7a0] sm:$0xff]  ;;  %v4271_v21 = vld [vmem:[#allocation20 + $0x788] sm:$0xff] }
 0x62c   :  { %v4275_v11 = vld [vmem:[#allocation20 + $0x7a8] sm:$0xff]  ;;  %v9519_v18 = vcombine.high %v4270_v16, %v4274_v20  ;;  %v9518_v25 = vcombine.low %v4270_v16, %v4274_v20  ;;  %v4318_v16 = vld [vmem:[#allocation20 + $0x900] sm:$0xff] }
 0x62d   :  { %v9521_v63 = vcombine.high %v4271_v21, %v4275_v11  ;;  %v9520_v41 = vcombine.low %v4271_v21, %v4275_v11  ;;  %v4322_v20 = vld [vmem:[#allocation20 + $0x920] sm:$0xff]  ;;  %v4319_v21 = vld [vmem:[#allocation20 + $0x908] sm:$0xff] }
 0x62e   :  { %7200 = vmatpush1.bf16.msra.mxu0 %v9462_v33  ;;  %7364 = vmatpush1.bf16.msra.mxu1 %v9464_v12  ;;  %v4278_v33 = vld [vmem:[#allocation20 + $0x7c0] sm:$0xff]  ;;  %v4323_v11 = vld [vmem:[#allocation20 + $0x928] sm:$0xff] }
 0x62f   :  { %7201 = vmatprep.subr.bf16.mxu0 %v9471_v50  ;;  %7365 = vmatprep.subr.bf16.mxu1 %v9473_v24  ;;  %v4282_v12 = vld [vmem:[#allocation20 + $0x7e0] sm:$0xff]  ;;  %v4279_v50 = vld [vmem:[#allocation20 + $0x7c8] sm:$0xff] }
 0x630   :  { %v4283_v24 = vld [vmem:[#allocation20 + $0x7e8] sm:$0xff]  ;;  %v9527_v38 = vcombine.high %v4278_v33, %v4282_v12  ;;  %v9526_v13 = vcombine.low %v4278_v33, %v4282_v12  ;;  %v4326_v33 = vld [vmem:[#allocation20 + $0x940] sm:$0xff] }
 0x631   :  { %v9529_v27 = vcombine.high %v4279_v50, %v4283_v24  ;;  %v9528_v2 = vcombine.low %v4279_v50, %v4283_v24  ;;  %v4330_v12 = vld [vmem:[#allocation20 + $0x960] sm:$0xff]  ;;  %v4327_v50 = vld [vmem:[#allocation20 + $0x948] sm:$0xff] }
 0x632   :  { %7202 = vmatpush1.bf16.msra.mxu0 %v9470_v42  ;;  %7366 = vmatpush1.bf16.msra.mxu1 %v9472_v29  ;;  %v4286_v42 = vld [vmem:[#allocation20 + $0x800] sm:$0xff]  ;;  %v4331_v24 = vld [vmem:[#allocation20 + $0x968] sm:$0xff] }
 0x633   :  { %7203 = vmatprep.subr.bf16.mxu0 %v9479_v0  ;;  %7367 = vmatprep.subr.bf16.mxu1 %v9481_v36  ;;  %v4290_v29 = vld [vmem:[#allocation20 + $0x820] sm:$0xff]  ;;  %v4287_v0 = vld [vmem:[#allocation20 + $0x808] sm:$0xff] }
 0x634   :  { %v4291_v36 = vld [vmem:[#allocation20 + $0x828] sm:$0xff]  ;;  %v9535_v26 = vcombine.high %v4286_v42, %v4290_v29  ;;  %v9534_v44 = vcombine.low %v4286_v42, %v4290_v29  ;;  %v4334_v42 = vld [vmem:[#allocation20 + $0x980] sm:$0xff] }
 0x635   :  { %v4338_v29 = vld [vmem:[#allocation20 + $0x9a0] sm:$0xff] }
 0x636   :  { %7204 = vmatpush1.bf16.msra.mxu0 %v9478_v28  ;;  %7368 = vmatpush1.bf16.msra.mxu1 %v9480_v6  ;;  %v9537_v28 = vcombine.high %v4287_v0, %v4291_v36  ;;  %v4005_v6 = vrot.slane %v11769_v15, %v11709_v35  ;;  %v9583_v30 = vcombine.high %v4334_v42, %v4338_v29 }
 0x637   :  { %7205 = vmatprep.subr.bf16.mxu0 %v9487_v43  ;;  %7369 = vmatprep.subr.bf16.mxu1 %v9489_v8  ;;  %v4294_v43 = vld [vmem:[#allocation20 + $0x840] sm:$0xff] }
 0x638   :  { %v4298_v8 = vld [vmem:[#allocation20 + $0x860] sm:$0xff] }
 0x63a   :  { %7206 = vmatpush1.bf16.msra.mxu0 %v9486_v45  ;;  %7370 = vmatpush1.bf16.msra.mxu1 %v9488_v47  ;;  %v9536_v45 = vcombine.low %v4287_v0, %v4291_v36  ;;  %v11801_v47 = vpack.c.bf16 %v4005_v6, %v4005_v6  ;;  %v4335_v0 = vld [vmem:[#allocation20 + $0x988] sm:$0xff]  ;;  %v4346_v6 = vld [vmem:[#allocation20 + $0x9e0] sm:$0xff] }
 0x63b   :  { %7207 = vmatprep.subr.bf16.mxu0 %v9495_v49  ;;  %7371 = vmatprep.subr.bf16.mxu1 %v9497_v51  ;;  %v9543_v49 = vcombine.high %v4294_v43, %v4298_v8  ;;  %v9545_v51 = vcombine.high %v4295_v1, %v4299_v59  ;;  %v4339_v36 = vld [vmem:[#allocation20 + $0x9a8] sm:$0xff] }
 0x63e   :  { %7208 = vmatpush1.bf16.msra.mxu0 %v9494_v61  ;;  %7372 = vmatpush1.bf16.msra.mxu1 %v9496_v31  ;;  %v9542_v61 = vcombine.low %v4294_v43, %v4298_v8  ;;  %v9544_v31 = vcombine.low %v4295_v1, %v4299_v59  ;;  %v4343_v43 = vld [vmem:[#allocation20 + $0x9c8] sm:$0xff]  ;;  %v9582_v1 = vcombine.low %v4334_v42, %v4338_v29 }
 0x63f   :  { %7209 = vmatprep.subr.bf16.mxu0 %v9503_v62  ;;  %7373 = vmatprep.subr.bf16.mxu1 %v9505_v14  ;;  %v9551_v62 = vcombine.high %v4302_v53, %v4306_v58  ;;  %v9553_v14 = vcombine.high %v4303_v60, %v4307_v40  ;;  %v4347_v8 = vld [vmem:[#allocation20 + $0x9e8] sm:$0xff]  ;;  %v9584_v59 = vcombine.low %v4335_v0, %v4339_v36 }
 0x640   :  { %v4383_v42 = vld [vmem:[#allocation20 + $0xb08] sm:$0xff] }
 0x641   :  { %v4387_v29 = vld [vmem:[#allocation20 + $0xb28] sm:$0xff] }
 0x642   :  { %7210 = vmatpush1.bf16.msra.mxu0 %v9502_v9  ;;  %7374 = vmatpush1.bf16.msra.mxu1 %v9504_v10  ;;  %v9550_v9 = vcombine.low %v4302_v53, %v4306_v58  ;;  %v9552_v10 = vcombine.low %v4303_v60, %v4307_v40  ;;  %v4351_v53 = vld [vmem:[#allocation20 + $0xa08] sm:$0xff]  ;;  %v9592_v40 = vcombine.low %v4343_v43, %v4347_v8 }
 0x643   :  { %7211 = vmatprep.subr.bf16.mxu0 %v9511_v57  ;;  %7375 = vmatprep.subr.bf16.mxu1 %v9513_v52  ;;  %v9559_v57 = vcombine.high %v4310_v3, %v4314_v5  ;;  %v9561_v52 = vcombine.high %v4311_v7, %v4315_v19  ;;  %v4355_v58 = vld [vmem:[#allocation20 + $0xa28] sm:$0xff] }
 0x646   :  { %7212 = vmatpush1.bf16.msra.mxu0 %v9510_v17  ;;  %7376 = vmatpush1.bf16.msra.mxu1 %v9512_v22  ;;  %v9558_v17 = vcombine.low %v4310_v3, %v4314_v5  ;;  %v9560_v22 = vcombine.low %v4311_v7, %v4315_v19  ;;  %v4359_v3 = vld [vmem:[#allocation20 + $0xa48] sm:$0xff]  ;;  %v9600_v19 = vcombine.low %v4351_v53, %v4355_v58 }
 0x647   :  { %7213 = vmatprep.subr.bf16.mxu0 %v9519_v18  ;;  %7377 = vmatprep.subr.bf16.mxu1 %v9521_v63  ;;  %v9567_v18 = vcombine.high %v4318_v16, %v4322_v20  ;;  %v9569_v63 = vcombine.high %v4319_v21, %v4323_v11  ;;  %v4363_v5 = vld [vmem:[#allocation20 + $0xa68] sm:$0xff] }
 0x64a   :  { %7214 = vmatpush1.bf16.msra.mxu0 %v9518_v25  ;;  %7378 = vmatpush1.bf16.msra.mxu1 %v9520_v41  ;;  %v9566_v25 = vcombine.low %v4318_v16, %v4322_v20  ;;  %v9568_v41 = vcombine.low %v4319_v21, %v4323_v11  ;;  %v4367_v16 = vld [vmem:[#allocation20 + $0xa88] sm:$0xff]  ;;  %v9608_v11 = vcombine.low %v4359_v3, %v4363_v5 }
 0x64b   :  { %7215 = vmatprep.subr.bf16.mxu0 %v9527_v38  ;;  %7379 = vmatprep.subr.bf16.mxu1 %v9529_v27  ;;  %v9575_v38 = vcombine.high %v4326_v33, %v4330_v12  ;;  %v9577_v27 = vcombine.high %v4327_v50, %v4331_v24  ;;  %v4371_v20 = vld [vmem:[#allocation20 + $0xaa8] sm:$0xff] }
 0x64e   :  { %7216 = vmatpush1.bf16.msra.mxu0 %v9526_v13  ;;  %7380 = vmatpush1.bf16.msra.mxu1 %v9528_v2  ;;  %v9574_v13 = vcombine.low %v4326_v33, %v4330_v12  ;;  %v9576_v2 = vcombine.low %v4327_v50, %v4331_v24  ;;  %v4375_v33 = vld [vmem:[#allocation20 + $0xac8] sm:$0xff]  ;;  %v9616_v24 = vcombine.low %v4367_v16, %v4371_v20 }
 0x64f   :  { %7226 = vmatprep.subr.bf16.mxu0 %v9535_v26  ;;  %7390 = vmatprep.subr.bf16.mxu1 %v9537_v28  ;;  %v9585_v26 = vcombine.high %v4335_v0, %v4339_v36  ;;  %v4342_v28 = vld [vmem:[#allocation20 + $0x9c0] sm:$0xff]  ;;  %v4379_v12 = vld [vmem:[#allocation20 + $0xae8] sm:$0xff] }
 0x650   :  { %v9590_v60 = vcombine.low %v4342_v28, %v4346_v6  ;;  %v9624_v36 = vcombine.low %v4375_v33, %v4379_v12 }
 0x651   :  { %7218 = vmatmul.mubr.bf16.vlgmr.msra.gmra.mrb[32].mxu0 %v11799_v34  ;;  %7382 = vmatmul.mubr.bf16.vlgmr.msra.gmra.mrb[88].mxu1 %v11799_v34 }
 0x652   :  { %7227 = vmatpush1.bf16.msra.mxu0 %v9534_v44  ;;  %7258 = vmatprep.mubr.bf16.mxu0 %v11801_v47  ;;  %v9591_v44 = vcombine.high %v4342_v28, %v4346_v6  ;;  %v4391_v28 = vld [vmem:[#allocation20 + $0xb48] sm:$0xff] }
 0x653   :  { %7391 = vmatpush1.bf16.msra.mxu1 %v9536_v45  ;;  %7422 = vmatprep.mubr.bf16.mxu1 %v11801_v47  ;;  %v9593_v45 = vcombine.high %v4343_v43, %v4347_v8  ;;  %v4395_v6 = vld [vmem:[#allocation20 + $0xb68] sm:$0xff]  ;;  %v9632_v8 = vcombine.low %v4383_v42, %v4387_v29 }
 0x654   :  { %7228 = vmatprep.subr.bf16.mxu0 %v9543_v49  ;;  %7392 = vmatprep.subr.bf16.mxu1 %v9545_v51  ;;  %v4350_v49 = vld [vmem:[#allocation20 + $0xa00] sm:$0xff] }
 0x655   :  { %v4354_v51 = vld [vmem:[#allocation20 + $0xa20] sm:$0xff] }
 0x656   :  { %7229 = vmatpush1.bf16.msra.mxu0 %v9542_v61  ;;  %v9599_v61 = vcombine.high %v4350_v49, %v4354_v51  ;;  %v9598_v7 = vcombine.low %v4350_v49, %v4354_v51  ;;  %v4399_v49 = vld [vmem:[#allocation20 + $0xb88] sm:$0xff] }
 0x657   :  { %7393 = vmatpush1.bf16.msra.mxu1 %v9544_v31  ;;  %7230 = vmatprep.subr.bf16.mxu0 %v9551_v62  ;;  %v9601_v31 = vcombine.high %v4351_v53, %v4355_v58  ;;  %v4358_v62 = vld [vmem:[#allocation20 + $0xa40] sm:$0xff]  ;;  %v4403_v51 = vld [vmem:[#allocation20 + $0xba8] sm:$0xff]  ;;  %v9640_v58 = vcombine.low %v4391_v28, %v4395_v6 }
 0x658   :  { %7394 = vmatprep.subr.bf16.mxu1 %v9553_v14  ;;  %v4362_v14 = vld [vmem:[#allocation20 + $0xa60] sm:$0xff] }
 0x659   :  { %v9606_v21 = vcombine.low %v4358_v62, %v4362_v14 }
 0x65a   :  { %7231 = vmatpush1.bf16.msra.mxu0 %v9550_v9  ;;  %v9607_v9 = vcombine.high %v4358_v62, %v4362_v14  ;;  %v4407_v62 = vld [vmem:[#allocation20 + $0xbc8] sm:$0xff] }
 0x65b   :  { %7395 = vmatpush1.bf16.msra.mxu1 %v9552_v10  ;;  %7232 = vmatprep.subr.bf16.mxu0 %v9559_v57  ;;  %v9609_v10 = vcombine.high %v4359_v3, %v4363_v5  ;;  %v4366_v57 = vld [vmem:[#allocation20 + $0xa80] sm:$0xff]  ;;  %v4411_v14 = vld [vmem:[#allocation20 + $0xbe8] sm:$0xff]  ;;  %v9648_v5 = vcombine.low %v4399_v49, %v4403_v51 }
 0x65c   :  { %7396 = vmatprep.subr.bf16.mxu1 %v9561_v52  ;;  %v4370_v52 = vld [vmem:[#allocation20 + $0xaa0] sm:$0xff] }
 0x65d   :  { %v9614_v50 = vcombine.low %v4366_v57, %v4370_v52 }
 0x65e   :  { %7233 = vmatpush1.bf16.msra.mxu0 %v9558_v17  ;;  %v9615_v17 = vcombine.high %v4366_v57, %v4370_v52  ;;  %v4415_v57 = vld [vmem:[#allocation20 + $0xc08] sm:$0xff] }
 0x65f   :  { %7397 = vmatpush1.bf16.msra.mxu1 %v9560_v22  ;;  %7234 = vmatprep.subr.bf16.mxu0 %v9567_v18  ;;  %v9617_v22 = vcombine.high %v4367_v16, %v4371_v20  ;;  %v4374_v18 = vld [vmem:[#allocation20 + $0xac0] sm:$0xff]  ;;  %v4419_v52 = vld [vmem:[#allocation20 + $0xc28] sm:$0xff]  ;;  %v9656_v20 = vcombine.low %v4407_v62, %v4411_v14 }
 0x660   :  { %7398 = vmatprep.subr.bf16.mxu1 %v9569_v63  ;;  %v4378_v63 = vld [vmem:[#allocation20 + $0xae0] sm:$0xff] }
 0x661   :  { %v9622_v0 = vcombine.low %v4374_v18, %v4378_v63 }
 0x662   :  { %7235 = vmatpush1.bf16.msra.mxu0 %v9566_v25  ;;  %v9623_v25 = vcombine.high %v4374_v18, %v4378_v63  ;;  %v4422_v18 = vld [vmem:[#allocation20 + $0xc40] sm:$0xff] }
 0x663   :  { %7399 = vmatpush1.bf16.msra.mxu1 %v9568_v41  ;;  %7236 = vmatprep.subr.bf16.mxu0 %v9575_v38  ;;  %v9625_v41 = vcombine.high %v4375_v33, %v4379_v12  ;;  %v4382_v38 = vld [vmem:[#allocation20 + $0xb00] sm:$0xff]  ;;  %v4423_v12 = vld [vmem:[#allocation20 + $0xc48] sm:$0xff] }
 0x664   :  { %7400 = vmatprep.subr.bf16.mxu1 %v9577_v27  ;;  %v4386_v27 = vld [vmem:[#allocation20 + $0xb20] sm:$0xff] }
 0x665   :  { %v9630_v43 = vcombine.low %v4382_v38, %v4386_v27  ;;  %v4426_v63 = vld [vmem:[#allocation20 + $0xc60] sm:$0xff] }
 0x666   :  { %7237 = vmatpush1.bf16.msra.mxu0 %v9574_v13  ;;  %v9631_v13 = vcombine.high %v4382_v38, %v4386_v27  ;;  %v4430_v38 = vld [vmem:[#allocation20 + $0xc80] sm:$0xff] }
 0x667   :  { %7401 = vmatpush1.bf16.msra.mxu1 %v9576_v2  ;;  %7238 = vmatprep.subr.bf16.mxu0 %v9583_v30  ;;  %v9633_v2 = vcombine.high %v4383_v42, %v4387_v29  ;;  %v4390_v30 = vld [vmem:[#allocation20 + $0xb40] sm:$0xff] }
 0x668   :  { %7402 = vmatprep.subr.bf16.mxu1 %v9585_v26  ;;  %v4394_v26 = vld [vmem:[#allocation20 + $0xb60] sm:$0xff] }
 0x669   :  { %v9638_v53 = vcombine.low %v4390_v30, %v4394_v26  ;;  %v4434_v27 = vld [vmem:[#allocation20 + $0xca0] sm:$0xff] }
 0x66a   :  { %7239 = vmatpush1.bf16.msra.mxu0 %v9582_v1  ;;  %v9639_v1 = vcombine.high %v4390_v30, %v4394_v26  ;;  %v9679_v30 = vcombine.high %v4430_v38, %v4434_v27 }
 0x66b   :  { %7403 = vmatpush1.bf16.msra.mxu1 %v9584_v59  ;;  %7240 = vmatprep.subr.bf16.mxu0 %v9591_v44  ;;  %v9641_v59 = vcombine.high %v4391_v28, %v4395_v6  ;;  %v4398_v44 = vld [vmem:[#allocation20 + $0xb80] sm:$0xff] }
 0x66c   :  { %7404 = vmatprep.subr.bf16.mxu1 %v9593_v45  ;;  %v4402_v45 = vld [vmem:[#allocation20 + $0xba0] sm:$0xff] }
 0x66d   :  { %v9646_v3 = vcombine.low %v4398_v44, %v4402_v45  ;;  %v4438_v28 = vld [vmem:[#allocation20 + $0xcc0] sm:$0xff] }
 0x66e   :  { %7241 = vmatpush1.bf16.msra.mxu0 %v9590_v60  ;;  %v9647_v60 = vcombine.high %v4398_v44, %v4402_v45  ;;  %v4442_v6 = vld [vmem:[#allocation20 + $0xce0] sm:$0xff] }
 0x66f   :  { %7405 = vmatpush1.bf16.msra.mxu1 %v9592_v40  ;;  %7242 = vmatprep.subr.bf16.mxu0 %v9599_v61  ;;  %v9649_v40 = vcombine.high %v4399_v49, %v4403_v51  ;;  %v4406_v61 = vld [vmem:[#allocation20 + $0xbc0] sm:$0xff]  ;;  %v9687_v44 = vcombine.high %v4438_v28, %v4442_v6 }
 0x670   :  { %7406 = vmatprep.subr.bf16.mxu1 %v9601_v31  ;;  %v4410_v31 = vld [vmem:[#allocation20 + $0xbe0] sm:$0xff] }
 0x671   :  { %v9654_v16 = vcombine.low %v4406_v61, %v4410_v31  ;;  %v4446_v49 = vld [vmem:[#allocation20 + $0xd00] sm:$0xff] }
 0x672   :  { %7243 = vmatpush1.bf16.msra.mxu0 %v9598_v7  ;;  %v9655_v7 = vcombine.high %v4406_v61, %v4410_v31  ;;  %v4450_v51 = vld [vmem:[#allocation20 + $0xd20] sm:$0xff] }
 0x673   :  { %7407 = vmatpush1.bf16.msra.mxu1 %v9600_v19  ;;  %7244 = vmatprep.subr.bf16.mxu0 %v9607_v9  ;;  %v9657_v19 = vcombine.high %v4407_v62, %v4411_v14  ;;  %v4414_v9 = vld [vmem:[#allocation20 + $0xc00] sm:$0xff]  ;;  %v9695_v61 = vcombine.high %v4446_v49, %v4450_v51 }
 0x674   :  { %7408 = vmatprep.subr.bf16.mxu1 %v9609_v10  ;;  %v4418_v10 = vld [vmem:[#allocation20 + $0xc20] sm:$0xff] }
 0x675   :  { %v9662_v33 = vcombine.low %v4414_v9, %v4418_v10  ;;  %v4454_v62 = vld [vmem:[#allocation20 + $0xd40] sm:$0xff] }
 0x676   :  { %7245 = vmatpush1.bf16.msra.mxu0 %v9606_v21  ;;  %v4001_v21 = vrot.slane %v11769_v15, %v11703_v23  ;;  %v4458_v14 = vld [vmem:[#allocation20 + $0xd60] sm:$0xff] }
 0x677   :  { %7409 = vmatpush1.bf16.msra.mxu1 %v9608_v11  ;;  %7246 = vmatprep.subr.bf16.mxu0 %v9615_v17  ;;  %v9663_v11 = vcombine.high %v4414_v9, %v4418_v10  ;;  %v9665_v17 = vcombine.high %v4415_v57, %v4419_v52  ;;  %v9703_v9 = vcombine.high %v4454_v62, %v4458_v14 }
 0x678   :  { %7410 = vmatprep.subr.bf16.mxu1 %v9617_v22  ;;  %v4013_v22 = vrot.slane %v11769_v15, %v11712_v32 }
 0x67a   :  { %7247 = vmatpush1.bf16.msra.mxu0 %v9614_v50  ;;  %v4427_v50 = vld [vmem:[#allocation20 + $0xc68] sm:$0xff]  ;;  %v11814_v42 = vpack.c.bf16 %v4013_v22, %v4013_v22 }
 0x67b   :  { %7411 = vmatpush1.bf16.msra.mxu1 %v9616_v24  ;;  %7248 = vmatprep.subr.bf16.mxu0 %v9623_v25  ;;  %v11811_v24 = vpack.c.bf16 %v4001_v21, %v4001_v21  ;;  %v9664_v25 = vcombine.low %v4415_v57, %v4419_v52  ;;  %v9673_v29 = vcombine.high %v4423_v12, %v4427_v50  ;;  %v4462_v57 = vld [vmem:[#allocation20 + $0xd80] sm:$0xff] }
 0x67c   :  { %7412 = vmatprep.subr.bf16.mxu1 %v9625_v41  ;;  %v9671_v41 = vcombine.high %v4422_v18, %v4426_v63  ;;  %v4466_v52 = vld [vmem:[#allocation20 + $0xda0] sm:$0xff]  ;;  %v9702_v21 = vcombine.low %v4454_v62, %v4458_v14 }
 0x67d   :  { %v4502_v62 = vld [vmem:[#allocation20 + $0xec0] sm:$0xff] }
 0x67e   :  { %7249 = vmatpush1.bf16.msra.mxu0 %v9622_v0  ;;  %v4431_v0 = vld [vmem:[#allocation20 + $0xc88] sm:$0xff]  ;;  %v4506_v14 = vld [vmem:[#allocation20 + $0xee0] sm:$0xff] }
 0x67f   :  { %7413 = vmatpush1.bf16.msra.mxu1 %v9624_v36  ;;  %7250 = vmatprep.subr.bf16.mxu0 %v9631_v13  ;;  %v4435_v36 = vld [vmem:[#allocation20 + $0xca8] sm:$0xff]  ;;  %v9670_v13 = vcombine.low %v4422_v18, %v4426_v63  ;;  %v4470_v18 = vld [vmem:[#allocation20 + $0xdc0] sm:$0xff] }
 0x680   :  { %7414 = vmatprep.subr.bf16.mxu1 %v9633_v2  ;;  %v9672_v2 = vcombine.low %v4423_v12, %v4427_v50  ;;  %v9681_v26 = vcombine.high %v4431_v0, %v4435_v36  ;;  %v4474_v63 = vld [vmem:[#allocation20 + $0xde0] sm:$0xff]  ;;  %v4475_v12 = vld [vmem:[#allocation20 + $0xde8] sm:$0xff]  ;;  %v9710_v50 = vcombine.low %v4462_v57, %v4466_v52 }
 0x682   :  { %7251 = vmatpush1.bf16.msra.mxu0 %v9630_v43  ;;  %v4439_v43 = vld [vmem:[#allocation20 + $0xcc8] sm:$0xff] }
 0x683   :  { %7415 = vmatpush1.bf16.msra.mxu1 %v9632_v8  ;;  %7252 = vmatprep.subr.bf16.mxu0 %v9639_v1  ;;  %v4443_v8 = vld [vmem:[#allocation20 + $0xce8] sm:$0xff]  ;;  %v9678_v1 = vcombine.low %v4430_v38, %v4434_v27  ;;  %v4478_v27 = vld [vmem:[#allocation20 + $0xe00] sm:$0xff] }
 0x684   :  { %7416 = vmatprep.subr.bf16.mxu1 %v9641_v59  ;;  %v9680_v59 = vcombine.low %v4431_v0, %v4435_v36  ;;  %v9689_v45 = vcombine.high %v4439_v43, %v4443_v8  ;;  %v4479_v0 = vld [vmem:[#allocation20 + $0xe08] sm:$0xff] }
 0x685   :  { %v4483_v36 = vld [vmem:[#allocation20 + $0xe28] sm:$0xff] }
 0x686   :  { %7253 = vmatpush1.bf16.msra.mxu0 %v9638_v53  ;;  %v4447_v53 = vld [vmem:[#allocation20 + $0xd08] sm:$0xff] }
 0x687   :  { %7417 = vmatpush1.bf16.msra.mxu1 %v9640_v58  ;;  %7254 = vmatprep.subr.bf16.mxu0 %v9647_v60  ;;  %v4451_v58 = vld [vmem:[#allocation20 + $0xd28] sm:$0xff]  ;;  %v9686_v60 = vcombine.low %v4438_v28, %v4442_v6  ;;  %v4486_v28 = vld [vmem:[#allocation20 + $0xe40] sm:$0xff] }
 0x688   :  { %7418 = vmatprep.subr.bf16.mxu1 %v9649_v40  ;;  %v9688_v40 = vcombine.low %v4439_v43, %v4443_v8  ;;  %v9697_v31 = vcombine.high %v4447_v53, %v4451_v58  ;;  %v4490_v6 = vld [vmem:[#allocation20 + $0xe60] sm:$0xff]  ;;  %v4487_v43 = vld [vmem:[#allocation20 + $0xe48] sm:$0xff] }
 0x689   :  { %v4491_v8 = vld [vmem:[#allocation20 + $0xe68] sm:$0xff] }
 0x68a   :  { %7255 = vmatpush1.bf16.msra.mxu0 %v9646_v3  ;;  %v4455_v3 = vld [vmem:[#allocation20 + $0xd48] sm:$0xff] }
 0x68b   :  { %7419 = vmatpush1.bf16.msra.mxu1 %v9648_v5  ;;  %7256 = vmatprep.subr.bf16.mxu0 %v9655_v7  ;;  %v4459_v5 = vld [vmem:[#allocation20 + $0xd68] sm:$0xff]  ;;  %v9694_v7 = vcombine.low %v4446_v49, %v4450_v51  ;;  %v4494_v49 = vld [vmem:[#allocation20 + $0xe80] sm:$0xff] }
 0x68c   :  { %7420 = vmatprep.subr.bf16.mxu1 %v9657_v19  ;;  %v9696_v19 = vcombine.low %v4447_v53, %v4451_v58  ;;  %v9705_v10 = vcombine.high %v4455_v3, %v4459_v5  ;;  %v4498_v51 = vld [vmem:[#allocation20 + $0xea0] sm:$0xff]  ;;  %v4495_v53 = vld [vmem:[#allocation20 + $0xe88] sm:$0xff] }
 0x68d   :  { %v4499_v58 = vld [vmem:[#allocation20 + $0xea8] sm:$0xff] }
 0x68e   :  { %7257 = vmatpush1.bf16.msra.mxu0 %v9654_v16  ;;  %v4463_v16 = vld [vmem:[#allocation20 + $0xd88] sm:$0xff] }
 0x68f   :  { %7421 = vmatpush1.bf16.msra.mxu1 %v9656_v20  ;;  %7267 = vmatprep.subr.bf16.mxu0 %v9663_v11  ;;  %v4467_v20 = vld [vmem:[#allocation20 + $0xda8] sm:$0xff]  ;;  %v9704_v11 = vcombine.low %v4455_v3, %v4459_v5 }
 0x690   :  { %7431 = vmatprep.subr.bf16.mxu1 %v9665_v17  ;;  %v9711_v17 = vcombine.high %v4462_v57, %v4466_v52  ;;  %v9713_v22 = vcombine.high %v4463_v16, %v4467_v20  ;;  %v4503_v3 = vld [vmem:[#allocation20 + $0xec8] sm:$0xff]  ;;  %v4510_v57 = vld [vmem:[#allocation20 + $0xf00] sm:$0xff] }
 0x691   :  { %7259 = vmatmul.mubr.bf16.vlgmr.msra.gmra.mrb[32].mxu0 %v11811_v24  ;;  %v4507_v5 = vld [vmem:[#allocation20 + $0xee8] sm:$0xff]  ;;  %v4514_v52 = vld [vmem:[#allocation20 + $0xf20] sm:$0xff] }
 0x692   :  { %7423 = vmatmul.mubr.bf16.vlgmr.msra.gmra.mrb[88].mxu1 %v11811_v24  ;;  %7268 = vmatpush1.bf16.msra.mxu0 %v9662_v33  ;;  %v4471_v33 = vld [vmem:[#allocation20 + $0xdc8] sm:$0xff] }
 0x693   :  { %7299 = vmatprep.mubr.bf16.mxu0 %v11814_v42  ;;  %7432 = vmatpush1.bf16.msra.mxu1 %v9664_v25  ;;  %v9712_v25 = vcombine.low %v4463_v16, %v4467_v20  ;;  %v9721_v38 = vcombine.high %v4471_v33, %v4475_v12  ;;  %v4511_v16 = vld [vmem:[#allocation20 + $0xf08] sm:$0xff] }
 0x694   :  { %7463 = vmatprep.mubr.bf16.mxu1 %v11814_v42  ;;  %7269 = vmatprep.subr.bf16.mxu0 %v9671_v41  ;;  %v9719_v41 = vcombine.high %v4470_v18, %v4474_v63  ;;  %v4515_v20 = vld [vmem:[#allocation20 + $0xf28] sm:$0xff] }
 0x695   :  { %7433 = vmatprep.subr.bf16.mxu1 %v9673_v29  ;;  %v4482_v29 = vld [vmem:[#allocation20 + $0xe20] sm:$0xff] }
 0x696   :  { %7270 = vmatpush1.bf16.msra.mxu0 %v9670_v13  ;;  %v9718_v13 = vcombine.low %v4470_v18, %v4474_v63  ;;  %v4518_v18 = vld [vmem:[#allocation20 + $0xf40] sm:$0xff] }
 0x697   :  { %7434 = vmatpush1.bf16.msra.mxu1 %v9672_v2  ;;  %7271 = vmatprep.subr.bf16.mxu0 %v9679_v30  ;;  %v9720_v2 = vcombine.low %v4471_v33, %v4475_v12  ;;  %v9727_v30 = vcombine.high %v4478_v27, %v4482_v29  ;;  %v4522_v63 = vld [vmem:[#allocation20 + $0xf60] sm:$0xff]  ;;  %v4519_v33 = vld [vmem:[#allocation20 + $0xf48] sm:$0xff] }
 0x698   :  { %7435 = vmatprep.subr.bf16.mxu1 %v9681_v26  ;;  %v9729_v26 = vcombine.high %v4479_v0, %v4483_v36  ;;  %v4523_v12 = vld [vmem:[#allocation20 + $0xf68] sm:$0xff] }
 0x69a   :  { %7272 = vmatpush1.bf16.msra.mxu0 %v9678_v1  ;;  %v9726_v1 = vcombine.low %v4478_v27, %v4482_v29  ;;  %v4526_v27 = vld [vmem:[#allocation20 + $0xf80] sm:$0xff] }
 0x69b   :  { %7436 = vmatpush1.bf16.msra.mxu1 %v9680_v59  ;;  %7273 = vmatprep.subr.bf16.mxu0 %v9687_v44  ;;  %v9728_v59 = vcombine.low %v4479_v0, %v4483_v36  ;;  %v9735_v44 = vcombine.high %v4486_v28, %v4490_v6  ;;  %v4530_v29 = vld [vmem:[#allocation20 + $0xfa0] sm:$0xff]  ;;  %v4527_v0 = vld [vmem:[#allocation20 + $0xf88] sm:$0xff] }
 0x69c   :  { %7437 = vmatprep.subr.bf16.mxu1 %v9689_v45  ;;  %v9737_v45 = vcombine.high %v4487_v43, %v4491_v8  ;;  %v4531_v36 = vld [vmem:[#allocation20 + $0xfa8] sm:$0xff] }
 0x69e   :  { %7274 = vmatpush1.bf16.msra.mxu0 %v9686_v60  ;;  %v9734_v60 = vcombine.low %v4486_v28, %v4490_v6  ;;  %v4534_v28 = vld [vmem:[#allocation20 + $0xfc0] sm:$0xff] }
 0x69f   :  { %7438 = vmatpush1.bf16.msra.mxu1 %v9688_v40  ;;  %7275 = vmatprep.subr.bf16.mxu0 %v9695_v61  ;;  %v9736_v40 = vcombine.low %v4487_v43, %v4491_v8  ;;  %v9743_v61 = vcombine.high %v4494_v49, %v4498_v51  ;;  %v4538_v6 = vld [vmem:[#allocation20 + $0xfe0] sm:$0xff]  ;;  %v4535_v43 = vld [vmem:[#allocation20 + $0xfc8] sm:$0xff] }
 0x6a0   :  { %7439 = vmatprep.subr.bf16.mxu1 %v9697_v31  ;;  %v9745_v31 = vcombine.high %v4495_v53, %v4499_v58  ;;  %v4539_v8 = vld [vmem:[#allocation20 + $0xfe8] sm:$0xff] }
 0x6a2   :  { %7276 = vmatpush1.bf16.msra.mxu0 %v9694_v7  ;;  %v9742_v7 = vcombine.low %v4494_v49, %v4498_v51  ;;  %v4032_v49 = vld [vmem:[#allocation20 + $0x10] sm:$0xff] }
 0x6a3   :  { %7440 = vmatpush1.bf16.msra.mxu1 %v9696_v19  ;;  %7277 = vmatprep.subr.bf16.mxu0 %v9703_v9  ;;  %v9744_v19 = vcombine.low %v4495_v53, %v4499_v58  ;;  %v9751_v9 = vcombine.high %v4502_v62, %v4506_v14  ;;  %v4036_v51 = vld [vmem:[#allocation20 + $0x30] sm:$0xff]  ;;  %v4033_v53 = vld [vmem:[#allocation20 + $0x18] sm:$0xff] }
 0x6a4   :  { %7441 = vmatprep.subr.bf16.mxu1 %v9705_v10  ;;  %v9753_v10 = vcombine.high %v4503_v3, %v4507_v5  ;;  %v4037_v58 = vld [vmem:[#allocation20 + $0x38] sm:$0xff] }
 0x6a6   :  { %7278 = vmatpush1.bf16.msra.mxu0 %v9702_v21  ;;  %v9750_v21 = vcombine.low %v4502_v62, %v4506_v14  ;;  %v9285_v62 = vcombine.high %v4033_v53, %v4037_v58  ;;  %v4040_v14 = vld [vmem:[#allocation20 + $0x50] sm:$0xff] }
 0x6a7   :  { %7442 = vmatpush1.bf16.msra.mxu1 %v9704_v11  ;;  %7279 = vmatprep.subr.bf16.mxu0 %v9711_v17  ;;  %v9752_v11 = vcombine.low %v4503_v3, %v4507_v5  ;;  %v9759_v17 = vcombine.high %v4510_v57, %v4514_v52  ;;  %v4044_v3 = vld [vmem:[#allocation20 + $0x70] sm:$0xff]  ;;  %v9282_v5 = vcombine.low %v4032_v49, %v4036_v51 }
 0x6a8   :  { %7443 = vmatprep.subr.bf16.mxu1 %v9713_v22  ;;  %v9761_v22 = vcombine.high %v4511_v16, %v4515_v20 }
 0x6aa   :  { %7280 = vmatpush1.bf16.msra.mxu0 %v9710_v50  ;;  %v9758_v50 = vcombine.low %v4510_v57, %v4514_v52  ;;  %v9291_v57 = vcombine.high %v4040_v14, %v4044_v3  ;;  %v4048_v52 = vld [vmem:[#allocation20 + $0x90] sm:$0xff] }
 0x6ab   :  { %7444 = vmatpush1.bf16.msra.mxu1 %v9712_v25  ;;  %7281 = vmatprep.subr.bf16.mxu0 %v9719_v41  ;;  %v9760_v25 = vcombine.low %v4511_v16, %v4515_v20  ;;  %v9767_v41 = vcombine.high %v4518_v18, %v4522_v63  ;;  %v4052_v16 = vld [vmem:[#allocation20 + $0xb0] sm:$0xff]  ;;  %v4049_v20 = vld [vmem:[#allocation20 + $0x98] sm:$0xff] }
 0x6ac   :  { %7445 = vmatprep.subr.bf16.mxu1 %v9721_v38  ;;  %v9769_v38 = vcombine.high %v4519_v33, %v4523_v12 }
 0x6ae   :  { %7282 = vmatpush1.bf16.msra.mxu0 %v9718_v13  ;;  %v9766_v13 = vcombine.low %v4518_v18, %v4522_v63  ;;  %v4056_v63 = vld [vmem:[#allocation20 + $0xd0] sm:$0xff] }
 0x6af   :  { %7446 = vmatpush1.bf16.msra.mxu1 %v9720_v2  ;;  %7283 = vmatprep.subr.bf16.mxu0 %v9727_v30  ;;  %v9768_v2 = vcombine.low %v4519_v33, %v4523_v12  ;;  %v9775_v30 = vcombine.high %v4526_v27, %v4530_v29  ;;  %v4060_v33 = vld [vmem:[#allocation20 + $0xf0] sm:$0xff]  ;;  %v4057_v12 = vld [vmem:[#allocation20 + $0xd8] sm:$0xff] }
 0x6b0   :  { %7447 = vmatprep.subr.bf16.mxu1 %v9729_v26  ;;  %v9777_v26 = vcombine.high %v4527_v0, %v4531_v36 }
 0x6b2   :  { %7284 = vmatpush1.bf16.msra.mxu0 %v9726_v1  ;;  %v9774_v1 = vcombine.low %v4526_v27, %v4530_v29  ;;  %v4064_v29 = vld [vmem:[#allocation20 + $0x110] sm:$0xff] }
 0x6b3   :  { %7448 = vmatpush1.bf16.msra.mxu1 %v9728_v59  ;;  %7285 = vmatprep.subr.bf16.mxu0 %v9735_v44  ;;  %v9776_v59 = vcombine.low %v4527_v0, %v4531_v36  ;;  %v9783_v44 = vcombine.high %v4534_v28, %v4538_v6  ;;  %v4068_v0 = vld [vmem:[#allocation20 + $0x130] sm:$0xff]  ;;  %v4065_v36 = vld [vmem:[#allocation20 + $0x118] sm:$0xff] }
 0x6b4   :  { %7449 = vmatprep.subr.bf16.mxu1 %v9737_v45  ;;  %v9785_v45 = vcombine.high %v4535_v43, %v4539_v8 }
 0x6b6   :  { %7286 = vmatpush1.bf16.msra.mxu0 %v9734_v60  ;;  %v9782_v60 = vcombine.low %v4534_v28, %v4538_v6  ;;  %v4072_v28 = vld [vmem:[#allocation20 + $0x150] sm:$0xff] }
 0x6b7   :  { %7450 = vmatpush1.bf16.msra.mxu1 %v9736_v40  ;;  %7287 = vmatprep.subr.bf16.mxu0 %v9743_v61  ;;  %v9784_v40 = vcombine.low %v4535_v43, %v4539_v8  ;;  %v4009_v61 = vrot.slane %v11769_v15, %v11706_v56  ;;  %v4076_v6 = vld [vmem:[#allocation20 + $0x170] sm:$0xff]  ;;  %v4073_v43 = vld [vmem:[#allocation20 + $0x158] sm:$0xff] }
 0x6b8   :  { %7451 = vmatprep.subr.bf16.mxu1 %v9745_v31  ;;  %v9283_v31 = vcombine.high %v4032_v49, %v4036_v51  ;;  %v4077_v8 = vld [vmem:[#allocation20 + $0x178] sm:$0xff]  ;;  %v4080_v49 = vld [vmem:[#allocation20 + $0x190] sm:$0xff] }
 0x6b9   :  { %v4084_v51 = vld [vmem:[#allocation20 + $0x1b0] sm:$0xff] }
 0x6ba   :  { %7288 = vmatpush1.bf16.msra.mxu0 %v9742_v7  ;;  %v4041_v7 = vld [vmem:[#allocation20 + $0x58] sm:$0xff] }
 0x6bb   :  { %7452 = vmatpush1.bf16.msra.mxu1 %v9744_v19  ;;  %7289 = vmatprep.subr.bf16.mxu0 %v9751_v9  ;;  %v4045_v19 = vld [vmem:[#allocation20 + $0x78] sm:$0xff]  ;;  %v11821_v9 = vpack.c.bf16 %v4009_v61, %v4009_v61  ;;  %v9331_v61 = vcombine.high %v4080_v49, %v4084_v51 }
 0x6bc   :  { %7453 = vmatprep.subr.bf16.mxu1 %v9753_v10  ;;  %v9284_v10 = vcombine.low %v4033_v53, %v4037_v58  ;;  %v9293_v15 = vcombine.high %v4041_v7, %v4045_v19  ;;  %v4081_v53 = vld [vmem:[#allocation20 + $0x198] sm:$0xff] }
 0x6bd   :  { %v4085_v58 = vld [vmem:[#allocation20 + $0x1b8] sm:$0xff] }
 0x6be   :  { %7290 = vmatpush1.bf16.msra.mxu0 %v9750_v21  ;;  %v4053_v21 = vld [vmem:[#allocation20 + $0xb8] sm:$0xff] }
 0x6bf   :  { %7454 = vmatpush1.bf16.msra.mxu1 %v9752_v11  ;;  %7291 = vmatprep.subr.bf16.mxu0 %v9759_v17  ;;  %v9290_v11 = vcombine.low %v4040_v14, %v4044_v3  ;;  %v9292_v17 = vcombine.low %v4041_v7, %v4045_v19  ;;  %v9301_v18 = vcombine.high %v4049_v20, %v4053_v21  ;;  %v4092_v14 = vld [vmem:[#allocation20 + $0x1f0] sm:$0xff]  ;;  %v4089_v3 = vld [vmem:[#allocation20 + $0x1d8] sm:$0xff] }
 0x6c0   :  { %7455 = vmatprep.subr.bf16.mxu1 %v9761_v22  ;;  %v9299_v22 = vcombine.high %v4048_v52, %v4052_v16  ;;  %v9330_v7 = vcombine.low %v4080_v49, %v4084_v51  ;;  %v9332_v19 = vcombine.low %v4081_v53, %v4085_v58  ;;  %v4132_v49 = vld [vmem:[#allocation20 + $0x330] sm:$0xff]  ;;  %v4129_v51 = vld [vmem:[#allocation20 + $0x318] sm:$0xff] }
 0x6c2   :  { %7292 = vmatpush1.bf16.msra.mxu0 %v9758_v50  ;;  %v4061_v50 = vld [vmem:[#allocation20 + $0xf8] sm:$0xff] }
 0x6c3   :  { %7456 = vmatpush1.bf16.msra.mxu1 %v9760_v25  ;;  %7293 = vmatprep.subr.bf16.mxu0 %v9767_v41  ;;  %v9298_v25 = vcombine.low %v4048_v52, %v4052_v16  ;;  %v9300_v41 = vcombine.low %v4049_v20, %v4053_v21  ;;  %v9309_v27 = vcombine.high %v4057_v12, %v4061_v50  ;;  %v4096_v52 = vld [vmem:[#allocation20 + $0x210] sm:$0xff]  ;;  %v4101_v20 = vld [vmem:[#allocation20 + $0x238] sm:$0xff] }
 0x6c4   :  { %7457 = vmatprep.subr.bf16.mxu1 %v9769_v38  ;;  %v9307_v38 = vcombine.high %v4056_v63, %v4060_v33  ;;  %v4100_v16 = vld [vmem:[#allocation20 + $0x230] sm:$0xff] }
 0x6c6   :  { %7294 = vmatpush1.bf16.msra.mxu0 %v9766_v13  ;;  %v4069_v13 = vld [vmem:[#allocation20 + $0x138] sm:$0xff] }
 0x6c7   :  { %7458 = vmatpush1.bf16.msra.mxu1 %v9768_v2  ;;  %7295 = vmatprep.subr.bf16.mxu0 %v9775_v30  ;;  %v9308_v2 = vcombine.low %v4057_v12, %v4061_v50  ;;  %v9315_v30 = vcombine.high %v4064_v29, %v4068_v0  ;;  %v4109_v12 = vld [vmem:[#allocation20 + $0x278] sm:$0xff]  ;;  %v9346_v50 = vcombine.low %v4096_v52, %v4100_v16 }
 0x6c8   :  { %7459 = vmatprep.subr.bf16.mxu1 %v9777_v26  ;;  %v9317_v26 = vcombine.high %v4065_v36, %v4069_v13 }
 0x6ca   :  { %7296 = vmatpush1.bf16.msra.mxu0 %v9774_v1  ;;  %v9314_v1 = vcombine.low %v4064_v29, %v4068_v0  ;;  %v4116_v29 = vld [vmem:[#allocation20 + $0x2b0] sm:$0xff]  ;;  %v4113_v0 = vld [vmem:[#allocation20 + $0x298] sm:$0xff] }
 0x6cb   :  { %7460 = vmatpush1.bf16.msra.mxu1 %v9776_v59  ;;  %7297 = vmatprep.subr.bf16.mxu0 %v9783_v44  ;;  %v9316_v59 = vcombine.low %v4065_v36, %v4069_v13  ;;  %v9323_v44 = vcombine.high %v4072_v28, %v4076_v6  ;;  %v4117_v36 = vld [vmem:[#allocation20 + $0x2b8] sm:$0xff] }
 0x6cc   :  { %7461 = vmatprep.subr.bf16.mxu1 %v9785_v45  ;;  %v9325_v45 = vcombine.high %v4073_v43, %v4077_v8 }
 0x6ce   :  { %7298 = vmatpush1.bf16.msra.mxu0 %v9782_v60  ;;  %v9322_v60 = vcombine.low %v4072_v28, %v4076_v6  ;;  %v4124_v28 = vld [vmem:[#allocation20 + $0x2f0] sm:$0xff]  ;;  %v4121_v6 = vld [vmem:[#allocation20 + $0x2d8] sm:$0xff] }
 0x6cf   :  { %7462 = vmatpush1.bf16.msra.mxu1 %v9784_v40  ;;  %7472 = vmatprep.subr.bf16.mxu0 %v9283_v31  ;;  %v9324_v40 = vcombine.low %v4073_v43, %v4077_v8  ;;  %v9333_v31 = vcombine.high %v4081_v53, %v4085_v58  ;;  %v4125_v43 = vld [vmem:[#allocation20 + $0x2f8] sm:$0xff] }
 0x6d0   :  { %7636 = vmatprep.subr.bf16.mxu1 %v9285_v62  ;;  %v4088_v62 = vld [vmem:[#allocation20 + $0x1d0] sm:$0xff]  ;;  %v4133_v53 = vld [vmem:[#allocation20 + $0x338] sm:$0xff] }
 0x6d1   :  { %7300 = vmatmul.mubr.bf16.vlgmr.msra.gmra.mrb[32].mxu0 %v11821_v9  ;;  %v9338_v21 = vcombine.low %v4088_v62, %v4092_v14 }
 0x6d2   :  { %7464 = vmatmul.mubr.bf16.vlgmr.msra.gmra.mrb[88].mxu1 %v11821_v9  ;;  %7473 = vmatpush1.bf16.msra.mxu0 %v9282_v5  ;;  %v4093_v5 = vld [vmem:[#allocation20 + $0x1f8] sm:$0xff] }
 0x6d3   :  { %7504 = vmatprep.mubr.bf16.mxu0 %v11777_v54  ;;  %7637 = vmatpush1.bf16.msra.mxu1 %v9284_v10  ;;  %v9339_v10 = vcombine.high %v4088_v62, %v4092_v14  ;;  %v4140_v62 = vld [vmem:[#allocation20 + $0x370] sm:$0xff]  ;;  %v4137_v14 = vld [vmem:[#allocation20 + $0x358] sm:$0xff] }
 0x6d4   :  { %7668 = vmatprep.mubr.bf16.mxu1 %v11777_v54  ;;  %7474 = vmatprep.subr.bf16.mxu0 %v9291_v57  ;;  %v9306_v54 = vcombine.low %v4056_v63, %v4060_v33  ;;  %v9341_v57 = vcombine.high %v4089_v3, %v4093_v5  ;;  %v4108_v63 = vld [vmem:[#allocation20 + $0x270] sm:$0xff]  ;;  %v4105_v33 = vld [vmem:[#allocation20 + $0x258] sm:$0xff] }
 0x6d5   :  { %7638 = vmatprep.subr.bf16.mxu1 %v9293_v15  ;;  %v4097_v15 = vld [vmem:[#allocation20 + $0x218] sm:$0xff] }
 0x6d6   :  { %7475 = vmatpush1.bf16.msra.mxu0 %v9290_v11  ;;  %v9340_v11 = vcombine.low %v4089_v3, %v4093_v5  ;;  %v4141_v3 = vld [vmem:[#allocation20 + $0x378] sm:$0xff] }
 0x6d7   :  { %7639 = vmatpush1.bf16.msra.mxu1 %v9292_v17  ;;  %7476 = vmatprep.subr.bf16.mxu0 %v9299_v22  ;;  %v9347_v17 = vcombine.high %v4096_v52, %v4100_v16  ;;  %v9349_v22 = vcombine.high %v4097_v15, %v4101_v20  ;;  %v4148_v52 = vld [vmem:[#allocation20 + $0x3b0] sm:$0xff]  ;;  %v4145_v16 = vld [vmem:[#allocation20 + $0x398] sm:$0xff] }
 0x6d8   :  { %7640 = vmatprep.subr.bf16.mxu1 %v9301_v18  ;;  %v4104_v18 = vld [vmem:[#allocation20 + $0x250] sm:$0xff] }
 0x6d9   :  { %v9354_v13 = vcombine.low %v4104_v18, %v4108_v63 }
 0x6da   :  { %7477 = vmatpush1.bf16.msra.mxu0 %v9298_v25  ;;  %v9348_v25 = vcombine.low %v4097_v15, %v4101_v20  ;;  %v4149_v15 = vld [vmem:[#allocation20 + $0x3b8] sm:$0xff] }
 0x6db   :  { %7641 = vmatpush1.bf16.msra.mxu1 %v9300_v41  ;;  %7478 = vmatprep.subr.bf16.mxu0 %v9307_v38  ;;  %v9355_v41 = vcombine.high %v4104_v18, %v4108_v63  ;;  %v9357_v38 = vcombine.high %v4105_v33, %v4109_v12  ;;  %v4156_v18 = vld [vmem:[#allocation20 + $0x3f0] sm:$0xff]  ;;  %v4153_v63 = vld [vmem:[#allocation20 + $0x3d8] sm:$0xff] }
 0x6dc   :  { %7642 = vmatprep.subr.bf16.mxu1 %v9309_v27  ;;  %v4112_v27 = vld [vmem:[#allocation20 + $0x290] sm:$0xff] }
 0x6dd   :  { %v9362_v8 = vcombine.low %v4112_v27, %v4116_v29 }
 0x6de   :  { %7479 = vmatpush1.bf16.msra.mxu0 %v9306_v54  ;;  %v9356_v54 = vcombine.low %v4105_v33, %v4109_v12  ;;  %v4157_v33 = vld [vmem:[#allocation20 + $0x3f8] sm:$0xff] }
 0x6df   :  { %7643 = vmatpush1.bf16.msra.mxu1 %v9308_v2  ;;  %7480 = vmatprep.subr.bf16.mxu0 %v9315_v30  ;;  %v9363_v2 = vcombine.high %v4112_v27, %v4116_v29  ;;  %v9365_v30 = vcombine.high %v4113_v0, %v4117_v36  ;;  %v4164_v27 = vld [vmem:[#allocation20 + $0x430] sm:$0xff]  ;;  %v4161_v29 = vld [vmem:[#allocation20 + $0x418] sm:$0xff] }
 0x6e0   :  { %7644 = vmatprep.subr.bf16.mxu1 %v9317_v26  ;;  %v4120_v26 = vld [vmem:[#allocation20 + $0x2d0] sm:$0xff] }
 0x6e1   :  { %v9370_v58 = vcombine.low %v4120_v26, %v4124_v28 }
 0x6e2   :  { %7481 = vmatpush1.bf16.msra.mxu0 %v9314_v1  ;;  %v9364_v1 = vcombine.low %v4113_v0, %v4117_v36  ;;  %v4165_v0 = vld [vmem:[#allocation20 + $0x438] sm:$0xff] }
 0x6e3   :  { %7645 = vmatpush1.bf16.msra.mxu1 %v9316_v59  ;;  %7482 = vmatprep.subr.bf16.mxu0 %v9323_v44  ;;  %v9371_v59 = vcombine.high %v4120_v26, %v4124_v28  ;;  %v9373_v44 = vcombine.high %v4121_v6, %v4125_v43  ;;  %v4172_v26 = vld [vmem:[#allocation20 + $0x470] sm:$0xff] }
 0x6e4   :  { %7646 = vmatprep.subr.bf16.mxu1 %v9325_v45  ;;  %v4128_v45 = vld [vmem:[#allocation20 + $0x310] sm:$0xff] }
 0x6e5   :  { %v9378_v5 = vcombine.low %v4128_v45, %v4132_v49 }
 0x6e6   :  { %7483 = vmatpush1.bf16.msra.mxu0 %v9322_v60  ;;  %v9372_v60 = vcombine.low %v4121_v6, %v4125_v43  ;;  %v4169_v6 = vld [vmem:[#allocation20 + $0x458] sm:$0xff] }
 0x6e7   :  { %7647 = vmatpush1.bf16.msra.mxu1 %v9324_v40  ;;  %7484 = vmatprep.subr.bf16.mxu0 %v9331_v61  ;;  %v9379_v40 = vcombine.high %v4128_v45, %v4132_v49  ;;  %v9381_v61 = vcombine.high %v4129_v51, %v4133_v53  ;;  %v4173_v43 = vld [vmem:[#allocation20 + $0x478] sm:$0xff] }
 0x6e8   :  { %7648 = vmatprep.subr.bf16.mxu1 %v9333_v31  ;;  %v4136_v31 = vld [vmem:[#allocation20 + $0x350] sm:$0xff]  ;;  %v9421_v45 = vcombine.high %v4169_v6, %v4173_v43  ;;  %v4177_v49 = vld [vmem:[#allocation20 + $0x498] sm:$0xff] }
 0x6e9   :  { %v9386_v20 = vcombine.low %v4136_v31, %v4140_v62 }
 0x6ea   :  { %7485 = vmatpush1.bf16.msra.mxu0 %v9330_v7  ;;  %v9380_v7 = vcombine.low %v4129_v51, %v4133_v53  ;;  %v4181_v51 = vld [vmem:[#allocation20 + $0x4b8] sm:$0xff] }
 0x6eb   :  { %7649 = vmatpush1.bf16.msra.mxu1 %v9332_v19  ;;  %7486 = vmatprep.subr.bf16.mxu0 %v9339_v10  ;;  %v9387_v19 = vcombine.high %v4136_v31, %v4140_v62  ;;  %v9389_v10 = vcombine.high %v4137_v14, %v4141_v3  ;;  %v4188_v31 = vld [vmem:[#allocation20 + $0x4f0] sm:$0xff]  ;;  %v4185_v62 = vld [vmem:[#allocation20 + $0x4d8] sm:$0xff] }
 0x6ec   :  { %7650 = vmatprep.subr.bf16.mxu1 %v9341_v57  ;;  %v4144_v57 = vld [vmem:[#allocation20 + $0x390] sm:$0xff] }
 0x6ed   :  { %v9394_v12 = vcombine.low %v4144_v57, %v4148_v52 }
 0x6ee   :  { %7487 = vmatpush1.bf16.msra.mxu0 %v9338_v21  ;;  %v9388_v21 = vcombine.low %v4137_v14, %v4141_v3  ;;  %v4189_v14 = vld [vmem:[#allocation20 + $0x4f8] sm:$0xff] }
 0x6ef   :  { %7651 = vmatpush1.bf16.msra.mxu1 %v9340_v11  ;;  %7488 = vmatprep.subr.bf16.mxu0 %v9347_v17  ;;  %v9395_v11 = vcombine.high %v4144_v57, %v4148_v52  ;;  %v9397_v17 = vcombine.high %v4145_v16, %v4149_v15  ;;  %v4193_v57 = vld [vmem:[#allocation20 + $0x518] sm:$0xff] }
 0x6f0   :  { %7652 = vmatprep.subr.bf16.mxu1 %v9349_v22  ;;  %v4152_v22 = vld [vmem:[#allocation20 + $0x3d0] sm:$0xff]  ;;  %v4197_v52 = vld [vmem:[#allocation20 + $0x538] sm:$0xff] }
 0x6f1   :  { %v9402_v36 = vcombine.low %v4152_v22, %v4156_v18 }
 0x6f2   :  { %7489 = vmatpush1.bf16.msra.mxu0 %v9346_v50  ;;  %v9396_v50 = vcombine.low %v4145_v16, %v4149_v15  ;;  %v9436_v16 = vcombine.low %v4185_v62, %v4189_v14 }
 0x6f3   :  { %7653 = vmatpush1.bf16.msra.mxu1 %v9348_v25  ;;  %7490 = vmatprep.subr.bf16.mxu0 %v9355_v41  ;;  %v9403_v25 = vcombine.high %v4152_v22, %v4156_v18  ;;  %v9405_v41 = vcombine.high %v4153_v63, %v4157_v33  ;;  %v4205_v22 = vld [vmem:[#allocation20 + $0x578] sm:$0xff] }
 0x6f4   :  { %7654 = vmatprep.subr.bf16.mxu1 %v9357_v38  ;;  %v4160_v38 = vld [vmem:[#allocation20 + $0x410] sm:$0xff] }
 0x6f5   :  { %v9410_v28 = vcombine.low %v4160_v38, %v4164_v27 }
 0x6f6   :  { %7491 = vmatpush1.bf16.msra.mxu0 %v9354_v13  ;;  %v9404_v13 = vcombine.low %v4153_v63, %v4157_v33  ;;  %v9444_v63 = vcombine.low %v4193_v57, %v4197_v52 }
 0x6f7   :  { %7655 = vmatpush1.bf16.msra.mxu1 %v9356_v54  ;;  %7492 = vmatprep.subr.bf16.mxu0 %v9363_v2  ;;  %v9411_v54 = vcombine.high %v4160_v38, %v4164_v27  ;;  %v9413_v2 = vcombine.high %v4161_v29, %v4165_v0  ;;  %v4213_v38 = vld [vmem:[#allocation20 + $0x5b8] sm:$0xff] }
 0x6f8   :  { %7656 = vmatprep.subr.bf16.mxu1 %v9365_v30  ;;  %v4168_v30 = vld [vmem:[#allocation20 + $0x450] sm:$0xff] }
 0x6f9   :  { %v9418_v53 = vcombine.low %v4168_v30, %v4172_v26 }
 0x6fa   :  { %7493 = vmatpush1.bf16.msra.mxu0 %v9362_v8  ;;  %v9412_v8 = vcombine.low %v4161_v29, %v4165_v0 }
 0x6fb   :  { %7657 = vmatpush1.bf16.msra.mxu1 %v9364_v1  ;;  %7494 = vmatprep.subr.bf16.mxu0 %v9371_v59  ;;  %v9419_v1 = vcombine.high %v4168_v30, %v4172_v26  ;;  %v4176_v59 = vld [vmem:[#allocation20 + $0x490] sm:$0xff]  ;;  %v4221_v30 = vld [vmem:[#allocation20 + $0x5f8] sm:$0xff] }
 0x6fc   :  { %7658 = vmatprep.subr.bf16.mxu1 %v9373_v44  ;;  %v4180_v44 = vld [vmem:[#allocation20 + $0x4b0] sm:$0xff] }
 0x6fd   :  { %v9426_v3 = vcombine.low %v4176_v59, %v4180_v44 }
 0x6fe   :  { %7495 = vmatpush1.bf16.msra.mxu0 %v9370_v58  ;;  %v9420_v58 = vcombine.low %v4169_v6, %v4173_v43 }
 0x6ff   :  { %7659 = vmatpush1.bf16.msra.mxu1 %v9372_v60  ;;  %7496 = vmatprep.subr.bf16.mxu0 %v9379_v40  ;;  %v9427_v60 = vcombine.high %v4176_v59, %v4180_v44  ;;  %v9429_v40 = vcombine.high %v4177_v49, %v4181_v51  ;;  %v4225_v59 = vld [vmem:[#allocation20 + $0x618] sm:$0xff] }
 0x700   :  { %7660 = vmatprep.subr.bf16.mxu1 %v9381_v61  ;;  %v4184_v61 = vld [vmem:[#allocation20 + $0x4d0] sm:$0xff]  ;;  %v4229_v44 = vld [vmem:[#allocation20 + $0x638] sm:$0xff] }
 0x702   :  { %7497 = vmatpush1.bf16.msra.mxu0 %v9378_v5  ;;  %v9435_v5 = vcombine.high %v4184_v61, %v4188_v31 }
 0x703   :  { %7661 = vmatpush1.bf16.msra.mxu1 %v9380_v7  ;;  %7498 = vmatprep.subr.bf16.mxu0 %v9387_v19  ;;  %v9437_v7 = vcombine.high %v4185_v62, %v4189_v14  ;;  %v4192_v19 = vld [vmem:[#allocation20 + $0x510] sm:$0xff]  ;;  %v9476_v62 = vcombine.low %v4225_v59, %v4229_v44 }
 0x704   :  { %7662 = vmatprep.subr.bf16.mxu1 %v9389_v10  ;;  %v4196_v10 = vld [vmem:[#allocation20 + $0x530] sm:$0xff] }
 0x705   :  { %v9443_v15 = vcombine.high %v4192_v19, %v4196_v10  ;;  %v9442_v18 = vcombine.low %v4192_v19, %v4196_v10  ;;  %v4245_v19 = vld [vmem:[#allocation20 + $0x6b8] sm:$0xff] }
 0x706   :  { %7499 = vmatpush1.bf16.msra.mxu0 %v9386_v20  ;;  %v9445_v20 = vcombine.high %v4193_v57, %v4197_v52 }
 0x707   :  { %7663 = vmatpush1.bf16.msra.mxu1 %v9388_v21  ;;  %7500 = vmatprep.subr.bf16.mxu0 %v9395_v11  ;;  %v4200_v21 = vld [vmem:[#allocation20 + $0x550] sm:$0xff] }
 0x708   :  { %7664 = vmatprep.subr.bf16.mxu1 %v9397_v17  ;;  %v4204_v11 = vld [vmem:[#allocation20 + $0x570] sm:$0xff]  ;;  %v4201_v17 = vld [vmem:[#allocation20 + $0x558] sm:$0xff] }
 0x709   :  { %v9451_v33 = vcombine.high %v4200_v21, %v4204_v11  ;;  %v9450_v27 = vcombine.low %v4200_v21, %v4204_v11  ;;  %v9452_v29 = vcombine.low %v4201_v17, %v4205_v22  ;;  %v4253_v21 = vld [vmem:[#allocation20 + $0x6f8] sm:$0xff] }
 0x70a   :  { %7501 = vmatpush1.bf16.msra.mxu0 %v9394_v12  ;;  %v9453_v12 = vcombine.high %v4201_v17, %v4205_v22 }
 0x70b   :  { %7665 = vmatpush1.bf16.msra.mxu1 %v9396_v50  ;;  %7502 = vmatprep.subr.bf16.mxu0 %v9403_v25  ;;  %v4208_v50 = vld [vmem:[#allocation20 + $0x590] sm:$0xff] }
 0x70c   :  { %7666 = vmatprep.subr.bf16.mxu1 %v9405_v41  ;;  %v4212_v25 = vld [vmem:[#allocation20 + $0x5b0] sm:$0xff]  ;;  %v4209_v41 = vld [vmem:[#allocation20 + $0x598] sm:$0xff] }
 0x70d   :  { %v9459_v0 = vcombine.high %v4208_v50, %v4212_v25  ;;  %v9458_v26 = vcombine.low %v4208_v50, %v4212_v25  ;;  %v4261_v50 = vld [vmem:[#allocation20 + $0x738] sm:$0xff] }
 0x70e   :  { %7503 = vmatpush1.bf16.msra.mxu0 %v9402_v36  ;;  %v9461_v36 = vcombine.high %v4209_v41, %v4213_v38 }
 0x70f   :  { %7667 = vmatpush1.bf16.msra.mxu1 %v9404_v13  ;;  %7513 = vmatprep.subr.bf16.mxu0 %v9411_v54  ;;  %v4216_v13 = vld [vmem:[#allocation20 + $0x5d0] sm:$0xff] }
 0x710   :  { %7677 = vmatprep.subr.bf16.mxu1 %v9413_v2  ;;  %v4220_v54 = vld [vmem:[#allocation20 + $0x5f0] sm:$0xff]  ;;  %v4217_v2 = vld [vmem:[#allocation20 + $0x5d8] sm:$0xff] }
 0x711   :  { %7505 = vmatmul.mubr.bf16.vlgmr.msra.gmra.mrb[36].mxu0 %v11779_v55  ;;  %v9467_v6 = vcombine.high %v4216_v13, %v4220_v54  ;;  %v9469_v43 = vcombine.high %v4217_v2, %v4221_v30 }
 0x712   :  { %7669 = vmatmul.mubr.bf16.vlgmr.msra.gmra.mrb[92].mxu1 %v11779_v55  ;;  %7514 = vmatpush1.bf16.msra.mxu0 %v9410_v28  ;;  %v9428_v55 = vcombine.low %v4177_v49, %v4181_v51  ;;  %v9460_v28 = vcombine.low %v4209_v41, %v4213_v38  ;;  %v9468_v49 = vcombine.low %v4217_v2, %v4221_v30 }
 0x713   :  { %7545 = vmatprep.mubr.bf16.mxu0 %v11785_v46  ;;  %7678 = vmatpush1.bf16.msra.mxu1 %v9412_v8  ;;  %v4224_v8 = vld [vmem:[#allocation20 + $0x610] sm:$0xff] }
 0x714   :  { %7709 = vmatprep.mubr.bf16.mxu1 %v11785_v46  ;;  %7515 = vmatprep.subr.bf16.mxu0 %v9419_v1  ;;  %v9434_v46 = vcombine.low %v4184_v61, %v4188_v31  ;;  %v4228_v1 = vld [vmem:[#allocation20 + $0x630] sm:$0xff]  ;;  %v4237_v61 = vld [vmem:[#allocation20 + $0x678] sm:$0xff] }
 0x715   :  { %7679 = vmatprep.subr.bf16.mxu1 %v9421_v45  ;;  %v9466_v45 = vcombine.low %v4216_v13, %v4220_v54  ;;  %v9475_v51 = vcombine.high %v4224_v8, %v4228_v1  ;;  %v9474_v31 = vcombine.low %v4224_v8, %v4228_v1  ;;  %v4269_v13 = vld [vmem:[#allocation20 + $0x778] sm:$0xff] }
 0x716   :  { %7516 = vmatpush1.bf16.msra.mxu0 %v9418_v53  ;;  %v9477_v53 = vcombine.high %v4225_v59, %v4229_v44  ;;  %v4277_v8 = vld [vmem:[#allocation20 + $0x7b8] sm:$0xff] }
 0x717   :  { %7680 = vmatpush1.bf16.msra.mxu1 %v9420_v58  ;;  %7517 = vmatprep.subr.bf16.mxu0 %v9427_v60  ;;  %v4232_v58 = vld [vmem:[#allocation20 + $0x650] sm:$0xff] }
 0x718   :  { %7681 = vmatprep.subr.bf16.mxu1 %v9429_v40  ;;  %v4236_v60 = vld [vmem:[#allocation20 + $0x670] sm:$0xff]  ;;  %v4233_v40 = vld [vmem:[#allocation20 + $0x658] sm:$0xff] }
 0x719   :  { %v9483_v14 = vcombine.high %v4232_v58, %v4236_v60  ;;  %v9482_v10 = vcombine.low %v4232_v58, %v4236_v60  ;;  %v9484_v57 = vcombine.low %v4233_v40, %v4237_v61  ;;  %v4285_v58 = vld [vmem:[#allocation20 + $0x7f8] sm:$0xff] }
 0x71a   :  { %7518 = vmatpush1.bf16.msra.mxu0 %v9426_v3  ;;  %v9485_v3 = vcombine.high %v4233_v40, %v4237_v61 }
 0x71b   :  { %7682 = vmatpush1.bf16.msra.mxu1 %v9428_v55  ;;  %7519 = vmatprep.subr.bf16.mxu0 %v9435_v5  ;;  %v4240_v55 = vld [vmem:[#allocation20 + $0x690] sm:$0xff] }
 0x71c   :  { %7683 = vmatprep.subr.bf16.mxu1 %v9437_v7  ;;  %v4244_v5 = vld [vmem:[#allocation20 + $0x6b0] sm:$0xff]  ;;  %v4241_v7 = vld [vmem:[#allocation20 + $0x698] sm:$0xff] }
 0x71d   :  { %v9491_v52 = vcombine.high %v4240_v55, %v4244_v5  ;;  %v9490_v11 = vcombine.low %v4240_v55, %v4244_v5  ;;  %v9492_v17 = vcombine.low %v4241_v7, %v4245_v19  ;;  %v4293_v55 = vld [vmem:[#allocation20 + $0x838] sm:$0xff] }
 0x71e   :  { %7520 = vmatpush1.bf16.msra.mxu0 %v9434_v46  ;;  %v9493_v46 = vcombine.high %v4241_v7, %v4245_v19 }
 0x71f   :  { %7684 = vmatpush1.bf16.msra.mxu1 %v9436_v16  ;;  %7521 = vmatprep.subr.bf16.mxu0 %v9443_v15  ;;  %v4248_v16 = vld [vmem:[#allocation20 + $0x6d0] sm:$0xff] }
 0x720   :  { %7685 = vmatprep.subr.bf16.mxu1 %v9445_v20  ;;  %v4252_v15 = vld [vmem:[#allocation20 + $0x6f0] sm:$0xff]  ;;  %v4249_v20 = vld [vmem:[#allocation20 + $0x6d8] sm:$0xff] }
 0x721   :  { %v9499_v22 = vcombine.high %v4248_v16, %v4252_v15  ;;  %v9498_v25 = vcombine.low %v4248_v16, %v4252_v15  ;;  %v9500_v41 = vcombine.low %v4249_v20, %v4253_v21  ;;  %v4297_v16 = vld [vmem:[#allocation20 + $0x858] sm:$0xff] }
 0x722   :  { %7522 = vmatpush1.bf16.msra.mxu0 %v9442_v18  ;;  %v9501_v18 = vcombine.high %v4249_v20, %v4253_v21  ;;  %v4301_v15 = vld [vmem:[#allocation20 + $0x878] sm:$0xff] }
 0x723   :  { %7686 = vmatpush1.bf16.msra.mxu1 %v9444_v63  ;;  %7523 = vmatprep.subr.bf16.mxu0 %v9451_v33  ;;  %v4256_v63 = vld [vmem:[#allocation20 + $0x710] sm:$0xff] }
 0x724   :  { %7687 = vmatprep.subr.bf16.mxu1 %v9453_v12  ;;  %v4260_v33 = vld [vmem:[#allocation20 + $0x730] sm:$0xff]  ;;  %v4257_v12 = vld [vmem:[#allocation20 + $0x718] sm:$0xff] }
 0x725   :  { %v9507_v38 = vcombine.high %v4256_v63, %v4260_v33  ;;  %v9506_v54 = vcombine.low %v4256_v63, %v4260_v33  ;;  %v9508_v2 = vcombine.low %v4257_v12, %v4261_v50  ;;  %v4309_v63 = vld [vmem:[#allocation20 + $0x8b8] sm:$0xff] }
 0x726   :  { %7524 = vmatpush1.bf16.msra.mxu0 %v9450_v27  ;;  %v9509_v27 = vcombine.high %v4257_v12, %v4261_v50  ;;  %v9548_v12 = vcombine.low %v4297_v16, %v4301_v15 }
 0x727   :  { %7688 = vmatpush1.bf16.msra.mxu1 %v9452_v29  ;;  %7525 = vmatprep.subr.bf16.mxu0 %v9459_v0  ;;  %v4264_v29 = vld [vmem:[#allocation20 + $0x750] sm:$0xff] }
 0x728   :  { %7689 = vmatprep.subr.bf16.mxu1 %v9461_v36  ;;  %v4268_v0 = vld [vmem:[#allocation20 + $0x770] sm:$0xff]  ;;  %v4265_v36 = vld [vmem:[#allocation20 + $0x758] sm:$0xff] }
 0x729   :  { %v9515_v30 = vcombine.high %v4264_v29, %v4268_v0  ;;  %v9514_v1 = vcombine.low %v4264_v29, %v4268_v0  ;;  %v9516_v59 = vcombine.low %v4265_v36, %v4269_v13  ;;  %v4317_v29 = vld [vmem:[#allocation20 + $0x8f8] sm:$0xff] }
 0x72a   :  { %7526 = vmatpush1.bf16.msra.mxu0 %v9458_v26  ;;  %v9517_v26 = vcombine.high %v4265_v36, %v4269_v13 }
 0x72b   :  { %7690 = vmatpush1.bf16.msra.mxu1 %v9460_v28  ;;  %7527 = vmatprep.subr.bf16.mxu0 %v9467_v6  ;;  %v4272_v28 = vld [vmem:[#allocation20 + $0x790] sm:$0xff] }
 0x72c   :  { %7691 = vmatprep.subr.bf16.mxu1 %v9469_v43  ;;  %v4276_v6 = vld [vmem:[#allocation20 + $0x7b0] sm:$0xff]  ;;  %v4273_v43 = vld [vmem:[#allocation20 + $0x798] sm:$0xff] }
 0x72d   :  { %v9523_v44 = vcombine.high %v4272_v28, %v4276_v6  ;;  %v9522_v60 = vcombine.low %v4272_v28, %v4276_v6  ;;  %v9524_v40 = vcombine.low %v4273_v43, %v4277_v8 }
 0x72e   :  { %7528 = vmatpush1.bf16.msra.mxu0 %v9466_v45  ;;  %v9525_v45 = vcombine.high %v4273_v43, %v4277_v8  ;;  %v4328_v8 = vld [vmem:[#allocation20 + $0x950] sm:$0xff] }
 0x72f   :  { %7692 = vmatpush1.bf16.msra.mxu1 %v9468_v49  ;;  %7529 = vmatprep.subr.bf16.mxu0 %v9475_v51  ;;  %v4280_v49 = vld [vmem:[#allocation20 + $0x7d0] sm:$0xff] }
 0x730   :  { %7693 = vmatprep.subr.bf16.mxu1 %v9477_v53  ;;  %v4284_v51 = vld [vmem:[#allocation20 + $0x7f0] sm:$0xff]  ;;  %v4281_v53 = vld [vmem:[#allocation20 + $0x7d8] sm:$0xff] }
 0x731   :  { %v9531_v61 = vcombine.high %v4280_v49, %v4284_v51  ;;  %v9530_v5 = vcombine.low %v4280_v49, %v4284_v51  ;;  %v9532_v7 = vcombine.low %v4281_v53, %v4285_v58 }
 0x732   :  { %7530 = vmatpush1.bf16.msra.mxu0 %v9474_v31  ;;  %v9533_v31 = vcombine.high %v4281_v53, %v4285_v58  ;;  %v4336_v58 = vld [vmem:[#allocation20 + $0x990] sm:$0xff] }
 0x733   :  { %7694 = vmatpush1.bf16.msra.mxu1 %v9476_v62  ;;  %7531 = vmatprep.subr.bf16.mxu0 %v9483_v14  ;;  %v4288_v62 = vld [vmem:[#allocation20 + $0x810] sm:$0xff] }
 0x734   :  { %7695 = vmatprep.subr.bf16.mxu1 %v9485_v3  ;;  %v4292_v14 = vld [vmem:[#allocation20 + $0x830] sm:$0xff]  ;;  %v4289_v3 = vld [vmem:[#allocation20 + $0x818] sm:$0xff] }
 0x735   :  { %v9539_v19 = vcombine.high %v4288_v62, %v4292_v14  ;;  %v9540_v20 = vcombine.low %v4289_v3, %v4293_v55 }
 0x736   :  { %7532 = vmatpush1.bf16.msra.mxu0 %v9482_v10  ;;  %v9541_v10 = vcombine.high %v4289_v3, %v4293_v55  ;;  %v4344_v55 = vld [vmem:[#allocation20 + $0x9d0] sm:$0xff] }
 0x737   :  { %7696 = vmatpush1.bf16.msra.mxu1 %v9484_v57  ;;  %7533 = vmatprep.subr.bf16.mxu0 %v9491_v52  ;;  %v4296_v57 = vld [vmem:[#allocation20 + $0x850] sm:$0xff] }
 0x738   :  { %7697 = vmatprep.subr.bf16.mxu1 %v9493_v46  ;;  %v4300_v52 = vld [vmem:[#allocation20 + $0x870] sm:$0xff]  ;;  %v9538_v46 = vcombine.low %v4288_v62, %v4292_v14 }
 0x739   :  { %v9547_v21 = vcombine.high %v4296_v57, %v4300_v52  ;;  %v9546_v33 = vcombine.low %v4296_v57, %v4300_v52 }
 0x73a   :  { %7534 = vmatpush1.bf16.msra.mxu0 %v9490_v11  ;;  %v4304_v11 = vld [vmem:[#allocation20 + $0x890] sm:$0xff] }
 0x73b   :  { %7698 = vmatpush1.bf16.msra.mxu1 %v9492_v17  ;;  %7535 = vmatprep.subr.bf16.mxu0 %v9499_v22  ;;  %v4308_v17 = vld [vmem:[#allocation20 + $0x8b0] sm:$0xff]  ;;  %v9549_v22 = vcombine.high %v4297_v16, %v4301_v15 }
 0x73c   :  { %7699 = vmatprep.subr.bf16.mxu1 %v9501_v18  ;;  %v4305_v18 = vld [vmem:[#allocation20 + $0x898] sm:$0xff]  ;;  %v9555_v50 = vcombine.high %v4304_v11, %v4308_v17  ;;  %v9554_v0 = vcombine.low %v4304_v11, %v4308_v17  ;;  %v4352_v16 = vld [vmem:[#allocation20 + $0xa10] sm:$0xff] }
 0x73d   :  { %v4356_v15 = vld [vmem:[#allocation20 + $0xa30] sm:$0xff] }
 0x73e   :  { %7536 = vmatpush1.bf16.msra.mxu0 %v9498_v25  ;;  %v9557_v25 = vcombine.high %v4305_v18, %v4309_v63 }
 0x73f   :  { %7700 = vmatpush1.bf16.msra.mxu1 %v9500_v41  ;;  %7537 = vmatprep.subr.bf16.mxu0 %v9507_v38  ;;  %v4312_v41 = vld [vmem:[#allocation20 + $0x8d0] sm:$0xff] }
 0x740   :  { %7701 = vmatprep.subr.bf16.mxu1 %v9509_v27  ;;  %v4316_v38 = vld [vmem:[#allocation20 + $0x8f0] sm:$0xff]  ;;  %v4313_v27 = vld [vmem:[#allocation20 + $0x8d8] sm:$0xff] }
 0x741   :  { %v9563_v36 = vcombine.high %v4312_v41, %v4316_v38  ;;  %v9565_v13 = vcombine.high %v4313_v27, %v4317_v29  ;;  %v9564_v28 = vcombine.low %v4313_v27, %v4317_v29  ;;  %v4368_v29 = vld [vmem:[#allocation20 + $0xa90] sm:$0xff] }
 0x742   :  { %7538 = vmatpush1.bf16.msra.mxu0 %v9506_v54  ;;  %v4320_v54 = vld [vmem:[#allocation20 + $0x910] sm:$0xff] }
 0x743   :  { %7702 = vmatpush1.bf16.msra.mxu1 %v9508_v2  ;;  %7539 = vmatprep.subr.bf16.mxu0 %v9515_v30  ;;  %v4324_v2 = vld [vmem:[#allocation20 + $0x930] sm:$0xff]  ;;  %v4321_v30 = vld [vmem:[#allocation20 + $0x918] sm:$0xff] }
 0x744   :  { %7703 = vmatprep.subr.bf16.mxu1 %v9517_v26  ;;  %v4325_v26 = vld [vmem:[#allocation20 + $0x938] sm:$0xff]  ;;  %v9571_v6 = vcombine.high %v4320_v54, %v4324_v2 }
 0x745   :  { %v9573_v43 = vcombine.high %v4321_v30, %v4325_v26  ;;  %v9572_v49 = vcombine.low %v4321_v30, %v4325_v26  ;;  %v4376_v26 = vld [vmem:[#allocation20 + $0xad0] sm:$0xff] }
 0x746   :  { %7540 = vmatpush1.bf16.msra.mxu0 %v9514_v1  ;;  %v4332_v1 = vld [vmem:[#allocation20 + $0x970] sm:$0xff] }
 0x747   :  { %7704 = vmatpush1.bf16.msra.mxu1 %v9516_v59  ;;  %7541 = vmatprep.subr.bf16.mxu0 %v9523_v44  ;;  %v4329_v59 = vld [vmem:[#allocation20 + $0x958] sm:$0xff]  ;;  %v9579_v51 = vcombine.high %v4328_v8, %v4332_v1 }
 0x748   :  { %7705 = vmatprep.subr.bf16.mxu1 %v9525_v45  ;;  %v4333_v44 = vld [vmem:[#allocation20 + $0x978] sm:$0xff]  ;;  %v9570_v45 = vcombine.low %v4320_v54, %v4324_v2 }
 0x749   :  { %v9581_v53 = vcombine.high %v4329_v59, %v4333_v44  ;;  %v9580_v62 = vcombine.low %v4329_v59, %v4333_v44  ;;  %v4384_v44 = vld [vmem:[#allocation20 + $0xb10] sm:$0xff] }
 0x74a   :  { %7542 = vmatpush1.bf16.msra.mxu0 %v9522_v60  ;;  %v4340_v60 = vld [vmem:[#allocation20 + $0x9b0] sm:$0xff] }
 0x74b   :  { %7706 = vmatpush1.bf16.msra.mxu1 %v9524_v40  ;;  %7543 = vmatprep.subr.bf16.mxu0 %v9531_v61  ;;  %v4337_v40 = vld [vmem:[#allocation20 + $0x998] sm:$0xff]  ;;  %v9587_v14 = vcombine.high %v4336_v58, %v4340_v60 }
 0x74c   :  { %7707 = vmatprep.subr.bf16.mxu1 %v9533_v31  ;;  %v4341_v61 = vld [vmem:[#allocation20 + $0x9b8] sm:$0xff]  ;;  %v9578_v31 = vcombine.low %v4328_v8, %v4332_v1 }
 0x74d   :  { %v9589_v3 = vcombine.high %v4337_v40, %v4341_v61  ;;  %v9588_v57 = vcombine.low %v4337_v40, %v4341_v61  ;;  %v4392_v61 = vld [vmem:[#allocation20 + $0xb50] sm:$0xff] }
 0x74e   :  { %7544 = vmatpush1.bf16.msra.mxu0 %v9530_v5  ;;  %v4348_v5 = vld [vmem:[#allocation20 + $0x9f0] sm:$0xff] }
 0x74f   :  { %7708 = vmatpush1.bf16.msra.mxu1 %v9532_v7  ;;  %7554 = vmatprep.subr.bf16.mxu0 %v9539_v19  ;;  %v4345_v7 = vld [vmem:[#allocation20 + $0x9d8] sm:$0xff]  ;;  %v9595_v52 = vcombine.high %v4344_v55, %v4348_v5  ;;  %v9594_v11 = vcombine.low %v4344_v55, %v4348_v5 }
 0x750   :  { %7718 = vmatprep.subr.bf16.mxu1 %v9541_v10  ;;  %v4349_v19 = vld [vmem:[#allocation20 + $0x9f8] sm:$0xff]  ;;  %v9586_v10 = vcombine.low %v4336_v58, %v4340_v60 }
 0x751   :  { %7546 = vmatmul.mubr.bf16.vlgmr.msra.gmra.mrb[36].mxu0 %v11799_v34  ;;  %v9596_v17 = vcombine.low %v4345_v7, %v4349_v19 }
 0x752   :  { %7710 = vmatmul.mubr.bf16.vlgmr.msra.gmra.mrb[92].mxu1 %v11799_v34  ;;  %7555 = vmatpush1.bf16.msra.mxu0 %v9538_v46  ;;  %v9556_v34 = vcombine.low %v4305_v18, %v4309_v63  ;;  %v9597_v46 = vcombine.high %v4345_v7, %v4349_v19  ;;  %v4360_v63 = vld [vmem:[#allocation20 + $0xa50] sm:$0xff] }
 0x753   :  { %7586 = vmatprep.mubr.bf16.mxu0 %v11801_v47  ;;  %7719 = vmatpush1.bf16.msra.mxu1 %v9540_v20  ;;  %v4353_v20 = vld [vmem:[#allocation20 + $0xa18] sm:$0xff]  ;;  %v4400_v19 = vld [vmem:[#allocation20 + $0xb90] sm:$0xff] }
 0x754   :  { %7750 = vmatprep.mubr.bf16.mxu1 %v11801_v47  ;;  %7556 = vmatprep.subr.bf16.mxu0 %v9547_v21  ;;  %v9562_v47 = vcombine.low %v4312_v41, %v4316_v38  ;;  %v4357_v21 = vld [vmem:[#allocation20 + $0xa38] sm:$0xff] }
 0x755   :  { %7720 = vmatprep.subr.bf16.mxu1 %v9549_v22  ;;  %v9603_v22 = vcombine.high %v4352_v16, %v4356_v15  ;;  %v9605_v18 = vcombine.high %v4353_v20, %v4357_v21  ;;  %v9604_v41 = vcombine.low %v4353_v20, %v4357_v21  ;;  %v4408_v21 = vld [vmem:[#allocation20 + $0xbd0] sm:$0xff] }
 0x756   :  { %7557 = vmatpush1.bf16.msra.mxu0 %v9546_v33  ;;  %v4364_v33 = vld [vmem:[#allocation20 + $0xa70] sm:$0xff] }
 0x757   :  { %7721 = vmatpush1.bf16.msra.mxu1 %v9548_v12  ;;  %7558 = vmatprep.subr.bf16.mxu0 %v9555_v50  ;;  %v4361_v12 = vld [vmem:[#allocation20 + $0xa58] sm:$0xff]  ;;  %v9611_v38 = vcombine.high %v4360_v63, %v4364_v33 }
 0x758   :  { %7722 = vmatprep.subr.bf16.mxu1 %v9557_v25  ;;  %v4365_v50 = vld [vmem:[#allocation20 + $0xa78] sm:$0xff]  ;;  %v9602_v25 = vcombine.low %v4352_v16, %v4356_v15 }
 0x759   :  { %v9613_v27 = vcombine.high %v4361_v12, %v4365_v50  ;;  %v9612_v54 = vcombine.low %v4361_v12, %v4365_v50  ;;  %v4416_v50 = vld [vmem:[#allocation20 + $0xc10] sm:$0xff] }
 0x75a   :  { %7559 = vmatpush1.bf16.msra.mxu0 %v9554_v0  ;;  %v4372_v0 = vld [vmem:[#allocation20 + $0xab0] sm:$0xff] }
 0x75b   :  { %7723 = vmatpush1.bf16.msra.mxu1 %v9556_v34  ;;  %7560 = vmatprep.subr.bf16.mxu0 %v9563_v36  ;;  %v4369_v34 = vld [vmem:[#allocation20 + $0xa98] sm:$0xff]  ;;  %v9619_v2 = vcombine.high %v4368_v29, %v4372_v0 }
 0x75c   :  { %7724 = vmatprep.subr.bf16.mxu1 %v9565_v13  ;;  %v4373_v36 = vld [vmem:[#allocation20 + $0xab8] sm:$0xff]  ;;  %v9610_v13 = vcombine.low %v4360_v63, %v4364_v33 }
 0x75d   :  { %v9621_v30 = vcombine.high %v4369_v34, %v4373_v36  ;;  %v9620_v8 = vcombine.low %v4369_v34, %v4373_v36  ;;  %v4424_v36 = vld [vmem:[#allocation20 + $0xc50] sm:$0xff] }
 0x75e   :  { %7561 = vmatpush1.bf16.msra.mxu0 %v9562_v47  ;;  %v4380_v47 = vld [vmem:[#allocation20 + $0xaf0] sm:$0xff] }
 0x75f   :  { %7725 = vmatpush1.bf16.msra.mxu1 %v9564_v28  ;;  %7562 = vmatprep.subr.bf16.mxu0 %v9571_v6  ;;  %v4377_v28 = vld [vmem:[#allocation20 + $0xad8] sm:$0xff]  ;;  %v9627_v1 = vcombine.high %v4376_v26, %v4380_v47 }
 0x760   :  { %7726 = vmatprep.subr.bf16.mxu1 %v9573_v43  ;;  %v4381_v6 = vld [vmem:[#allocation20 + $0xaf8] sm:$0xff]  ;;  %v9618_v43 = vcombine.low %v4368_v29, %v4372_v0 }
 0x761   :  { %v9629_v59 = vcombine.high %v4377_v28, %v4381_v6  ;;  %v9628_v58 = vcombine.low %v4377_v28, %v4381_v6  ;;  %v4432_v28 = vld [vmem:[#allocation20 + $0xc90] sm:$0xff] }
 0x762   :  { %7563 = vmatpush1.bf16.msra.mxu0 %v9570_v45  ;;  %v4388_v45 = vld [vmem:[#allocation20 + $0xb30] sm:$0xff] }
 0x763   :  { %7727 = vmatpush1.bf16.msra.mxu1 %v9572_v49  ;;  %7564 = vmatprep.subr.bf16.mxu0 %v9579_v51  ;;  %v4385_v49 = vld [vmem:[#allocation20 + $0xb18] sm:$0xff]  ;;  %v9635_v60 = vcombine.high %v4384_v44, %v4388_v45  ;;  %v4436_v6 = vld [vmem:[#allocation20 + $0xcb0] sm:$0xff] }
 0x764   :  { %7728 = vmatprep.subr.bf16.mxu1 %v9581_v53  ;;  %v4389_v51 = vld [vmem:[#allocation20 + $0xb38] sm:$0xff]  ;;  %v9626_v53 = vcombine.low %v4376_v26, %v4380_v47 }
 0x765   :  { %v9637_v40 = vcombine.high %v4385_v49, %v4389_v51  ;;  %v9636_v55 = vcombine.low %v4385_v49, %v4389_v51  ;;  %v4440_v51 = vld [vmem:[#allocation20 + $0xcd0] sm:$0xff] }
 0x766   :  { %7565 = vmatpush1.bf16.msra.mxu0 %v9578_v31  ;;  %v4396_v31 = vld [vmem:[#allocation20 + $0xb70] sm:$0xff] }
 0x767   :  { %7729 = vmatpush1.bf16.msra.mxu1 %v9580_v62  ;;  %7566 = vmatprep.subr.bf16.mxu0 %v9587_v14  ;;  %v4393_v62 = vld [vmem:[#allocation20 + $0xb58] sm:$0xff]  ;;  %v9643_v5 = vcombine.high %v4392_v61, %v4396_v31 }
 0x768   :  { %7730 = vmatprep.subr.bf16.mxu1 %v9589_v3  ;;  %v4397_v14 = vld [vmem:[#allocation20 + $0xb78] sm:$0xff]  ;;  %v9634_v3 = vcombine.low %v4384_v44, %v4388_v45  ;;  %v9683_v45 = vcombine.high %v4432_v28, %v4436_v6 }
 0x769   :  { %v9645_v7 = vcombine.high %v4393_v62, %v4397_v14  ;;  %v9644_v16 = vcombine.low %v4393_v62, %v4397_v14  ;;  %v4448_v62 = vld [vmem:[#allocation20 + $0xd10] sm:$0xff] }
 0x76a   :  { %7567 = vmatpush1.bf16.msra.mxu0 %v9586_v10  ;;  %v4404_v10 = vld [vmem:[#allocation20 + $0xbb0] sm:$0xff] }
 0x76b   :  { %7731 = vmatpush1.bf16.msra.mxu1 %v9588_v57  ;;  %7568 = vmatprep.subr.bf16.mxu0 %v9595_v52  ;;  %v4401_v57 = vld [vmem:[#allocation20 + $0xb98] sm:$0xff]  ;;  %v9651_v15 = vcombine.high %v4400_v19, %v4404_v10  ;;  %v4452_v14 = vld [vmem:[#allocation20 + $0xd30] sm:$0xff] }
 0x76c   :  { %7732 = vmatprep.subr.bf16.mxu1 %v9597_v46  ;;  %v4405_v52 = vld [vmem:[#allocation20 + $0xbb8] sm:$0xff]  ;;  %v9642_v46 = vcombine.low %v4392_v61, %v4396_v31 }
 0x76d   :  { %v9653_v20 = vcombine.high %v4401_v57, %v4405_v52  ;;  %v9652_v63 = vcombine.low %v4401_v57, %v4405_v52  ;;  %v4460_v57 = vld [vmem:[#allocation20 + $0xd70] sm:$0xff]  ;;  %v4457_v52 = vld [vmem:[#allocation20 + $0xd58] sm:$0xff] }
 0x76e   :  { %7569 = vmatpush1.bf16.msra.mxu0 %v9594_v11  ;;  %v4412_v11 = vld [vmem:[#allocation20 + $0xbf0] sm:$0xff] }
 0x76f   :  { %7733 = vmatpush1.bf16.msra.mxu1 %v9596_v17  ;;  %7570 = vmatprep.subr.bf16.mxu0 %v9603_v22  ;;  %v4409_v17 = vld [vmem:[#allocation20 + $0xbd8] sm:$0xff]  ;;  %v9659_v33 = vcombine.high %v4408_v21, %v4412_v11 }
 0x770   :  { %7734 = vmatprep.subr.bf16.mxu1 %v9605_v18  ;;  %v4413_v22 = vld [vmem:[#allocation20 + $0xbf8] sm:$0xff]  ;;  %v9650_v18 = vcombine.low %v4400_v19, %v4404_v10  ;;  %v4456_v10 = vld [vmem:[#allocation20 + $0xd50] sm:$0xff] }
 0x771   :  { %v9661_v12 = vcombine.high %v4409_v17, %v4413_v22  ;;  %v9660_v29 = vcombine.low %v4409_v17, %v4413_v22  ;;  %v4468_v17 = vld [vmem:[#allocation20 + $0xdb0] sm:$0xff]  ;;  %v4465_v22 = vld [vmem:[#allocation20 + $0xd98] sm:$0xff] }
 0x772   :  { %7571 = vmatpush1.bf16.msra.mxu0 %v9602_v25  ;;  %v4420_v25 = vld [vmem:[#allocation20 + $0xc30] sm:$0xff] }
 0x773   :  { %7735 = vmatpush1.bf16.msra.mxu1 %v9604_v41  ;;  %7572 = vmatprep.subr.bf16.mxu0 %v9611_v38  ;;  %v4417_v41 = vld [vmem:[#allocation20 + $0xc18] sm:$0xff]  ;;  %v9667_v0 = vcombine.high %v4416_v50, %v4420_v25 }
 0x774   :  { %7736 = vmatprep.subr.bf16.mxu1 %v9613_v27  ;;  %v4421_v38 = vld [vmem:[#allocation20 + $0xc38] sm:$0xff]  ;;  %v9658_v27 = vcombine.low %v4408_v21, %v4412_v11  ;;  %v4464_v11 = vld [vmem:[#allocation20 + $0xd90] sm:$0xff] }
 0x775   :  { %v9669_v34 = vcombine.high %v4417_v41, %v4421_v38  ;;  %v9668_v26 = vcombine.low %v4417_v41, %v4421_v38  ;;  %v4472_v41 = vld [vmem:[#allocation20 + $0xdd0] sm:$0xff] }
 0x776   :  { %7573 = vmatpush1.bf16.msra.mxu0 %v9610_v13  ;;  %v4428_v13 = vld [vmem:[#allocation20 + $0xc70] sm:$0xff] }
 0x777   :  { %7737 = vmatpush1.bf16.msra.mxu1 %v9612_v54  ;;  %7574 = vmatprep.subr.bf16.mxu0 %v9619_v2  ;;  %v9666_v54 = vcombine.low %v4416_v50, %v4420_v25  ;;  %v4425_v2 = vld [vmem:[#allocation20 + $0xc58] sm:$0xff]  ;;  %v9675_v47 = vcombine.high %v4424_v36, %v4428_v13  ;;  %v4476_v38 = vld [vmem:[#allocation20 + $0xdf0] sm:$0xff] }
 0x778   :  { %7738 = vmatprep.subr.bf16.mxu1 %v9621_v30  ;;  %v4429_v30 = vld [vmem:[#allocation20 + $0xc78] sm:$0xff] }
 0x779   :  { %v9676_v44 = vcombine.low %v4425_v2, %v4429_v30 }
 0x77a   :  { %7575 = vmatpush1.bf16.msra.mxu0 %v9618_v43  ;;  %v9677_v43 = vcombine.high %v4425_v2, %v4429_v30 }
 0x77b   :  { %7739 = vmatpush1.bf16.msra.mxu1 %v9620_v8  ;;  %7576 = vmatprep.subr.bf16.mxu0 %v9627_v1  ;;  %v4433_v8 = vld [vmem:[#allocation20 + $0xc98] sm:$0xff] }
 0x77c   :  { %7740 = vmatprep.subr.bf16.mxu1 %v9629_v59  ;;  %v4437_v1 = vld [vmem:[#allocation20 + $0xcb8] sm:$0xff]  ;;  %v9674_v59 = vcombine.low %v4424_v36, %v4428_v13 }
 0x77d   :  { %v9685_v49 = vcombine.high %v4433_v8, %v4437_v1 }
 0x77e   :  { %7577 = vmatpush1.bf16.msra.mxu0 %v9626_v53  ;;  %v4444_v53 = vld [vmem:[#allocation20 + $0xcf0] sm:$0xff] }
 0x77f   :  { %7741 = vmatpush1.bf16.msra.mxu1 %v9628_v58  ;;  %7578 = vmatprep.subr.bf16.mxu0 %v9635_v60  ;;  %v4441_v58 = vld [vmem:[#allocation20 + $0xcd8] sm:$0xff]  ;;  %v9691_v61 = vcombine.high %v4440_v51, %v4444_v53 }
 0x780   :  { %7742 = vmatprep.subr.bf16.mxu1 %v9637_v40  ;;  %v4445_v60 = vld [vmem:[#allocation20 + $0xcf8] sm:$0xff]  ;;  %v9682_v40 = vcombine.low %v4432_v28, %v4436_v6 }
 0x781   :  { %v9693_v31 = vcombine.high %v4441_v58, %v4445_v60 }
 0x782   :  { %7579 = vmatpush1.bf16.msra.mxu0 %v9634_v3  ;;  %v4449_v3 = vld [vmem:[#allocation20 + $0xd18] sm:$0xff] }
 0x783   :  { %7743 = vmatpush1.bf16.msra.mxu1 %v9636_v55  ;;  %7580 = vmatprep.subr.bf16.mxu0 %v9643_v5  ;;  %v4453_v55 = vld [vmem:[#allocation20 + $0xd38] sm:$0xff]  ;;  %v9692_v5 = vcombine.low %v4441_v58, %v4445_v60  ;;  %v4492_v58 = vld [vmem:[#allocation20 + $0xe70] sm:$0xff] }
 0x784   :  { %7744 = vmatprep.subr.bf16.mxu1 %v9645_v7  ;;  %v9699_v7 = vcombine.high %v4448_v62, %v4452_v14  ;;  %v9701_v19 = vcombine.high %v4449_v3, %v4453_v55  ;;  %v4489_v60 = vld [vmem:[#allocation20 + $0xe58] sm:$0xff] }
 0x786   :  { %7581 = vmatpush1.bf16.msra.mxu0 %v9642_v46  ;;  %v4461_v46 = vld [vmem:[#allocation20 + $0xd78] sm:$0xff] }
 0x787   :  { %7745 = vmatpush1.bf16.msra.mxu1 %v9644_v16  ;;  %7582 = vmatprep.subr.bf16.mxu0 %v9651_v15  ;;  %v9698_v16 = vcombine.low %v4448_v62, %v4452_v14  ;;  %v9700_v15 = vcombine.low %v4449_v3, %v4453_v55  ;;  %v9709_v21 = vcombine.high %v4457_v52, %v4461_v46  ;;  %v4496_v14 = vld [vmem:[#allocation20 + $0xe90] sm:$0xff]  ;;  %v4497_v55 = vld [vmem:[#allocation20 + $0xe98] sm:$0xff] }
 0x788   :  { %7746 = vmatprep.subr.bf16.mxu1 %v9653_v20  ;;  %v9707_v20 = vcombine.high %v4456_v10, %v4460_v57  ;;  %v4500_v3 = vld [vmem:[#allocation20 + $0xeb0] sm:$0xff] }
 0x78a   :  { %7583 = vmatpush1.bf16.msra.mxu0 %v9650_v18  ;;  %v4469_v18 = vld [vmem:[#allocation20 + $0xdb8] sm:$0xff] }
 0x78b   :  { %7747 = vmatpush1.bf16.msra.mxu1 %v9652_v63  ;;  %7584 = vmatprep.subr.bf16.mxu0 %v9659_v33  ;;  %v9706_v63 = vcombine.low %v4456_v10, %v4460_v57  ;;  %v9708_v33 = vcombine.low %v4457_v52, %v4461_v46  ;;  %v9717_v25 = vcombine.high %v4465_v22, %v4469_v18  ;;  %v4504_v57 = vld [vmem:[#allocation20 + $0xed0] sm:$0xff]  ;;  %v4505_v46 = vld [vmem:[#allocation20 + $0xed8] sm:$0xff] }
 0x78c   :  { %7748 = vmatprep.subr.bf16.mxu1 %v9661_v12  ;;  %v9715_v12 = vcombine.high %v4464_v11, %v4468_v17  ;;  %v4508_v52 = vld [vmem:[#allocation20 + $0xef0] sm:$0xff] }
 0x78e   :  { %7585 = vmatpush1.bf16.msra.mxu0 %v9658_v27 }
 0x78f   :  { %7749 = vmatpush1.bf16.msra.mxu1 %v9660_v29  ;;  %7595 = vmatprep.subr.bf16.mxu0 %v9667_v0  ;;  %v4473_v0 = vld [vmem:[#allocation20 + $0xdd8] sm:$0xff] }
 0x790   :  { %7759 = vmatprep.subr.bf16.mxu1 %v9669_v34  ;;  %v4477_v34 = vld [vmem:[#allocation20 + $0xdf8] sm:$0xff] }
 0x791   :  { %7587 = vmatmul.mubr.bf16.vlgmr.msra.gmra.mrb[36].mxu0 %v11811_v24  ;;  %v9725_v6 = vcombine.high %v4473_v0, %v4477_v34 }
 0x792   :  { %7751 = vmatmul.mubr.bf16.vlgmr.msra.gmra.mrb[92].mxu1 %v11811_v24  ;;  %7596 = vmatpush1.bf16.msra.mxu0 %v9666_v54  ;;  %v9684_v24 = vcombine.low %v4433_v8, %v4437_v1  ;;  %v9714_v54 = vcombine.low %v4464_v11, %v4468_v17  ;;  %v4484_v8 = vld [vmem:[#allocation20 + $0xe30] sm:$0xff]  ;;  %v4481_v1 = vld [vmem:[#allocation20 + $0xe18] sm:$0xff] }
 0x793   :  { %7627 = vmatprep.mubr.bf16.mxu0 %v11814_v42  ;;  %7760 = vmatpush1.bf16.msra.mxu1 %v9668_v26  ;;  %v9716_v26 = vcombine.low %v4465_v22, %v4469_v18  ;;  %v4512_v17 = vld [vmem:[#allocation20 + $0xf10] sm:$0xff]  ;;  %v4513_v18 = vld [vmem:[#allocation20 + $0xf18] sm:$0xff] }
 0x794   :  { %7791 = vmatprep.mubr.bf16.mxu1 %v11814_v42  ;;  %7597 = vmatprep.subr.bf16.mxu0 %v9675_v47  ;;  %v9690_v42 = vcombine.low %v4440_v51, %v4444_v53  ;;  %v9723_v47 = vcombine.high %v4472_v41, %v4476_v38  ;;  %v4488_v53 = vld [vmem:[#allocation20 + $0xe50] sm:$0xff] }
 0x795   :  { %7761 = vmatprep.subr.bf16.mxu1 %v9677_v43  ;;  %v4480_v43 = vld [vmem:[#allocation20 + $0xe10] sm:$0xff] }
 0x796   :  { %7598 = vmatpush1.bf16.msra.mxu0 %v9674_v59  ;;  %v4485_v59 = vld [vmem:[#allocation20 + $0xe38] sm:$0xff]  ;;  %v4516_v22 = vld [vmem:[#allocation20 + $0xf30] sm:$0xff] }
 0x797   :  { %7762 = vmatpush1.bf16.msra.mxu1 %v9676_v44  ;;  %7599 = vmatprep.subr.bf16.mxu0 %v9683_v45  ;;  %v9722_v44 = vcombine.low %v4472_v41, %v4476_v38  ;;  %v9724_v45 = vcombine.low %v4473_v0, %v4477_v34  ;;  %v9733_v51 = vcombine.high %v4481_v1, %v4485_v59  ;;  %v4520_v38 = vld [vmem:[#allocation20 + $0xf50] sm:$0xff]  ;;  %v4521_v34 = vld [vmem:[#allocation20 + $0xf58] sm:$0xff] }
 0x798   :  { %7763 = vmatprep.subr.bf16.mxu1 %v9685_v49  ;;  %v9731_v49 = vcombine.high %v4480_v43, %v4484_v8  ;;  %v4524_v0 = vld [vmem:[#allocation20 + $0xf70] sm:$0xff] }
 0x79a   :  { %7600 = vmatpush1.bf16.msra.mxu0 %v9682_v40  ;;  %v4493_v40 = vld [vmem:[#allocation20 + $0xe78] sm:$0xff] }
 0x79b   :  { %7764 = vmatpush1.bf16.msra.mxu1 %v9684_v24  ;;  %7601 = vmatprep.subr.bf16.mxu0 %v9691_v61  ;;  %v9730_v24 = vcombine.low %v4480_v43, %v4484_v8  ;;  %v9732_v61 = vcombine.low %v4481_v1, %v4485_v59  ;;  %v9741_v62 = vcombine.high %v4489_v60, %v4493_v40  ;;  %v4533_v43 = vld [vmem:[#allocation20 + $0xfb8] sm:$0xff]  ;;  %v11847_v8 = vld [vmem:[#allocation22] sm:$0xff] }
 0x79c   :  { %7765 = vmatprep.subr.bf16.mxu1 %v9693_v31  ;;  %v9739_v31 = vcombine.high %v4488_v53, %v4492_v58  ;;  %v9770_v1 = vcombine.low %v4520_v38, %v4524_v0 }
 0x79e   :  { %7602 = vmatpush1.bf16.msra.mxu0 %v9690_v42  ;;  %v4501_v42 = vld [vmem:[#allocation20 + $0xeb8] sm:$0xff] }
 0x79f   :  { %7766 = vmatpush1.bf16.msra.mxu1 %v9692_v5  ;;  %7603 = vmatprep.subr.bf16.mxu0 %v9699_v7  ;;  %v9738_v5 = vcombine.low %v4488_v53, %v4492_v58  ;;  %v9740_v7 = vcombine.low %v4489_v60, %v4493_v40  ;;  %v9749_v10 = vcombine.high %v4497_v55, %v4501_v42  ;;  %v4537_v58 = vld [vmem:[#allocation20 + $0xfd8] sm:$0xff] }
 0x7a0   :  { %7767 = vmatprep.subr.bf16.mxu1 %v9701_v19  ;;  %v9747_v19 = vcombine.high %v4496_v14, %v4500_v3  ;;  %v7111_v53 = vrot.slane %v11847_v8, %v11401_v39  ;;  %v4541_v60 = vld [vmem:[#allocation20 + $0xff8] sm:$0xff] }
 0x7a2   :  { %7604 = vmatpush1.bf16.msra.mxu0 %v9698_v16  ;;  %v4509_v16 = vld [vmem:[#allocation20 + $0xef8] sm:$0xff] }
 0x7a3   :  { %7768 = vmatpush1.bf16.msra.mxu1 %v9700_v15  ;;  %7605 = vmatprep.subr.bf16.mxu0 %v9707_v20  ;;  %v9746_v15 = vcombine.low %v4496_v14, %v4500_v3  ;;  %v9748_v20 = vcombine.low %v4497_v55, %v4501_v42  ;;  %v9757_v11 = vcombine.high %v4505_v46, %v4509_v16  ;;  %v10392_v55 = vld [vmem:[#allocation23 + $0x4] ss:$8 sps:$4 sm:$0xff]  }
 0x7a4   :  { %v11839_v50 = vpop.f32.mrb[32].mxu0  ;;  %7769 = vmatprep.subr.bf16.mxu1 %v9709_v21  ;;  %v9755_v21 = vcombine.high %v4504_v57, %v4508_v52  ;;  %v9788_v3 = vcombine.low %v4537_v58, %v4541_v60 }
 0x7a5   :  { %v11841_v27 = vpop.f32.mrb[88].mxu1  ;;  %v11843_v29 = vpop.f32.mrb[33].mxu0 }
 0x7a6   :  { %v11845_v36 = vpop.f32.mrb[89].mxu1  ;;  %v7305_v13 = vpop.f32.mrb[34].mxu0  ;;  %7606 = vmatpush1.bf16.msra.mxu0 %v9706_v63  ;;  %v4517_v63 = vld [vmem:[#allocation20 + $0xf38] sm:$0xff] }
 0x7a7   :  { %v7469_v2 = vpop.f32.mrb[90].mxu1  ;;  %7770 = vmatpush1.bf16.msra.mxu1 %v9708_v33  ;;  %v7306_v30 = vpop.f32.mrb[35].mxu0  ;;  %7607 = vmatprep.subr.bf16.mxu0 %v9715_v12  ;;  %v9754_v33 = vcombine.low %v4504_v57, %v4508_v52  ;;  %v9756_v12 = vcombine.low %v4505_v46, %v4509_v16  ;;  %v9765_v41 = vcombine.high %v4513_v18, %v4517_v63  ;;  %v4525_v13 = vld [vmem:[#allocation20 + $0xf78] sm:$0xff]  ;;  %v10396_v57 = vld [vmem:[#allocation23 + $0x20] ss:$8 sps:$4 sm:$0xff]  }
 0x7a8   :  { %v7470_v28 = vpop.f32.mrb[91].mxu1  ;;  %7771 = vmatprep.subr.bf16.mxu1 %v9717_v25  ;;  %v9763_v25 = vcombine.high %v4512_v17, %v4516_v22  ;;  %v9764_v2 = vcombine.low %v4513_v18, %v4517_v63  ;;  %v9771_v30 = vcombine.high %v4520_v38, %v4524_v0  ;;  %v9772_v59 = vcombine.low %v4521_v34, %v4525_v13  ;;  %v10401_v52 = vld [vmem:[#allocation23 + $0x34] ss:$8 sps:$4 sm:$0xff]   ;;  %v10399_v46 = vld [vmem:[#allocation23 + $0x30] ss:$8 sps:$4 sm:$0xff]  }
 0x7a9   :  { %v4532_v28 = vld [vmem:[#allocation20 + $0xfb0] sm:$0xff]  ;;  %v10425_v38 = vld [vmem:[#allocation23 + $0xb4] ss:$8 sps:$4 sm:$0xff]   ;;  %v10423_v0 = vld [vmem:[#allocation23 + $0xb0] ss:$8 sps:$4 sm:$0xff]  }
 0x7aa   :  { %7608 = vmatpush1.bf16.msra.mxu0 %v9714_v54  ;;  %v9762_v54 = vcombine.low %v4512_v17, %v4516_v22  ;;  %v10404_v16 = vld [vmem:[#allocation23 + $0x44] ss:$8 sps:$4 sm:$0xff]   ;;  %v10413_v17 = vld [vmem:[#allocation23 + $0x74] ss:$8 sps:$4 sm:$0xff]   ;;  %v10411_v22 = vld [vmem:[#allocation23 + $0x70] ss:$8 sps:$4 sm:$0xff]  }
 0x7ab   :  { %7772 = vmatpush1.bf16.msra.mxu1 %v9716_v26  ;;  %7609 = vmatprep.subr.bf16.mxu0 %v9723_v47  ;;  %v9773_v26 = vcombine.high %v4521_v34, %v4525_v13  ;;  %v4528_v47 = vld [vmem:[#allocation20 + $0xf90] sm:$0xff] }
 0x7ac   :  { %7773 = vmatprep.subr.bf16.mxu1 %v9725_v6  ;;  %v4529_v6 = vld [vmem:[#allocation20 + $0xf98] sm:$0xff]  ;;  %v9778_v40 = vcombine.low %v4528_v47, %v4532_v28  ;;  %v10416_v18 = vld [vmem:[#allocation23 + $0x84] ss:$8 sps:$4 sm:$0xff]   ;;  %v10414_v63 = vld [vmem:[#allocation23 + $0x80] ss:$8 sps:$4 sm:$0xff]  }
 0x7ad   :  { %v10428_v34 = vld [vmem:[#allocation23 + $0xc4] ss:$8 sps:$4 sm:$0xff]   ;;  %v10426_v13 = vld [vmem:[#allocation23 + $0xc0] ss:$8 sps:$4 sm:$0xff]  }
 0x7ae   :  { %7610 = vmatpush1.bf16.msra.mxu0 %v9722_v44  ;;  %v9779_v44 = vcombine.high %v4528_v47, %v4532_v28  ;;  %v7119_v47 = vrot.slane %v11847_v8, %v11523_v48  ;;  %v10432_v28 = vld [vmem:[#allocation23 + $0xe0] ss:$8 sps:$4 sm:$0xff]  }
 0x7af   :  { %7774 = vmatpush1.bf16.msra.mxu1 %v9724_v45  ;;  %7611 = vmatprep.subr.bf16.mxu0 %v9731_v49  ;;  %v9781_v45 = vcombine.high %v4529_v6, %v4533_v43  ;;  %v4536_v49 = vld [vmem:[#allocation20 + $0xfd0] sm:$0xff] }
 0x7b0   :  { %7775 = vmatprep.subr.bf16.mxu1 %v9733_v51  ;;  %v4540_v51 = vld [vmem:[#allocation20 + $0xff0] sm:$0xff] }
 0x7b1   :  { %v9786_v14 = vcombine.low %v4536_v49, %v4540_v51 }
 0x7b2   :  { %7612 = vmatpush1.bf16.msra.mxu0 %v9730_v24  ;;  %v9780_v24 = vcombine.low %v4529_v6, %v4533_v43  ;;  %v10437_v43 = vld [vmem:[#allocation23 + $0xf4] ss:$8 sps:$4 sm:$0xff]  }
 0x7b3   :  { %7776 = vmatpush1.bf16.msra.mxu1 %v9732_v61  ;;  %7613 = vmatprep.subr.bf16.mxu0 %v9739_v31  ;;  %v9787_v61 = vcombine.high %v4536_v49, %v4540_v51  ;;  %v9789_v31 = vcombine.high %v4537_v58, %v4541_v60  ;;  %v10438_v51 = vld [vmem:[#allocation23 + $0x100] ss:$8 sps:$4 sm:$0xff]   ;;  %v10443_v58 = vld [vmem:[#allocation23 + $0x114] ss:$8 sps:$4 sm:$0xff]   ;;  %v10446_v60 = vld [vmem:[#allocation23 + $0x124] ss:$8 sps:$4 sm:$0xff]  }
 0x7b4   :  { %7777 = vmatprep.subr.bf16.mxu1 %v9741_v62  ;;  %v10022_v62 = vadd.f32 %v11843_v29, %v7111_v53  ;;  %v10393_v29 = vld [vmem:[#allocation23 + $0x10] ss:$8 sps:$4 sm:$0xff]  }
 0x7b6   :  { %7614 = vmatpush1.bf16.msra.mxu0 %v9738_v5  ;;  %v7801_v42 = vmax.f32 %v10022_v62, 0.0  ;;  %v10390_v5 = vld [vmem:[#allocation23] ss:$8 sps:$4 sm:$0xff]   ;;  %v10455_v62 = vld [vmem:[#allocation23 + $0x154] ss:$8 sps:$4 sm:$0xff]  }
 0x7b7   :  { %7778 = vmatpush1.bf16.msra.mxu1 %v9740_v7  ;;  %7615 = vmatprep.subr.bf16.mxu0 %v9747_v19  ;;  %v10395_v7 = vld [vmem:[#allocation23 + $0x14] ss:$8 sps:$4 sm:$0xff]  }
 0x7b8   :  { %7779 = vmatprep.subr.bf16.mxu1 %v9749_v10  ;;  %v7809_v19 = vpack.c.bf16 %v7801_v42, %v7801_v42  ;;  %v10398_v10 = vld [vmem:[#allocation23 + $0x24] ss:$8 sps:$4 sm:$0xff]   ;;  %v10461_v42 = vld [vmem:[#allocation23 + $0x174] ss:$8 sps:$4 sm:$0xff]  }
 0x7ba   :  { %7616 = vmatpush1.bf16.msra.mxu0 %v9746_v15  ;;  %v10402_v15 = vld [vmem:[#allocation23 + $0x40] ss:$8 sps:$4 sm:$0xff]  }
 0x7bb   :  { %7780 = vmatpush1.bf16.msra.mxu1 %v9748_v20  ;;  %7617 = vmatprep.subr.bf16.mxu0 %v9755_v21  ;;  %v10407_v20 = vld [vmem:[#allocation23 + $0x54] ss:$8 sps:$4 sm:$0xff]   ;;  %v10405_v21 = vld [vmem:[#allocation23 + $0x50] ss:$8 sps:$4 sm:$0xff]  }
 0x7bc   :  { %7781 = vmatprep.subr.bf16.mxu1 %v9757_v11  ;;  %v10408_v11 = vld [vmem:[#allocation23 + $0x60] ss:$8 sps:$4 sm:$0xff]  }
 0x7be   :  { %7618 = vmatpush1.bf16.msra.mxu0 %v9754_v33  ;;  %v10419_v33 = vld [vmem:[#allocation23 + $0x94] ss:$8 sps:$4 sm:$0xff]  }
 0x7bf   :  { %7782 = vmatpush1.bf16.msra.mxu1 %v9756_v12  ;;  %7619 = vmatprep.subr.bf16.mxu0 %v9763_v25  ;;  %v10417_v12 = vld [vmem:[#allocation23 + $0x90] ss:$8 sps:$4 sm:$0xff]   ;;  %v10422_v25 = vld [vmem:[#allocation23 + $0xa4] ss:$8 sps:$4 sm:$0xff]  }
 0x7c0   :  { %7783 = vmatprep.subr.bf16.mxu1 %v9765_v41  ;;  %v10420_v41 = vld [vmem:[#allocation23 + $0xa0] ss:$8 sps:$4 sm:$0xff]  }
 0x7c2   :  { %7620 = vmatpush1.bf16.msra.mxu0 %v9762_v54  ;;  %v10431_v54 = vld [vmem:[#allocation23 + $0xd4] ss:$8 sps:$4 sm:$0xff]  }
 0x7c3   :  { %7784 = vmatpush1.bf16.msra.mxu1 %v9764_v2  ;;  %7621 = vmatprep.subr.bf16.mxu0 %v9771_v30  ;;  %v10429_v2 = vld [vmem:[#allocation23 + $0xd0] ss:$8 sps:$4 sm:$0xff]   ;;  %v7107_v30 = vrot.slane %v11847_v8, %v11398_v37 }
 0x7c4   :  { %7785 = vmatprep.subr.bf16.mxu1 %v9773_v26  ;;  %v10434_v26 = vld [vmem:[#allocation23 + $0xe4] ss:$8 sps:$4 sm:$0xff]  }
 0x7c5   :  { %v10021_v6 = vadd.f32 %v11839_v50, %v7107_v30  ;;  %v10441_v50 = vld [vmem:[#allocation23 + $0x110] ss:$8 sps:$4 sm:$0xff]   ;;  %v10498_v30 = vld [vmem:[#allocation23 + $0x240] ss:$8 sps:$4 sm:$0xff]  }
 0x7c6   :  { %7622 = vmatpush1.bf16.msra.mxu0 %v9770_v1  ;;  %v10024_v1 = vadd.f32 %v11845_v36, %v7119_v47  ;;  %v10444_v36 = vld [vmem:[#allocation23 + $0x120] ss:$8 sps:$4 sm:$0xff]   ;;  %v10501_v47 = vld [vmem:[#allocation23 + $0x250] ss:$8 sps:$4 sm:$0xff]  }
 0x7c7   :  { %7786 = vmatpush1.bf16.msra.mxu1 %v9772_v59  ;;  %7623 = vmatprep.subr.bf16.mxu0 %v9779_v44  ;;  %v10435_v59 = vld [vmem:[#allocation23 + $0xf0] ss:$8 sps:$4 sm:$0xff]   ;;  %v7800_v44 = vmax.f32 %v10021_v6, 0.0  ;;  %v10504_v6 = vld [vmem:[#allocation23 + $0x260] ss:$8 sps:$4 sm:$0xff]  }
 0x7c8   :  { %7787 = vmatprep.subr.bf16.mxu1 %v9781_v45  ;;  %v10440_v45 = vld [vmem:[#allocation23 + $0x104] ss:$8 sps:$4 sm:$0xff]   ;;  %v7803_v49 = vmax.f32 %v10024_v1, 0.0  ;;  %v10507_v1 = vld [vmem:[#allocation23 + $0x270] ss:$8 sps:$4 sm:$0xff]  }
 0x7c9   :  { %v7808_v53 = vpack.c.bf16 %v7800_v44, %v7800_v44  ;;  %v10510_v44 = vld [vmem:[#allocation23 + $0x280] ss:$8 sps:$4 sm:$0xff]  }
 0x7ca   :  { %7624 = vmatpush1.bf16.msra.mxu0 %v9778_v40  ;;  %v7811_v48 = vpack.c.bf16 %v7803_v49, %v7803_v49  ;;  %v10449_v40 = vld [vmem:[#allocation23 + $0x134] ss:$8 sps:$4 sm:$0xff]  }
 0x7cb   :  { %7788 = vmatpush1.bf16.msra.mxu1 %v9780_v24  ;;  %7625 = vmatprep.subr.bf16.mxu0 %v9787_v61  ;;  %v10447_v24 = vld [vmem:[#allocation23 + $0x130] ss:$8 sps:$4 sm:$0xff]   ;;  %v10452_v61 = vld [vmem:[#allocation23 + $0x144] ss:$8 sps:$4 sm:$0xff]   ;;  %v10515_v49 = vld [vmem:[#allocation23 + $0x294] ss:$8 sps:$4 sm:$0xff]  }
 0x7cc   :  { %7789 = vmatprep.subr.bf16.mxu1 %v9789_v31  ;;  %v10450_v31 = vld [vmem:[#allocation23 + $0x140] ss:$8 sps:$4 sm:$0xff]  }
 0x7ce   :  { %7626 = vmatpush1.bf16.msra.mxu0 %v9786_v14  ;;  %v10453_v14 = vld [vmem:[#allocation23 + $0x150] ss:$8 sps:$4 sm:$0xff]  }
 0x7cf   :  { %7790 = vmatpush1.bf16.msra.mxu1 %v9788_v3  ;;  %8596 = vmatprep.subr.bf16.mxu0 %v10392_v55  ;;  %v10458_v3 = vld [vmem:[#allocation23 + $0x164] ss:$8 sps:$4 sm:$0xff]   ;;  %v10456_v55 = vld [vmem:[#allocation23 + $0x160] ss:$8 sps:$4 sm:$0xff]  }
 0x7d1   :  { %7628 = vmatmul.mubr.bf16.vlgmr.msra.gmra.mrb[36].mxu0 %v11821_v9 }
 0x7d2   :  { %7792 = vmatmul.mubr.bf16.vlgmr.msra.gmra.mrb[92].mxu1 %v11821_v9  ;;  %8597 = vmatpush1.bf16.msra.mxu0 %v10390_v5  ;;  %v10410_v9 = vld [vmem:[#allocation23 + $0x64] ss:$8 sps:$4 sm:$0xff]   ;;  %v10459_v5 = vld [vmem:[#allocation23 + $0x170] ss:$8 sps:$4 sm:$0xff]  }
 0x7d3   :  { %8628 = vmatprep.mubr.bf16.mxu0 %v7809_v19  ;;  %8598 = vmatprep.subr.bf16.mxu0 %v10395_v7  ;;  %v10464_v7 = vld [vmem:[#allocation23 + $0x184] ss:$8 sps:$4 sm:$0xff]   ;;  %v10462_v19 = vld [vmem:[#allocation23 + $0x180] ss:$8 sps:$4 sm:$0xff]  }
 0x7d6   :  { %8599 = vmatpush1.bf16.msra.mxu0 %v10393_v29  ;;  %v10467_v29 = vld [vmem:[#allocation23 + $0x194] ss:$8 sps:$4 sm:$0xff]  }
 0x7d7   :  { %8600 = vmatprep.subr.bf16.mxu0 %v10398_v10  ;;  %v10465_v10 = vld [vmem:[#allocation23 + $0x190] ss:$8 sps:$4 sm:$0xff]  }
 0x7da   :  { %8601 = vmatpush1.bf16.msra.mxu0 %v10396_v57  ;;  %v10470_v57 = vld [vmem:[#allocation23 + $0x1a4] ss:$8 sps:$4 sm:$0xff]  }
 0x7db   :  { %8602 = vmatprep.subr.bf16.mxu0 %v10401_v52  ;;  %v10468_v52 = vld [vmem:[#allocation23 + $0x1a0] ss:$8 sps:$4 sm:$0xff]  }
 0x7de   :  { %8603 = vmatpush1.bf16.msra.mxu0 %v10399_v46  ;;  %v10473_v46 = vld [vmem:[#allocation23 + $0x1b4] ss:$8 sps:$4 sm:$0xff]  }
 0x7df   :  { %8604 = vmatprep.subr.bf16.mxu0 %v10404_v16  ;;  %v10471_v16 = vld [vmem:[#allocation23 + $0x1b0] ss:$8 sps:$4 sm:$0xff]  }
 0x7e2   :  { %8605 = vmatpush1.bf16.msra.mxu0 %v10402_v15  ;;  %v10476_v15 = vld [vmem:[#allocation23 + $0x1c4] ss:$8 sps:$4 sm:$0xff]  }
 0x7e3   :  { %8606 = vmatprep.subr.bf16.mxu0 %v10407_v20  ;;  %v10474_v20 = vld [vmem:[#allocation23 + $0x1c0] ss:$8 sps:$4 sm:$0xff]  }
 0x7e6   :  { %8607 = vmatpush1.bf16.msra.mxu0 %v10405_v21  ;;  %v10479_v21 = vld [vmem:[#allocation23 + $0x1d4] ss:$8 sps:$4 sm:$0xff]  }
 0x7e7   :  { %8608 = vmatprep.subr.bf16.mxu0 %v10410_v9  ;;  %v10477_v9 = vld [vmem:[#allocation23 + $0x1d0] ss:$8 sps:$4 sm:$0xff]  }
 0x7ea   :  { %8609 = vmatpush1.bf16.msra.mxu0 %v10408_v11  ;;  %v7115_v11 = vrot.slane %v11847_v8, %v11516_v4  ;;  %v10489_v4 = vld [vmem:[#allocation23 + $0x210] ss:$8 sps:$4 sm:$0xff]  }
 0x7eb   :  { %8610 = vmatprep.subr.bf16.mxu0 %v10413_v17  ;;  %v10482_v17 = vld [vmem:[#allocation23 + $0x1e4] ss:$8 sps:$4 sm:$0xff]  }
 0x7ee   :  { %8611 = vmatpush1.bf16.msra.mxu0 %v10411_v22  ;;  %v10480_v22 = vld [vmem:[#allocation23 + $0x1e0] ss:$8 sps:$4 sm:$0xff]  }
 0x7ef   :  { %8612 = vmatprep.subr.bf16.mxu0 %v10416_v18  ;;  %v10023_v18 = vadd.f32 %v11841_v27, %v7115_v11  ;;  %v10497_v27 = vld [vmem:[#allocation23 + $0x234] ss:$8 sps:$4 sm:$0xff]  }
 0x7f2   :  { %8613 = vmatpush1.bf16.msra.mxu0 %v10414_v63  ;;  %v10485_v63 = vld [vmem:[#allocation23 + $0x1f4] ss:$8 sps:$4 sm:$0xff]  }
 0x7f3   :  { %8614 = vmatprep.subr.bf16.mxu0 %v10419_v33  ;;  %v10483_v33 = vld [vmem:[#allocation23 + $0x1f0] ss:$8 sps:$4 sm:$0xff]  }
 0x7f6   :  { %8615 = vmatpush1.bf16.msra.mxu0 %v10417_v12  ;;  %v7802_v12 = vmax.f32 %v10023_v18, 0.0  ;;  %v10539_v18 = vld [vmem:[#allocation23 + $0x314] ss:$8 sps:$4 sm:$0xff]  }
 0x7f7   :  { %8616 = vmatprep.subr.bf16.mxu0 %v10422_v25  ;;  %v10488_v25 = vld [vmem:[#allocation23 + $0x204] ss:$8 sps:$4 sm:$0xff]  }
 0x7fa   :  { %8617 = vmatpush1.bf16.msra.mxu0 %v10420_v41  ;;  %v10486_v41 = vld [vmem:[#allocation23 + $0x200] ss:$8 sps:$4 sm:$0xff]  }
 0x7fb   :  { %8618 = vmatprep.subr.bf16.mxu0 %v10425_v38  ;;  %v7810_v38 = vpack.c.bf16 %v7802_v12, %v7802_v12  ;;  %v10540_v12 = vld [vmem:[#allocation23 + $0x320] ss:$8 sps:$4 sm:$0xff]  }
 0x7fe   :  { %8619 = vmatpush1.bf16.msra.mxu0 %v10423_v0  ;;  %v10491_v0 = vld [vmem:[#allocation23 + $0x214] ss:$8 sps:$4 sm:$0xff]  }
 0x7ff   :  { %8620 = vmatprep.subr.bf16.mxu0 %v10428_v34  ;;  %v10494_v34 = vld [vmem:[#allocation23 + $0x224] ss:$8 sps:$4 sm:$0xff]  }
 0x802   :  { %8621 = vmatpush1.bf16.msra.mxu0 %v10426_v13  ;;  %v10492_v13 = vld [vmem:[#allocation23 + $0x220] ss:$8 sps:$4 sm:$0xff]  }
 0x803   :  { %8622 = vmatprep.subr.bf16.mxu0 %v10431_v54  ;;  %v10495_v54 = vld [vmem:[#allocation23 + $0x230] ss:$8 sps:$4 sm:$0xff]  }
 0x806   :  { %8623 = vmatpush1.bf16.msra.mxu0 %v10429_v2  ;;  %v10500_v2 = vld [vmem:[#allocation23 + $0x244] ss:$8 sps:$4 sm:$0xff]  }
 0x807   :  { %8624 = vmatprep.subr.bf16.mxu0 %v10434_v26  ;;  %v10503_v26 = vld [vmem:[#allocation23 + $0x254] ss:$8 sps:$4 sm:$0xff]  }
 0x80a   :  { %8625 = vmatpush1.bf16.msra.mxu0 %v10432_v28  ;;  %v10506_v28 = vld [vmem:[#allocation23 + $0x264] ss:$8 sps:$4 sm:$0xff]  }
 0x80b   :  { %8626 = vmatprep.subr.bf16.mxu0 %v10437_v43  ;;  %v10509_v43 = vld [vmem:[#allocation23 + $0x274] ss:$8 sps:$4 sm:$0xff]  }
 0x80e   :  { %8627 = vmatpush1.bf16.msra.mxu0 %v10435_v59  ;;  %v10512_v59 = vld [vmem:[#allocation23 + $0x284] ss:$8 sps:$4 sm:$0xff]  }
 0x80f   :  { %8637 = vmatprep.subr.bf16.mxu0 %v10440_v45  ;;  %v11016_v45 = vmov 0.0  }
 0x810   :  { %9945 = vmatprep.subr.bf16.mxu1 %v11016_v45  ;;  %9947 = vmatprep.mubr.msk.bf16.mxu1 %vm11017_vm3, %v11016_v45 }
 0x811   :  { %8629 = vmatmul.mubr.bf16.vlgmr.msra.gmra.mrb[40].mxu0 %v7808_v53  ;;  %v10518_v53 = vld [vmem:[#allocation23 + $0x2a4] ss:$8 sps:$4 sm:$0xff]  }
 0x812   :  { %8638 = vmatpush1.bf16.msra.mxu0 %v10438_v51  ;;  %8669 = vmatprep.mubr.bf16.mxu0 %v7811_v48  ;;  %v10513_v51 = vld [vmem:[#allocation23 + $0x290] ss:$8 sps:$4 sm:$0xff]   ;;  %v10521_v48 = vld [vmem:[#allocation23 + $0x2b4] ss:$8 sps:$4 sm:$0xff]  }
 0x813   :  { %8639 = vmatprep.subr.bf16.mxu0 %v10443_v58  ;;  %v10516_v58 = vld [vmem:[#allocation23 + $0x2a0] ss:$8 sps:$4 sm:$0xff]  }
 0x816   :  { %8640 = vmatpush1.bf16.msra.mxu0 %v10441_v50  ;;  %v10519_v50 = vld [vmem:[#allocation23 + $0x2b0] ss:$8 sps:$4 sm:$0xff]  }
 0x817   :  { %8641 = vmatprep.subr.bf16.mxu0 %v10446_v60  ;;  %v10524_v60 = vld [vmem:[#allocation23 + $0x2c4] ss:$8 sps:$4 sm:$0xff]  }
 0x81a   :  { %8642 = vmatpush1.bf16.msra.mxu0 %v10444_v36  ;;  %v10522_v36 = vld [vmem:[#allocation23 + $0x2c0] ss:$8 sps:$4 sm:$0xff]  }
 0x81b   :  { %8643 = vmatprep.subr.bf16.mxu0 %v10449_v40  ;;  %v10527_v40 = vld [vmem:[#allocation23 + $0x2d4] ss:$8 sps:$4 sm:$0xff]  }
 0x81e   :  { %8644 = vmatpush1.bf16.msra.mxu0 %v10447_v24  ;;  %v10525_v24 = vld [vmem:[#allocation23 + $0x2d0] ss:$8 sps:$4 sm:$0xff]  }
 0x81f   :  { %8645 = vmatprep.subr.bf16.mxu0 %v10452_v61  ;;  %v10530_v61 = vld [vmem:[#allocation23 + $0x2e4] ss:$8 sps:$4 sm:$0xff]  }
 0x822   :  { %8646 = vmatpush1.bf16.msra.mxu0 %v10450_v31  ;;  %v10528_v31 = vld [vmem:[#allocation23 + $0x2e0] ss:$8 sps:$4 sm:$0xff]  }
 0x823   :  { %8647 = vmatprep.subr.bf16.mxu0 %v10455_v62  ;;  %v10533_v62 = vld [vmem:[#allocation23 + $0x2f4] ss:$8 sps:$4 sm:$0xff]  }
 0x826   :  { %8648 = vmatpush1.bf16.msra.mxu0 %v10453_v14  ;;  %v10531_v14 = vld [vmem:[#allocation23 + $0x2f0] ss:$8 sps:$4 sm:$0xff]  }
 0x827   :  { %8649 = vmatprep.subr.bf16.mxu0 %v10458_v3  ;;  %v10536_v3 = vld [vmem:[#allocation23 + $0x304] ss:$8 sps:$4 sm:$0xff]  }
 0x82a   :  { %8650 = vmatpush1.bf16.msra.mxu0 %v10456_v55  ;;  %v7123_v55 = vrot.slane %v11847_v8, %v11703_v23 }
 0x82b   :  { %8651 = vmatprep.subr.bf16.mxu0 %v10461_v42  ;;  %v7127_v42 = vrot.slane %v11847_v8, %v11709_v35  ;;  %v10534_v35 = vld [vmem:[#allocation23 + $0x300] ss:$8 sps:$4 sm:$0xff]  }
 0x82e   :  { %8652 = vmatpush1.bf16.msra.mxu0 %v10459_v5  ;;  %v7135_v5 = vrot.slane %v11847_v8, %v11712_v32 }
 0x82f   :  { %8653 = vmatprep.subr.bf16.mxu0 %v10464_v7 }
 0x832   :  { %8654 = vmatpush1.bf16.msra.mxu0 %v10462_v19 }
 0x833   :  { %8655 = vmatprep.subr.bf16.mxu0 %v10467_v29 }
 0x836   :  { %8656 = vmatpush1.bf16.msra.mxu0 %v10465_v10 }
 0x837   :  { %8657 = vmatprep.subr.bf16.mxu0 %v10470_v57 }
 0x83a   :  { %8658 = vmatpush1.bf16.msra.mxu0 %v10468_v52 }
 0x83b   :  { %8659 = vmatprep.subr.bf16.mxu0 %v10473_v46 }
 0x83e   :  { %8660 = vmatpush1.bf16.msra.mxu0 %v10471_v16 }
 0x83f   :  { %8661 = vmatprep.subr.bf16.mxu0 %v10476_v15 }
 0x842   :  { %8662 = vmatpush1.bf16.msra.mxu0 %v10474_v20 }
 0x843   :  { %8663 = vmatprep.subr.bf16.mxu0 %v10479_v21 }
 0x846   :  { %8664 = vmatpush1.bf16.msra.mxu0 %v10477_v9 }
 0x847   :  { %8665 = vmatprep.subr.bf16.mxu0 %v10482_v17 }
 0x84a   :  { %8666 = vmatpush1.bf16.msra.mxu0 %v10480_v22 }
 0x84b   :  { %8667 = vmatprep.subr.bf16.mxu0 %v10485_v63  ;;  %v10537_v63 = vld [vmem:[#allocation23 + $0x310] ss:$8 sps:$4 sm:$0xff]  }
 0x84e   :  { %8668 = vmatpush1.bf16.msra.mxu0 %v10483_v33  ;;  %v10542_v33 = vld [vmem:[#allocation23 + $0x324] ss:$8 sps:$4 sm:$0xff]  }
 0x84f   :  { %8678 = vmatprep.subr.bf16.mxu0 %v10488_v25  ;;  %v10545_v25 = vld [vmem:[#allocation23 + $0x334] ss:$8 sps:$4 sm:$0xff]  }
 0x851   :  { %8670 = vmatmul.mubr.bf16.vlgmr.msra.gmra.mrb[40].mxu0 %v7810_v38  ;;  %v10548_v38 = vld [vmem:[#allocation23 + $0x344] ss:$8 sps:$4 sm:$0xff]  }
 0x852   :  { %8679 = vmatpush1.bf16.msra.mxu0 %v10486_v41  ;;  %v10543_v41 = vld [vmem:[#allocation23 + $0x330] ss:$8 sps:$4 sm:$0xff]  }
 0x853   :  { %8680 = vmatprep.subr.bf16.mxu0 %v10491_v0  ;;  %v10546_v0 = vld [vmem:[#allocation23 + $0x340] ss:$8 sps:$4 sm:$0xff]  }
 0x856   :  { %8681 = vmatpush1.bf16.msra.mxu0 %v10489_v4  ;;  %v10551_v4 = vld [vmem:[#allocation23 + $0x354] ss:$8 sps:$4 sm:$0xff]  }
 0x857   :  { %8682 = vmatprep.subr.bf16.mxu0 %v10494_v34  ;;  %v10549_v34 = vld [vmem:[#allocation23 + $0x350] ss:$8 sps:$4 sm:$0xff]  }
 0x85a   :  { %8683 = vmatpush1.bf16.msra.mxu0 %v10492_v13  ;;  %v10554_v13 = vld [vmem:[#allocation23 + $0x364] ss:$8 sps:$4 sm:$0xff]  }
 0x85b   :  { %8684 = vmatprep.subr.bf16.mxu0 %v10497_v27  ;;  %v10552_v27 = vld [vmem:[#allocation23 + $0x360] ss:$8 sps:$4 sm:$0xff]  }
 0x85e   :  { %8685 = vmatpush1.bf16.msra.mxu0 %v10495_v54  ;;  %v10557_v54 = vld [vmem:[#allocation23 + $0x374] ss:$8 sps:$4 sm:$0xff]  }
 0x85f   :  { %8686 = vmatprep.subr.bf16.mxu0 %v10500_v2  ;;  %v10555_v2 = vld [vmem:[#allocation23 + $0x370] ss:$8 sps:$4 sm:$0xff]  }
 0x862   :  { %8687 = vmatpush1.bf16.msra.mxu0 %v10498_v30  ;;  %v10560_v30 = vld [vmem:[#allocation23 + $0x384] ss:$8 sps:$4 sm:$0xff]  }
 0x863   :  { %8688 = vmatprep.subr.bf16.mxu0 %v10503_v26  ;;  %v10558_v26 = vld [vmem:[#allocation23 + $0x380] ss:$8 sps:$4 sm:$0xff]  }
 0x866   :  { %8689 = vmatpush1.bf16.msra.mxu0 %v10501_v47  ;;  %v10563_v47 = vld [vmem:[#allocation23 + $0x394] ss:$8 sps:$4 sm:$0xff]  }
 0x867   :  { %8690 = vmatprep.subr.bf16.mxu0 %v10506_v28  ;;  %v10561_v28 = vld [vmem:[#allocation23 + $0x390] ss:$8 sps:$4 sm:$0xff]  }
 0x86a   :  { %8691 = vmatpush1.bf16.msra.mxu0 %v10504_v6  ;;  %v10566_v6 = vld [vmem:[#allocation23 + $0x3a4] ss:$8 sps:$4 sm:$0xff]  }
 0x86b   :  { %8692 = vmatprep.subr.bf16.mxu0 %v10509_v43  ;;  %v10564_v43 = vld [vmem:[#allocation23 + $0x3a0] ss:$8 sps:$4 sm:$0xff]  }
 0x86e   :  { %8693 = vmatpush1.bf16.msra.mxu0 %v10507_v1  ;;  %v10569_v1 = vld [vmem:[#allocation23 + $0x3b4] ss:$8 sps:$4 sm:$0xff]  }
 0x86f   :  { %8694 = vmatprep.subr.bf16.mxu0 %v10512_v59  ;;  %v10567_v59 = vld [vmem:[#allocation23 + $0x3b0] ss:$8 sps:$4 sm:$0xff]  }
 0x872   :  { %8695 = vmatpush1.bf16.msra.mxu0 %v10510_v44  ;;  %v10572_v44 = vld [vmem:[#allocation23 + $0x3c4] ss:$8 sps:$4 sm:$0xff]  }
 0x873   :  { %8696 = vmatprep.subr.bf16.mxu0 %v10515_v49  ;;  %v10570_v49 = vld [vmem:[#allocation23 + $0x3c0] ss:$8 sps:$4 sm:$0xff]  }
 0x876   :  { %8697 = vmatpush1.bf16.msra.mxu0 %v10513_v51  ;;  %v10575_v51 = vld [vmem:[#allocation23 + $0x3d4] ss:$8 sps:$4 sm:$0xff]  }
 0x877   :  { %8698 = vmatprep.subr.bf16.mxu0 %v10518_v53  ;;  %v10573_v53 = vld [vmem:[#allocation23 + $0x3d0] ss:$8 sps:$4 sm:$0xff]  }
 0x87a   :  { %8699 = vmatpush1.bf16.msra.mxu0 %v10516_v58  ;;  %v7131_v58 = vrot.slane %v11847_v8, %v11706_v56  ;;  %v8767_v56 = vld [vmem:[%s8766_s0] sm:$0x3]  ;;  %v7944_v8 = vld [vmem:[#allocation25] sm:$0x3] }
 0x87b   :  { %8700 = vmatprep.subr.bf16.mxu0 %v10521_v48  ;;  %v10578_v48 = vld [vmem:[#allocation23 + $0x3e4] ss:$8 sps:$4 sm:$0xff]   ;;  %9946 = vmatpush3.bf16.xpose.msra.mxu1 %v8767_v56 }
 0x87c   :  { %9951 = vmatprep.subr.bf16.mxu1 %v11016_v45 }
 0x87e   :  { %8701 = vmatpush1.bf16.msra.mxu0 %v10519_v50  ;;  %v10576_v50 = vld [vmem:[#allocation23 + $0x3e0] ss:$8 sps:$4 sm:$0xff]  }
 0x87f   :  { %8702 = vmatprep.subr.bf16.mxu0 %v10524_v60 }
 0x882   :  { %8703 = vmatpush1.bf16.msra.mxu0 %v10522_v36  ;;  %v10581_v36 = vld [vmem:[#allocation23 + $0x3f4] ss:$8 sps:$4 sm:$0xff]  }
 0x883   :  { %8704 = vmatprep.subr.bf16.mxu0 %v10527_v40  ;;  %v10579_v40 = vld [vmem:[#allocation23 + $0x3f0] ss:$8 sps:$4 sm:$0xff]  }
 0x886   :  { %8705 = vmatpush1.bf16.msra.mxu0 %v10525_v24 }
 0x887   :  { %8706 = vmatprep.subr.bf16.mxu0 %v10530_v61 }
 0x88a   :  { %8707 = vmatpush1.bf16.msra.mxu0 %v10528_v31  ;;  %v8589_v31 = vrot.slane %v7944_v8, %v11398_v37 }
 0x88b   :  { %8708 = vmatprep.subr.bf16.mxu0 %v10533_v62 }
 0x88e   :  { %8709 = vmatpush1.bf16.msra.mxu0 %v10531_v14 }
 0x88f   :  { %8719 = vmatprep.subr.bf16.mxu0 %v10536_v3  ;;  %v8593_v3 = vrot.slane %v7944_v8, %v11401_v39  ;;  %v8772_v39 = vld [vmem:[%s8771_s14] sm:$0x1] }
 0x8a4   :  { %v7629_v7 = vpop.f32.mrb[36].mxu0 }
 0x8a5   :  { %v10025_v19 = vadd.f32 %v7629_v7, %v7123_v55  ;;  %v11870_v29 = vpop.f32.mrb[92].mxu1  ;;  %v7631_v10 = vpop.f32.mrb[37].mxu0 }
 0x8a6   :  { %v10026_v57 = vadd.f32 %v7631_v10, %v7127_v42  ;;  %v7795_v52 = vpop.f32.mrb[93].mxu1  ;;  %v7633_v46 = vpop.f32.mrb[38].mxu0  ;;  %v10027_v60 = vadd.f32 %v11870_v29, %v7131_v58  ;;  %v8770_v10 = vld [vmem:[%s8769_s25] sm:$0x3] }
 0x8a7   :  { %v7804_v16 = vmax.f32 %v10025_v19, 0.0  ;;  %v10028_v15 = vadd.f32 %v7795_v52, %v7135_v5  ;;  %v7797_v20 = vpop.f32.mrb[94].mxu1  ;;  %v7634_v21 = vpop.f32.mrb[39].mxu0 }
 0x8a8   :  { %v7805_v9 = vmax.f32 %v10026_v57, 0.0  ;;  %v7798_v23 = vpop.f32.mrb[95].mxu1  ;;  %v7806_v24 = vmax.f32 %v10027_v60, 0.0 }
 0x8a9   :  { %v7807_v11 = vmax.f32 %v10028_v15, 0.0  ;;  %v7812_v22 = vpack.c.bf16 %v7804_v16, %v7804_v16 }
 0x8aa   :  { %v7813_v17 = vpack.c.bf16 %v7805_v9, %v7805_v9  ;;  %v7814_v61 = vpack.c.bf16 %v7806_v24, %v7806_v24 }
 0x8ab   :  { %v7815_v32 = vpack.c.bf16 %v7807_v11, %v7807_v11 }
 0x8ac   :  { %8710 = vmatprep.mubr.bf16.mxu0 %v7813_v17 }
 0x8ad   :  { %8711 = vmatmul.mubr.bf16.vlgmr.msra.gmra.mrb[40].mxu0 %v7812_v22 }
 0x8ae   :  { %8720 = vmatpush1.bf16.msra.mxu0 %v10534_v35  ;;  %8751 = vmatprep.mubr.bf16.mxu0 %v7815_v32 }
 0x8af   :  { %8721 = vmatprep.subr.bf16.mxu0 %v10539_v18 }
 0x8b2   :  { %8722 = vmatpush1.bf16.msra.mxu0 %v10537_v63 }
 0x8b3   :  { %8723 = vmatprep.subr.bf16.mxu0 %v10542_v33 }
 0x8b6   :  { %8724 = vmatpush1.bf16.msra.mxu0 %v10540_v12 }
 0x8b7   :  { %8725 = vmatprep.subr.bf16.mxu0 %v10545_v25 }
 0x8ba   :  { %8726 = vmatpush1.bf16.msra.mxu0 %v10543_v41 }
 0x8bb   :  { %8727 = vmatprep.subr.bf16.mxu0 %v10548_v38 }
 0x8be   :  { %8728 = vmatpush1.bf16.msra.mxu0 %v10546_v0 }
 0x8bf   :  { %8729 = vmatprep.subr.bf16.mxu0 %v10551_v4 }
 0x8c2   :  { %8730 = vmatpush1.bf16.msra.mxu0 %v10549_v34 }
 0x8c3   :  { %8731 = vmatprep.subr.bf16.mxu0 %v10554_v13 }
 0x8c6   :  { %8732 = vmatpush1.bf16.msra.mxu0 %v10552_v27 }
 0x8c7   :  { %8733 = vmatprep.subr.bf16.mxu0 %v10557_v54 }
 0x8ca   :  { %8734 = vmatpush1.bf16.msra.mxu0 %v10555_v2 }
 0x8cb   :  { %8735 = vmatprep.subr.bf16.mxu0 %v10560_v30 }
 0x8ce   :  { %8736 = vmatpush1.bf16.msra.mxu0 %v10558_v26 }
 0x8cf   :  { %8737 = vmatprep.subr.bf16.mxu0 %v10563_v47 }
 0x8d2   :  { %8738 = vmatpush1.bf16.msra.mxu0 %v10561_v28 }
 0x8d3   :  { %8739 = vmatprep.subr.bf16.mxu0 %v10566_v6 }
 0x8d6   :  { %8740 = vmatpush1.bf16.msra.mxu0 %v10564_v43 }
 0x8d7   :  { %8741 = vmatprep.subr.bf16.mxu0 %v10569_v1 }
 0x8da   :  { %8742 = vmatpush1.bf16.msra.mxu0 %v10567_v59 }
 0x8db   :  { %8743 = vmatprep.subr.bf16.mxu0 %v10572_v44 }
 0x8de   :  { %8744 = vmatpush1.bf16.msra.mxu0 %v10570_v49 }
 0x8df   :  { %8745 = vmatprep.subr.bf16.mxu0 %v10575_v51 }
 0x8e2   :  { %8746 = vmatpush1.bf16.msra.mxu0 %v10573_v53 }
 0x8e3   :  { %8747 = vmatprep.subr.bf16.mxu0 %v10578_v48 }
 0x8e6   :  { %8748 = vmatpush1.bf16.msra.mxu0 %v10576_v50 }
 0x8e7   :  { %8749 = vmatprep.subr.bf16.mxu0 %v10581_v36 }
 0x8ea   :  { %8750 = vmatpush1.bf16.msra.mxu0 %v10579_v40 }
 0x8ed   :  { %8752 = vmatmul.mubr.bf16.vlgmr.msra.gmra.mrb[40].mxu0 %v7814_v61 }
 0x9c0   :  { %v8753_v62 = vpop.f32.mrb[40].mxu0 }
 0x9c1   :  { %v10029_v14 = vadd.f32 %v8753_v62, %v8589_v31  ;;  %v8755_v55 = vpop.f32.mrb[41].mxu0 }
 0x9c2   :  { %v8757_v42 = vpop.f32.mrb[42].mxu0  ;;  %v10030_v29 = vadd.f32 %v8755_v55, %v8593_v3 }
 0x9c3   :  { %v8760_v5 = vmax.f32 %v10029_v14, 0.0  ;;  %v8758_v7 = vpop.f32.mrb[43].mxu0 }
 0x9c4   :  { %v8761_v37 = vmax.f32 %v10030_v29, 0.0 }
 0x9c5   :  { %v8762_v19 = vpack.c.bf16 %v8760_v5, %v8760_v5 }
 0x9c6   :  { %v8763_v57 = vpack.c.bf16 %v8761_v37, %v8761_v37 }
 0x9c7   :  { %9948 = vmatmul.mubr.bf16.vlgmr.msra.gmra.mrb[96].mxu1 %v8762_v19 }
 0x9c8   :  { %9952 = vmatpush3.bf16.xpose.msra.mxu1 %v8770_v10  ;;  %9953 = vmatprep.mubr.msk.bf16.mxu1 %vm11017_vm3, %v11016_v45 }
 0x9cf   :  { %9954 = vmatmul.mubr.bf16.vlgmr.msra.gmra.mrb[100].mxu1 %v8763_v57 }
 0xa9a   :  { %v8807_v52 = vpop.f32.mrb[96].mxu1 }
 0xa9b   :  { %v8808_v46 = vadd.f32 %v8807_v52, %v8772_v39  ;;  %v9949_v16 = vpop.f32.mrb[97].mxu1 }
 0xa9c   :  { %v8810_v15 = vpop.f32.mrb[98].mxu1 }
 0xa9d   :  { %v9950_v20 = vpop.f32.mrb[99].mxu1  ;;  %8814 = vst.msk [vmem:[#allocation29] sm:$0x1] %vm8813_vm4, %v8808_v46 }
 0xa9e   :  { %10933 = shalt.err (!%p10930_p1)
}
 0xa9f   :  { %s10934_s26 = scalar_lea.hbm %s11936_s19, 16 }
 0xaa0   :  { %p10935_p2 = scmp.ne.s32.totalorder %s11936_s19, %s10934_s26  ;;  %p10938_p3 = scmp.lt.u32.totalorder %s10934_s26, %s11936_s19 }
 0xaa2   :  { %p10940_p4 = pnand %p10938_p3, %p10935_p2 }
 0xaa4   :  { %10943 = shalt.err (!%p10940_p4)
}
 0xaa5   :  { %8868 = dma.vmem_to_hbm [thread:$0]  %s8866_s29, 16, %s11936_s19, [#allocation5]   ;;  %v8816_v45 = vld [vmem:[%s8815_s4] sm:$0x1]  ;;  %v8851_v21 = vpop.f32.mrb[100].mxu1  ;;  %vm8857_vm5 = vcmask 16384  }
 0xaa6   :  { %s11019_s12 = smov [#allocation30]   ;;  %v8852_v9 = vadd.f32 %v8851_v21, %v8816_v45  ;;  %v9955_v23 = vpop.f32.mrb[101].mxu1 }
 0xaa7   :  { %s8875_s8 = sshll.u32 %s11019_s12, 4  ;;  %v8854_v11 = vpop.f32.mrb[102].mxu1  ;;  %s8876_s8 = int_to_ptr.vmem [resolvable:$true] %s8875_s8 }
 0xaa8   :  { %v9956_v17 = vpop.f32.mrb[103].mxu1  ;;  %8858 = vst.msk [vmem:[#allocation30] sm:$0x1] %vm8857_vm5, %v8852_v9  ;;  %s10944_s9 = scalar_lea.vmem %s8876_s8, 16  ;;  %s10948_s21 = scalar_lea.vmem %s8876_s8, 32 }
 0xaa9   :  { %p10945_p5 = scmp.ne.s32.totalorder %s8876_s8, %s10944_s9  ;;  %p10949_p6 = scmp.lt.s32.totalorder %s8876_s8, %s8876_s8 }
 0xaaa   :  { %p10950_p7 = scmp.lt.s32.totalorder %s10948_s21, %s10944_s9 }
 0xaac   :  { %p10951_p8 = por %p10950_p7, %p10949_p6 }
 0xaae   :  { %p10952_p9 = pnand %p10951_p8, %p10945_p5 }
 0xab0   :  { %10955 = shalt.err (!%p10952_p9)
}
 0xab1   :  { %s10956_s2 = scalar_lea.hbm %s11937_s20, 16 }
 0xab2   :  { %p10957_p10 = scmp.ne.s32.totalorder %s11937_s20, %s10956_s2  ;;  %p10960_p11 = scmp.lt.u32.totalorder %s10956_s2, %s11937_s20 }
 0xab4   :  { %p10962_p12 = pnand %p10960_p11, %p10957_p10 }
 0xab6   :  { %10965 = shalt.err (!%p10962_p12)
}
 0xab7   :  { %8878 = dma.vmem_to_hbm [thread:$0]  %s8876_s8, 16, %s11937_s20, [#allocation31]  }
 0xab8   :  { %10984 = dma.done.wait [#allocation5], 16  }
 0xab9   :  { %10985 = vsyncadd [#allocation5], 4294967280 }
 0xaba   :  { %10986 = dma.done.wait [#allocation31], 16  }
 0xabb   :  { %10987 = vsyncadd [#allocation31], 4294967280 }
 0xabc   :  { %8885 = vsyncpa [#allocation4], 1 }
 0xabd   :  { %8886 = vsyncpa [#allocation9], 1 }
 0xabe   :  { %8887 = vsyncpa [#allocation12], 1 }
 0xabf   :  { %8888 = vsyncpa [#allocation15], 1 }
 0xac0   :  { %8889 = vsyncpa [#allocation18], 1 }
 0xac1   :  { %8890 = vsyncpa [#allocation21], 1 }
 0xac2   :  { %8891 = vsyncpa [#allocation24], 1 }
 0xac3   :  { %8892 = vsyncpa [#allocation27], 1 }
 0xac4   :  { %8893 = vsyncpa [#allocation5], 1 }
 0xac5   :  { %8894 = vsyncpa [#allocation31], 1 }
 0xac6   :  { %8895 = vsyncpa [#allocation6], 1 }

</bundles_post_ra>
